<compile_context>
chip_gen: v5e
topology: v5e:2x2
jax: 0.10.0
libtpu: 0.0.40
codegen_flags: <defaults>
</compile_context>

<pallas_src>
import functools

import jax
import jax.numpy as jnp
from jax import lax
from jax.experimental import pallas as pl
from jax.experimental.pallas import tpu as pltpu


def _round_up(x, m):
    return ((x + m - 1) // m) * m


# --------------------------------------------------------------------------- #
# Pallas kernel: fused BiLSTM + output Linear for one batch tile
# --------------------------------------------------------------------------- #
def bilstm_linear_kernel(x_ref,            # (S, BT, Din1)  bf16, time-major (bias col folded)
                         wih_ref,          # (Din1, 8*Hp)   bf16  [fwd 4*Hp | bwd 4*Hp]
                         whh_f_ref,        # (Hp, 4*Hp)     bf16
                         whh_b_ref,        # (Hp, 4*Hp)     bf16
                         wout_f_ref,       # (Hp, Cp)       bf16
                         wout_b_ref,       # (Hp, Cp)       bf16
                         bout_ref,         # (1, Cp)        f32
                         o_ref,            # (S, BT, Cp)    f32 lane-dense logits
                         gin_ref,          # scratch (S*BT, 8*Hp) bf16 precomputed input gates
                         hid_f_ref,        # scratch (S*BT, Hp)   bf16
                         hid_b_ref,        # scratch (S*BT, Hp)   bf16
                         *, S, BT, Hp):
    G = 4 * Hp
    Din1 = x_ref.shape[2]

    # ---- 1) Input projection for BOTH directions: one big bf16 MXU matmul.
    #      Bias is folded in via the ones column of x / bias row of wih.
    x2 = x_ref[...].reshape(S * BT, Din1)                   # layout-preserving (BT % 16 == 0)
    gin_ref[...] = jnp.dot(x2, wih_ref[...],
                           preferred_element_type=jnp.float32).astype(jnp.bfloat16)

    def lstm_cell(gates, c):
        # PyTorch LSTM gate order: i, f, g, o.  Hp is a multiple of 128, so every gate
        # slice is whole vregs.  All elementwise / transcendental math stays f32.
        i_g = jax.nn.sigmoid(gates[:, 0:Hp])
        f_g = jax.nn.sigmoid(gates[:, Hp:2 * Hp])
        g_g = jnp.tanh(gates[:, 2 * Hp:3 * Hp])
        o_g = jax.nn.sigmoid(gates[:, 3 * Hp:4 * Hp])
        c_new = f_g * c + i_g * g_g
        h_new = o_g * jnp.tanh(c_new)
        return h_new, c_new

    # ---- 2) Fused bidirectional recurrence: S serial steps, both directions per step.
    def step(t, carry):
        h_f, c_f, h_b, c_b = carry                          # h_*: bf16, c_*: f32
        rf = pl.multiple_of(t * BT, BT)                     # forward reads time t
        rb = pl.multiple_of((S - 1 - t) * BT, BT)           # backward reads time S-1-t
        gin_f = gin_ref[pl.ds(rf, BT), 0:G].astype(jnp.float32)
        gin_b = gin_ref[pl.ds(rb, BT), G:2 * G].astype(jnp.float32)
        # Recurrent weights read from VMEM refs inside the loop (not hoisted to vregs).
        gates_f = gin_f + jnp.dot(h_f, whh_f_ref[...], preferred_element_type=jnp.float32)
        gates_b = gin_b + jnp.dot(h_b, whh_b_ref[...], preferred_element_type=jnp.float32)
        hf32, c_f = lstm_cell(gates_f, c_f)
        hb32, c_b = lstm_cell(gates_b, c_b)
        h_f = hf32.astype(jnp.bfloat16)
        h_b = hb32.astype(jnp.bfloat16)
        hid_f_ref[pl.ds(rf, BT), :] = h_f
        hid_b_ref[pl.ds(rb, BT), :] = h_b
        return h_f, c_f, h_b, c_b

    zeros_h = jnp.zeros((BT, Hp), jnp.bfloat16)
    zeros_c = jnp.zeros((BT, Hp), jnp.float32)
    lax.fori_loop(0, S, step, (zeros_h, zeros_c, zeros_h, zeros_c),
                  unroll=min(8, S))

    # ---- 3) Output Linear without concatenating the two direction halves.
    logits = (jnp.dot(hid_f_ref[...], wout_f_ref[...], preferred_element_type=jnp.float32)
              + jnp.dot(hid_b_ref[...], wout_b_ref[...], preferred_element_type=jnp.float32)
              + bout_ref[...])
    o_ref[...] = logits.reshape(o_ref.shape).astype(o_ref.dtype)


# --------------------------------------------------------------------------- #
# Wrapper: embeddings (glue), weight packing/padding, tiling, pallas_call
# --------------------------------------------------------------------------- #
def _pad_gate_cols(w, H, Hp):
    """(..., 4*H) -> (..., 4*Hp): each gate block (i,f,g,o) zero-padded to Hp lanes."""
    if H == Hp:
        return w
    pad = [(0, 0)] * (w.ndim - 1) + [(0, Hp - H)]
    return jnp.concatenate(
        [jnp.pad(w[..., g * H:(g + 1) * H], pad) for g in range(4)], axis=-1)


def srl_forward(params, sample):
    B, S = sample['words'].shape
    H = params['whh_f'].shape[0]
    C = params['wout'].shape[1]
    Din = (params['emb_words'].shape[1] + params['emb_pos'].shape[1]
           + params['emb_lemmas'].shape[1] + params['emb_relations'].shape[1]
           + params['emb_predicates'].shape[1])
    Din1 = Din + 1                  # +1 ones column folds the LSTM input bias into wih
    Hp = _round_up(H, 128)          # full-vreg gate slices
    Cp = _round_up(C, 128)          # lane-dense output stores

    # ---- choose batch tile BT (multiple of 16) so the per-block working set fits VMEM.
    def est_vmem(bt):
        x_blk = S * bt * Din1 * 2
        o_blk = S * bt * Cp * 4
        w = (Din1 * 8 * Hp + 2 * Hp * 4 * Hp + 2 * Hp * Cp) * 2 + Cp * 4
        scratch = S * bt * (8 * Hp + 2 * Hp) * 2            # bf16 gin + 2x hid
        gin_f32_tmp = S * bt * 8 * Hp * 4                   # dot result before bf16 cast
        return 2 * (x_blk + o_blk + w) + scratch + gin_f32_tmp + x_blk + o_blk

    budget = 40 << 20
    Bp_min = _round_up(B, 16)
    cands = [c for c in (128, 112, 96, 80, 64, 48, 32, 16) if c <= Bp_min] or [16]
    BT = 16
    for c in cands:
        if est_vmem(c) <= budget:
            BT = c
            break
    Bp = _round_up(B, BT)
    NB = Bp // BT
    vmem_limit = int(min(max(est_vmem(BT) + (4 << 20), 16 << 20), 56 << 20))

    # ---- Embedding lookups directly in time-major layout: transpose/pad the (tiny)
    #      int index arrays, not the big float activation tensor.
    def emb(table, idx2d):
        idx = jnp.transpose(idx2d)                                   # (S, B)
        idx = jnp.pad(idx, ((0, 0), (0, Bp - B)))                    # pad idx 0 -> zero row
        return jnp.take(table, idx, axis=0).astype(jnp.bfloat16)     # (S, Bp, d)

    # torch.cat((word, pos, lemma, relations, predicates), dim=2); dropout = identity.
    word_rep = jnp.concatenate(
        [emb(params['emb_words'], sample['words']),
         emb(params['emb_pos'], sample['pos_tags']),
         emb(params['emb_lemmas'], sample['lemmas']),
         emb(params['emb_relations'], sample['dependency_relations']),
         emb(params['emb_predicates'], sample['predicates']),
         jnp.ones((S, Bp, 1), jnp.bfloat16)],                        # bias-folding column
        axis=2)                                                      # (S, Bp, Din1)

    # ---- Pack weights (gate-padded, direction-packed, bf16 for the MXU).
    wih = jnp.concatenate([_pad_gate_cols(params['wih_f'], H, Hp),
                           _pad_gate_cols(params['wih_b'], H, Hp)], axis=1)   # (Din, 8Hp)
    b_in = jnp.concatenate([_pad_gate_cols(params['b_f'], H, Hp),
                            _pad_gate_cols(params['b_b'], H, Hp)], axis=1)    # (1, 8Hp)
    wih = jnp.concatenate([wih, b_in], axis=0).astype(jnp.bfloat16)           # (Din1, 8Hp)

    def pad_whh(w):
        w = _pad_gate_cols(w, H, Hp)                                          # (H, 4Hp)
        return jnp.pad(w, ((0, Hp - H), (0, 0))).astype(jnp.bfloat16)         # (Hp, 4Hp)

    whh_f = pad_whh(params['whh_f'])
    whh_b = pad_whh(params['whh_b'])

    wout = params['wout']                                                     # (2H, C)
    wout_f = jnp.pad(wout[:H], ((0, Hp - H), (0, Cp - C))).astype(jnp.bfloat16)
    wout_b = jnp.pad(wout[H:], ((0, Hp - H), (0, Cp - C))).astype(jnp.bfloat16)
    bout = jnp.pad(params['bout'], ((0, 0), (0, Cp - C))).astype(jnp.float32)

    kernel = functools.partial(bilstm_linear_kernel, S=S, BT=BT, Hp=Hp)

    out3d = pl.pallas_call(
        kernel,
        out_shape=jax.ShapeDtypeStruct((S, Bp, Cp), jnp.float32),
        grid=(NB,),
        in_specs=[
            pl.BlockSpec((S, BT, Din1), lambda i: (0, i, 0)),
            pl.BlockSpec((Din1, 8 * Hp), lambda i: (0, 0)),
            pl.BlockSpec((Hp, 4 * Hp), lambda i: (0, 0)),
            pl.BlockSpec((Hp, 4 * Hp), lambda i: (0, 0)),
            pl.BlockSpec((Hp, Cp), lambda i: (0, 0)),
            pl.BlockSpec((Hp, Cp), lambda i: (0, 0)),
            pl.BlockSpec((1, Cp), lambda i: (0, 0)),
        ],
        out_specs=pl.BlockSpec((S, BT, Cp), lambda i: (0, i, 0)),
        scratch_shapes=[pltpu.VMEM((S * BT, 8 * Hp), jnp.bfloat16),
                        pltpu.VMEM((S * BT, Hp), jnp.bfloat16),
                        pltpu.VMEM((S * BT, Hp), jnp.bfloat16)],
        compiler_params=pltpu.CompilerParams(
            dimension_semantics=("parallel",),
            vmem_limit_bytes=vmem_limit),
    )(word_rep, wih, whh_f, whh_b, wout_f, wout_b, bout)

    # Strip batch / class padding and return (B, S, C) like the PyTorch module.
    return jnp.transpose(out3d, (1, 0, 2))[:B, :, :C]


# --------------------------------------------------------------------------- #
# Pure-JAX reference (f32 correctness check)
# --------------------------------------------------------------------------- #
def srl_forward_ref(params, sample):
    word_emb = jnp.take(params['emb_words'], sample['words'], axis=0)
    pos_emb = jnp.take(params['emb_pos'], sample['pos_tags'], axis=0)
    lemma_emb = jnp.take(params['emb_lemmas'], sample['lemmas'], axis=0)
    pred_emb = jnp.take(params['emb_predicates'], sample['predicates'], axis=0)
    rel_emb = jnp.take(params['emb_relations'], sample['dependency_relations'], axis=0)
    x = jnp.concatenate([word_emb, pos_emb, lemma_emb, rel_emb, pred_emb], axis=2)
    x = jnp.transpose(x, (1, 0, 2)).astype(jnp.float32)                 # (S, B, Din)
    S, B, _ = x.shape
    H = params['whh_f'].shape[0]

    def run_dir(wih, whh, b, reverse):
        xs = x[::-1] if reverse else x

        def step(carry, x_t):
            h, c = carry
            gates = x_t @ wih + h @ whh + b
            i_g = jax.nn.sigmoid(gates[:, 0:H])
            f_g = jax.nn.sigmoid(gates[:, H:2 * H])
            g_g = jnp.tanh(gates[:, 2 * H:3 * H])
            o_g = jax.nn.sigmoid(gates[:, 3 * H:4 * H])
            c_new = f_g * c + i_g * g_g
            h_new = o_g * jnp.tanh(c_new)
            return (h_new, c_new), h_new

        zeros = jnp.zeros((B, H), jnp.float32)
        _, hs = lax.scan(step, (zeros, zeros), xs)
        return hs[::-1] if reverse else hs

    hf = run_dir(params['wih_f'], params['whh_f'], params['b_f'], False)
    hb = run_dir(params['wih_b'], params['whh_b'], params['b_b'], True)
    hidden = jnp.concatenate([hf, hb], axis=-1)                         # (S, B, 2H)
    logits = hidden @ params['wout'] + params['bout']
    return jnp.transpose(logits, (1, 0, 2))


# --------------------------------------------------------------------------- #
# Deterministic parameter init (synthetic; not a checkpoint load)
# --------------------------------------------------------------------------- #
def init_params(key, *, vocab_words, vocab_pos, vocab_lemmas, vocab_rel, vocab_pred,
                d_words, d_pos, d_lemmas, d_rel, d_pred, H, C):
    ks = jax.random.split(key, 16)
    d_in = d_words + d_pos + d_lemmas + d_rel + d_pred

    def emb(k, v, d):
        w = 0.1 * jax.random.normal(k, (v, d), jnp.float32)
        return w.at[0].set(0.0)                                         # padding_idx=0

    return {
        'emb_words': emb(ks[0], vocab_words, d_words),
        'emb_pos': emb(ks[1], vocab_pos, d_pos),
        'emb_lemmas': emb(ks[2], vocab_lemmas, d_lemmas),
        'emb_relations': emb(ks[3], vocab_rel, d_rel),
        'emb_predicates': emb(ks[4], vocab_pred, d_pred),
        # LSTM weights stored transposed relative to PyTorch: x @ (Din,4H), h @ (H,4H)
        'wih_f': 0.1 * jax.random.normal(ks[5], (d_in, 4 * H), jnp.float32),
        'whh_f': 0.1 * jax.random.normal(ks[6], (H, 4 * H), jnp.float32),
        'b_f': 0.1 * jax.random.normal(ks[7], (1, 4 * H), jnp.float32),   # bias_ih+bias_hh
        'wih_b': 0.1 * jax.random.normal(ks[8], (d_in, 4 * H), jnp.float32),
        'whh_b': 0.1 * jax.random.normal(ks[9], (H, 4 * H), jnp.float32),
        'b_b': 0.1 * jax.random.normal(ks[10], (1, 4 * H), jnp.float32),
        # output Linear (2H -> C), weight transposed relative to PyTorch
        'wout': 0.1 * jax.random.normal(ks[11], (2 * H, C), jnp.float32),
        'bout': 0.1 * jax.random.normal(ks[12], (1, C), jnp.float32),
    }


# --------------------------------------------------------------------------- #
if __name__ == "__main__":
    key = jax.random.PRNGKey(0)
    B, S = 2, 8
    H, C = 32, 10                      # lstm_hidden_dim, num_classes
    vocab_words, vocab_pos, vocab_lemmas, vocab_rel, vocab_pred = 100, 20, 80, 30, 6
    d_words, d_pos, d_lemmas, d_rel, d_pred = 16, 8, 16, 8, 8

    kp, kw, kpo, kl, kr, kpr = jax.random.split(key, 6)
    params = init_params(kp,
                         vocab_words=vocab_words, vocab_pos=vocab_pos,
                         vocab_lemmas=vocab_lemmas, vocab_rel=vocab_rel,
                         vocab_pred=vocab_pred,
                         d_words=d_words, d_pos=d_pos, d_lemmas=d_lemmas,
                         d_rel=d_rel, d_pred=d_pred, H=H, C=C)

    sample = {
        'words': jax.random.randint(kw, (B, S), 0, vocab_words, jnp.int32),
        'pos_tags': jax.random.randint(kpo, (B, S), 0, vocab_pos, jnp.int32),
        'lemmas': jax.random.randint(kl, (B, S), 0, vocab_lemmas, jnp.int32),
        'dependency_relations': jax.random.randint(kr, (B, S), 0, vocab_rel, jnp.int32),
        'predicates': jax.random.randint(kpr, (B, S), 0, vocab_pred, jnp.int32),
    }

    logits = srl_forward(params, sample)
    jax.block_until_ready(logits)

    ref = srl_forward_ref(params, sample)
    assert logits.shape == (B, S, C)
    # bf16 MXU operands -> looser tolerance than the pure-f32 reference.
    assert jnp.max(jnp.abs(logits - ref)) < 3e-2, "kernel mismatch vs reference"

    # TODO(synk): CRF / BERT-LSTM / GCN / biaffine branches are disabled by the chosen
    # configurator (all False), matching the module's simplest forward path.
    print("KERNEL_OK")
</pallas_src>

<mosaic_0001>
module attributes {stable_mosaic.version = 11 : i64} {
  func.func @bilstm_linear_kernel(%arg0: i32, %arg1: memref<8x16x57xbf16, #tpu.memory_space<vmem>>, %arg2: memref<57x1024xbf16, #tpu.memory_space<vmem>>, %arg3: memref<128x512xbf16, #tpu.memory_space<vmem>>, %arg4: memref<128x512xbf16, #tpu.memory_space<vmem>>, %arg5: memref<128x128xbf16, #tpu.memory_space<vmem>>, %arg6: memref<128x128xbf16, #tpu.memory_space<vmem>>, %arg7: memref<1x128xf32, #tpu.memory_space<vmem>>, %arg8: memref<8x16x128xf32, #tpu.memory_space<vmem>>, %arg9: memref<128x1024xbf16, #tpu.memory_space<vmem>>, %arg10: memref<128x128xbf16, #tpu.memory_space<vmem>>, %arg11: memref<128x128xbf16, #tpu.memory_space<vmem>>) attributes {dimension_semantics = [#tpu.dimension_semantics<parallel>], iteration_bounds = array<i64: 1>, scalar_prefetch = 0 : i64, scratch_operands = 3 : i64, tpu.core_type = #tpu.core_type<tc>, window_params = [{transform_indices = @transform_0, window_bounds = array<i64: 8, 16, 57>}, {pipeline_mode = #tpu.pipeline_mode<synchronous>, transform_indices = @transform_1, window_bounds = array<i64: 57, 1024>}, {pipeline_mode = #tpu.pipeline_mode<synchronous>, transform_indices = @transform_2, window_bounds = array<i64: 128, 512>}, {pipeline_mode = #tpu.pipeline_mode<synchronous>, transform_indices = @transform_3, window_bounds = array<i64: 128, 512>}, {pipeline_mode = #tpu.pipeline_mode<synchronous>, transform_indices = @transform_4, window_bounds = array<i64: 128, 128>}, {pipeline_mode = #tpu.pipeline_mode<synchronous>, transform_indices = @transform_5, window_bounds = array<i64: 128, 128>}, {pipeline_mode = #tpu.pipeline_mode<synchronous>, transform_indices = @transform_6, window_bounds = array<i64: 1, 128>}, {transform_indices = @transform_7, window_bounds = array<i64: 8, 16, 128>}]} {
    %c0 = arith.constant 0 : index
    %c0_0 = arith.constant 0 : index
    %c0_1 = arith.constant 0 : index
    %0 = vector.load %arg1[%c0, %c0_0, %c0_1] : memref<8x16x57xbf16, #tpu.memory_space<vmem>>, vector<8x16x57xbf16>
    %1 = vector.shape_cast %0 : vector<8x16x57xbf16> to vector<128x57xbf16>
    %c0_2 = arith.constant 0 : index
    %c0_3 = arith.constant 0 : index
    %2 = vector.load %arg2[%c0_2, %c0_3] : memref<57x1024xbf16, #tpu.memory_space<vmem>>, vector<57x1024xbf16>
    %cst = arith.constant dense<0.000000e+00> : vector<128x1024xf32>
    %3 = tpu.matmul %1, %2, %cst {dimension_numbers = #tpu.dot_dimension_numbers<[1], [0], [0], [1], [0, 0, 1, 1], [], []>} : vector<128x57xbf16>, vector<57x1024xbf16>, vector<128x1024xf32> -> vector<128x1024xf32>
    %4 = arith.truncf %3 : vector<128x1024xf32> to vector<128x1024xbf16>
    %c0_4 = arith.constant 0 : index
    %c0_5 = arith.constant 0 : index
    %5 = vector.load %arg9[%c0_4, %c0_5] : memref<128x1024xbf16, #tpu.memory_space<vmem>>, vector<128x1024xbf16>
    tpu.vector_store %arg9[%c0_4, %c0_5], %4 {strides = array<i32>} : memref<128x1024xbf16, #tpu.memory_space<vmem>>, vector<128x1024xbf16>,
    %cst_6 = arith.constant 0.000000e+00 : bf16
    %6 = vector.broadcast %cst_6 : bf16 to vector<16x128xbf16>
    %cst_7 = arith.constant 0.000000e+00 : f32
    %7 = vector.broadcast %cst_7 : f32 to vector<16x128xf32>
    %c0_i32 = arith.constant 0 : i32
    %c16_i32 = arith.constant 16 : i32
    %8 = arith.muli %c0_i32, %c16_i32 : i32
    %9 = tpu.assume_multiple %8, 16 : i32
    %c7_i32 = arith.constant 7 : i32
    %10 = arith.subi %c7_i32, %c0_i32 : i32
    %c16_i32_8 = arith.constant 16 : i32
    %11 = arith.muli %10, %c16_i32_8 : i32
    %12 = tpu.assume_multiple %11, 16 : i32
    %13 = arith.index_cast %9 : i32 to index
    %c0_9 = arith.constant 0 : index
    %14 = vector.load %arg9[%13, %c0_9] : memref<128x1024xbf16, #tpu.memory_space<vmem>>, vector<16x512xbf16>
    %15 = arith.extf %14 : vector<16x512xbf16> to vector<16x512xf32>
    %16 = arith.index_cast %12 : i32 to index
    %c512 = arith.constant 512 : index
    %17 = vector.load %arg9[%16, %c512] : memref<128x1024xbf16, #tpu.memory_space<vmem>>, vector<16x512xbf16>
    %18 = arith.extf %17 : vector<16x512xbf16> to vector<16x512xf32>
    %c0_10 = arith.constant 0 : index
    %c0_11 = arith.constant 0 : index
    %19 = vector.load %arg3[%c0_10, %c0_11] : memref<128x512xbf16, #tpu.memory_space<vmem>>, vector<128x512xbf16>
    %cst_12 = arith.constant dense<0.000000e+00> : vector<16x512xf32>
    %20 = tpu.matmul %6, %19, %cst_12 {dimension_numbers = #tpu.dot_dimension_numbers<[1], [0], [0], [1], [0, 0, 1, 1], [], []>} : vector<16x128xbf16>, vector<128x512xbf16>, vector<16x512xf32> -> vector<16x512xf32>
    %21 = arith.addf %15, %20 : vector<16x512xf32>
    %c0_13 = arith.constant 0 : index
    %c0_14 = arith.constant 0 : index
    %22 = vector.load %arg4[%c0_13, %c0_14] : memref<128x512xbf16, #tpu.memory_space<vmem>>, vector<128x512xbf16>
    %cst_15 = arith.constant dense<0.000000e+00> : vector<16x512xf32>
    %23 = tpu.matmul %6, %22, %cst_15 {dimension_numbers = #tpu.dot_dimension_numbers<[1], [0], [0], [1], [0, 0, 1, 1], [], []>} : vector<16x128xbf16>, vector<128x512xbf16>, vector<16x512xf32> -> vector<16x512xf32>
    %24 = arith.addf %18, %23 : vector<16x512xf32>
    %25 = vector.extract_strided_slice %21 {offsets = [0, 0], sizes = [16, 128], strides = [1, 1]} : vector<16x512xf32> to vector<16x128xf32>
    %26 = arith.negf %25 : vector<16x128xf32>
    %27 = math.exp %26 : vector<16x128xf32>
    %cst_16 = arith.constant 1.000000e+00 : f32
    %28 = vector.broadcast %cst_16 : f32 to vector<16x128xf32>
    %29 = arith.addf %28, %27 : vector<16x128xf32>
    %30 = arith.divf %28, %29 : vector<16x128xf32>
    %31 = vector.extract_strided_slice %21 {offsets = [0, 128], sizes = [16, 128], strides = [1, 1]} : vector<16x512xf32> to vector<16x128xf32>
    %32 = arith.negf %31 : vector<16x128xf32>
    %33 = math.exp %32 : vector<16x128xf32>
    %cst_17 = arith.constant 1.000000e+00 : f32
    %34 = vector.broadcast %cst_17 : f32 to vector<16x128xf32>
    %35 = arith.addf %34, %33 : vector<16x128xf32>
    %36 = arith.divf %34, %35 : vector<16x128xf32>
    %37 = vector.extract_strided_slice %21 {offsets = [0, 256], sizes = [16, 128], strides = [1, 1]} : vector<16x512xf32> to vector<16x128xf32>
    %38 = math.tanh %37 : vector<16x128xf32>
    %39 = vector.extract_strided_slice %21 {offsets = [0, 384], sizes = [16, 128], strides = [1, 1]} : vector<16x512xf32> to vector<16x128xf32>
    %40 = arith.negf %39 : vector<16x128xf32>
    %41 = math.exp %40 : vector<16x128xf32>
    %cst_18 = arith.constant 1.000000e+00 : f32
    %42 = vector.broadcast %cst_18 : f32 to vector<16x128xf32>
    %43 = arith.addf %42, %41 : vector<16x128xf32>
    %44 = arith.divf %42, %43 : vector<16x128xf32>
    %45 = arith.mulf %36, %7 : vector<16x128xf32>
    %46 = arith.mulf %30, %38 : vector<16x128xf32>
    %47 = arith.addf %45, %46 : vector<16x128xf32>
    %48 = math.tanh %47 : vector<16x128xf32>
    %49 = arith.mulf %44, %48 : vector<16x128xf32>
    %50 = vector.extract_strided_slice %24 {offsets = [0, 0], sizes = [16, 128], strides = [1, 1]} : vector<16x512xf32> to vector<16x128xf32>
    %51 = arith.negf %50 : vector<16x128xf32>
    %52 = math.exp %51 : vector<16x128xf32>
    %cst_19 = arith.constant 1.000000e+00 : f32
    %53 = vector.broadcast %cst_19 : f32 to vector<16x128xf32>
    %54 = arith.addf %53, %52 : vector<16x128xf32>
    %55 = arith.divf %53, %54 : vector<16x128xf32>
    %56 = vector.extract_strided_slice %24 {offsets = [0, 128], sizes = [16, 128], strides = [1, 1]} : vector<16x512xf32> to vector<16x128xf32>
    %57 = arith.negf %56 : vector<16x128xf32>
    %58 = math.exp %57 : vector<16x128xf32>
    %cst_20 = arith.constant 1.000000e+00 : f32
    %59 = vector.broadcast %cst_20 : f32 to vector<16x128xf32>
    %60 = arith.addf %59, %58 : vector<16x128xf32>
    %61 = arith.divf %59, %60 : vector<16x128xf32>
    %62 = vector.extract_strided_slice %24 {offsets = [0, 256], sizes = [16, 128], strides = [1, 1]} : vector<16x512xf32> to vector<16x128xf32>
    %63 = math.tanh %62 : vector<16x128xf32>
    %64 = vector.extract_strided_slice %24 {offsets = [0, 384], sizes = [16, 128], strides = [1, 1]} : vector<16x512xf32> to vector<16x128xf32>
    %65 = arith.negf %64 : vector<16x128xf32>
    %66 = math.exp %65 : vector<16x128xf32>
    %cst_21 = arith.constant 1.000000e+00 : f32
    %67 = vector.broadcast %cst_21 : f32 to vector<16x128xf32>
    %68 = arith.addf %67, %66 : vector<16x128xf32>
    %69 = arith.divf %67, %68 : vector<16x128xf32>
    %70 = arith.mulf %61, %7 : vector<16x128xf32>
    %71 = arith.mulf %55, %63 : vector<16x128xf32>
    %72 = arith.addf %70, %71 : vector<16x128xf32>
    %73 = math.tanh %72 : vector<16x128xf32>
    %74 = arith.mulf %69, %73 : vector<16x128xf32>
    %75 = arith.truncf %49 : vector<16x128xf32> to vector<16x128xbf16>
    %76 = arith.truncf %74 : vector<16x128xf32> to vector<16x128xbf16>
    %77 = arith.index_cast %9 : i32 to index
    %c0_22 = arith.constant 0 : index
    %78 = vector.load %arg10[%77, %c0_22] : memref<128x128xbf16, #tpu.memory_space<vmem>>, vector<16x128xbf16>
    tpu.vector_store %arg10[%77, %c0_22], %75 {strides = array<i32>} : memref<128x128xbf16, #tpu.memory_space<vmem>>, vector<16x128xbf16>,
    %79 = arith.index_cast %12 : i32 to index
    %c0_23 = arith.constant 0 : index
    %80 = vector.load %arg11[%79, %c0_23] : memref<128x128xbf16, #tpu.memory_space<vmem>>, vector<16x128xbf16>
    tpu.vector_store %arg11[%79, %c0_23], %76 {strides = array<i32>} : memref<128x128xbf16, #tpu.memory_space<vmem>>, vector<16x128xbf16>,
    %c1_i32 = arith.constant 1 : i32
    %c16_i32_24 = arith.constant 16 : i32
    %81 = arith.muli %c1_i32, %c16_i32_24 : i32
    %82 = tpu.assume_multiple %81, 16 : i32
    %c7_i32_25 = arith.constant 7 : i32
    %83 = arith.subi %c7_i32_25, %c1_i32 : i32
    %c16_i32_26 = arith.constant 16 : i32
    %84 = arith.muli %83, %c16_i32_26 : i32
    %85 = tpu.assume_multiple %84, 16 : i32
    %86 = arith.index_cast %82 : i32 to index
    %c0_27 = arith.constant 0 : index
    %87 = vector.load %arg9[%86, %c0_27] : memref<128x1024xbf16, #tpu.memory_space<vmem>>, vector<16x512xbf16>
    %88 = arith.extf %87 : vector<16x512xbf16> to vector<16x512xf32>
    %89 = arith.index_cast %85 : i32 to index
    %c512_28 = arith.constant 512 : index
    %90 = vector.load %arg9[%89, %c512_28] : memref<128x1024xbf16, #tpu.memory_space<vmem>>, vector<16x512xbf16>
    %91 = arith.extf %90 : vector<16x512xbf16> to vector<16x512xf32>
    %c0_29 = arith.constant 0 : index
    %c0_30 = arith.constant 0 : index
    %92 = vector.load %arg3[%c0_29, %c0_30] : memref<128x512xbf16, #tpu.memory_space<vmem>>, vector<128x512xbf16>
    %cst_31 = arith.constant dense<0.000000e+00> : vector<16x512xf32>
    %93 = tpu.matmul %75, %92, %cst_31 {dimension_numbers = #tpu.dot_dimension_numbers<[1], [0], [0], [1], [0, 0, 1, 1], [], []>} : vector<16x128xbf16>, vector<128x512xbf16>, vector<16x512xf32> -> vector<16x512xf32>
    %94 = arith.addf %88, %93 : vector<16x512xf32>
    %c0_32 = arith.constant 0 : index
    %c0_33 = arith.constant 0 : index
    %95 = vector.load %arg4[%c0_32, %c0_33] : memref<128x512xbf16, #tpu.memory_space<vmem>>, vector<128x512xbf16>
    %cst_34 = arith.constant dense<0.000000e+00> : vector<16x512xf32>
    %96 = tpu.matmul %76, %95, %cst_34 {dimension_numbers = #tpu.dot_dimension_numbers<[1], [0], [0], [1], [0, 0, 1, 1], [], []>} : vector<16x128xbf16>, vector<128x512xbf16>, vector<16x512xf32> -> vector<16x512xf32>
    %97 = arith.addf %91, %96 : vector<16x512xf32>
    %98 = vector.extract_strided_slice %94 {offsets = [0, 0], sizes = [16, 128], strides = [1, 1]} : vector<16x512xf32> to vector<16x128xf32>
    %99 = arith.negf %98 : vector<16x128xf32>
    %100 = math.exp %99 : vector<16x128xf32>
    %cst_35 = arith.constant 1.000000e+00 : f32
    %101 = vector.broadcast %cst_35 : f32 to vector<16x128xf32>
    %102 = arith.addf %101, %100 : vector<16x128xf32>
    %103 = arith.divf %101, %102 : vector<16x128xf32>
    %104 = vector.extract_strided_slice %94 {offsets = [0, 128], sizes = [16, 128], strides = [1, 1]} : vector<16x512xf32> to vector<16x128xf32>
    %105 = arith.negf %104 : vector<16x128xf32>
    %106 = math.exp %105 : vector<16x128xf32>
    %cst_36 = arith.constant 1.000000e+00 : f32
    %107 = vector.broadcast %cst_36 : f32 to vector<16x128xf32>
    %108 = arith.addf %107, %106 : vector<16x128xf32>
    %109 = arith.divf %107, %108 : vector<16x128xf32>
    %110 = vector.extract_strided_slice %94 {offsets = [0, 256], sizes = [16, 128], strides = [1, 1]} : vector<16x512xf32> to vector<16x128xf32>
    %111 = math.tanh %110 : vector<16x128xf32>
    %112 = vector.extract_strided_slice %94 {offsets = [0, 384], sizes = [16, 128], strides = [1, 1]} : vector<16x512xf32> to vector<16x128xf32>
    %113 = arith.negf %112 : vector<16x128xf32>
    %114 = math.exp %113 : vector<16x128xf32>
    %cst_37 = arith.constant 1.000000e+00 : f32
    %115 = vector.broadcast %cst_37 : f32 to vector<16x128xf32>
    %116 = arith.addf %115, %114 : vector<16x128xf32>
    %117 = arith.divf %115, %116 : vector<16x128xf32>
    %118 = arith.mulf %109, %47 : vector<16x128xf32>
    %119 = arith.mulf %103, %111 : vector<16x128xf32>
    %120 = arith.addf %118, %119 : vector<16x128xf32>
    %121 = math.tanh %120 : vector<16x128xf32>
    %122 = arith.mulf %117, %121 : vector<16x128xf32>
    %123 = vector.extract_strided_slice %97 {offsets = [0, 0], sizes = [16, 128], strides = [1, 1]} : vector<16x512xf32> to vector<16x128xf32>
    %124 = arith.negf %123 : vector<16x128xf32>
    %125 = math.exp %124 : vector<16x128xf32>
    %cst_38 = arith.constant 1.000000e+00 : f32
    %126 = vector.broadcast %cst_38 : f32 to vector<16x128xf32>
    %127 = arith.addf %126, %125 : vector<16x128xf32>
    %128 = arith.divf %126, %127 : vector<16x128xf32>
    %129 = vector.extract_strided_slice %97 {offsets = [0, 128], sizes = [16, 128], strides = [1, 1]} : vector<16x512xf32> to vector<16x128xf32>
    %130 = arith.negf %129 : vector<16x128xf32>
    %131 = math.exp %130 : vector<16x128xf32>
    %cst_39 = arith.constant 1.000000e+00 : f32
    %132 = vector.broadcast %cst_39 : f32 to vector<16x128xf32>
    %133 = arith.addf %132, %131 : vector<16x128xf32>
    %134 = arith.divf %132, %133 : vector<16x128xf32>
    %135 = vector.extract_strided_slice %97 {offsets = [0, 256], sizes = [16, 128], strides = [1, 1]} : vector<16x512xf32> to vector<16x128xf32>
    %136 = math.tanh %135 : vector<16x128xf32>
    %137 = vector.extract_strided_slice %97 {offsets = [0, 384], sizes = [16, 128], strides = [1, 1]} : vector<16x512xf32> to vector<16x128xf32>
    %138 = arith.negf %137 : vector<16x128xf32>
    %139 = math.exp %138 : vector<16x128xf32>
    %cst_40 = arith.constant 1.000000e+00 : f32
    %140 = vector.broadcast %cst_40 : f32 to vector<16x128xf32>
    %141 = arith.addf %140, %139 : vector<16x128xf32>
    %142 = arith.divf %140, %141 : vector<16x128xf32>
    %143 = arith.mulf %134, %72 : vector<16x128xf32>
    %144 = arith.mulf %128, %136 : vector<16x128xf32>
    %145 = arith.addf %143, %144 : vector<16x128xf32>
    %146 = math.tanh %145 : vector<16x128xf32>
    %147 = arith.mulf %142, %146 : vector<16x128xf32>
    %148 = arith.truncf %122 : vector<16x128xf32> to vector<16x128xbf16>
    %149 = arith.truncf %147 : vector<16x128xf32> to vector<16x128xbf16>
    %150 = arith.index_cast %82 : i32 to index
    %c0_41 = arith.constant 0 : index
    %151 = vector.load %arg10[%150, %c0_41] : memref<128x128xbf16, #tpu.memory_space<vmem>>, vector<16x128xbf16>
    tpu.vector_store %arg10[%150, %c0_41], %148 {strides = array<i32>} : memref<128x128xbf16, #tpu.memory_space<vmem>>, vector<16x128xbf16>,
    %152 = arith.index_cast %85 : i32 to index
    %c0_42 = arith.constant 0 : index
    %153 = vector.load %arg11[%152, %c0_42] : memref<128x128xbf16, #tpu.memory_space<vmem>>, vector<16x128xbf16>
    tpu.vector_store %arg11[%152, %c0_42], %149 {strides = array<i32>} : memref<128x128xbf16, #tpu.memory_space<vmem>>, vector<16x128xbf16>,
    %c2_i32 = arith.constant 2 : i32
    %c16_i32_43 = arith.constant 16 : i32
    %154 = arith.muli %c2_i32, %c16_i32_43 : i32
    %155 = tpu.assume_multiple %154, 16 : i32
    %c7_i32_44 = arith.constant 7 : i32
    %156 = arith.subi %c7_i32_44, %c2_i32 : i32
    %c16_i32_45 = arith.constant 16 : i32
    %157 = arith.muli %156, %c16_i32_45 : i32
    %158 = tpu.assume_multiple %157, 16 : i32
    %159 = arith.index_cast %155 : i32 to index
    %c0_46 = arith.constant 0 : index
    %160 = vector.load %arg9[%159, %c0_46] : memref<128x1024xbf16, #tpu.memory_space<vmem>>, vector<16x512xbf16>
    %161 = arith.extf %160 : vector<16x512xbf16> to vector<16x512xf32>
    %162 = arith.index_cast %158 : i32 to index
    %c512_47 = arith.constant 512 : index
    %163 = vector.load %arg9[%162, %c512_47] : memref<128x1024xbf16, #tpu.memory_space<vmem>>, vector<16x512xbf16>
    %164 = arith.extf %163 : vector<16x512xbf16> to vector<16x512xf32>
    %c0_48 = arith.constant 0 : index
    %c0_49 = arith.constant 0 : index
    %165 = vector.load %arg3[%c0_48, %c0_49] : memref<128x512xbf16, #tpu.memory_space<vmem>>, vector<128x512xbf16>
    %cst_50 = arith.constant dense<0.000000e+00> : vector<16x512xf32>
    %166 = tpu.matmul %148, %165, %cst_50 {dimension_numbers = #tpu.dot_dimension_numbers<[1], [0], [0], [1], [0, 0, 1, 1], [], []>} : vector<16x128xbf16>, vector<128x512xbf16>, vector<16x512xf32> -> vector<16x512xf32>
    %167 = arith.addf %161, %166 : vector<16x512xf32>
    %c0_51 = arith.constant 0 : index
    %c0_52 = arith.constant 0 : index
    %168 = vector.load %arg4[%c0_51, %c0_52] : memref<128x512xbf16, #tpu.memory_space<vmem>>, vector<128x512xbf16>
    %cst_53 = arith.constant dense<0.000000e+00> : vector<16x512xf32>
    %169 = tpu.matmul %149, %168, %cst_53 {dimension_numbers = #tpu.dot_dimension_numbers<[1], [0], [0], [1], [0, 0, 1, 1], [], []>} : vector<16x128xbf16>, vector<128x512xbf16>, vector<16x512xf32> -> vector<16x512xf32>
    %170 = arith.addf %164, %169 : vector<16x512xf32>
    %171 = vector.extract_strided_slice %167 {offsets = [0, 0], sizes = [16, 128], strides = [1, 1]} : vector<16x512xf32> to vector<16x128xf32>
    %172 = arith.negf %171 : vector<16x128xf32>
    %173 = math.exp %172 : vector<16x128xf32>
    %cst_54 = arith.constant 1.000000e+00 : f32
    %174 = vector.broadcast %cst_54 : f32 to vector<16x128xf32>
    %175 = arith.addf %174, %173 : vector<16x128xf32>
    %176 = arith.divf %174, %175 : vector<16x128xf32>
    %177 = vector.extract_strided_slice %167 {offsets = [0, 128], sizes = [16, 128], strides = [1, 1]} : vector<16x512xf32> to vector<16x128xf32>
    %178 = arith.negf %177 : vector<16x128xf32>
    %179 = math.exp %178 : vector<16x128xf32>
    %cst_55 = arith.constant 1.000000e+00 : f32
    %180 = vector.broadcast %cst_55 : f32 to vector<16x128xf32>
    %181 = arith.addf %180, %179 : vector<16x128xf32>
    %182 = arith.divf %180, %181 : vector<16x128xf32>
    %183 = vector.extract_strided_slice %167 {offsets = [0, 256], sizes = [16, 128], strides = [1, 1]} : vector<16x512xf32> to vector<16x128xf32>
    %184 = math.tanh %183 : vector<16x128xf32>
    %185 = vector.extract_strided_slice %167 {offsets = [0, 384], sizes = [16, 128], strides = [1, 1]} : vector<16x512xf32> to vector<16x128xf32>
    %186 = arith.negf %185 : vector<16x128xf32>
    %187 = math.exp %186 : vector<16x128xf32>
    %cst_56 = arith.constant 1.000000e+00 : f32
    %188 = vector.broadcast %cst_56 : f32 to vector<16x128xf32>
    %189 = arith.addf %188, %187 : vector<16x128xf32>
    %190 = arith.divf %188, %189 : vector<16x128xf32>
    %191 = arith.mulf %182, %120 : vector<16x128xf32>
    %192 = arith.mulf %176, %184 : vector<16x128xf32>
    %193 = arith.addf %191, %192 : vector<16x128xf32>
    %194 = math.tanh %193 : vector<16x128xf32>
    %195 = arith.mulf %190, %194 : vector<16x128xf32>
    %196 = vector.extract_strided_slice %170 {offsets = [0, 0], sizes = [16, 128], strides = [1, 1]} : vector<16x512xf32> to vector<16x128xf32>
    %197 = arith.negf %196 : vector<16x128xf32>
    %198 = math.exp %197 : vector<16x128xf32>
    %cst_57 = arith.constant 1.000000e+00 : f32
    %199 = vector.broadcast %cst_57 : f32 to vector<16x128xf32>
    %200 = arith.addf %199, %198 : vector<16x128xf32>
    %201 = arith.divf %199, %200 : vector<16x128xf32>
    %202 = vector.extract_strided_slice %170 {offsets = [0, 128], sizes = [16, 128], strides = [1, 1]} : vector<16x512xf32> to vector<16x128xf32>
    %203 = arith.negf %202 : vector<16x128xf32>
    %204 = math.exp %203 : vector<16x128xf32>
    %cst_58 = arith.constant 1.000000e+00 : f32
    %205 = vector.broadcast %cst_58 : f32 to vector<16x128xf32>
    %206 = arith.addf %205, %204 : vector<16x128xf32>
    %207 = arith.divf %205, %206 : vector<16x128xf32>
    %208 = vector.extract_strided_slice %170 {offsets = [0, 256], sizes = [16, 128], strides = [1, 1]} : vector<16x512xf32> to vector<16x128xf32>
    %209 = math.tanh %208 : vector<16x128xf32>
    %210 = vector.extract_strided_slice %170 {offsets = [0, 384], sizes = [16, 128], strides = [1, 1]} : vector<16x512xf32> to vector<16x128xf32>
    %211 = arith.negf %210 : vector<16x128xf32>
    %212 = math.exp %211 : vector<16x128xf32>
    %cst_59 = arith.constant 1.000000e+00 : f32
    %213 = vector.broadcast %cst_59 : f32 to vector<16x128xf32>
    %214 = arith.addf %213, %212 : vector<16x128xf32>
    %215 = arith.divf %213, %214 : vector<16x128xf32>
    %216 = arith.mulf %207, %145 : vector<16x128xf32>
    %217 = arith.mulf %201, %209 : vector<16x128xf32>
    %218 = arith.addf %216, %217 : vector<16x128xf32>
    %219 = math.tanh %218 : vector<16x128xf32>
    %220 = arith.mulf %215, %219 : vector<16x128xf32>
    %221 = arith.truncf %195 : vector<16x128xf32> to vector<16x128xbf16>
    %222 = arith.truncf %220 : vector<16x128xf32> to vector<16x128xbf16>
    %223 = arith.index_cast %155 : i32 to index
    %c0_60 = arith.constant 0 : index
    %224 = vector.load %arg10[%223, %c0_60] : memref<128x128xbf16, #tpu.memory_space<vmem>>, vector<16x128xbf16>
    tpu.vector_store %arg10[%223, %c0_60], %221 {strides = array<i32>} : memref<128x128xbf16, #tpu.memory_space<vmem>>, vector<16x128xbf16>,
    %225 = arith.index_cast %158 : i32 to index
    %c0_61 = arith.constant 0 : index
    %226 = vector.load %arg11[%225, %c0_61] : memref<128x128xbf16, #tpu.memory_space<vmem>>, vector<16x128xbf16>
    tpu.vector_store %arg11[%225, %c0_61], %222 {strides = array<i32>} : memref<128x128xbf16, #tpu.memory_space<vmem>>, vector<16x128xbf16>,
    %c3_i32 = arith.constant 3 : i32
    %c16_i32_62 = arith.constant 16 : i32
    %227 = arith.muli %c3_i32, %c16_i32_62 : i32
    %228 = tpu.assume_multiple %227, 16 : i32
    %c7_i32_63 = arith.constant 7 : i32
    %229 = arith.subi %c7_i32_63, %c3_i32 : i32
    %c16_i32_64 = arith.constant 16 : i32
    %230 = arith.muli %229, %c16_i32_64 : i32
    %231 = tpu.assume_multiple %230, 16 : i32
    %232 = arith.index_cast %228 : i32 to index
    %c0_65 = arith.constant 0 : index
    %233 = vector.load %arg9[%232, %c0_65] : memref<128x1024xbf16, #tpu.memory_space<vmem>>, vector<16x512xbf16>
    %234 = arith.extf %233 : vector<16x512xbf16> to vector<16x512xf32>
    %235 = arith.index_cast %231 : i32 to index
    %c512_66 = arith.constant 512 : index
    %236 = vector.load %arg9[%235, %c512_66] : memref<128x1024xbf16, #tpu.memory_space<vmem>>, vector<16x512xbf16>
    %237 = arith.extf %236 : vector<16x512xbf16> to vector<16x512xf32>
    %c0_67 = arith.constant 0 : index
    %c0_68 = arith.constant 0 : index
    %238 = vector.load %arg3[%c0_67, %c0_68] : memref<128x512xbf16, #tpu.memory_space<vmem>>, vector<128x512xbf16>
    %cst_69 = arith.constant dense<0.000000e+00> : vector<16x512xf32>
    %239 = tpu.matmul %221, %238, %cst_69 {dimension_numbers = #tpu.dot_dimension_numbers<[1], [0], [0], [1], [0, 0, 1, 1], [], []>} : vector<16x128xbf16>, vector<128x512xbf16>, vector<16x512xf32> -> vector<16x512xf32>
    %240 = arith.addf %234, %239 : vector<16x512xf32>
    %c0_70 = arith.constant 0 : index
    %c0_71 = arith.constant 0 : index
    %241 = vector.load %arg4[%c0_70, %c0_71] : memref<128x512xbf16, #tpu.memory_space<vmem>>, vector<128x512xbf16>
    %cst_72 = arith.constant dense<0.000000e+00> : vector<16x512xf32>
    %242 = tpu.matmul %222, %241, %cst_72 {dimension_numbers = #tpu.dot_dimension_numbers<[1], [0], [0], [1], [0, 0, 1, 1], [], []>} : vector<16x128xbf16>, vector<128x512xbf16>, vector<16x512xf32> -> vector<16x512xf32>
    %243 = arith.addf %237, %242 : vector<16x512xf32>
    %244 = vector.extract_strided_slice %240 {offsets = [0, 0], sizes = [16, 128], strides = [1, 1]} : vector<16x512xf32> to vector<16x128xf32>
    %245 = arith.negf %244 : vector<16x128xf32>
    %246 = math.exp %245 : vector<16x128xf32>
    %cst_73 = arith.constant 1.000000e+00 : f32
    %247 = vector.broadcast %cst_73 : f32 to vector<16x128xf32>
    %248 = arith.addf %247, %246 : vector<16x128xf32>
    %249 = arith.divf %247, %248 : vector<16x128xf32>
    %250 = vector.extract_strided_slice %240 {offsets = [0, 128], sizes = [16, 128], strides = [1, 1]} : vector<16x512xf32> to vector<16x128xf32>
    %251 = arith.negf %250 : vector<16x128xf32>
    %252 = math.exp %251 : vector<16x128xf32>
    %cst_74 = arith.constant 1.000000e+00 : f32
    %253 = vector.broadcast %cst_74 : f32 to vector<16x128xf32>
    %254 = arith.addf %253, %252 : vector<16x128xf32>
    %255 = arith.divf %253, %254 : vector<16x128xf32>
    %256 = vector.extract_strided_slice %240 {offsets = [0, 256], sizes = [16, 128], strides = [1, 1]} : vector<16x512xf32> to vector<16x128xf32>
    %257 = math.tanh %256 : vector<16x128xf32>
    %258 = vector.extract_strided_slice %240 {offsets = [0, 384], sizes = [16, 128], strides = [1, 1]} : vector<16x512xf32> to vector<16x128xf32>
    %259 = arith.negf %258 : vector<16x128xf32>
    %260 = math.exp %259 : vector<16x128xf32>
    %cst_75 = arith.constant 1.000000e+00 : f32
    %261 = vector.broadcast %cst_75 : f32 to vector<16x128xf32>
    %262 = arith.addf %261, %260 : vector<16x128xf32>
    %263 = arith.divf %261, %262 : vector<16x128xf32>
    %264 = arith.mulf %255, %193 : vector<16x128xf32>
    %265 = arith.mulf %249, %257 : vector<16x128xf32>
    %266 = arith.addf %264, %265 : vector<16x128xf32>
    %267 = math.tanh %266 : vector<16x128xf32>
    %268 = arith.mulf %263, %267 : vector<16x128xf32>
    %269 = vector.extract_strided_slice %243 {offsets = [0, 0], sizes = [16, 128], strides = [1, 1]} : vector<16x512xf32> to vector<16x128xf32>
    %270 = arith.negf %269 : vector<16x128xf32>
    %271 = math.exp %270 : vector<16x128xf32>
    %cst_76 = arith.constant 1.000000e+00 : f32
    %272 = vector.broadcast %cst_76 : f32 to vector<16x128xf32>
    %273 = arith.addf %272, %271 : vector<16x128xf32>
    %274 = arith.divf %272, %273 : vector<16x128xf32>
    %275 = vector.extract_strided_slice %243 {offsets = [0, 128], sizes = [16, 128], strides = [1, 1]} : vector<16x512xf32> to vector<16x128xf32>
    %276 = arith.negf %275 : vector<16x128xf32>
    %277 = math.exp %276 : vector<16x128xf32>
    %cst_77 = arith.constant 1.000000e+00 : f32
    %278 = vector.broadcast %cst_77 : f32 to vector<16x128xf32>
    %279 = arith.addf %278, %277 : vector<16x128xf32>
    %280 = arith.divf %278, %279 : vector<16x128xf32>
    %281 = vector.extract_strided_slice %243 {offsets = [0, 256], sizes = [16, 128], strides = [1, 1]} : vector<16x512xf32> to vector<16x128xf32>
    %282 = math.tanh %281 : vector<16x128xf32>
    %283 = vector.extract_strided_slice %243 {offsets = [0, 384], sizes = [16, 128], strides = [1, 1]} : vector<16x512xf32> to vector<16x128xf32>
    %284 = arith.negf %283 : vector<16x128xf32>
    %285 = math.exp %284 : vector<16x128xf32>
    %cst_78 = arith.constant 1.000000e+00 : f32
    %286 = vector.broadcast %cst_78 : f32 to vector<16x128xf32>
    %287 = arith.addf %286, %285 : vector<16x128xf32>
    %288 = arith.divf %286, %287 : vector<16x128xf32>
    %289 = arith.mulf %280, %218 : vector<16x128xf32>
    %290 = arith.mulf %274, %282 : vector<16x128xf32>
    %291 = arith.addf %289, %290 : vector<16x128xf32>
    %292 = math.tanh %291 : vector<16x128xf32>
    %293 = arith.mulf %288, %292 : vector<16x128xf32>
    %294 = arith.truncf %268 : vector<16x128xf32> to vector<16x128xbf16>
    %295 = arith.truncf %293 : vector<16x128xf32> to vector<16x128xbf16>
    %296 = arith.index_cast %228 : i32 to index
    %c0_79 = arith.constant 0 : index
    %297 = vector.load %arg10[%296, %c0_79] : memref<128x128xbf16, #tpu.memory_space<vmem>>, vector<16x128xbf16>
    tpu.vector_store %arg10[%296, %c0_79], %294 {strides = array<i32>} : memref<128x128xbf16, #tpu.memory_space<vmem>>, vector<16x128xbf16>,
    %298 = arith.index_cast %231 : i32 to index
    %c0_80 = arith.constant 0 : index
    %299 = vector.load %arg11[%298, %c0_80] : memref<128x128xbf16, #tpu.memory_space<vmem>>, vector<16x128xbf16>
    tpu.vector_store %arg11[%298, %c0_80], %295 {strides = array<i32>} : memref<128x128xbf16, #tpu.memory_space<vmem>>, vector<16x128xbf16>,
    %c4_i32 = arith.constant 4 : i32
    %c16_i32_81 = arith.constant 16 : i32
    %300 = arith.muli %c4_i32, %c16_i32_81 : i32
    %301 = tpu.assume_multiple %300, 16 : i32
    %c7_i32_82 = arith.constant 7 : i32
    %302 = arith.subi %c7_i32_82, %c4_i32 : i32
    %c16_i32_83 = arith.constant 16 : i32
    %303 = arith.muli %302, %c16_i32_83 : i32
    %304 = tpu.assume_multiple %303, 16 : i32
    %305 = arith.index_cast %301 : i32 to index
    %c0_84 = arith.constant 0 : index
    %306 = vector.load %arg9[%305, %c0_84] : memref<128x1024xbf16, #tpu.memory_space<vmem>>, vector<16x512xbf16>
    %307 = arith.extf %306 : vector<16x512xbf16> to vector<16x512xf32>
    %308 = arith.index_cast %304 : i32 to index
    %c512_85 = arith.constant 512 : index
    %309 = vector.load %arg9[%308, %c512_85] : memref<128x1024xbf16, #tpu.memory_space<vmem>>, vector<16x512xbf16>
    %310 = arith.extf %309 : vector<16x512xbf16> to vector<16x512xf32>
    %c0_86 = arith.constant 0 : index
    %c0_87 = arith.constant 0 : index
    %311 = vector.load %arg3[%c0_86, %c0_87] : memref<128x512xbf16, #tpu.memory_space<vmem>>, vector<128x512xbf16>
    %cst_88 = arith.constant dense<0.000000e+00> : vector<16x512xf32>
    %312 = tpu.matmul %294, %311, %cst_88 {dimension_numbers = #tpu.dot_dimension_numbers<[1], [0], [0], [1], [0, 0, 1, 1], [], []>} : vector<16x128xbf16>, vector<128x512xbf16>, vector<16x512xf32> -> vector<16x512xf32>
    %313 = arith.addf %307, %312 : vector<16x512xf32>
    %c0_89 = arith.constant 0 : index
    %c0_90 = arith.constant 0 : index
    %314 = vector.load %arg4[%c0_89, %c0_90] : memref<128x512xbf16, #tpu.memory_space<vmem>>, vector<128x512xbf16>
    %cst_91 = arith.constant dense<0.000000e+00> : vector<16x512xf32>
    %315 = tpu.matmul %295, %314, %cst_91 {dimension_numbers = #tpu.dot_dimension_numbers<[1], [0], [0], [1], [0, 0, 1, 1], [], []>} : vector<16x128xbf16>, vector<128x512xbf16>, vector<16x512xf32> -> vector<16x512xf32>
    %316 = arith.addf %310, %315 : vector<16x512xf32>
    %317 = vector.extract_strided_slice %313 {offsets = [0, 0], sizes = [16, 128], strides = [1, 1]} : vector<16x512xf32> to vector<16x128xf32>
    %318 = arith.negf %317 : vector<16x128xf32>
    %319 = math.exp %318 : vector<16x128xf32>
    %cst_92 = arith.constant 1.000000e+00 : f32
    %320 = vector.broadcast %cst_92 : f32 to vector<16x128xf32>
    %321 = arith.addf %320, %319 : vector<16x128xf32>
    %322 = arith.divf %320, %321 : vector<16x128xf32>
    %323 = vector.extract_strided_slice %313 {offsets = [0, 128], sizes = [16, 128], strides = [1, 1]} : vector<16x512xf32> to vector<16x128xf32>
    %324 = arith.negf %323 : vector<16x128xf32>
    %325 = math.exp %324 : vector<16x128xf32>
    %cst_93 = arith.constant 1.000000e+00 : f32
    %326 = vector.broadcast %cst_93 : f32 to vector<16x128xf32>
    %327 = arith.addf %326, %325 : vector<16x128xf32>
    %328 = arith.divf %326, %327 : vector<16x128xf32>
    %329 = vector.extract_strided_slice %313 {offsets = [0, 256], sizes = [16, 128], strides = [1, 1]} : vector<16x512xf32> to vector<16x128xf32>
    %330 = math.tanh %329 : vector<16x128xf32>
    %331 = vector.extract_strided_slice %313 {offsets = [0, 384], sizes = [16, 128], strides = [1, 1]} : vector<16x512xf32> to vector<16x128xf32>
    %332 = arith.negf %331 : vector<16x128xf32>
    %333 = math.exp %332 : vector<16x128xf32>
    %cst_94 = arith.constant 1.000000e+00 : f32
    %334 = vector.broadcast %cst_94 : f32 to vector<16x128xf32>
    %335 = arith.addf %334, %333 : vector<16x128xf32>
    %336 = arith.divf %334, %335 : vector<16x128xf32>
    %337 = arith.mulf %328, %266 : vector<16x128xf32>
    %338 = arith.mulf %322, %330 : vector<16x128xf32>
    %339 = arith.addf %337, %338 : vector<16x128xf32>
    %340 = math.tanh %339 : vector<16x128xf32>
    %341 = arith.mulf %336, %340 : vector<16x128xf32>
    %342 = vector.extract_strided_slice %316 {offsets = [0, 0], sizes = [16, 128], strides = [1, 1]} : vector<16x512xf32> to vector<16x128xf32>
    %343 = arith.negf %342 : vector<16x128xf32>
    %344 = math.exp %343 : vector<16x128xf32>
    %cst_95 = arith.constant 1.000000e+00 : f32
    %345 = vector.broadcast %cst_95 : f32 to vector<16x128xf32>
    %346 = arith.addf %345, %344 : vector<16x128xf32>
    %347 = arith.divf %345, %346 : vector<16x128xf32>
    %348 = vector.extract_strided_slice %316 {offsets = [0, 128], sizes = [16, 128], strides = [1, 1]} : vector<16x512xf32> to vector<16x128xf32>
    %349 = arith.negf %348 : vector<16x128xf32>
    %350 = math.exp %349 : vector<16x128xf32>
    %cst_96 = arith.constant 1.000000e+00 : f32
    %351 = vector.broadcast %cst_96 : f32 to vector<16x128xf32>
    %352 = arith.addf %351, %350 : vector<16x128xf32>
    %353 = arith.divf %351, %352 : vector<16x128xf32>
    %354 = vector.extract_strided_slice %316 {offsets = [0, 256], sizes = [16, 128], strides = [1, 1]} : vector<16x512xf32> to vector<16x128xf32>
    %355 = math.tanh %354 : vector<16x128xf32>
    %356 = vector.extract_strided_slice %316 {offsets = [0, 384], sizes = [16, 128], strides = [1, 1]} : vector<16x512xf32> to vector<16x128xf32>
    %357 = arith.negf %356 : vector<16x128xf32>
    %358 = math.exp %357 : vector<16x128xf32>
    %cst_97 = arith.constant 1.000000e+00 : f32
    %359 = vector.broadcast %cst_97 : f32 to vector<16x128xf32>
    %360 = arith.addf %359, %358 : vector<16x128xf32>
    %361 = arith.divf %359, %360 : vector<16x128xf32>
    %362 = arith.mulf %353, %291 : vector<16x128xf32>
    %363 = arith.mulf %347, %355 : vector<16x128xf32>
    %364 = arith.addf %362, %363 : vector<16x128xf32>
    %365 = math.tanh %364 : vector<16x128xf32>
    %366 = arith.mulf %361, %365 : vector<16x128xf32>
    %367 = arith.truncf %341 : vector<16x128xf32> to vector<16x128xbf16>
    %368 = arith.truncf %366 : vector<16x128xf32> to vector<16x128xbf16>
    %369 = arith.index_cast %301 : i32 to index
    %c0_98 = arith.constant 0 : index
    %370 = vector.load %arg10[%369, %c0_98] : memref<128x128xbf16, #tpu.memory_space<vmem>>, vector<16x128xbf16>
    tpu.vector_store %arg10[%369, %c0_98], %367 {strides = array<i32>} : memref<128x128xbf16, #tpu.memory_space<vmem>>, vector<16x128xbf16>,
    %371 = arith.index_cast %304 : i32 to index
    %c0_99 = arith.constant 0 : index
    %372 = vector.load %arg11[%371, %c0_99] : memref<128x128xbf16, #tpu.memory_space<vmem>>, vector<16x128xbf16>
    tpu.vector_store %arg11[%371, %c0_99], %368 {strides = array<i32>} : memref<128x128xbf16, #tpu.memory_space<vmem>>, vector<16x128xbf16>,
    %c5_i32 = arith.constant 5 : i32
    %c16_i32_100 = arith.constant 16 : i32
    %373 = arith.muli %c5_i32, %c16_i32_100 : i32
    %374 = tpu.assume_multiple %373, 16 : i32
    %c7_i32_101 = arith.constant 7 : i32
    %375 = arith.subi %c7_i32_101, %c5_i32 : i32
    %c16_i32_102 = arith.constant 16 : i32
    %376 = arith.muli %375, %c16_i32_102 : i32
    %377 = tpu.assume_multiple %376, 16 : i32
    %378 = arith.index_cast %374 : i32 to index
    %c0_103 = arith.constant 0 : index
    %379 = vector.load %arg9[%378, %c0_103] : memref<128x1024xbf16, #tpu.memory_space<vmem>>, vector<16x512xbf16>
    %380 = arith.extf %379 : vector<16x512xbf16> to vector<16x512xf32>
    %381 = arith.index_cast %377 : i32 to index
    %c512_104 = arith.constant 512 : index
    %382 = vector.load %arg9[%381, %c512_104] : memref<128x1024xbf16, #tpu.memory_space<vmem>>, vector<16x512xbf16>
    %383 = arith.extf %382 : vector<16x512xbf16> to vector<16x512xf32>
    %c0_105 = arith.constant 0 : index
    %c0_106 = arith.constant 0 : index
    %384 = vector.load %arg3[%c0_105, %c0_106] : memref<128x512xbf16, #tpu.memory_space<vmem>>, vector<128x512xbf16>
    %cst_107 = arith.constant dense<0.000000e+00> : vector<16x512xf32>
    %385 = tpu.matmul %367, %384, %cst_107 {dimension_numbers = #tpu.dot_dimension_numbers<[1], [0], [0], [1], [0, 0, 1, 1], [], []>} : vector<16x128xbf16>, vector<128x512xbf16>, vector<16x512xf32> -> vector<16x512xf32>
    %386 = arith.addf %380, %385 : vector<16x512xf32>
    %c0_108 = arith.constant 0 : index
    %c0_109 = arith.constant 0 : index
    %387 = vector.load %arg4[%c0_108, %c0_109] : memref<128x512xbf16, #tpu.memory_space<vmem>>, vector<128x512xbf16>
    %cst_110 = arith.constant dense<0.000000e+00> : vector<16x512xf32>
    %388 = tpu.matmul %368, %387, %cst_110 {dimension_numbers = #tpu.dot_dimension_numbers<[1], [0], [0], [1], [0, 0, 1, 1], [], []>} : vector<16x128xbf16>, vector<128x512xbf16>, vector<16x512xf32> -> vector<16x512xf32>
    %389 = arith.addf %383, %388 : vector<16x512xf32>
    %390 = vector.extract_strided_slice %386 {offsets = [0, 0], sizes = [16, 128], strides = [1, 1]} : vector<16x512xf32> to vector<16x128xf32>
    %391 = arith.negf %390 : vector<16x128xf32>
    %392 = math.exp %391 : vector<16x128xf32>
    %cst_111 = arith.constant 1.000000e+00 : f32
    %393 = vector.broadcast %cst_111 : f32 to vector<16x128xf32>
    %394 = arith.addf %393, %392 : vector<16x128xf32>
    %395 = arith.divf %393, %394 : vector<16x128xf32>
    %396 = vector.extract_strided_slice %386 {offsets = [0, 128], sizes = [16, 128], strides = [1, 1]} : vector<16x512xf32> to vector<16x128xf32>
    %397 = arith.negf %396 : vector<16x128xf32>
    %398 = math.exp %397 : vector<16x128xf32>
    %cst_112 = arith.constant 1.000000e+00 : f32
    %399 = vector.broadcast %cst_112 : f32 to vector<16x128xf32>
    %400 = arith.addf %399, %398 : vector<16x128xf32>
    %401 = arith.divf %399, %400 : vector<16x128xf32>
    %402 = vector.extract_strided_slice %386 {offsets = [0, 256], sizes = [16, 128], strides = [1, 1]} : vector<16x512xf32> to vector<16x128xf32>
    %403 = math.tanh %402 : vector<16x128xf32>
    %404 = vector.extract_strided_slice %386 {offsets = [0, 384], sizes = [16, 128], strides = [1, 1]} : vector<16x512xf32> to vector<16x128xf32>
    %405 = arith.negf %404 : vector<16x128xf32>
    %406 = math.exp %405 : vector<16x128xf32>
    %cst_113 = arith.constant 1.000000e+00 : f32
    %407 = vector.broadcast %cst_113 : f32 to vector<16x128xf32>
    %408 = arith.addf %407, %406 : vector<16x128xf32>
    %409 = arith.divf %407, %408 : vector<16x128xf32>
    %410 = arith.mulf %401, %339 : vector<16x128xf32>
    %411 = arith.mulf %395, %403 : vector<16x128xf32>
    %412 = arith.addf %410, %411 : vector<16x128xf32>
    %413 = math.tanh %412 : vector<16x128xf32>
    %414 = arith.mulf %409, %413 : vector<16x128xf32>
    %415 = vector.extract_strided_slice %389 {offsets = [0, 0], sizes = [16, 128], strides = [1, 1]} : vector<16x512xf32> to vector<16x128xf32>
    %416 = arith.negf %415 : vector<16x128xf32>
    %417 = math.exp %416 : vector<16x128xf32>
    %cst_114 = arith.constant 1.000000e+00 : f32
    %418 = vector.broadcast %cst_114 : f32 to vector<16x128xf32>
    %419 = arith.addf %418, %417 : vector<16x128xf32>
    %420 = arith.divf %418, %419 : vector<16x128xf32>
    %421 = vector.extract_strided_slice %389 {offsets = [0, 128], sizes = [16, 128], strides = [1, 1]} : vector<16x512xf32> to vector<16x128xf32>
    %422 = arith.negf %421 : vector<16x128xf32>
    %423 = math.exp %422 : vector<16x128xf32>
    %cst_115 = arith.constant 1.000000e+00 : f32
    %424 = vector.broadcast %cst_115 : f32 to vector<16x128xf32>
    %425 = arith.addf %424, %423 : vector<16x128xf32>
    %426 = arith.divf %424, %425 : vector<16x128xf32>
    %427 = vector.extract_strided_slice %389 {offsets = [0, 256], sizes = [16, 128], strides = [1, 1]} : vector<16x512xf32> to vector<16x128xf32>
    %428 = math.tanh %427 : vector<16x128xf32>
    %429 = vector.extract_strided_slice %389 {offsets = [0, 384], sizes = [16, 128], strides = [1, 1]} : vector<16x512xf32> to vector<16x128xf32>
    %430 = arith.negf %429 : vector<16x128xf32>
    %431 = math.exp %430 : vector<16x128xf32>
    %cst_116 = arith.constant 1.000000e+00 : f32
    %432 = vector.broadcast %cst_116 : f32 to vector<16x128xf32>
    %433 = arith.addf %432, %431 : vector<16x128xf32>
    %434 = arith.divf %432, %433 : vector<16x128xf32>
    %435 = arith.mulf %426, %364 : vector<16x128xf32>
    %436 = arith.mulf %420, %428 : vector<16x128xf32>
    %437 = arith.addf %435, %436 : vector<16x128xf32>
    %438 = math.tanh %437 : vector<16x128xf32>
    %439 = arith.mulf %434, %438 : vector<16x128xf32>
    %440 = arith.truncf %414 : vector<16x128xf32> to vector<16x128xbf16>
    %441 = arith.truncf %439 : vector<16x128xf32> to vector<16x128xbf16>
    %442 = arith.index_cast %374 : i32 to index
    %c0_117 = arith.constant 0 : index
    %443 = vector.load %arg10[%442, %c0_117] : memref<128x128xbf16, #tpu.memory_space<vmem>>, vector<16x128xbf16>
    tpu.vector_store %arg10[%442, %c0_117], %440 {strides = array<i32>} : memref<128x128xbf16, #tpu.memory_space<vmem>>, vector<16x128xbf16>,
    %444 = arith.index_cast %377 : i32 to index
    %c0_118 = arith.constant 0 : index
    %445 = vector.load %arg11[%444, %c0_118] : memref<128x128xbf16, #tpu.memory_space<vmem>>, vector<16x128xbf16>
    tpu.vector_store %arg11[%444, %c0_118], %441 {strides = array<i32>} : memref<128x128xbf16, #tpu.memory_space<vmem>>, vector<16x128xbf16>,
    %c6_i32 = arith.constant 6 : i32
    %c16_i32_119 = arith.constant 16 : i32
    %446 = arith.muli %c6_i32, %c16_i32_119 : i32
    %447 = tpu.assume_multiple %446, 16 : i32
    %c7_i32_120 = arith.constant 7 : i32
    %448 = arith.subi %c7_i32_120, %c6_i32 : i32
    %c16_i32_121 = arith.constant 16 : i32
    %449 = arith.muli %448, %c16_i32_121 : i32
    %450 = tpu.assume_multiple %449, 16 : i32
    %451 = arith.index_cast %447 : i32 to index
    %c0_122 = arith.constant 0 : index
    %452 = vector.load %arg9[%451, %c0_122] : memref<128x1024xbf16, #tpu.memory_space<vmem>>, vector<16x512xbf16>
    %453 = arith.extf %452 : vector<16x512xbf16> to vector<16x512xf32>
    %454 = arith.index_cast %450 : i32 to index
    %c512_123 = arith.constant 512 : index
    %455 = vector.load %arg9[%454, %c512_123] : memref<128x1024xbf16, #tpu.memory_space<vmem>>, vector<16x512xbf16>
    %456 = arith.extf %455 : vector<16x512xbf16> to vector<16x512xf32>
    %c0_124 = arith.constant 0 : index
    %c0_125 = arith.constant 0 : index
    %457 = vector.load %arg3[%c0_124, %c0_125] : memref<128x512xbf16, #tpu.memory_space<vmem>>, vector<128x512xbf16>
    %cst_126 = arith.constant dense<0.000000e+00> : vector<16x512xf32>
    %458 = tpu.matmul %440, %457, %cst_126 {dimension_numbers = #tpu.dot_dimension_numbers<[1], [0], [0], [1], [0, 0, 1, 1], [], []>} : vector<16x128xbf16>, vector<128x512xbf16>, vector<16x512xf32> -> vector<16x512xf32>
    %459 = arith.addf %453, %458 : vector<16x512xf32>
    %c0_127 = arith.constant 0 : index
    %c0_128 = arith.constant 0 : index
    %460 = vector.load %arg4[%c0_127, %c0_128] : memref<128x512xbf16, #tpu.memory_space<vmem>>, vector<128x512xbf16>
    %cst_129 = arith.constant dense<0.000000e+00> : vector<16x512xf32>
    %461 = tpu.matmul %441, %460, %cst_129 {dimension_numbers = #tpu.dot_dimension_numbers<[1], [0], [0], [1], [0, 0, 1, 1], [], []>} : vector<16x128xbf16>, vector<128x512xbf16>, vector<16x512xf32> -> vector<16x512xf32>
    %462 = arith.addf %456, %461 : vector<16x512xf32>
    %463 = vector.extract_strided_slice %459 {offsets = [0, 0], sizes = [16, 128], strides = [1, 1]} : vector<16x512xf32> to vector<16x128xf32>
    %464 = arith.negf %463 : vector<16x128xf32>
    %465 = math.exp %464 : vector<16x128xf32>
    %cst_130 = arith.constant 1.000000e+00 : f32
    %466 = vector.broadcast %cst_130 : f32 to vector<16x128xf32>
    %467 = arith.addf %466, %465 : vector<16x128xf32>
    %468 = arith.divf %466, %467 : vector<16x128xf32>
    %469 = vector.extract_strided_slice %459 {offsets = [0, 128], sizes = [16, 128], strides = [1, 1]} : vector<16x512xf32> to vector<16x128xf32>
    %470 = arith.negf %469 : vector<16x128xf32>
    %471 = math.exp %470 : vector<16x128xf32>
    %cst_131 = arith.constant 1.000000e+00 : f32
    %472 = vector.broadcast %cst_131 : f32 to vector<16x128xf32>
    %473 = arith.addf %472, %471 : vector<16x128xf32>
    %474 = arith.divf %472, %473 : vector<16x128xf32>
    %475 = vector.extract_strided_slice %459 {offsets = [0, 256], sizes = [16, 128], strides = [1, 1]} : vector<16x512xf32> to vector<16x128xf32>
    %476 = math.tanh %475 : vector<16x128xf32>
    %477 = vector.extract_strided_slice %459 {offsets = [0, 384], sizes = [16, 128], strides = [1, 1]} : vector<16x512xf32> to vector<16x128xf32>
    %478 = arith.negf %477 : vector<16x128xf32>
    %479 = math.exp %478 : vector<16x128xf32>
    %cst_132 = arith.constant 1.000000e+00 : f32
    %480 = vector.broadcast %cst_132 : f32 to vector<16x128xf32>
    %481 = arith.addf %480, %479 : vector<16x128xf32>
    %482 = arith.divf %480, %481 : vector<16x128xf32>
    %483 = arith.mulf %474, %412 : vector<16x128xf32>
    %484 = arith.mulf %468, %476 : vector<16x128xf32>
    %485 = arith.addf %483, %484 : vector<16x128xf32>
    %486 = math.tanh %485 : vector<16x128xf32>
    %487 = arith.mulf %482, %486 : vector<16x128xf32>
    %488 = vector.extract_strided_slice %462 {offsets = [0, 0], sizes = [16, 128], strides = [1, 1]} : vector<16x512xf32> to vector<16x128xf32>
    %489 = arith.negf %488 : vector<16x128xf32>
    %490 = math.exp %489 : vector<16x128xf32>
    %cst_133 = arith.constant 1.000000e+00 : f32
    %491 = vector.broadcast %cst_133 : f32 to vector<16x128xf32>
    %492 = arith.addf %491, %490 : vector<16x128xf32>
    %493 = arith.divf %491, %492 : vector<16x128xf32>
    %494 = vector.extract_strided_slice %462 {offsets = [0, 128], sizes = [16, 128], strides = [1, 1]} : vector<16x512xf32> to vector<16x128xf32>
    %495 = arith.negf %494 : vector<16x128xf32>
    %496 = math.exp %495 : vector<16x128xf32>
    %cst_134 = arith.constant 1.000000e+00 : f32
    %497 = vector.broadcast %cst_134 : f32 to vector<16x128xf32>
    %498 = arith.addf %497, %496 : vector<16x128xf32>
    %499 = arith.divf %497, %498 : vector<16x128xf32>
    %500 = vector.extract_strided_slice %462 {offsets = [0, 256], sizes = [16, 128], strides = [1, 1]} : vector<16x512xf32> to vector<16x128xf32>
    %501 = math.tanh %500 : vector<16x128xf32>
    %502 = vector.extract_strided_slice %462 {offsets = [0, 384], sizes = [16, 128], strides = [1, 1]} : vector<16x512xf32> to vector<16x128xf32>
    %503 = arith.negf %502 : vector<16x128xf32>
    %504 = math.exp %503 : vector<16x128xf32>
    %cst_135 = arith.constant 1.000000e+00 : f32
    %505 = vector.broadcast %cst_135 : f32 to vector<16x128xf32>
    %506 = arith.addf %505, %504 : vector<16x128xf32>
    %507 = arith.divf %505, %506 : vector<16x128xf32>
    %508 = arith.mulf %499, %437 : vector<16x128xf32>
    %509 = arith.mulf %493, %501 : vector<16x128xf32>
    %510 = arith.addf %508, %509 : vector<16x128xf32>
    %511 = math.tanh %510 : vector<16x128xf32>
    %512 = arith.mulf %507, %511 : vector<16x128xf32>
    %513 = arith.truncf %487 : vector<16x128xf32> to vector<16x128xbf16>
    %514 = arith.truncf %512 : vector<16x128xf32> to vector<16x128xbf16>
    %515 = arith.index_cast %447 : i32 to index
    %c0_136 = arith.constant 0 : index
    %516 = vector.load %arg10[%515, %c0_136] : memref<128x128xbf16, #tpu.memory_space<vmem>>, vector<16x128xbf16>
    tpu.vector_store %arg10[%515, %c0_136], %513 {strides = array<i32>} : memref<128x128xbf16, #tpu.memory_space<vmem>>, vector<16x128xbf16>,
    %517 = arith.index_cast %450 : i32 to index
    %c0_137 = arith.constant 0 : index
    %518 = vector.load %arg11[%517, %c0_137] : memref<128x128xbf16, #tpu.memory_space<vmem>>, vector<16x128xbf16>
    tpu.vector_store %arg11[%517, %c0_137], %514 {strides = array<i32>} : memref<128x128xbf16, #tpu.memory_space<vmem>>, vector<16x128xbf16>,
    %c7_i32_138 = arith.constant 7 : i32
    %c16_i32_139 = arith.constant 16 : i32
    %519 = arith.muli %c7_i32_138, %c16_i32_139 : i32
    %520 = tpu.assume_multiple %519, 16 : i32
    %c7_i32_140 = arith.constant 7 : i32
    %521 = arith.subi %c7_i32_140, %c7_i32_138 : i32
    %c16_i32_141 = arith.constant 16 : i32
    %522 = arith.muli %521, %c16_i32_141 : i32
    %523 = tpu.assume_multiple %522, 16 : i32
    %524 = arith.index_cast %520 : i32 to index
    %c0_142 = arith.constant 0 : index
    %525 = vector.load %arg9[%524, %c0_142] : memref<128x1024xbf16, #tpu.memory_space<vmem>>, vector<16x512xbf16>
    %526 = arith.extf %525 : vector<16x512xbf16> to vector<16x512xf32>
    %527 = arith.index_cast %523 : i32 to index
    %c512_143 = arith.constant 512 : index
    %528 = vector.load %arg9[%527, %c512_143] : memref<128x1024xbf16, #tpu.memory_space<vmem>>, vector<16x512xbf16>
    %529 = arith.extf %528 : vector<16x512xbf16> to vector<16x512xf32>
    %c0_144 = arith.constant 0 : index
    %c0_145 = arith.constant 0 : index
    %530 = vector.load %arg3[%c0_144, %c0_145] : memref<128x512xbf16, #tpu.memory_space<vmem>>, vector<128x512xbf16>
    %cst_146 = arith.constant dense<0.000000e+00> : vector<16x512xf32>
    %531 = tpu.matmul %513, %530, %cst_146 {dimension_numbers = #tpu.dot_dimension_numbers<[1], [0], [0], [1], [0, 0, 1, 1], [], []>} : vector<16x128xbf16>, vector<128x512xbf16>, vector<16x512xf32> -> vector<16x512xf32>
    %532 = arith.addf %526, %531 : vector<16x512xf32>
    %c0_147 = arith.constant 0 : index
    %c0_148 = arith.constant 0 : index
    %533 = vector.load %arg4[%c0_147, %c0_148] : memref<128x512xbf16, #tpu.memory_space<vmem>>, vector<128x512xbf16>
    %cst_149 = arith.constant dense<0.000000e+00> : vector<16x512xf32>
    %534 = tpu.matmul %514, %533, %cst_149 {dimension_numbers = #tpu.dot_dimension_numbers<[1], [0], [0], [1], [0, 0, 1, 1], [], []>} : vector<16x128xbf16>, vector<128x512xbf16>, vector<16x512xf32> -> vector<16x512xf32>
    %535 = arith.addf %529, %534 : vector<16x512xf32>
    %536 = vector.extract_strided_slice %532 {offsets = [0, 0], sizes = [16, 128], strides = [1, 1]} : vector<16x512xf32> to vector<16x128xf32>
    %537 = arith.negf %536 : vector<16x128xf32>
    %538 = math.exp %537 : vector<16x128xf32>
    %cst_150 = arith.constant 1.000000e+00 : f32
    %539 = vector.broadcast %cst_150 : f32 to vector<16x128xf32>
    %540 = arith.addf %539, %538 : vector<16x128xf32>
    %541 = arith.divf %539, %540 : vector<16x128xf32>
    %542 = vector.extract_strided_slice %532 {offsets = [0, 128], sizes = [16, 128], strides = [1, 1]} : vector<16x512xf32> to vector<16x128xf32>
    %543 = arith.negf %542 : vector<16x128xf32>
    %544 = math.exp %543 : vector<16x128xf32>
    %cst_151 = arith.constant 1.000000e+00 : f32
    %545 = vector.broadcast %cst_151 : f32 to vector<16x128xf32>
    %546 = arith.addf %545, %544 : vector<16x128xf32>
    %547 = arith.divf %545, %546 : vector<16x128xf32>
    %548 = vector.extract_strided_slice %532 {offsets = [0, 256], sizes = [16, 128], strides = [1, 1]} : vector<16x512xf32> to vector<16x128xf32>
    %549 = math.tanh %548 : vector<16x128xf32>
    %550 = vector.extract_strided_slice %532 {offsets = [0, 384], sizes = [16, 128], strides = [1, 1]} : vector<16x512xf32> to vector<16x128xf32>
    %551 = arith.negf %550 : vector<16x128xf32>
    %552 = math.exp %551 : vector<16x128xf32>
    %cst_152 = arith.constant 1.000000e+00 : f32
    %553 = vector.broadcast %cst_152 : f32 to vector<16x128xf32>
    %554 = arith.addf %553, %552 : vector<16x128xf32>
    %555 = arith.divf %553, %554 : vector<16x128xf32>
    %556 = arith.mulf %547, %485 : vector<16x128xf32>
    %557 = arith.mulf %541, %549 : vector<16x128xf32>
    %558 = arith.addf %556, %557 : vector<16x128xf32>
    %559 = math.tanh %558 : vector<16x128xf32>
    %560 = arith.mulf %555, %559 : vector<16x128xf32>
    %561 = vector.extract_strided_slice %535 {offsets = [0, 0], sizes = [16, 128], strides = [1, 1]} : vector<16x512xf32> to vector<16x128xf32>
    %562 = arith.negf %561 : vector<16x128xf32>
    %563 = math.exp %562 : vector<16x128xf32>
    %cst_153 = arith.constant 1.000000e+00 : f32
    %564 = vector.broadcast %cst_153 : f32 to vector<16x128xf32>
    %565 = arith.addf %564, %563 : vector<16x128xf32>
    %566 = arith.divf %564, %565 : vector<16x128xf32>
    %567 = vector.extract_strided_slice %535 {offsets = [0, 128], sizes = [16, 128], strides = [1, 1]} : vector<16x512xf32> to vector<16x128xf32>
    %568 = arith.negf %567 : vector<16x128xf32>
    %569 = math.exp %568 : vector<16x128xf32>
    %cst_154 = arith.constant 1.000000e+00 : f32
    %570 = vector.broadcast %cst_154 : f32 to vector<16x128xf32>
    %571 = arith.addf %570, %569 : vector<16x128xf32>
    %572 = arith.divf %570, %571 : vector<16x128xf32>
    %573 = vector.extract_strided_slice %535 {offsets = [0, 256], sizes = [16, 128], strides = [1, 1]} : vector<16x512xf32> to vector<16x128xf32>
    %574 = math.tanh %573 : vector<16x128xf32>
    %575 = vector.extract_strided_slice %535 {offsets = [0, 384], sizes = [16, 128], strides = [1, 1]} : vector<16x512xf32> to vector<16x128xf32>
    %576 = arith.negf %575 : vector<16x128xf32>
    %577 = math.exp %576 : vector<16x128xf32>
    %cst_155 = arith.constant 1.000000e+00 : f32
    %578 = vector.broadcast %cst_155 : f32 to vector<16x128xf32>
    %579 = arith.addf %578, %577 : vector<16x128xf32>
    %580 = arith.divf %578, %579 : vector<16x128xf32>
    %581 = arith.mulf %572, %510 : vector<16x128xf32>
    %582 = arith.mulf %566, %574 : vector<16x128xf32>
    %583 = arith.addf %581, %582 : vector<16x128xf32>
    %584 = math.tanh %583 : vector<16x128xf32>
    %585 = arith.mulf %580, %584 : vector<16x128xf32>
    %586 = arith.truncf %560 : vector<16x128xf32> to vector<16x128xbf16>
    %587 = arith.truncf %585 : vector<16x128xf32> to vector<16x128xbf16>
    %588 = arith.index_cast %520 : i32 to index
    %c0_156 = arith.constant 0 : index
    %589 = vector.load %arg10[%588, %c0_156] : memref<128x128xbf16, #tpu.memory_space<vmem>>, vector<16x128xbf16>
    tpu.vector_store %arg10[%588, %c0_156], %586 {strides = array<i32>} : memref<128x128xbf16, #tpu.memory_space<vmem>>, vector<16x128xbf16>,
    %590 = arith.index_cast %523 : i32 to index
    %c0_157 = arith.constant 0 : index
    %591 = vector.load %arg11[%590, %c0_157] : memref<128x128xbf16, #tpu.memory_space<vmem>>, vector<16x128xbf16>
    tpu.vector_store %arg11[%590, %c0_157], %587 {strides = array<i32>} : memref<128x128xbf16, #tpu.memory_space<vmem>>, vector<16x128xbf16>,
    %c8_i32 = arith.constant 8 : i32
    %c0_158 = arith.constant 0 : index
    %c0_159 = arith.constant 0 : index
    %592 = vector.load %arg10[%c0_158, %c0_159] : memref<128x128xbf16, #tpu.memory_space<vmem>>, vector<128x128xbf16>
    %c0_160 = arith.constant 0 : index
    %c0_161 = arith.constant 0 : index
    %593 = vector.load %arg5[%c0_160, %c0_161] : memref<128x128xbf16, #tpu.memory_space<vmem>>, vector<128x128xbf16>
    %cst_162 = arith.constant dense<0.000000e+00> : vector<128x128xf32>
    %594 = tpu.matmul %592, %593, %cst_162 {dimension_numbers = #tpu.dot_dimension_numbers<[1], [0], [0], [1], [0, 0, 1, 1], [], []>} : vector<128x128xbf16>, vector<128x128xbf16>, vector<128x128xf32> -> vector<128x128xf32>
    %c0_163 = arith.constant 0 : index
    %c0_164 = arith.constant 0 : index
    %595 = vector.load %arg11[%c0_163, %c0_164] : memref<128x128xbf16, #tpu.memory_space<vmem>>, vector<128x128xbf16>
    %c0_165 = arith.constant 0 : index
    %c0_166 = arith.constant 0 : index
    %596 = vector.load %arg6[%c0_165, %c0_166] : memref<128x128xbf16, #tpu.memory_space<vmem>>, vector<128x128xbf16>
    %cst_167 = arith.constant dense<0.000000e+00> : vector<128x128xf32>
    %597 = tpu.matmul %595, %596, %cst_167 {dimension_numbers = #tpu.dot_dimension_numbers<[1], [0], [0], [1], [0, 0, 1, 1], [], []>} : vector<128x128xbf16>, vector<128x128xbf16>, vector<128x128xf32> -> vector<128x128xf32>
    %598 = arith.addf %594, %597 : vector<128x128xf32>
    %c0_168 = arith.constant 0 : index
    %c0_169 = arith.constant 0 : index
    %599 = vector.load %arg7[%c0_168, %c0_169] : memref<1x128xf32, #tpu.memory_space<vmem>>, vector<1x128xf32>
    %600 = vector.broadcast %599 : vector<1x128xf32> to vector<128x128xf32>
    %601 = arith.addf %598, %600 : vector<128x128xf32>
    %602 = vector.shape_cast %601 : vector<128x128xf32> to vector<8x16x128xf32>
    %c0_170 = arith.constant 0 : index
    %c0_171 = arith.constant 0 : index
    %c0_172 = arith.constant 0 : index
    %603 = vector.load %arg8[%c0_170, %c0_171, %c0_172] : memref<8x16x128xf32, #tpu.memory_space<vmem>>, vector<8x16x128xf32>
    tpu.vector_store %arg8[%c0_170, %c0_171, %c0_172], %602 {strides = array<i32>} : memref<8x16x128xf32, #tpu.memory_space<vmem>>, vector<8x16x128xf32>,
    return
  }
  func.func @transform_0(%arg0: i32) -> (i32, i32, i32) {
    %c0_i32 = arith.constant 0 : i32
    %c0_i32_0 = arith.constant 0 : i32
    %c0_i32_1 = arith.constant 0 : i32
    return %c0_i32, %arg0, %c0_i32_0 : i32, i32, i32
  }
  func.func @transform_1(%arg0: i32) -> (i32, i32) {
    %c0_i32 = arith.constant 0 : i32
    %c0_i32_0 = arith.constant 0 : i32
    %c0_i32_1 = arith.constant 0 : i32
    return %c0_i32, %c0_i32_0 : i32, i32
  }
  func.func @transform_2(%arg0: i32) -> (i32, i32) {
    %c0_i32 = arith.constant 0 : i32
    %c0_i32_0 = arith.constant 0 : i32
    %c0_i32_1 = arith.constant 0 : i32
    return %c0_i32, %c0_i32_0 : i32, i32
  }
  func.func @transform_3(%arg0: i32) -> (i32, i32) {
    %c0_i32 = arith.constant 0 : i32
    %c0_i32_0 = arith.constant 0 : i32
    %c0_i32_1 = arith.constant 0 : i32
    return %c0_i32, %c0_i32_0 : i32, i32
  }
  func.func @transform_4(%arg0: i32) -> (i32, i32) {
    %c0_i32 = arith.constant 0 : i32
    %c0_i32_0 = arith.constant 0 : i32
    %c0_i32_1 = arith.constant 0 : i32
    return %c0_i32, %c0_i32_0 : i32, i32
  }
  func.func @transform_5(%arg0: i32) -> (i32, i32) {
    %c0_i32 = arith.constant 0 : i32
    %c0_i32_0 = arith.constant 0 : i32
    %c0_i32_1 = arith.constant 0 : i32
    return %c0_i32, %c0_i32_0 : i32, i32
  }
  func.func @transform_6(%arg0: i32) -> (i32, i32) {
    %c0_i32 = arith.constant 0 : i32
    %c0_i32_0 = arith.constant 0 : i32
    %c0_i32_1 = arith.constant 0 : i32
    return %c0_i32, %c0_i32_0 : i32, i32
  }
  func.func @transform_7(%arg0: i32) -> (i32, i32, i32) {
    %c0_i32 = arith.constant 0 : i32
    %c0_i32_0 = arith.constant 0 : i32
    %c0_i32_1 = arith.constant 0 : i32
    return %c0_i32, %arg0, %c0_i32_0 : i32, i32, i32
  }
}

</mosaic_0001>

<bundles_post_ra>
// kernel: tpu_custom_call.1
= control target key start
LH: loop header
LB: loop body
LE: loop exit
PB: predicated region body
PF: predicated region fallthrough
CT: control target
= control target key end

     0   :  { %12 = vsyncpa [#allocation6], 0  ;;  %s15041_s0 = inlined_call_operand.hbm [shape: bf16[8,16,57], index: 0, kind: input, shape index: {}]   ;;  %s15042_s1 = inlined_call_operand.hbm [shape: bf16[57,1024], index: 1, kind: input, shape index: {}]   ;;  %s15043_s2 = inlined_call_operand.hbm [shape: bf16[128,512], index: 2, kind: input, shape index: {}]   ;;  %s15044_s3 = inlined_call_operand.hbm [shape: bf16[128,512], index: 3, kind: input, shape index: {}]   ;;  %s15045_s4 = inlined_call_operand.hbm [shape: bf16[128,128], index: 4, kind: input, shape index: {}]   ;;  %s15046_s5 = inlined_call_operand.hbm [shape: bf16[128,128], index: 5, kind: input, shape index: {}]   ;;  %s15047_s6 = inlined_call_operand.vmem [shape: f32[1,128], index: 6, kind: input, shape index: {}]   ;;  %s15048_s7 = inlined_call_operand.hbm [shape: f32[8,16,128], index: 7, kind: output, shape index: {}]  }
   0x1   :  { %13 = vsyncpa [#allocation9], 0 }
   0x2   :  { %14 = vsyncpa [#allocation12], 0 }
   0x3   :  { %15 = vsyncpa [#allocation15], 0  ;;  %s34_s26 = sshll.u32 %s15042_s1, 4  ;;  %s35_s26 = int_to_ptr.hbm [resolvable:$true] %s34_s26 }
   0x4   :  { %16 = vsyncpa [#allocation7], 0  ;;  %s11720_s27 = smov [#allocation8]   ;;  %s11721_s29 = smov 512  }
   0x5   :  { %s36_s28 = sshll.u32 %s11720_s27, 4  ;;  %s11722_s30 = smov 32   ;;  %s37_s28 = int_to_ptr.vmem [resolvable:$true] %s36_s28 }
   0x6   :  { %42 = dma.hbm_to_vmem [thread:$0]  %s35_s26, 4096, %s37_s28, [#allocation9], %s11721_s29, %s11721_s29, %s11722_s30  }
   0x7   :  { %s60_s10 = sshll.u32 %s15044_s3, 4  ;;  %s11723_s11 = smov [#allocation11]   ;;  %s61_s10 = int_to_ptr.hbm [resolvable:$true] %s60_s10 }
   0x8   :  { %s62_s12 = sshll.u32 %s11723_s11, 4  ;;  %s21_s15 = sshll.u32 %s15041_s0, 4  ;;  %s63_s12 = int_to_ptr.vmem [resolvable:$true] %s62_s12  ;;  %s22_s15 = int_to_ptr.hbm [resolvable:$true] %s21_s15 }
   0x9   :  { %s11724_s1 = smov 256   ;;  %s11725_s16 = smov 16  }
   0xa   :  { %68 = dma.hbm_to_vmem [thread:$0]  %s61_s10, 4096, %s63_s12, [#allocation12], %s11724_s1, %s11724_s1, %s11725_s16  }
   0xb   :  { %s11726_s17 = smov [#allocation5]   ;;  %s47_s21 = sshll.u32 %s15043_s2, 4  ;;  %s48_s21 = int_to_ptr.hbm [resolvable:$true] %s47_s21 }
   0xc   :  { %s23_s18 = sshll.u32 %s11726_s17, 4  ;;  %s11727_s3 = smov 64   ;;  %s24_s18 = int_to_ptr.vmem [resolvable:$true] %s23_s18 }
   0xd   :  { %s11728_s22 = smov 4   ;;  %s11729_s23 = smov [#allocation10]  }
   0xe   :  { %29 = dma.hbm_to_vmem [thread:$0]  %s22_s15, 1024, %s24_s18, [#allocation6], %s11727_s3, %s11727_s3, %s11728_s22  }
   0xf   :  { %s49_s24 = sshll.u32 %s11729_s23, 4  ;;  %s73_s26 = sshll.u32 %s15045_s4, 4  ;;  %s50_s24 = int_to_ptr.vmem [resolvable:$true] %s49_s24  ;;  %s74_s26 = int_to_ptr.hbm [resolvable:$true] %s73_s26 }
  0x10   :  { %55 = dma.hbm_to_vmem [thread:$0]  %s48_s21, 4096, %s50_s24, [#allocation9], %s11724_s1, %s11724_s1, %s11725_s16  }
  0x11   :  { %s86_s29 = sshll.u32 %s15046_s5, 4  ;;  %s11730_s30 = smov [#allocation13]   ;;  %s87_s29 = int_to_ptr.hbm [resolvable:$true] %s86_s29 }
  0x12   :  { %s75_s8 = sshll.u32 %s11730_s30, 4  ;;  %s11731_s2 = smov [#allocation14]   ;;  %s76_s8 = int_to_ptr.vmem [resolvable:$true] %s75_s8 }
  0x13   :  { %81 = dma.hbm_to_vmem [thread:$0]  %s74_s26, 1024, %s76_s8, [#allocation12], %s11727_s3, %s11727_s3, %s11728_s22  }
  0x14   :  { %s88_s9 = sshll.u32 %s11731_s2, 4  ;;  %s89_s9 = int_to_ptr.vmem [resolvable:$true] %s88_s9 }
  0x15   :  { %94 = dma.hbm_to_vmem [thread:$0]  %s87_s29, 1024, %s89_s9, [#allocation15], %s11727_s3, %s11727_s3, %s11728_s22  }
  0x16   :  { %11710 = dma.done.wait [#allocation6], 1024  }
  0x17   :  { %11711 = vsyncadd [#allocation6], 4294966272 }
  0x18   :  { %11712 = dma.done.wait [#allocation9], 8192  }
  0x19   :  { %11713 = vsyncadd [#allocation9], 4294959104 }
  0x1a   :  { %11714 = dma.done.wait [#allocation12], 5120  }
  0x1b   :  { %11715 = vsyncadd [#allocation12], 4294962176 }
  0x1c   :  { %11716 = dma.done.wait [#allocation15], 1024  }
  0x1d   :  { %11717 = vsyncadd [#allocation15], 4294966272  ;;  %vm387_vm0 = vcmask 1043456   ;;  %vm388_vm1 = vcmask 1044480   ;;  %v11732_v0 = vmov 65535   ;;  %v11799_v35 = vld [vmem:[#allocation5] sm:$0xff] }
  0x1e   :  { %v389_v1 = vsel %vm387_vm0, 4294967295, %v11732_v0  ;;  %v7974_v3 = vld [vmem:[#allocation8 + $0xc0] sm:$0xf]  ;;  %v10372_v5 = vld [vmem:[#allocation8 + $0xc4] sm:$0xf]  ;;  %vm362_vm2 = vcmask 465920  }
  0x1f   :  { %v11795_v2 = vsel %vm388_vm1, %v389_v1, 0  ;;  %v10376_v4 = vld [vmem:[#allocation8 + $0xdc] sm:$0x10]  ;;  %v7976_v7 = vld [vmem:[#allocation8 + $0xe0] sm:$0x10]  ;;  %v11813_v51 = vld [vmem:[#allocation5 + $0x8] sm:$0xff] }
  0x20   :  { %v7975_v6 = vor.u32 %v10376_v4, %v7974_v3  ;;  %v7979_v8 = vor.u32 %v10372_v5, %v7976_v7  ;;  %v7942_v9 = vld [vmem:[#allocation8 + $0x80] sm:$0xf]  ;;  %v10364_v12 = vld [vmem:[#allocation8 + $0x84] sm:$0xf]  ;;  %v10373_v21 = vld [vmem:[#allocation8 + $0xcc] sm:$0xf] }
  0x21   :  { %v10368_v10 = vld [vmem:[#allocation8 + $0x9c] sm:$0xf0]  ;;  %v7944_v13 = vld [vmem:[#allocation8 + $0xa0] sm:$0xf0]  ;;  %v7984_v22 = vld [vmem:[#allocation8 + $0xe8] sm:$0x10] }
  0x22   :  { %v392_v11 = vand.u32 %v7975_v6, %v11795_v2  ;;  %v395_v14 = vand.u32 %v7979_v8, %v11795_v2  ;;  %v7943_v15 = vor.u32 %v10368_v10, %v7942_v9  ;;  %v7947_v16 = vor.u32 %v10364_v12, %v7944_v13  ;;  %v7910_v17 = vld [vmem:[#allocation8 + $0x40] sm:$0xf]  ;;  %v10356_v19 = vld [vmem:[#allocation8 + $0x44] sm:$0xf]  ;;  %v7982_v23 = vld [vmem:[#allocation8 + $0xc8] sm:$0xf] }
  0x23   :  { %v10360_v18 = vld [vmem:[#allocation8 + $0x5c] sm:$0xf0]  ;;  %v7912_v20 = vld [vmem:[#allocation8 + $0x60] sm:$0xf0]  ;;  %v10377_v24 = vld [vmem:[#allocation8 + $0xe4] sm:$0x10]  ;;  %v7987_v31 = vor.u32 %v10373_v21, %v7984_v22 }
  0x24   :  { %419 = vmatpush.bf16.msra.mxu0 %v392_v11  ;;  %11004 = vmatpush.bf16.msra.mxu2 %v392_v11  ;;  %v7911_v25 = vor.u32 %v10360_v18, %v7910_v17  ;;  %v7915_v26 = vor.u32 %v10356_v19, %v7912_v20  ;;  %v7878_v27 = vld [vmem:[#allocation8] sm:$0xf]  ;;  %v10348_v29 = vld [vmem:[#allocation8 + $0x4] sm:$0xf]  ;;  %v7983_v32 = vor.u32 %v10377_v24, %v7982_v23  ;;  %v10365_v39 = vld [vmem:[#allocation8 + $0x8c] sm:$0xf] }
  0x25   :  { %468 = vmatpush.bf16.msra.mxu1 %v395_v14  ;;  %11008 = vmatpush.bf16.msra.mxu3 %v395_v14  ;;  %v10352_v28 = vld [vmem:[#allocation8 + $0x1c] sm:$0xf0]  ;;  %v7880_v30 = vld [vmem:[#allocation8 + $0x20] sm:$0xf0]  ;;  %v401_v37 = vand.u32 %v7987_v31, %v11795_v2  ;;  %v7952_v40 = vld [vmem:[#allocation8 + $0xa8] sm:$0xf0] }
  0x26   :  { %v7879_v33 = vor.u32 %v10352_v28, %v7878_v27  ;;  %v7883_v34 = vor.u32 %v10348_v29, %v7880_v30  ;;  %v11801_v36 = vld [vmem:[#allocation5 + $0x20] sm:$0xff]  ;;  %v398_v38 = vand.u32 %v7983_v32, %v11795_v2  ;;  %v7950_v41 = vld [vmem:[#allocation8 + $0x88] sm:$0xf]  ;;  %v7955_v43 = vor.u32 %v10365_v39, %v7952_v40  ;;  %v10357_v45 = vld [vmem:[#allocation8 + $0x4c] sm:$0xf]  ;;  %s7821_s13 = sshll.u32 %s15048_s7, 4  ;;  %s7822_s13 = int_to_ptr.hbm [resolvable:$true] %s7821_s13 }
  0x27   :  { %v10369_v42 = vld [vmem:[#allocation8 + $0xa4] sm:$0xf0]  ;;  %v7920_v46 = vld [vmem:[#allocation8 + $0x68] sm:$0xf0]  ;;  %v7990_v53 = vld [vmem:[#allocation8 + $0xd0] sm:$0xf] }
  0x28   :  { %420 = vmatpush.bf16.msra.mxu0 %v7943_v15  ;;  %11005 = vmatpush.bf16.msra.mxu2 %v7943_v15  ;;  %v7951_v44 = vor.u32 %v10369_v42, %v7950_v41  ;;  %v7918_v47 = vld [vmem:[#allocation8 + $0x48] sm:$0xf]  ;;  %v7923_v49 = vor.u32 %v10357_v45, %v7920_v46  ;;  %v10378_v54 = vld [vmem:[#allocation8 + $0xec] sm:$0x10]  ;;  %v10374_v55 = vld [vmem:[#allocation8 + $0xd4] sm:$0xf] }
  0x29   :  { %469 = vmatpush.bf16.msra.mxu1 %v7947_v16  ;;  %11009 = vmatpush.bf16.msra.mxu3 %v7947_v16  ;;  %v10361_v48 = vld [vmem:[#allocation8 + $0x64] sm:$0xf0]  ;;  %v7991_v56 = vor.u32 %v10378_v54, %v7990_v53  ;;  %v7992_v57 = vld [vmem:[#allocation8 + $0xf0] sm:$0x10]  ;;  %v10349_v60 = vld [vmem:[#allocation8 + $0xc] sm:$0xf] }
  0x2a   :  { %v7919_v50 = vor.u32 %v10361_v48, %v7918_v47  ;;  %v11815_v52 = vld [vmem:[#allocation5 + $0x28] sm:$0xff]  ;;  %v7995_v58 = vor.u32 %v10374_v55, %v7992_v57  ;;  %v7958_v63 = vld [vmem:[#allocation8 + $0x90] sm:$0xf]  ;;  %v10366_v3 = vld [vmem:[#allocation8 + $0x94] sm:$0xf]  ;;  %s11735_s14 = smov 128  }
  0x2b   :  { %v404_v59 = vand.u32 %v7991_v56, %v11795_v2  ;;  %v7888_v61 = vld [vmem:[#allocation8 + $0x28] sm:$0xf0]  ;;  %v10370_v1 = vld [vmem:[#allocation8 + $0xac] sm:$0xf0]  ;;  %v7960_v4 = vld [vmem:[#allocation8 + $0xb0] sm:$0xf0] }
  0x2c   :  { %421 = vmatpush.bf16.msra.mxu0 %v7911_v25  ;;  %11006 = vmatpush.bf16.msra.mxu2 %v7911_v25  ;;  %v407_v62 = vand.u32 %v7995_v58, %v11795_v2  ;;  %v7891_v0 = vor.u32 %v10349_v60, %v7888_v61  ;;  %v7959_v5 = vor.u32 %v10370_v1, %v7958_v63  ;;  %v7926_v7 = vld [vmem:[#allocation8 + $0x50] sm:$0xf]  ;;  %v10358_v9 = vld [vmem:[#allocation8 + $0x54] sm:$0xf]  ;;  %v7886_v11 = vld [vmem:[#allocation8 + $0x8] sm:$0xf] }
  0x2d   :  { %470 = vmatpush.bf16.msra.mxu1 %v7915_v26  ;;  %11010 = vmatpush.bf16.msra.mxu3 %v7915_v26  ;;  %v7963_v6 = vor.u32 %v10366_v3, %v7960_v4  ;;  %v10362_v8 = vld [vmem:[#allocation8 + $0x6c] sm:$0xf0]  ;;  %v7928_v10 = vld [vmem:[#allocation8 + $0x70] sm:$0xf0]  ;;  %v10353_v12 = vld [vmem:[#allocation8 + $0x24] sm:$0xf0] }
  0x2e   :  { %v7887_v13 = vor.u32 %v10353_v12, %v7886_v11  ;;  %v7927_v14 = vor.u32 %v10362_v8, %v7926_v7  ;;  %v7931_v15 = vor.u32 %v10358_v9, %v7928_v10  ;;  %v7894_v16 = vld [vmem:[#allocation8 + $0x10] sm:$0xf]  ;;  %v10350_v18 = vld [vmem:[#allocation8 + $0x14] sm:$0xf]  ;;  %v10375_v24 = vld [vmem:[#allocation8 + $0xdc] sm:$0xf] }
  0x2f   :  { %v10354_v17 = vld [vmem:[#allocation8 + $0x2c] sm:$0xf0]  ;;  %v7896_v19 = vld [vmem:[#allocation8 + $0x30] sm:$0xf0]  ;;  %v8000_v25 = vld [vmem:[#allocation8 + $0xf8] sm:$0x10] }
  0x30   :  { %422 = vmatpush.bf16.msra.mxu0 %v7879_v33  ;;  %11007 = vmatpush.bf16.msra.mxu2 %v7879_v33  ;;  %v7895_v20 = vor.u32 %v10354_v17, %v7894_v16  ;;  %v7899_v21 = vor.u32 %v10350_v18, %v7896_v19  ;;  %v11827_v22 = vld [vmem:[#allocation5 + $0x10] sm:$0xff]  ;;  %v7998_v26 = vld [vmem:[#allocation8 + $0xd8] sm:$0xf]  ;;  %v8003_v27 = vor.u32 %v10375_v24, %v8000_v25  ;;  %v10359_v41 = vld [vmem:[#allocation8 + $0x5c] sm:$0xf]  ;;  %s11736_s15 = smov 8  }
  0x31   :  { %471 = vmatpush.bf16.msra.mxu1 %v7883_v34  ;;  %11011 = vmatpush.bf16.msra.mxu3 %v7883_v34  ;;  %v11829_v23 = vld [vmem:[#allocation5 + $0x30] sm:$0xff]  ;;  %v10379_v28 = vld [vmem:[#allocation8 + $0xf4] sm:$0x10]  ;;  %v7968_v34 = vld [vmem:[#allocation8 + $0xb8] sm:$0xf0] }
  0x32   :  { %v7999_v29 = vor.u32 %v10379_v28, %v7998_v26  ;;  %v413_v30 = vand.u32 %v8003_v27, %v11795_v2  ;;  %v11841_v32 = vld [vmem:[#allocation5 + $0x18] sm:$0xff]  ;;  %v10410_v53 = vld [vmem:[#allocation10 + $0xec] sm:$0xf0]  ;;  %v10408_v54 = vld [vmem:[#allocation10 + $0xe4] sm:$0xf] }
  0x33   :  { %8004 = vmatmul.msk.bf16.vlgmr.msra.gmra.mxu0 %vm362_vm2, %v11799_v35  ;;  %8008 = vmatmul.msk.bf16.vlgmr.msra.gmra.mxu2 %vm362_vm2, %v11801_v36  ;;  %v11843_v33 = vld [vmem:[#allocation5 + $0x38] sm:$0xff]  ;;  %v8184_v56 = vld [vmem:[#allocation10 + $0xf0] sm:$0xf0]  ;;  %v10406_v63 = vld [vmem:[#allocation10 + $0xcc] sm:$0xf0] }
  0x34   :  { %517 = vmatpush.bf16.msrb.mxu2 %v398_v38  ;;  %8012 = vmatmul.msk.bf16.vlgmr.msra.gmra.mxu1 %vm362_vm2, %v11799_v35  ;;  %v410_v31 = vand.u32 %v7999_v29, %v11795_v2  ;;  %v10367_v2 = vld [vmem:[#allocation8 + $0x9c] sm:$0xf]  ;;  %v10371_v39 = vld [vmem:[#allocation8 + $0xb4] sm:$0xf0]  ;;  %v8168_v4 = vld [vmem:[#allocation10 + $0xd0] sm:$0xf0] }
  0x35   :  { %566 = vmatpush.bf16.msrb.mxu3 %v401_v37  ;;  %615 = vmatpush.bf16.msrb.mxu0 %v404_v59  ;;  %v7966_v37 = vld [vmem:[#allocation8 + $0x98] sm:$0xf]  ;;  %v7971_v38 = vor.u32 %v10367_v2, %v7968_v34  ;;  %v7936_v42 = vld [vmem:[#allocation8 + $0x78] sm:$0xf0]  ;;  %v8187_v59 = vor.u32 %v10408_v54, %v8184_v56  ;;  %v8150_v10 = vld [vmem:[#allocation10 + $0xa0] sm:$0xf] }
  0x36   :  { %8016 = vmatmul.msk.bf16.vlgmr.msra.gmra.mxu3 %vm362_vm2, %v11801_v36  ;;  %664 = vmatpush.bf16.msrb.mxu1 %v407_v62  ;;  %v7967_v40 = vor.u32 %v10371_v39, %v7966_v37  ;;  %v10363_v45 = vld [vmem:[#allocation8 + $0x74] sm:$0xf0]  ;;  %v10351_v57 = vld [vmem:[#allocation8 + $0x1c] sm:$0xf]  ;;  %v8166_v62 = vld [vmem:[#allocation10 + $0xc0] sm:$0xf] }
  0x37   :  { %v7904_v58 = vld [vmem:[#allocation8 + $0x38] sm:$0xf0]  ;;  %v8167_v3 = vor.u32 %v10406_v63, %v8166_v62  ;;  %v10402_v11 = vld [vmem:[#allocation10 + $0xac] sm:$0xf0]  ;;  %v10400_v12 = vld [vmem:[#allocation10 + $0xa4] sm:$0xf] }
  0x38   :  { %518 = vmatpush.bf16.msrb.mxu2 %v7951_v44  ;;  %v7934_v44 = vld [vmem:[#allocation8 + $0x58] sm:$0xf]  ;;  %v7907_v60 = vor.u32 %v10351_v57, %v7904_v58  ;;  %v10396_v24 = vld [vmem:[#allocation10 + $0x84] sm:$0xf]  ;;  %v8136_v27 = vld [vmem:[#allocation10 + $0x90] sm:$0xf0] }
  0x39   :  { %567 = vmatpush.bf16.msrb.mxu3 %v7955_v43  ;;  %616 = vmatpush.bf16.msrb.mxu0 %v7959_v5  ;;  %v7939_v43 = vor.u32 %v10359_v41, %v7936_v42  ;;  %v7935_v46 = vor.u32 %v10363_v45, %v7934_v44  ;;  %v10355_v16 = vld [vmem:[#allocation8 + $0x34] sm:$0xf0]  ;;  %v8118_v34 = vld [vmem:[#allocation10 + $0x60] sm:$0xf]  ;;  %v10394_v37 = vld [vmem:[#allocation10 + $0x6c] sm:$0xf0] }
  0x3a   :  { %665 = vmatpush.bf16.msrb.mxu1 %v7963_v6  ;;  %v8119_v39 = vor.u32 %v10394_v37, %v8118_v34  ;;  %v10390_v44 = vld [vmem:[#allocation10 + $0x4c] sm:$0xf0]  ;;  %v10388_v45 = vld [vmem:[#allocation10 + $0x44] sm:$0xf]  ;;  %v8086_v56 = vld [vmem:[#allocation10 + $0x20] sm:$0xf] }
  0x3b   :  { %v10386_v57 = vld [vmem:[#allocation10 + $0x2c] sm:$0xf0]  ;;  %v10384_v58 = vld [vmem:[#allocation10 + $0x24] sm:$0xf]  ;;  %v8070_v63 = vld [vmem:[#allocation10] sm:$0xf] }
  0x3c   :  { %519 = vmatpush.bf16.msrb.mxu2 %v7919_v50  ;;  %v8182_v50 = vld [vmem:[#allocation10 + $0xe0] sm:$0xf]  ;;  %v10405_v37 = vld [vmem:[#allocation10 + $0xcc] sm:$0xf] }
  0x3d   :  { %568 = vmatpush.bf16.msrb.mxu3 %v7923_v49  ;;  %617 = vmatpush.bf16.msrb.mxu0 %v7927_v14  ;;  %v8183_v55 = vor.u32 %v10410_v53, %v8182_v50  ;;  %v8152_v14 = vld [vmem:[#allocation10 + $0xb0] sm:$0xf0] }
  0x3e   :  { %666 = vmatpush.bf16.msrb.mxu1 %v7931_v15  ;;  %v7902_v15 = vld [vmem:[#allocation8 + $0x18] sm:$0xf]  ;;  %v8155_v17 = vor.u32 %v10400_v12, %v8152_v14  ;;  %v8192_v14 = vld [vmem:[#allocation10 + $0xf8] sm:$0xf0] }
  0x3f   :  { %v7903_v18 = vor.u32 %v10355_v16, %v7902_v15 }
  0x40   :  { %520 = vmatpush.bf16.msrb.mxu2 %v7887_v13  ;;  %v8151_v13 = vor.u32 %v10402_v11, %v8150_v10 }
  0x41   :  { %569 = vmatpush.bf16.msrb.mxu3 %v7891_v0  ;;  %618 = vmatpush.bf16.msrb.mxu0 %v7895_v20  ;;  %v10404_v0 = vld [vmem:[#allocation10 + $0xc4] sm:$0xf]  ;;  %v8134_v20 = vld [vmem:[#allocation10 + $0x80] sm:$0xf] }
  0x42   :  { %667 = vmatpush.bf16.msrb.mxu1 %v7899_v21  ;;  %v8171_v7 = vor.u32 %v10404_v0, %v8168_v4  ;;  %v10398_v21 = vld [vmem:[#allocation10 + $0x8c] sm:$0xf0] }
  0x43   :  { %8005 = vmatmul.msk.bf16.gmra.mxu0 %vm362_vm2, %v11813_v51  ;;  %8009 = vmatmul.msk.bf16.gmra.mxu2 %vm362_vm2, %v11815_v52  ;;  %v8135_v26 = vor.u32 %v10398_v21, %v8134_v20  ;;  %v10382_v0 = vld [vmem:[#allocation10 + $0xc] sm:$0xf0]  ;;  %v8190_v21 = vld [vmem:[#allocation10 + $0xe8] sm:$0xf] }
  0x44   :  { %8013 = vmatmul.msk.bf16.gmra.mxu1 %vm362_vm2, %v11813_v51  ;;  %713 = vmatpush.bf16.msra.mxu2 %v410_v31  ;;  %v8071_v4 = vor.u32 %v10382_v0, %v8070_v63 }
  0x45   :  { %762 = vmatpush.bf16.msra.mxu3 %v413_v30  ;;  %1157 = vmatpush.bf16.msra.mxu0 %v8183_v55  ;;  %v8139_v30 = vor.u32 %v10396_v24, %v8136_v27  ;;  %v10411_v24 = vld [vmem:[#allocation10 + $0xf4] sm:$0xf0] }
  0x46   :  { %8017 = vmatmul.msk.bf16.gmra.mxu3 %vm362_vm2, %v11815_v52  ;;  %1171 = vmatpush.bf16.msra.mxu1 %v8187_v59  ;;  %v8087_v59 = vor.u32 %v10386_v57, %v8086_v56 }
  0x48   :  { %714 = vmatpush.bf16.msra.mxu2 %v7967_v40  ;;  %v8120_v40 = vld [vmem:[#allocation10 + $0x70] sm:$0xf0] }
  0x49   :  { %763 = vmatpush.bf16.msra.mxu3 %v7971_v38  ;;  %1158 = vmatpush.bf16.msra.mxu0 %v8167_v3  ;;  %v10392_v38 = vld [vmem:[#allocation10 + $0x64] sm:$0xf] }
  0x4a   :  { %1172 = vmatpush.bf16.msra.mxu1 %v8171_v7  ;;  %v8123_v41 = vor.u32 %v10392_v38, %v8120_v40  ;;  %v8176_v38 = vld [vmem:[#allocation10 + $0xd8] sm:$0xf0] }
  0x4c   :  { %715 = vmatpush.bf16.msra.mxu2 %v7935_v46 }
  0x4d   :  { %764 = vmatpush.bf16.msra.mxu3 %v7939_v43  ;;  %1159 = vmatpush.bf16.msra.mxu0 %v8151_v13  ;;  %v8102_v43 = vld [vmem:[#allocation10 + $0x40] sm:$0xf]  ;;  %v10409_v13 = vld [vmem:[#allocation10 + $0xec] sm:$0xf] }
  0x4e   :  { %1173 = vmatpush.bf16.msra.mxu1 %v8155_v17  ;;  %v8195_v15 = vor.u32 %v10409_v13, %v8192_v14 }
  0x50   :  { %716 = vmatpush.bf16.msra.mxu2 %v7903_v18 }
  0x51   :  { %765 = vmatpush.bf16.msra.mxu3 %v7907_v60  ;;  %1160 = vmatpush.bf16.msra.mxu0 %v8135_v26  ;;  %v8088_v60 = vld [vmem:[#allocation10 + $0x30] sm:$0xf0] }
  0x52   :  { %1174 = vmatpush.bf16.msra.mxu1 %v8139_v30 }
  0x53   :  { %8006 = vmatmul.msk.bf16.gmra.mxu0 %vm362_vm2, %v11827_v22  ;;  %8010 = vmatmul.msk.bf16.gmra.mxu2 %vm362_vm2, %v11829_v23 }
  0x54   :  { %8014 = vmatmul.msk.bf16.gmra.mxu1 %vm362_vm2, %v11827_v22 }
  0x55   :  { %1161 = vmatpush.bf16.msra.mxu0 %v8119_v39  ;;  %v8179_v39 = vor.u32 %v10405_v37, %v8176_v38  ;;  %v8142_v38 = vld [vmem:[#allocation10 + $0x88] sm:$0xf] }
  0x56   :  { %8018 = vmatmul.msk.bf16.gmra.mxu3 %vm362_vm2, %v11829_v23  ;;  %1175 = vmatpush.bf16.msra.mxu1 %v8123_v41 }
  0x63   :  { %8007 = vmatmul.msk.bf16.gmra.mxu0 %vm362_vm2, %v11841_v32  ;;  %8011 = vmatmul.msk.bf16.gmra.mxu2 %vm362_vm2, %v11843_v33 }
  0x64   :  { %8015 = vmatmul.msk.bf16.gmra.mxu1 %vm362_vm2, %v11841_v32 }
  0x66   :  { %8019 = vmatmul.msk.bf16.gmra.mxu3 %vm362_vm2, %v11843_v33 }
  0x73   :  { %8020 = vmatmul.msk.bf16.vlgmr.msrb.gmra.mxu2 %vm362_vm2, %v11799_v35  ;;  %8036 = vmatmul.msk.bf16.vlgmr.msrb.gmra.mxu0 %vm362_vm2, %v11799_v35 }
  0x74   :  { %8044 = vmatmul.msk.bf16.vlgmr.msrb.gmra.mxu1 %vm362_vm2, %v11799_v35 }
  0x76   :  { %8028 = vmatmul.msk.bf16.vlgmr.msrb.gmra.mxu3 %vm362_vm2, %v11799_v35 }
  0x77   :  { %1199 = vmatpush.bf16.msrb.mxu3 %v8195_v15 }
  0x7b   :  { %1200 = vmatpush.bf16.msrb.mxu3 %v8179_v39  ;;  %v10399_v39 = vld [vmem:[#allocation10 + $0x94] sm:$0xf0] }
  0x83   :  { %8021 = vmatmul.msk.bf16.gmra.mxu2 %vm362_vm2, %v11813_v51  ;;  %8037 = vmatmul.msk.bf16.gmra.mxu0 %vm362_vm2, %v11813_v51 }
  0x84   :  { %8045 = vmatmul.msk.bf16.gmra.mxu1 %vm362_vm2, %v11813_v51 }
  0x86   :  { %8029 = vmatmul.msk.bf16.gmra.mxu3 %vm362_vm2, %v11813_v51 }
  0x93   :  { %8022 = vmatmul.msk.bf16.gmra.mxu2 %vm362_vm2, %v11827_v22  ;;  %8038 = vmatmul.msk.bf16.gmra.mxu0 %vm362_vm2, %v11827_v22 }
  0x94   :  { %8046 = vmatmul.msk.bf16.gmra.mxu1 %vm362_vm2, %v11827_v22 }
  0x96   :  { %8030 = vmatmul.msk.bf16.gmra.mxu3 %vm362_vm2, %v11827_v22 }
  0xa3   :  { %8023 = vmatmul.msk.bf16.gmra.mxu2 %vm362_vm2, %v11841_v32  ;;  %8039 = vmatmul.msk.bf16.gmra.mxu0 %vm362_vm2, %v11841_v32 }
  0xa4   :  { %8047 = vmatmul.msk.bf16.gmra.mxu1 %vm362_vm2, %v11841_v32 }
  0xa6   :  { %8031 = vmatmul.msk.bf16.gmra.mxu3 %vm362_vm2, %v11841_v32 }
  0xb0   :  { %v424_v47 = vpop.f32.mrf.mxu0 }
  0xb1   :  { %v473_v48 = vpop.f32.mrf.mxu1 }
  0xb2   :  { %v11885_v49 = vpack.c.bf16 %v473_v48, %v424_v47  ;;  %v8103_v47 = vor.u32 %v10390_v44, %v8102_v43  ;;  %v8104_v48 = vld [vmem:[#allocation10 + $0x50] sm:$0xf0] }
  0xb3   :  { %8024 = vmatmul.msk.bf16.gmra.mxu2 %vm362_vm2, %v11801_v36  ;;  %8040 = vmatmul.msk.bf16.gmra.mxu0 %vm362_vm2, %v11801_v36  ;;  %v8107_v54 = vor.u32 %v10388_v45, %v8104_v48  ;;  %v8174_v45 = vld [vmem:[#allocation10 + $0xc8] sm:$0xf] }
  0xb4   :  { %8048 = vmatmul.msk.bf16.gmra.mxu1 %vm362_vm2, %v11801_v36  ;;  %1162 = vmatpush.bf16.msra.mxu0 %v8103_v47 }
  0xb5   :  { %1176 = vmatpush.bf16.msra.mxu1 %v8107_v54 }
  0xb6   :  { %8032 = vmatmul.msk.bf16.gmra.mxu3 %vm362_vm2, %v11801_v36  ;;  %v444_v61 = vpop.f32.mrf.mxu2 }
  0xb8   :  { %v426_v6 = vpop.f32.mrf.mxu0  ;;  %1163 = vmatpush.bf16.msra.mxu0 %v8087_v59 }
  0xb9   :  { %v493_v1 = vpop.f32.mrf.mxu3  ;;  %v475_v8 = vpop.f32.mrf.mxu1 }
  0xba   :  { %v11895_v5 = vpack.c.bf16 %v493_v1, %v444_v61  ;;  %v11897_v9 = vpack.c.bf16 %v475_v8, %v426_v6  ;;  %v8091_v61 = vor.u32 %v10384_v58, %v8088_v60  ;;  %v10380_v1 = vld [vmem:[#allocation10 + $0x4] sm:$0xf]  ;;  %v8072_v6 = vld [vmem:[#allocation10 + $0x10] sm:$0xf0]  ;;  %v15049_v60 = vmov 0  }
  0xbb   :  { %v8075_v10 = vor.u32 %v10380_v1, %v8072_v6 }
  0xbc   :  { %15081 = vst [vmem:[#allocation22_spill] sm:$0xff] %v11895_v5  ;;  %1177 = vmatpush.bf16.msra.mxu1 %v8091_v61  ;;  %1164 = vmatpush.bf16.msra.mxu0 %v8071_v4  ;;  %v10401_v61 = vld [vmem:[#allocation10 + $0xac] sm:$0xf] }
  0xbe   :  { %v446_v19 = vpop.f32.mrf.mxu2 }
  0xc0   :  { %v429_v29 = vpop.f32.mrf.mxu0  ;;  %1178 = vmatpush.bf16.msra.mxu1 %v8075_v10  ;;  %v10403_v10 = vld [vmem:[#allocation10 + $0xb4] sm:$0xf0] }
  0xc1   :  { %v495_v25 = vpop.f32.mrf.mxu3  ;;  %v478_v31 = vpop.f32.mrf.mxu1 }
  0xc2   :  { %v11899_v28 = vpack.c.bf16 %v495_v25, %v446_v19  ;;  %v11901_v2 = vpack.c.bf16 %v478_v31, %v429_v29  ;;  %v8191_v25 = vor.u32 %v10411_v24, %v8190_v21  ;;  %v10397_v21 = vld [vmem:[#allocation10 + $0x8c] sm:$0xf]  ;;  %v8144_v24 = vld [vmem:[#allocation10 + $0x98] sm:$0xf0] }
  0xc3   :  { %8025 = vmatmul.msk.bf16.gmra.mxu2 %vm362_vm2, %v11815_v52  ;;  %8041 = vmatmul.msk.bf16.gmra.mxu0 %vm362_vm2, %v11815_v52 }
  0xc4   :  { %15082 = vst [vmem:[#allocation23_spill] sm:$0xff] %v11899_v28  ;;  %8049 = vmatmul.msk.bf16.gmra.mxu1 %vm362_vm2, %v11815_v52  ;;  %1185 = vmatpush.bf16.msrb.mxu2 %v8191_v25  ;;  %v8147_v25 = vor.u32 %v10397_v21, %v8144_v24  ;;  %v10434_v24 = vld [vmem:[#allocation11 + $0xac] sm:$0xf0] }
  0xc6   :  { %8033 = vmatmul.msk.bf16.gmra.mxu3 %vm362_vm2, %v11815_v52  ;;  %v449_v42 = vpop.f32.mrf.mxu2 }
  0xc8   :  { %v11913_v53 = vpop.f32.mrf.mxu0 }
  0xc9   :  { %v498_v46 = vpop.f32.mrf.mxu3  ;;  %v11915_v55 = vpop.f32.mrf.mxu1 }
  0xca   :  { %v11911_v50 = vpack.c.bf16 %v498_v46, %v449_v42  ;;  %v10407_v46 = vld [vmem:[#allocation10 + $0xd4] sm:$0xf0] }
  0xcb   :  { %v8175_v47 = vor.u32 %v10407_v46, %v8174_v45  ;;  %v10442_v45 = vld [vmem:[#allocation11 + $0xec] sm:$0xf0]  ;;  %v10440_v46 = vld [vmem:[#allocation11 + $0xe4] sm:$0xf] }
  0xcc   :  { %15083 = vst [vmem:[#allocation24_spill] sm:$0xff] %v11911_v50 }
  0xcd   :  { %1186 = vmatpush.bf16.msrb.mxu2 %v8175_v47  ;;  %v8312_v47 = vld [vmem:[#allocation11 + $0xf0] sm:$0xf0] }
  0xce   :  { %v451_v62 = vpop.f32.mrf.mxu2 }
  0xd0   :  { %v434_v8 = vpop.f32.mrf.mxu0 }
  0xd1   :  { %v500_v3 = vpop.f32.mrf.mxu3  ;;  %v483_v11 = vpop.f32.mrf.mxu1 }
  0xd2   :  { %v11917_v7 = vpack.c.bf16 %v500_v3, %v451_v62  ;;  %v11919_v12 = vpack.c.bf16 %v483_v11, %v434_v8  ;;  %v8160_v62 = vld [vmem:[#allocation10 + $0xb8] sm:$0xf0]  ;;  %v8158_v8 = vld [vmem:[#allocation10 + $0xa8] sm:$0xf] }
  0xd3   :  { %8026 = vmatmul.msk.bf16.gmra.mxu2 %vm362_vm2, %v11829_v23  ;;  %8042 = vmatmul.msk.bf16.gmra.mxu0 %vm362_vm2, %v11829_v23  ;;  %v8163_v63 = vor.u32 %v10401_v61, %v8160_v62  ;;  %v8159_v11 = vor.u32 %v10403_v10, %v8158_v8  ;;  %v8294_v62 = vld [vmem:[#allocation11 + $0xc0] sm:$0xf]  ;;  %v8296_v10 = vld [vmem:[#allocation11 + $0xd0] sm:$0xf0] }
  0xd4   :  { %15084 = vst [vmem:[#allocation25_spill] sm:$0xff] %v11917_v7  ;;  %8050 = vmatmul.msk.bf16.gmra.mxu1 %vm362_vm2, %v11829_v23 }
  0xd5   :  { %1201 = vmatpush.bf16.msrb.mxu3 %v8163_v63  ;;  %1187 = vmatpush.bf16.msrb.mxu2 %v8159_v11  ;;  %v10438_v63 = vld [vmem:[#allocation11 + $0xcc] sm:$0xf0] }
  0xd6   :  { %8034 = vmatmul.msk.bf16.gmra.mxu3 %vm362_vm2, %v11829_v23  ;;  %v454_v16 = vpop.f32.mrf.mxu2  ;;  %v8295_v8 = vor.u32 %v10438_v63, %v8294_v62  ;;  %v10395_v62 = vld [vmem:[#allocation10 + $0x74] sm:$0xf0] }
  0xd8   :  { %v11931_v19 = vpop.f32.mrf.mxu0 }
  0xd9   :  { %v503_v17 = vpop.f32.mrf.mxu3  ;;  %v11933_v20 = vpop.f32.mrf.mxu1  ;;  %1202 = vmatpush.bf16.msrb.mxu3 %v8147_v25  ;;  %v10432_v25 = vld [vmem:[#allocation11 + $0xa4] sm:$0xf] }
  0xda   :  { %v11929_v18 = vpack.c.bf16 %v503_v17, %v454_v16 }
  0xdc   :  { %15085 = vst [vmem:[#allocation26_spill] sm:$0xff] %v11929_v18 }
  0xde   :  { %v456_v26 = vpop.f32.mrf.mxu2 }
  0xe0   :  { %v439_v30 = vpop.f32.mrf.mxu0 }
  0xe1   :  { %v505_v27 = vpop.f32.mrf.mxu3  ;;  %v488_v31 = vpop.f32.mrf.mxu1 }
  0xe2   :  { %v11935_v29 = vpack.c.bf16 %v505_v27, %v456_v26  ;;  %v11937_v34 = vpack.c.bf16 %v488_v31, %v439_v30 }
  0xe3   :  { %8027 = vmatmul.msk.bf16.gmra.mxu2 %vm362_vm2, %v11843_v33  ;;  %8043 = vmatmul.msk.bf16.gmra.mxu0 %vm362_vm2, %v11843_v33 }
  0xe4   :  { %15086 = vst [vmem:[#allocation27_spill] sm:$0xff] %v11935_v29  ;;  %8051 = vmatmul.msk.bf16.gmra.mxu1 %vm362_vm2, %v11843_v33  ;;  %v943_v29 = vunpack.c.h.bf16 %v11885_v49 }
  0xe5   :  { %15087 = vst [vmem:[#allocation28_spill] sm:$0xff] %v11937_v34 }
  0xe6   :  { %8035 = vmatmul.msk.bf16.gmra.mxu3 %vm362_vm2, %v11843_v33  ;;  %v459_v40 = vpop.f32.mrf.mxu2 }
  0xe8   :  { %v11949_v43 = vpop.f32.mrf.mxu0 }
  0xe9   :  { %v508_v41 = vpop.f32.mrf.mxu3  ;;  %15089 = vst [vmem:[#allocation30_spill] sm:$0xff] %v11949_v43  ;;  %v11951_v44 = vpop.f32.mrf.mxu1  ;;  %v8380_v43 = vld [vmem:[#allocation10 + $0x58] sm:$0xf0] }
  0xea   :  { %v11947_v42 = vpack.c.bf16 %v508_v41, %v459_v40  ;;  %15090 = vst [vmem:[#allocation31_spill] sm:$0xff] %v11951_v44  ;;  %v8143_v40 = vor.u32 %v10399_v39, %v8142_v38  ;;  %v8310_v41 = vld [vmem:[#allocation11 + $0xe0] sm:$0xf] }
  0xec   :  { %15088 = vst [vmem:[#allocation29_spill] sm:$0xff] %v11947_v42  ;;  %1188 = vmatpush.bf16.msrb.mxu2 %v8143_v40 }
  0xee   :  { %v461_v48 = vpop.f32.mrf.mxu2 }
  0xf0   :  { %v620_v57 = vpop.f32.mrf.mxu0 }
  0xf1   :  { %v510_v54 = vpop.f32.mrf.mxu3  ;;  %v669_v58 = vpop.f32.mrf.mxu1 }
  0xf2   :  { %v11953_v56 = vpack.c.bf16 %v510_v54, %v461_v48  ;;  %v11955_v59 = vpack.c.bf16 %v669_v58, %v620_v57  ;;  %v8315_v54 = vor.u32 %v10440_v46, %v8312_v47  ;;  %v10430_v46 = vld [vmem:[#allocation11 + $0x8c] sm:$0xf0] }
  0xf3   :  { %8052 = vmatmul.msk.bf16.vlgmr.msra.gmra.mxu2 %vm362_vm2, %v11799_v35  ;;  %1165 = vmatmul.bf16.vlgmr.msra.gmra.mxu0 %v15049_v60 }
  0xf4   :  { %15091 = vst [vmem:[#allocation32_spill] sm:$0xff] %v11953_v56  ;;  %1179 = vmatmul.bf16.vlgmr.msra.gmra.mxu1 %v15049_v60 }
  0xf5   :  { %15092 = vst [vmem:[#allocation33_spill] sm:$0xff] %v11955_v59  ;;  %1427 = vmatpush.bf16.msrb.mxu1 %v8315_v54  ;;  %v8264_v54 = vld [vmem:[#allocation11 + $0x90] sm:$0xf0]  ;;  %v8304_v59 = vld [vmem:[#allocation11 + $0xd8] sm:$0xf0] }
  0xf6   :  { %8060 = vmatmul.msk.bf16.vlgmr.msra.gmra.mxu3 %vm362_vm2, %v11799_v35  ;;  %v522_v0 = vpop.f32.mrf.mxu2 }
  0xf8   :  { %v11965_v4 = vpop.f32.mrf.mxu0 }
  0xf9   :  { %v571_v1 = vpop.f32.mrf.mxu3  ;;  %15093 = vst [vmem:[#allocation34_spill] sm:$0xff] %v11965_v4  ;;  %v11967_v6 = vpop.f32.mrf.mxu1  ;;  %v8272_v4 = vld [vmem:[#allocation11 + $0x98] sm:$0xf0] }
  0xfa   :  { %v11963_v3 = vpack.c.bf16 %v571_v1, %v522_v0  ;;  %15094 = vst [vmem:[#allocation35_spill] sm:$0xff] %v11967_v6  ;;  %v10436_v0 = vld [vmem:[#allocation11 + $0xc4] sm:$0xf] }
  0xfe   :  { %v524_v13 = vpop.f32.mrf.mxu2 }
 0x100   :  { %v625_v15 = vpop.f32.mrf.mxu0 }
 0x101   :  { %v573_v35 = vpop.f32.mrf.mxu3  ;;  %v674_v16 = vpop.f32.mrf.mxu1 }
 0x102   :  { %v11969_v14 = vpack.c.bf16 %v573_v35, %v524_v13  ;;  %v11971_v17 = vpack.c.bf16 %v674_v16, %v625_v15  ;;  %v8299_v13 = vor.u32 %v10436_v0, %v8296_v10  ;;  %v10393_v35 = vld [vmem:[#allocation10 + $0x6c] sm:$0xf]  ;;  %v8128_v15 = vld [vmem:[#allocation10 + $0x78] sm:$0xf0]  ;;  %v8278_v16 = vld [vmem:[#allocation11 + $0xa0] sm:$0xf] }
 0x103   :  { %8053 = vmatmul.msk.bf16.gmra.mxu2 %vm362_vm2, %v11813_v51  ;;  %v8131_v21 = vor.u32 %v10393_v35, %v8128_v15  ;;  %v8279_v38 = vor.u32 %v10434_v24, %v8278_v16  ;;  %v8246_v0 = vld [vmem:[#allocation11 + $0x60] sm:$0xf] }
 0x104   :  { %15095 = vst [vmem:[#allocation36_spill] sm:$0xff] %v11971_v17  ;;  %1428 = vmatpush.bf16.msrb.mxu1 %v8299_v13  ;;  %v8248_v13 = vld [vmem:[#allocation11 + $0x70] sm:$0xf0] }
 0x105   :  { %1203 = vmatpush.bf16.msrb.mxu3 %v8131_v21 }
 0x106   :  { %8061 = vmatmul.msk.bf16.gmra.mxu3 %vm362_vm2, %v11813_v51  ;;  %v527_v26 = vpop.f32.mrf.mxu2  ;;  %v8311_v51 = vor.u32 %v10442_v45, %v8310_v41 }
 0x108   :  { %v11979_v31 = vpop.f32.mrf.mxu0  ;;  %1413 = vmatpush.bf16.msrb.mxu0 %v8311_v51  ;;  %v10428_v51 = vld [vmem:[#allocation11 + $0x84] sm:$0xf] }
 0x109   :  { %v576_v27 = vpop.f32.mrf.mxu3  ;;  %15096 = vst [vmem:[#allocation37_spill] sm:$0xff] %v11979_v31  ;;  %v11981_v37 = vpop.f32.mrf.mxu1  ;;  %v942_v31 = vunpack.c.l.bf16 %v11885_v49  ;;  %v946_v49 = vunpack.c.l.bf16 %v11897_v9 }
 0x10a   :  { %v11977_v30 = vpack.c.bf16 %v576_v27, %v527_v26  ;;  %15097 = vst [vmem:[#allocation38_spill] sm:$0xff] %v11981_v37  ;;  %v8280_v26 = vld [vmem:[#allocation11 + $0xb0] sm:$0xf0] }
 0x10b   :  { %v8283_v39 = vor.u32 %v10432_v25, %v8280_v26  ;;  %v8230_v25 = vld [vmem:[#allocation11 + $0x40] sm:$0xf]  ;;  %v10422_v26 = vld [vmem:[#allocation11 + $0x4c] sm:$0xf0] }
 0x10c   :  { %1414 = vmatpush.bf16.msrb.mxu0 %v8295_v8  ;;  %v10424_v8 = vld [vmem:[#allocation11 + $0x64] sm:$0xf] }
 0x10d   :  { %1429 = vmatpush.bf16.msrb.mxu1 %v8283_v39  ;;  %v8251_v15 = vor.u32 %v10424_v8, %v8248_v13  ;;  %v8231_v39 = vor.u32 %v10422_v26, %v8230_v25  ;;  %v8200_v26 = vld [vmem:[#allocation11 + $0x10] sm:$0xf0] }
 0x10e   :  { %v529_v48 = vpop.f32.mrf.mxu2 }
 0x110   :  { %v630_v61 = vpop.f32.mrf.mxu0  ;;  %1415 = vmatpush.bf16.msrb.mxu0 %v8279_v38 }
 0x111   :  { %v578_v57 = vpop.f32.mrf.mxu3  ;;  %v679_v1 = vpop.f32.mrf.mxu1 }
 0x112   :  { %v11983_v58 = vpack.c.bf16 %v578_v57, %v529_v48  ;;  %v11985_v11 = vpack.c.bf16 %v679_v1, %v630_v61  ;;  %v8267_v57 = vor.u32 %v10428_v51, %v8264_v54  ;;  %v8126_v61 = vld [vmem:[#allocation10 + $0x68] sm:$0xf]  ;;  %v10426_v1 = vld [vmem:[#allocation11 + $0x6c] sm:$0xf0]  ;;  %v10389_v51 = vld [vmem:[#allocation10 + $0x4c] sm:$0xf] }
 0x113   :  { %8054 = vmatmul.msk.bf16.gmra.mxu2 %vm362_vm2, %v11827_v22  ;;  %v8127_v63 = vor.u32 %v10395_v62, %v8126_v61  ;;  %v8247_v10 = vor.u32 %v10426_v1, %v8246_v0  ;;  %v8214_v54 = vld [vmem:[#allocation11 + $0x20] sm:$0xf]  ;;  %v10418_v61 = vld [vmem:[#allocation11 + $0x2c] sm:$0xf0]  ;;  %v10416_v62 = vld [vmem:[#allocation11 + $0x24] sm:$0xf] }
 0x114   :  { %15098 = vst [vmem:[#allocation39_spill] sm:$0xff] %v11985_v11  ;;  %1430 = vmatpush.bf16.msrb.mxu1 %v8267_v57  ;;  %v8215_v1 = vor.u32 %v10418_v61, %v8214_v54 }
 0x115   :  { %1189 = vmatpush.bf16.msrb.mxu2 %v8127_v63  ;;  %v8216_v63 = vld [vmem:[#allocation11 + $0x30] sm:$0xf0] }
 0x116   :  { %8062 = vmatmul.msk.bf16.gmra.mxu3 %vm362_vm2, %v11827_v22  ;;  %v532_v27 = vpop.f32.mrf.mxu2  ;;  %v8262_v22 = vld [vmem:[#allocation11 + $0x80] sm:$0xf]  ;;  %v8219_v8 = vor.u32 %v10416_v62, %v8216_v63  ;;  %v10385_v62 = vld [vmem:[#allocation10 + $0x2c] sm:$0xf]  ;;  %v8096_v63 = vld [vmem:[#allocation10 + $0x38] sm:$0xf0] }
 0x117   :  { %v8263_v48 = vor.u32 %v10430_v46, %v8262_v22 }
 0x118   :  { %v11993_v45 = vpop.f32.mrf.mxu0  ;;  %1431 = vmatpush.bf16.msrb.mxu1 %v8251_v15  ;;  %v10414_v15 = vld [vmem:[#allocation11 + $0xc] sm:$0xf0] }
 0x119   :  { %v581_v40 = vpop.f32.mrf.mxu3  ;;  %15099 = vst [vmem:[#allocation40_spill] sm:$0xff] %v11993_v45  ;;  %v11995_v47 = vpop.f32.mrf.mxu1  ;;  %1416 = vmatpush.bf16.msrb.mxu0 %v8263_v48  ;;  %v8112_v48 = vld [vmem:[#allocation10 + $0x58] sm:$0xf0] }
 0x11a   :  { %v11991_v41 = vpack.c.bf16 %v581_v40, %v532_v27  ;;  %15100 = vst [vmem:[#allocation41_spill] sm:$0xff] %v11995_v47  ;;  %v10420_v27 = vld [vmem:[#allocation11 + $0x44] sm:$0xf]  ;;  %v8232_v40 = vld [vmem:[#allocation11 + $0x50] sm:$0xf0]  ;;  %v8115_v57 = vor.u32 %v10389_v51, %v8112_v48 }
 0x11b   :  { %v8235_v46 = vor.u32 %v10420_v27, %v8232_v40 }
 0x11c   :  { %1204 = vmatpush.bf16.msrb.mxu3 %v8115_v57 }
 0x11d   :  { %1417 = vmatpush.bf16.msrb.mxu0 %v8247_v10  ;;  %1432 = vmatpush.bf16.msrb.mxu1 %v8235_v46 }
 0x11e   :  { %v534_v35 = vpop.f32.mrf.mxu2 }
 0x120   :  { %v635_v24 = vpop.f32.mrf.mxu0 }
 0x121   :  { %v583_v16 = vpop.f32.mrf.mxu3  ;;  %v684_v38 = vpop.f32.mrf.mxu1  ;;  %1418 = vmatpush.bf16.msrb.mxu0 %v8231_v39  ;;  %1433 = vmatpush.bf16.msrb.mxu1 %v8219_v8  ;;  %v10391_v39 = vld [vmem:[#allocation10 + $0x54] sm:$0xf0] }
 0x122   :  { %v11997_v21 = vpack.c.bf16 %v583_v16, %v534_v35  ;;  %v11999_v22 = vpack.c.bf16 %v684_v38, %v635_v24  ;;  %v10412_v16 = vld [vmem:[#allocation11 + $0x4] sm:$0xf]  ;;  %v8110_v38 = vld [vmem:[#allocation10 + $0x48] sm:$0xf] }
 0x123   :  { %8055 = vmatmul.msk.bf16.gmra.mxu2 %vm362_vm2, %v11841_v32  ;;  %v8203_v27 = vor.u32 %v10412_v16, %v8200_v26  ;;  %v8111_v40 = vor.u32 %v10391_v39, %v8110_v38  ;;  %v8094_v16 = vld [vmem:[#allocation10 + $0x28] sm:$0xf] }
 0x124   :  { %15101 = vst [vmem:[#allocation42_spill] sm:$0xff] %v11997_v21  ;;  %v10499_v21 = vld [vmem:[#allocation11 + $0xb4] sm:$0xf0] }
 0x125   :  { %15102 = vst [vmem:[#allocation43_spill] sm:$0xff] %v11999_v22  ;;  %1419 = vmatpush.bf16.msrb.mxu0 %v8215_v1  ;;  %1434 = vmatpush.bf16.msrb.mxu1 %v8203_v27 }
 0x126   :  { %8063 = vmatmul.msk.bf16.gmra.mxu3 %vm362_vm2, %v11841_v32  ;;  %v537_v0 = vpop.f32.mrf.mxu2  ;;  %v8198_v32 = vld [vmem:[#allocation11] sm:$0xf]  ;;  %1190 = vmatpush.bf16.msrb.mxu2 %v8111_v40 }
 0x127   :  { %v8199_v25 = vor.u32 %v10414_v15, %v8198_v32 }
 0x128   :  { %v12007_v35 = vpop.f32.mrf.mxu0  ;;  %1435 = vmatmul.bf16.vlgmr.msrb.gmra.mxu1 %v15049_v60 }
 0x129   :  { %v586_v10 = vpop.f32.mrf.mxu3  ;;  %15104 = vst [vmem:[#allocation45_spill] sm:$0xff] %v12007_v35  ;;  %v12009_v24 = vpop.f32.mrf.mxu1  ;;  %1420 = vmatpush.bf16.msrb.mxu0 %v8199_v25  ;;  %v10387_v25 = vld [vmem:[#allocation10 + $0x34] sm:$0xf0] }
 0x12a   :  { %v12005_v13 = vpack.c.bf16 %v586_v10, %v537_v0  ;;  %15105 = vst [vmem:[#allocation46_spill] sm:$0xff] %v12009_v24  ;;  %v8099_v0 = vor.u32 %v10385_v62, %v8096_v63  ;;  %v8095_v26 = vor.u32 %v10387_v25, %v8094_v16  ;;  %v8080_v63 = vld [vmem:[#allocation10 + $0x18] sm:$0xf0]  ;;  %v10441_v25 = vld [vmem:[#allocation11 + $0xec] sm:$0xf] }
 0x12b   :  { %v8458_v24 = vld [vmem:[#allocation10 + $0xe8] sm:$0xf]  ;;  %v10475_v35 = vld [vmem:[#allocation10 + $0xf4] sm:$0xf0] }
 0x12c   :  { %15103 = vst [vmem:[#allocation44_spill] sm:$0xff] %v12005_v13  ;;  %1421 = vmatmul.bf16.vlgmr.msrb.gmra.mxu0 %v15049_v60  ;;  %1205 = vmatpush.bf16.msrb.mxu3 %v8099_v0  ;;  %v8318_v0 = vld [vmem:[#allocation11 + $0xe8] sm:$0xf]  ;;  %v8396_v13 = vld [vmem:[#allocation10 + $0x78] sm:$0xf0] }
 0x12d   :  { %1191 = vmatpush.bf16.msrb.mxu2 %v8095_v26  ;;  %v8320_v26 = vld [vmem:[#allocation11 + $0xf8] sm:$0xf0] }
 0x12e   :  { %v539_v46 = vpop.f32.mrf.mxu2 }
 0x130   :  { %v640_v54 = vpop.f32.mrf.mxu0 }
 0x131   :  { %v588_v51 = vpop.f32.mrf.mxu3  ;;  %v689_v57 = vpop.f32.mrf.mxu1 }
 0x132   :  { %v12012_v48 = vpack.c.bf16 %v588_v51, %v539_v46  ;;  %v12015_v61 = vpack.c.bf16 %v689_v57, %v640_v54  ;;  %v8078_v46 = vld [vmem:[#allocation10 + $0x8] sm:$0xf]  ;;  %v10383_v51 = vld [vmem:[#allocation10 + $0x14] sm:$0xf0]  ;;  %v10381_v54 = vld [vmem:[#allocation10 + $0xc] sm:$0xf] }
 0x133   :  { %8056 = vmatmul.msk.bf16.gmra.mxu2 %vm362_vm2, %v11801_v36  ;;  %v8079_v62 = vor.u32 %v10383_v51, %v8078_v46  ;;  %v10437_v46 = vld [vmem:[#allocation11 + $0xcc] sm:$0xf] }
 0x134   :  { %15106 = vst [vmem:[#allocation47_spill] sm:$0xff] %v12012_v48 }
 0x135   :  { %15107 = vst [vmem:[#allocation48_spill] sm:$0xff] %v12015_v61  ;;  %1192 = vmatpush.bf16.msrb.mxu2 %v8079_v62  ;;  %v10435_v62 = vld [vmem:[#allocation11 + $0xb4] sm:$0xf0] }
 0x136   :  { %8064 = vmatmul.msk.bf16.gmra.mxu3 %vm362_vm2, %v11801_v36  ;;  %v542_v1 = vpop.f32.mrf.mxu2 }
 0x138   :  { %v12023_v32 = vpop.f32.mrf.mxu0 }
 0x139   :  { %v591_v8 = vpop.f32.mrf.mxu3  ;;  %15109 = vst [vmem:[#allocation50_spill] sm:$0xff] %v12023_v32  ;;  %v12025_v15 = vpop.f32.mrf.mxu1  ;;  %v10466_v32 = vld [vmem:[#allocation10 + $0xac] sm:$0xf0] }
 0x13a   :  { %v12021_v10 = vpack.c.bf16 %v591_v8, %v542_v1  ;;  %15110 = vst [vmem:[#allocation51_spill] sm:$0xff] %v12025_v15  ;;  %v10443_v1 = vld [vmem:[#allocation11 + $0xf4] sm:$0xf0]  ;;  %v8083_v8 = vor.u32 %v10381_v54, %v8080_v63  ;;  %v8307_v63 = vor.u32 %v10437_v46, %v8304_v59 }
 0x13b   :  { %v8319_v16 = vor.u32 %v10443_v1, %v8318_v0  ;;  %v10433_v1 = vld [vmem:[#allocation11 + $0xac] sm:$0xf] }
 0x13c   :  { %15108 = vst [vmem:[#allocation49_spill] sm:$0xff] %v12021_v10  ;;  %1206 = vmatpush.bf16.msrb.mxu3 %v8083_v8 }
 0x13d   :  { %1441 = vmatpush.bf16.msra.mxu2 %v8319_v16  ;;  %v8288_v16 = vld [vmem:[#allocation11 + $0xb8] sm:$0xf0] }
 0x13e   :  { %v544_v27 = vpop.f32.mrf.mxu2 }
 0x140   :  { %v645_v36 = vpop.f32.mrf.mxu0 }
 0x141   :  { %v593_v38 = vpop.f32.mrf.mxu3  ;;  %v694_v40 = vpop.f32.mrf.mxu1 }
 0x142   :  { %v12027_v39 = vpack.c.bf16 %v593_v38, %v544_v27  ;;  %v12029_v57 = vpack.c.bf16 %v694_v40, %v645_v36  ;;  %v8323_v27 = vor.u32 %v10441_v25, %v8320_v26  ;;  %v8302_v36 = vld [vmem:[#allocation11 + $0xc8] sm:$0xf]  ;;  %v10439_v40 = vld [vmem:[#allocation11 + $0xd4] sm:$0xf0]  ;;  %v8291_v25 = vor.u32 %v10433_v1, %v8288_v16  ;;  %v10425_v1 = vld [vmem:[#allocation11 + $0x6c] sm:$0xf] }
 0x143   :  { %8057 = vmatmul.msk.bf16.gmra.mxu2 %vm362_vm2, %v11815_v52  ;;  %v8303_v60 = vor.u32 %v10439_v40, %v8302_v36  ;;  %v10431_v36 = vld [vmem:[#allocation11 + $0x94] sm:$0xf0]  ;;  %v8256_v16 = vld [vmem:[#allocation11 + $0x78] sm:$0xf0] }
 0x144   :  { %15111 = vst [vmem:[#allocation52_spill] sm:$0xff] %v12027_v39  ;;  %1455 = vmatpush.bf16.msra.mxu3 %v8323_v27  ;;  %v8270_v27 = vld [vmem:[#allocation11 + $0x88] sm:$0xf]  ;;  %v8452_v39 = vld [vmem:[#allocation10 + $0xf0] sm:$0xf0] }
 0x145   :  { %15112 = vst [vmem:[#allocation53_spill] sm:$0xff] %v12029_v57  ;;  %1442 = vmatpush.bf16.msra.mxu2 %v8303_v60  ;;  %v8554_v57 = vld [vmem:[#allocation11 + $0xa8] sm:$0xf] }
 0x146   :  { %8065 = vmatmul.msk.bf16.gmra.mxu3 %vm362_vm2, %v11815_v52  ;;  %v547_v38 = vpop.f32.mrf.mxu2  ;;  %v8286_v52 = vld [vmem:[#allocation11 + $0xa8] sm:$0xf] }
 0x147   :  { %v8287_v8 = vor.u32 %v10435_v62, %v8286_v52  ;;  %v8254_v52 = vld [vmem:[#allocation11 + $0x68] sm:$0xf]  ;;  %v10427_v62 = vld [vmem:[#allocation11 + $0x74] sm:$0xf0] }
 0x148   :  { %v12037_v54 = vpop.f32.mrf.mxu0  ;;  %1456 = vmatpush.bf16.msra.mxu3 %v8307_v63 }
 0x149   :  { %v596_v51 = vpop.f32.mrf.mxu3  ;;  %v12039_v0 = vpop.f32.mrf.mxu1  ;;  %1443 = vmatpush.bf16.msra.mxu2 %v8287_v8  ;;  %v8255_v8 = vor.u32 %v10427_v62, %v8254_v52  ;;  %v10419_v52 = vld [vmem:[#allocation11 + $0x34] sm:$0xf0]  ;;  %v10417_v62 = vld [vmem:[#allocation11 + $0x2c] sm:$0xf] }
 0x14a   :  { %v12035_v6 = vpack.c.bf16 %v596_v51, %v547_v38  ;;  %15114 = vst [vmem:[#allocation55_spill] sm:$0xff] %v12039_v0  ;;  %v10429_v38 = vld [vmem:[#allocation11 + $0x8c] sm:$0xf]  ;;  %v8271_v51 = vor.u32 %v10431_v36, %v8270_v27  ;;  %v8238_v36 = vld [vmem:[#allocation11 + $0x48] sm:$0xf] }
 0x14b   :  { %v8275_v46 = vor.u32 %v10429_v38, %v8272_v4  ;;  %v10423_v38 = vld [vmem:[#allocation11 + $0x54] sm:$0xf0] }
 0x14c   :  { %15113 = vst [vmem:[#allocation54_spill] sm:$0xff] %v12035_v6  ;;  %1457 = vmatpush.bf16.msra.mxu3 %v8291_v25  ;;  %v8259_v25 = vor.u32 %v10425_v1, %v8256_v16 }
 0x14d   :  { %1444 = vmatpush.bf16.msra.mxu2 %v8271_v51  ;;  %v8239_v51 = vor.u32 %v10423_v38, %v8238_v36  ;;  %v8208_v38 = vld [vmem:[#allocation11 + $0x18] sm:$0xf0] }
 0x14e   :  { %v549_v26 = vpop.f32.mrf.mxu2 }
 0x150   :  { %v650_v60 = vpop.f32.mrf.mxu0  ;;  %1458 = vmatpush.bf16.msra.mxu3 %v8275_v46  ;;  %v8240_v46 = vld [vmem:[#allocation11 + $0x58] sm:$0xf0] }
 0x151   :  { %v598_v40 = vpop.f32.mrf.mxu3  ;;  %v699_v63 = vpop.f32.mrf.mxu1  ;;  %1445 = vmatpush.bf16.msra.mxu2 %v8255_v8 }
 0x152   :  { %v12041_v59 = vpack.c.bf16 %v598_v40, %v549_v26  ;;  %v12043_v56 = vpack.c.bf16 %v699_v63, %v650_v60  ;;  %v10421_v40 = vld [vmem:[#allocation11 + $0x4c] sm:$0xf]  ;;  %v8222_v63 = vld [vmem:[#allocation11 + $0x28] sm:$0xf] }
 0x153   :  { %8058 = vmatmul.msk.bf16.gmra.mxu2 %vm362_vm2, %v11829_v23  ;;  %v8243_v60 = vor.u32 %v10421_v40, %v8240_v46  ;;  %v8223_v42 = vor.u32 %v10419_v52, %v8222_v63  ;;  %v15122_v52 = vmov 0  }
 0x154   :  { %15115 = vst [vmem:[#allocation56_spill] sm:$0xff] %v12041_v59  ;;  %1459 = vmatpush.bf16.msra.mxu3 %v8259_v25  ;;  %v8206_v25 = vld [vmem:[#allocation11 + $0x8] sm:$0xf] }
 0x155   :  { %1446 = vmatpush.bf16.msra.mxu2 %v8239_v51 }
 0x156   :  { %8066 = vmatmul.msk.bf16.gmra.mxu3 %vm362_vm2, %v11829_v23  ;;  %v552_v4 = vpop.f32.mrf.mxu2  ;;  %v8224_v23 = vld [vmem:[#allocation11 + $0x38] sm:$0xf0] }
 0x157   :  { %v8227_v8 = vor.u32 %v10417_v62, %v8224_v23 }
 0x158   :  { %1460 = vmatpush.bf16.msra.mxu3 %v8243_v60 }
 0x159   :  { %v601_v26 = vpop.f32.mrf.mxu3  ;;  %1447 = vmatpush.bf16.msra.mxu2 %v8223_v42 }
 0x15a   :  { %v12049_v27 = vpack.c.bf16 %v601_v26, %v552_v4  ;;  %v10415_v4 = vld [vmem:[#allocation11 + $0x14] sm:$0xf0]  ;;  %v10413_v26 = vld [vmem:[#allocation11 + $0xc] sm:$0xf] }
 0x15b   :  { %v8207_v36 = vor.u32 %v10415_v4, %v8206_v25  ;;  %v8211_v40 = vor.u32 %v10413_v26, %v8208_v38 }
 0x15c   :  { %15116 = vst [vmem:[#allocation57_spill] sm:$0xff] %v12049_v27  ;;  %1461 = vmatpush.bf16.msra.mxu3 %v8227_v8 }
 0x15d   :  { %1448 = vmatpush.bf16.msra.mxu2 %v8207_v36 }
 0x15e   :  { %v12051_v1 = vpop.f32.mrf.mxu2 }
 0x15f   :  { %15117 = vst [vmem:[#allocation58_spill] sm:$0xff] %v12051_v1 }
 0x160   :  { %1462 = vmatpush.bf16.msra.mxu3 %v8211_v40 }
 0x161   :  { %v12053_v16 = vpop.f32.mrf.mxu3 }
 0x162   :  { %15118 = vst [vmem:[#allocation59_spill] sm:$0xff] %v12053_v16 }
 0x163   :  { %8059 = vmatmul.msk.bf16.gmra.mxu2 %vm362_vm2, %v11843_v33 }
 0x166   :  { %8067 = vmatmul.msk.bf16.gmra.mxu3 %vm362_vm2, %v11843_v33  ;;  %v557_v51 = vpop.f32.mrf.mxu2 }
 0x169   :  { %v606_v46 = vpop.f32.mrf.mxu3 }
 0x16a   :  { %v12059_v60 = vpack.c.bf16 %v606_v46, %v557_v51  ;;  %v12081_v51 = vpop.f32.mrf.mxu1 }
 0x16c   :  { %15119 = vst [vmem:[#allocation60_spill] sm:$0xff] %v12059_v60 }
 0x16e   :  { %v12061_v42 = vpop.f32.mrf.mxu2 }
 0x16f   :  { %15120 = vst [vmem:[#allocation61_spill] sm:$0xff] %v12061_v42 }
 0x171   :  { %v12063_v63 = vpop.f32.mrf.mxu3 }
 0x172   :  { %15121 = vst [vmem:[#allocation62_spill] sm:$0xff] %v12063_v63 }
 0x173   :  { %1193 = vmatmul.bf16.vlgmr.msrb.gmra.mxu2 %v15122_v52 }
 0x176   :  { %1207 = vmatmul.bf16.vlgmr.msrb.gmra.mxu3 %v15122_v52  ;;  %v718_v62 = vpop.f32.mrf.mxu2 }
 0x179   :  { %v767_v23 = vpop.f32.mrf.mxu3 }
 0x17a   :  { %v12067_v8 = vpack.c.bf16 %v767_v23, %v718_v62 }
 0x17c   :  { %15123 = vst [vmem:[#allocation63_spill] sm:$0xff] %v12067_v8 }
 0x17e   :  { %v12069_v25 = vpop.f32.mrf.mxu2 }
 0x17f   :  { %15124 = vst [vmem:[#allocation64_spill] sm:$0xff] %v12069_v25  ;;  %v12085_v25 = vpop.f32.mrf.mxu0 }
 0x181   :  { %v12071_v33 = vpop.f32.mrf.mxu3 }
 0x182   :  { %15125 = vst [vmem:[#allocation65_spill] sm:$0xff] %v12071_v33  ;;  %v704_v33 = vpop.f32.mrf.mxu1 }
 0x183   :  { %1449 = vmatmul.bf16.vlgmr.msra.gmra.mxu2 %v15122_v52 }
 0x186   :  { %1463 = vmatmul.bf16.vlgmr.msra.gmra.mxu3 %v15122_v52  ;;  %v723_v4 = vpop.f32.mrf.mxu2 }
 0x187   :  { %v655_v63 = vpop.f32.mrf.mxu0 }
 0x189   :  { %v772_v26 = vpop.f32.mrf.mxu3 }
 0x18a   :  { %v12075_v36 = vpack.c.bf16 %v772_v26, %v723_v4  ;;  %v706_v42 = vpop.f32.mrf.mxu1 }
 0x18c   :  { %15126 = vst [vmem:[#allocation66_spill] sm:$0xff] %v12075_v36 }
 0x18e   :  { %v12077_v38 = vpop.f32.mrf.mxu2 }
 0x18f   :  { %15127 = vst [vmem:[#allocation67_spill] sm:$0xff] %v12077_v38  ;;  %v657_v36 = vpop.f32.mrf.mxu0 }
 0x191   :  { %v12079_v40 = vpop.f32.mrf.mxu3 }
 0x192   :  { %15128 = vst [vmem:[#allocation68_spill] sm:$0xff] %v12079_v40 }
 0x196   :  { %v728_v46 = vpop.f32.mrf.mxu2 }
 0x197   :  { %v1166_v38 = vpop.f32.mrf.mxu0 }
 0x198   :  { %v1213_v1 = vadd.f32 %v1166_v38, %v942_v31 }
 0x199   :  { %v777_v62 = vpop.f32.mrf.mxu3 }
 0x19a   :  { %v12083_v23 = vpack.c.bf16 %v777_v62, %v728_v46  ;;  %v1180_v46 = vpop.f32.mrf.mxu1 }
 0x19b   :  { %v1214_v18 = vadd.f32 %v1180_v46, %v943_v29 }
 0x19c   :  { %15129 = vst [vmem:[#allocation69_spill] sm:$0xff] %v12083_v23 }
 0x19e   :  { %v12087_v8 = vpop.f32.mrf.mxu2 }
 0x19f   :  { %15130 = vst [vmem:[#allocation70_spill] sm:$0xff] %v12087_v8  ;;  %v8326_v8 = vmul.f32 -1.442695, %v1214_v18 }
 0x1a1   :  { %v12089_v52 = vpop.f32.mrf.mxu3 }
 0x1a2   :  { %15131 = vst [vmem:[#allocation71_spill] sm:$0xff] %v12089_v52  ;;  %v1182_v27 = vpop.f32.mrf.mxu1 }
 0x1a6   :  { %v733_v4 = vpop.f32.mrf.mxu2 }
 0x1a9   :  { %v782_v26 = vpop.f32.mrf.mxu3 }
 0x1aa   :  { %v12091_v60 = vpack.c.bf16 %v782_v26, %v733_v4  ;;  %v947_v4 = vunpack.c.h.bf16 %v11897_v9  ;;  %v8324_v26 = vmul.f32 -1.442695, %v1213_v1 }
 0x1ac   :  { %15132 = vst [vmem:[#allocation72_spill] sm:$0xff] %v12091_v60  ;;  %v1218_v11 = vadd.f32 %v1182_v27, %v947_v4  ;;  %11030 = vpow2.f32 %v8324_v26  ;;  %v10474_v60 = vld [vmem:[#allocation10 + $0xec] sm:$0xf0] }
 0x1ad   :  { %11032 = vpow2.f32 %v8326_v8 }
 0x1ae   :  { %v12093_v17 = vpop.f32.mrf.mxu2  ;;  %v8327_v59 = vmul.f32 -1.442695, %v1218_v11 }
 0x1af   :  { %15133 = vst [vmem:[#allocation73_spill] sm:$0xff] %v12093_v17 }
 0x1b0   :  { %11034 = vpow2.f32 %v8327_v59  ;;  %v865_v59 = vpack.c.bf16 %v704_v33, %v655_v63  ;;  %v10472_v33 = vld [vmem:[#allocation10 + $0xe4] sm:$0xf] }
 0x1b1   :  { %v12095_v40 = vpop.f32.mrf.mxu3  ;;  %v8455_v10 = vor.u32 %v10472_v33, %v8452_v39  ;;  %v8434_v39 = vld [vmem:[#allocation10 + $0xc0] sm:$0xf]  ;;  %v10471_v33 = vld [vmem:[#allocation10 + $0xd4] sm:$0xf0] }
 0x1b2   :  { %15134 = vst [vmem:[#allocation74_spill] sm:$0xff] %v12095_v40  ;;  %v11031_v38 = vpop.eup %11030 }
 0x1b3   :  { %v12109_v29 = vadd.f32 1.0, %v11031_v38  ;;  %v11033_v46 = vpop.eup %11032  ;;  %1980 = vmatpush.bf16.msra.mxu1 %v8455_v10  ;;  %v8444_v10 = vld [vmem:[#allocation10 + $0xd8] sm:$0xf0] }
 0x1b4   :  { %v12114_v18 = vadd.f32 1.0, %v11033_v46  ;;  %v958_v46 = vunpack.c.h.bf16 %v865_v59 }
 0x1b5   :  { %11036 = vrcp.f32 %v12109_v29  ;;  %v1496_v26 = vand.u32 2147483648, %v12109_v29  ;;  %vm1490_vm12 = vweird.f32 %v12109_v29 }
 0x1b6   :  { %v738_v62 = vpop.f32.mrf.mxu2  ;;  %v11035_v27 = vpop.eup %11034  ;;  %vm1528_vm6 = vweird.f32 %v12114_v18 }
 0x1b7   :  { %v12118_v8 = vadd.f32 1.0, %v11035_v27  ;;  %v12127_v27 = vor.u32 1.1754944e-38, %v1496_v26 }
 0x1b9   :  { %v787_v37 = vpop.f32.mrf.mxu3  ;;  %vm1543_vm7 = vweird.f32 %v12118_v8 }
 0x1ba   :  { %v12098_v16 = vpack.c.bf16 %v787_v37, %v738_v62  ;;  %v1168_v37 = vpop.f32.mrf.mxu0 }
 0x1bb   :  { %v1217_v1 = vadd.f32 %v1168_v37, %v946_v49  ;;  %v1534_v37 = vand.u32 2147483648, %v12114_v18  ;;  %v12124_v38 = vpop.eup %11036  ;;  %v869_v49 = vpack.c.bf16 %v706_v42, %v657_v36 }
 0x1bc   :  { %15135 = vst [vmem:[#allocation75_spill] sm:$0xff] %v12098_v16  ;;  %v12132_v6 = vmul.f32 %v12124_v38, %v12109_v29  ;;  %vm1491_vm11 = vweird.f32 %v12124_v38 }
 0x1bd   :  { %v8325_v4 = vmul.f32 -1.442695, %v1217_v1  ;;  %v12134_v50 = vor.u32 1.1754944e-38, %v1534_v37  ;;  %v961_v36 = vunpack.c.l.bf16 %v869_v49  ;;  %v962_v16 = vunpack.c.h.bf16 %v869_v49  ;;  %v8436_v49 = vld [vmem:[#allocation10 + $0xd0] sm:$0xf0]  ;;  %vm12255_vm14 = vmor %vm1490_vm12, %vm1491_vm11 }
 0x1be   :  { %v12102_v23 = vpop.f32.mrf.mxu2 }
 0x1bf   :  { %15136 = vst [vmem:[#allocation76_spill] sm:$0xff] %v12102_v23  ;;  %11038 = vpow2.f32 %v8325_v4 }
 0x1c0   :  { %11040 = vrcp.f32 %v12114_v18 }
 0x1c1   :  { %v12104_v52 = vpop.f32.mrf.mxu3  ;;  %11042 = vrcp.f32 %v12118_v8 }
 0x1c2   :  { %15137 = vst [vmem:[#allocation77_spill] sm:$0xff] %v12104_v52  ;;  %v1422_v9 = vpop.f32.mrf.mxu0 }
 0x1c5   :  { %v11039_v7 = vpop.eup %11038 }
 0x1c6   :  { %v743_v47 = vpop.f32.mrf.mxu2  ;;  %v12138_v42 = vpop.eup %11040  ;;  %v12142_v28 = vadd.f32 1.0, %v11039_v7 }
 0x1c7   :  { %v12140_v26 = vpop.eup %11042  ;;  %v1524_v23 = vmul.f32 %v12138_v42, %v12114_v18  ;;  %vm1529_vm3 = vweird.f32 %v12138_v42 }
 0x1c8   :  { %11044 = vrcp.f32 %v12142_v28  ;;  %v1511_v15 = vand.u32 2147483648, %v12142_v28  ;;  %vm1544_vm5 = vweird.f32 %v12140_v26  ;;  %vm12190_vm8 = vmor %vm1528_vm6, %vm1529_vm3  ;;  %vm1505_vm1 = vweird.f32 %v12142_v28 }
 0x1c9   :  { %v792_v31 = vpop.f32.mrf.mxu3  ;;  %vm12202_vm9 = vmor %vm1543_vm7, %vm1544_vm5 }
 0x1ca   :  { %v12107_v62 = vpack.c.bf16 %v792_v31, %v743_v47  ;;  %v1436_v47 = vpop.f32.mrf.mxu1  ;;  %v957_v31 = vunpack.c.l.bf16 %v865_v59  ;;  %v8450_v59 = vld [vmem:[#allocation10 + $0xe0] sm:$0xf]  ;;  %v1424_v22 = vpop.f32.mrf.mxu0 }
 0x1cb   :  { %v8451_v4 = vor.u32 %v10474_v60, %v8450_v59  ;;  %v1470_v37 = vadd.f32 %v1436_v47, %v958_v46  ;;  %v1539_v60 = vmul.f32 %v12140_v26, %v12118_v8  ;;  %v1473_v59 = vadd.f32 %v1424_v22, %v961_v36  ;;  %v8442_v46 = vld [vmem:[#allocation10 + $0xc8] sm:$0xf]  ;;  %v10469_v36 = vld [vmem:[#allocation10 + $0xcc] sm:$0xf] }
 0x1cc   :  { %15138 = vst [vmem:[#allocation78_spill] sm:$0xff] %v12107_v62  ;;  %v1469_v40 = vadd.f32 %v1422_v9, %v957_v31  ;;  %v8459_v9 = vor.u32 %v10475_v35, %v8458_v24  ;;  %v10473_v31 = vld [vmem:[#allocation10 + $0xec] sm:$0xf]  ;;  %v10470_v35 = vld [vmem:[#allocation10 + $0xcc] sm:$0xf0]  ;;  %v8443_v22 = vor.u32 %v10471_v33, %v8442_v46 }
 0x1cd   :  { %1966 = vmatpush.bf16.msra.mxu0 %v8451_v4  ;;  %v10468_v24 = vld [vmem:[#allocation10 + $0xc4] sm:$0xf]  ;;  %v8332_v4 = vmul.f32 -1.442695, %v1470_v37  ;;  %v8418_v37 = vld [vmem:[#allocation10 + $0xa0] sm:$0xf] }
 0x1ce   :  { %v12111_v45 = vpop.f32.mrf.mxu2  ;;  %v8330_v5 = vmul.f32 -1.442695, %v1469_v40  ;;  %1994 = vmatpush.bf16.msrb.mxu2 %v8459_v9  ;;  %v8435_v40 = vor.u32 %v10470_v35, %v8434_v39  ;;  %v1540_v39 = vsub.f32 1.0, %v1539_v60  ;;  %v8331_v35 = vmul.f32 -1.442695, %v1473_v59  ;;  %v12156_v60 = vpop.eup %11044 }
 0x1cf   :  { %15139 = vst [vmem:[#allocation79_spill] sm:$0xff] %v12111_v45  ;;  %v8420_v46 = vld [vmem:[#allocation10 + $0xb0] sm:$0xf0]  ;;  %v12177_v48 = vmul.f32 %v12156_v60, %v12142_v28  ;;  %v8578_v45 = vld [vmem:[#allocation11 + $0xe0] sm:$0xf]  ;;  %vm1506_vm0 = vweird.f32 %v12156_v60 }
 0x1d0   :  { %11046 = vpow2.f32 %v8330_v5  ;;  %v8426_v5 = vld [vmem:[#allocation10 + $0xa8] sm:$0xf]  ;;  %vm12309_vm2 = vmor %vm1505_vm1, %vm1506_vm0 }
 0x1d1   :  { %v12116_v11 = vpop.f32.mrf.mxu3  ;;  %1967 = vmatpush.bf16.msra.mxu0 %v8435_v40  ;;  %11048 = vpow2.f32 %v8332_v4 }
 0x1d2   :  { %15140 = vst [vmem:[#allocation80_spill] sm:$0xff] %v12116_v11  ;;  %v1438_v7 = vpop.f32.mrf.mxu1  ;;  %1995 = vmatpush.bf16.msrb.mxu2 %v8443_v22  ;;  %11050 = vpow2.f32 %v8331_v35  ;;  %v8348_v11 = vld [vmem:[#allocation10 + $0x18] sm:$0xf0] }
 0x1d3   :  { %v1474_v9 = vadd.f32 %v1438_v7, %v962_v16  ;;  %v10467_v16 = vld [vmem:[#allocation10 + $0xb4] sm:$0xf0] }
 0x1d4   :  { %v8427_v33 = vor.u32 %v10467_v16, %v8426_v5  ;;  %v8404_v5 = vld [vmem:[#allocation10 + $0x90] sm:$0xf0]  ;;  %v8410_v16 = vld [vmem:[#allocation10 + $0x88] sm:$0xf] }
 0x1d5   :  { %v8333_v7 = vmul.f32 -1.442695, %v1474_v9  ;;  %v10462_v9 = vld [vmem:[#allocation10 + $0x8c] sm:$0xf0] }
 0x1d6   :  { %v748_v1 = vpop.f32.mrf.mxu2  ;;  %v11047_v4 = vpop.eup %11046  ;;  %1996 = vmatpush.bf16.msrb.mxu2 %v8427_v33  ;;  %v1547_v33 = vand.u32 2147483647, %v12118_v8 }
 0x1d7   :  { %11052 = vpow2.f32 %v8333_v7  ;;  %v11049_v61 = vpop.eup %11048  ;;  %v8386_v7 = vld [vmem:[#allocation10 + $0x60] sm:$0xf] }
 0x1d8   :  { %v11051_v44 = vpop.eup %11050  ;;  %vm12206_vm10 = vcmp.eq.f32.partialorder %v1547_v33, 8.507059e+37 }
 0x1d9   :  { %v797_v63 = vpop.f32.mrf.mxu3  ;;  %v12226_v34 = vadd.f32 1.0, %v11051_v44 }
 0x1da   :  { %v12136_v17 = vpack.c.bf16 %v797_v63, %v748_v1  ;;  %v8460_v1 = vld [vmem:[#allocation10 + $0xf8] sm:$0xf0]  ;;  %v8447_v63 = vor.u32 %v10469_v36, %v8444_v10  ;;  %v10465_v36 = vld [vmem:[#allocation10 + $0xac] sm:$0xf]  ;;  %v8402_v10 = vld [vmem:[#allocation10 + $0x80] sm:$0xf] }
 0x1db   :  { %v8463_v52 = vor.u32 %v10473_v31, %v8460_v1  ;;  %v8439_v1 = vor.u32 %v10468_v24, %v8436_v49  ;;  %v10464_v24 = vld [vmem:[#allocation10 + $0xa4] sm:$0xf]  ;;  %v8419_v49 = vor.u32 %v10466_v32, %v8418_v37  ;;  %vm1631_vm11 = vweird.f32 %v12226_v34 }
 0x1dc   :  { %v8423_v40 = vor.u32 %v10464_v24, %v8420_v46  ;;  %v10460_v37 = vld [vmem:[#allocation10 + $0x84] sm:$0xf]  ;;  %v1541_v24 = vmul.f32 %v12140_v26, %v1540_v39 }
 0x1dd   :  { %2008 = vmatpush.bf16.msrb.mxu3 %v8463_v52  ;;  %v1525_v52 = vsub.f32 1.0, %v1524_v23  ;;  %1981 = vmatpush.bf16.msra.mxu1 %v8439_v1  ;;  %v8428_v23 = vld [vmem:[#allocation10 + $0xb8] sm:$0xf0]  ;;  %v1549_v1 = vand.u32 2147483648, %v12118_v8  ;;  %v8407_v39 = vor.u32 %v10460_v37, %v8404_v5  ;;  %v10456_v37 = vld [vmem:[#allocation10 + $0x64] sm:$0xf] }
 0x1de   :  { %v12149_v47 = vpop.f32.mrf.mxu2  ;;  %1968 = vmatpush.bf16.msra.mxu0 %v8419_v49  ;;  %v8431_v22 = vor.u32 %v10465_v36, %v8428_v23  ;;  %v8403_v49 = vor.u32 %v10462_v9, %v8402_v10  ;;  %v10461_v36 = vld [vmem:[#allocation10 + $0x8c] sm:$0xf]  ;;  %v8412_v23 = vld [vmem:[#allocation10 + $0x98] sm:$0xf0]  ;;  %v10458_v9 = vld [vmem:[#allocation10 + $0x6c] sm:$0xf0]  ;;  %v1542_v5 = vadd.f32 %v12140_v26, %v1541_v24 }
 0x1df   :  { %v1526_v59 = vmul.f32 %v12138_v42, %v1525_v52  ;;  %v8415_v10 = vor.u32 %v10461_v36, %v8412_v23  ;;  %v12186_v36 = vadd.f32 1.0, %v11049_v61  ;;  %v10457_v23 = vld [vmem:[#allocation10 + $0x6c] sm:$0xf]  ;;  %v10450_v52 = vld [vmem:[#allocation10 + $0x2c] sm:$0xf0] }
 0x1e1   :  { %v12152_v31 = vpop.f32.mrf.mxu3  ;;  %2009 = vmatpush.bf16.msrb.mxu3 %v8447_v63  ;;  %v12160_v63 = vor.u32 1.1754944e-38, %v1511_v15  ;;  %1982 = vmatpush.bf16.msra.mxu1 %v8423_v40  ;;  %v15141_v15 = vand.u32 2147483647, %v12114_v18  ;;  %v10463_v40 = vld [vmem:[#allocation10 + $0x94] sm:$0xf0]  ;;  %vm1654_vm6 = vweird.f32 %v12186_v36 }
 0x1e2   :  { %v8411_v35 = vor.u32 %v10463_v40, %v8410_v16  ;;  %1969 = vmatpush.bf16.msra.mxu0 %v8403_v49  ;;  %v8388_v16 = vld [vmem:[#allocation10 + $0x70] sm:$0xf0]  ;;  %v8394_v40 = vld [vmem:[#allocation10 + $0x68] sm:$0xf]  ;;  %v1550_v49 = vor.u32 1.1754944e-38, %v1549_v1 }
 0x1e3   :  { %vm12170_vm4 = vcmp.eq.f32.partialorder %v15141_v15, 8.507059e+37  ;;  %v12179_v15 = vadd.f32 1.0, %v11047_v4  ;;  %v8387_v4 = vor.u32 %v10458_v9, %v8386_v7  ;;  %v8399_v7 = vor.u32 %v10457_v23, %v8396_v13  ;;  %v11053_v9 = vpop.eup %11052 }
 0x1e4   :  { %1997 = vmatpush.bf16.msrb.mxu2 %v8411_v35  ;;  %v8391_v35 = vor.u32 %v10456_v37, %v8388_v16  ;;  %v10452_v16 = vld [vmem:[#allocation10 + $0x44] sm:$0xf]  ;;  %v1546_v13 = vsel %vm12202_vm9, %v12140_v26, %v1542_v5  ;;  %v12228_v26 = vadd.f32 1.0, %v11053_v9  ;;  %v8356_v9 = vld [vmem:[#allocation10 + $0x30] sm:$0xf0] }
 0x1e5   :  { %2010 = vmatpush.bf16.msrb.mxu3 %v8431_v22  ;;  %v1527_v22 = vadd.f32 %v12138_v42, %v1526_v59  ;;  %1983 = vmatpush.bf16.msra.mxu1 %v8407_v39  ;;  %v10459_v59 = vld [vmem:[#allocation10 + $0x74] sm:$0xf0]  ;;  %11054 = vrcp.f32 %v12179_v15  ;;  %v8378_v39 = vld [vmem:[#allocation10 + $0x48] sm:$0xf]  ;;  %v1551_v61 = vsel %vm12206_vm10, %v1550_v49, %v1546_v13  ;;  %v15151_v1 = vand.u32 2147483647, %v12109_v29 }
 0x1e6   :  { %v12162_v32 = vpop.f32.mrf.mxu2  ;;  %v8395_v18 = vor.u32 %v10459_v59, %v8394_v40  ;;  %1970 = vmatpush.bf16.msra.mxu0 %v8387_v4  ;;  %v15150_v40 = vsub.f32 1.0, %v12132_v6  ;;  %v8372_v59 = vld [vmem:[#allocation10 + $0x50] sm:$0xf0]  ;;  %11056 = vrcp.f32 %v12186_v36  ;;  %v10453_v6 = vld [vmem:[#allocation10 + $0x4c] sm:$0xf]  ;;  %vm1616_vm3 = vweird.f32 %v12179_v15 }
 0x1e7   :  { %v8375_v23 = vor.u32 %v10452_v16, %v8372_v59  ;;  %v8383_v5 = vor.u32 %v10453_v6, %v8380_v43  ;;  %vm12240_vm13 = vcmp.eq.f32.partialorder %v15151_v1, 8.507059e+37  ;;  %v8364_v59 = vld [vmem:[#allocation10 + $0x38] sm:$0xf0]  ;;  %11058 = vrcp.f32 %v12226_v34  ;;  %v10444_v29 = vld [vmem:[#allocation10 + $0x4] sm:$0xf] }
 0x1e8   :  { %1998 = vmatpush.bf16.msrb.mxu2 %v8395_v18  ;;  %v1488_v33 = vmul.f32 %v12124_v38, %v15150_v40  ;;  %v1660_v40 = vand.u32 2147483648, %v12186_v36  ;;  %v8340_v1 = vld [vmem:[#allocation10 + $0x10] sm:$0xf0]  ;;  %11060 = vrcp.f32 %v12228_v26 }
 0x1e9   :  { %v12165_v46 = vpop.f32.mrf.mxu3  ;;  %2011 = vmatpush.bf16.msrb.mxu3 %v8415_v10  ;;  %v1531_v10 = vsel %vm12190_vm8, %v12138_v42, %v1527_v22  ;;  %1984 = vmatpush.bf16.msra.mxu1 %v8391_v35  ;;  %v8370_v42 = vld [vmem:[#allocation10 + $0x40] sm:$0xf]  ;;  %v10454_v22 = vld [vmem:[#allocation10 + $0x4c] sm:$0xf0]  ;;  %v10455_v35 = vld [vmem:[#allocation10 + $0x54] sm:$0xf0]  ;;  %vm1669_vm8 = vweird.f32 %v12228_v26 }
 0x1ea   :  { %v8371_v4 = vor.u32 %v10454_v22, %v8370_v42  ;;  %v1536_v18 = vsel %vm12170_vm4, %v12134_v50, %v1531_v10  ;;  %v8379_v24 = vor.u32 %v10455_v35, %v8378_v39  ;;  %v8354_v50 = vld [vmem:[#allocation10 + $0x20] sm:$0xf]  ;;  %v10448_v10 = vld [vmem:[#allocation10 + $0x24] sm:$0xf]  ;;  %v8362_v42 = vld [vmem:[#allocation10 + $0x28] sm:$0xf]  ;;  %v12236_v43 = vadd.f32 %v12124_v38, %v1488_v33 }
 0x1eb   :  { %v8355_v44 = vor.u32 %v10450_v52, %v8354_v50  ;;  %v10451_v22 = vld [vmem:[#allocation10 + $0x34] sm:$0xf0]  ;;  %v8359_v16 = vor.u32 %v10448_v10, %v8356_v9  ;;  %v12246_v39 = vpop.eup %11054  ;;  %v12248_v35 = vor.u32 1.1754944e-38, %v1660_v40  ;;  %v945_v50 = vunpack.c.h.bf16 %v11963_v3  ;;  %v8338_v52 = vld [vmem:[#allocation10] sm:$0xf] }
 0x1ec   :  { %1971 = vmatpush.bf16.msra.mxu0 %v8371_v4  ;;  %1999 = vmatpush.bf16.msrb.mxu2 %v8379_v24  ;;  %v12244_v24 = vmul.f32 0.0, %v1536_v18  ;;  %v8363_v13 = vor.u32 %v10451_v22, %v8362_v42  ;;  %v10449_v4 = vld [vmem:[#allocation10 + $0x2c] sm:$0xf]  ;;  %v12259_v18 = vmul.f32 0.0, %v1551_v61  ;;  %v10446_v10 = vld [vmem:[#allocation10 + $0xc] sm:$0xf0]  ;;  %vm1617_vm4 = vweird.f32 %v12246_v39 }
 0x1ed   :  { %2012 = vmatpush.bf16.msrb.mxu3 %v8399_v7  ;;  %1985 = vmatpush.bf16.msra.mxu1 %v8375_v23  ;;  %v944_v7 = vunpack.c.l.bf16 %v11963_v3  ;;  %v8367_v6 = vor.u32 %v10449_v4, %v8364_v59  ;;  %v15156_v22 = vsub.f32 1.0, %v12177_v48  ;;  %v8346_v4 = vld [vmem:[#allocation10 + $0x8] sm:$0xf]  ;;  %v10447_v59 = vld [vmem:[#allocation10 + $0x14] sm:$0xf0]  ;;  %v8343_v3 = vor.u32 %v10444_v29, %v8340_v1  ;;  %vm12353_vm5 = vmor %vm1616_vm3, %vm1617_vm4 }
 0x1ee   :  { %v12210_v37 = vpop.f32.mrf.mxu2  ;;  %v1493_v48 = vsel %vm12255_vm14, %v12124_v38, %v12236_v43  ;;  %v8586_v33 = vld [vmem:[#allocation11 + $0xe8] sm:$0xf]  ;;  %v8588_v1 = vld [vmem:[#allocation11 + $0xf8] sm:$0xf0] }
 0x1ef   :  { %v1503_v61 = vmul.f32 %v12156_v60, %v15156_v22 }
 0x1f0   :  { %1972 = vmatpush.bf16.msra.mxu0 %v8355_v44  ;;  %2000 = vmatpush.bf16.msrb.mxu2 %v8363_v13  ;;  %v8339_v44 = vor.u32 %v10446_v10, %v8338_v52  ;;  %v10445_v13 = vld [vmem:[#allocation10 + $0xc] sm:$0xf]  ;;  %v10504_v52 = vld [vmem:[#allocation11 + $0xe4] sm:$0xf] }
 0x1f1   :  { %v12213_v8 = vpop.f32.mrf.mxu3  ;;  %2013 = vmatpush.bf16.msrb.mxu3 %v8383_v5  ;;  %v12261_v5 = vpop.eup %11056  ;;  %1986 = vmatpush.bf16.msra.mxu1 %v8359_v16  ;;  %v8347_v16 = vor.u32 %v10447_v59, %v8346_v4  ;;  %v8562_v4 = vld [vmem:[#allocation11 + $0xc0] sm:$0xf] }
 0x1f2   :  { %v12279_v10 = vmul.f32 %v12261_v5, %v12186_v36  ;;  %v12291_v59 = vpop.eup %11058  ;;  %vm1655_vm7 = vweird.f32 %v12261_v5 }
 0x1f3   :  { %vm12396_vm9 = vmor %vm1654_vm6, %vm1655_vm7  ;;  %vm1632_vm12 = vweird.f32 %v12291_v59 }
 0x1f4   :  { %1973 = vmatpush.bf16.msra.mxu0 %v8339_v44  ;;  %2001 = vmatpush.bf16.msrb.mxu2 %v8347_v16  ;;  %vm12433_vm0 = vmor %vm1631_vm11, %vm1632_vm12 }
 0x1f5   :  { %2014 = vmatpush.bf16.msrb.mxu3 %v8367_v6  ;;  %v8351_v6 = vor.u32 %v10445_v13, %v8348_v11  ;;  %1987 = vmatpush.bf16.msra.mxu1 %v8343_v3  ;;  %v10507_v11 = vld [vmem:[#allocation11 + $0xf4] sm:$0xf0]  ;;  %v948_v3 = vunpack.c.l.bf16 %v11969_v14  ;;  %v10502_v13 = vld [vmem:[#allocation11 + $0xcc] sm:$0xf0] }
 0x1f6   :  { %v1194_v40 = vpop.f32.mrf.mxu2  ;;  %v8587_v44 = vor.u32 %v10507_v11, %v8586_v33  ;;  %v10501_v33 = vld [vmem:[#allocation11 + $0xcc] sm:$0xf]  ;;  %v12299_v11 = vpop.eup %11060 }
 0x1f7   :  { %v1215_v9 = vadd.f32 %v1194_v40, %v944_v7  ;;  %v12271_v7 = vmul.f32 %v12246_v39, %v12179_v15  ;;  %v10506_v40 = vld [vmem:[#allocation11 + $0xec] sm:$0xf0]  ;;  %vm1670_vm14 = vweird.f32 %v12299_v11 }
 0x1f8   :  { %v8579_v38 = vor.u32 %v10506_v40, %v8578_v45  ;;  %v949_v45 = vunpack.c.h.bf16 %v11969_v14  ;;  %v8564_v40 = vld [vmem:[#allocation11 + $0xd0] sm:$0xf0]  ;;  %2256 = vmatpush.bf16.msra.mxu2 %v8587_v44  ;;  %vm12472_vm3 = vmor %vm1669_vm8, %vm1670_vm14 }
 0x1f9   :  { %v1208_v42 = vpop.f32.mrf.mxu3  ;;  %11062 = vtanh.f32 %v1215_v9  ;;  %v12288_v9 = vadd.f32 %v12156_v60, %v1503_v61  ;;  %2015 = vmatpush.bf16.msrb.mxu3 %v8351_v6  ;;  %v10500_v61 = vld [vmem:[#allocation11 + $0xc4] sm:$0xf]  ;;  %v1498_v6 = vsel %vm12240_vm13, %v12127_v27, %v1493_v48  ;;  %v1613_v14 = vsub.f32 1.0, %v12271_v7  ;;  %v8572_v48 = vld [vmem:[#allocation11 + $0xd8] sm:$0xf0] }
 0x1fa   :  { %v1216_v23 = vadd.f32 %v1208_v42, %v945_v50  ;;  %v8580_v50 = vld [vmem:[#allocation11 + $0xf0] sm:$0xf0]  ;;  %v15157_v42 = vand.u32 2147483647, %v12142_v28  ;;  %2228 = vmatpush.bf16.msrb.mxu0 %v8579_v38  ;;  %v1651_v38 = vsub.f32 1.0, %v12279_v10  ;;  %v12315_v7 = vmul.f32 %v12291_v59, %v12226_v34 }
 0x1fb   :  { %v8583_v43 = vor.u32 %v10504_v52, %v8580_v50  ;;  %v8563_v52 = vor.u32 %v10502_v13, %v8562_v4  ;;  %v8567_v50 = vor.u32 %v10500_v61, %v8564_v40  ;;  %v8575_v13 = vor.u32 %v10501_v33, %v8572_v48  ;;  %v8546_v61 = vld [vmem:[#allocation11 + $0xa0] sm:$0xf]  ;;  %v10498_v40 = vld [vmem:[#allocation11 + $0xac] sm:$0xf0]  ;;  %v10497_v33 = vld [vmem:[#allocation11 + $0xac] sm:$0xf] }
 0x1fc   :  { %v8328_v29 = vmul.f32 -1.442695, %v1216_v23  ;;  %vm12283_vm15 = vcmp.eq.f32.partialorder %v15157_v42, 8.507059e+37  ;;  %v10505_v23 = vld [vmem:[#allocation11 + $0xec] sm:$0xf]  ;;  %v1652_v48 = vmul.f32 %v12261_v5, %v1651_v38 }
 0x1fd   :  { %2242 = vmatpush.bf16.msrb.mxu1 %v8583_v43  ;;  %v8591_v16 = vor.u32 %v10505_v23, %v8588_v1  ;;  %v10503_v42 = vld [vmem:[#allocation11 + $0xd4] sm:$0xf0]  ;;  %v15160_v43 = vand.u32 2147483648, %v12228_v26  ;;  %v1508_v1 = vsel %vm12309_vm2, %v12156_v60, %v12288_v9  ;;  %v8555_v9 = vor.u32 %v10499_v21, %v8554_v57  ;;  %v8538_v38 = vld [vmem:[#allocation11 + $0x88] sm:$0xf] }
 0x1fe   :  { %11064 = vpow2.f32 %v8328_v29  ;;  %v8570_v29 = vld [vmem:[#allocation11 + $0xc8] sm:$0xf]  ;;  %v1196_v49 = vpop.f32.mrf.mxu2  ;;  %2229 = vmatpush.bf16.msrb.mxu0 %v8563_v52  ;;  %v1513_v21 = vsel %vm12283_vm15, %v12160_v63, %v1508_v1  ;;  %v1622_v57 = vand.u32 2147483648, %v12179_v15 }
 0x1ff   :  { %v12305_v23 = vor.u32 1.1754944e-38, %v15160_v43  ;;  %2270 = vmatpush.bf16.msra.mxu3 %v8591_v16  ;;  %v8571_v27 = vor.u32 %v10503_v42, %v8570_v29  ;;  %v11063_v44 = vpop.eup %11062  ;;  %v1219_v10 = vadd.f32 %v1196_v49, %v948_v3  ;;  %v10496_v43 = vld [vmem:[#allocation11 + $0xa4] sm:$0xf]  ;;  %v8547_v29 = vor.u32 %v10498_v40, %v8546_v61  ;;  %v8548_v42 = vld [vmem:[#allocation11 + $0xb0] sm:$0xf0] }
 0x200   :  { %v1595_v62 = vmul.f32 %v11063_v44, %v1498_v6  ;;  %v12323_v3 = vmul.f32 %v12299_v11, %v12228_v26  ;;  %v8551_v60 = vor.u32 %v10496_v43, %v8548_v42  ;;  %v8556_v49 = vld [vmem:[#allocation11 + $0xb8] sm:$0xf0]  ;;  %v10493_v43 = vld [vmem:[#allocation11 + $0x8c] sm:$0xf]  ;;  %v1620_v42 = vand.u32 2147483647, %v12179_v15 }
 0x201   :  { %v1210_v4 = vpop.f32.mrf.mxu3  ;;  %2243 = vmatpush.bf16.msrb.mxu1 %v8567_v50  ;;  %11066 = vtanh.f32 %v1219_v10  ;;  %2257 = vmatpush.bf16.msra.mxu2 %v8571_v27  ;;  %v8559_v50 = vor.u32 %v10497_v33, %v8556_v49  ;;  %v8530_v27 = vld [vmem:[#allocation11 + $0x80] sm:$0xf]  ;;  %v10494_v10 = vld [vmem:[#allocation11 + $0x8c] sm:$0xf0]  ;;  %v12367_v15 = vpack.c.bf16 %v12213_v8, %v12210_v37  ;;  %v12379_v8 = vadd.f32 %v12261_v5, %v1652_v48 }
 0x202   :  { %v1220_v16 = vadd.f32 %v1210_v4, %v949_v45  ;;  %v12327_v45 = vpack.c.bf16 %v12165_v46, %v12162_v32  ;;  %v12330_v6 = vadd.f32 %v1595_v62, %v12244_v24  ;;  %v1614_v32 = vmul.f32 %v12246_v39, %v1613_v14  ;;  %2230 = vmatpush.bf16.msrb.mxu0 %v8547_v29  ;;  %v10492_v46 = vld [vmem:[#allocation11 + $0x84] sm:$0xf]  ;;  %v8532_v24 = vld [vmem:[#allocation11 + $0x90] sm:$0xf0]  ;;  %v10495_v14 = vld [vmem:[#allocation11 + $0x94] sm:$0xf0] }
 0x203   :  { %2271 = vmatpush.bf16.msra.mxu3 %v8575_v13  ;;  %v8531_v62 = vor.u32 %v10494_v10, %v8530_v27  ;;  %v1628_v4 = vsub.f32 1.0, %v12315_v7  ;;  %v1666_v63 = vsub.f32 1.0, %v12323_v3  ;;  %v8535_v61 = vor.u32 %v10492_v46, %v8532_v24  ;;  %v10490_v27 = vld [vmem:[#allocation11 + $0x6c] sm:$0xf0]  ;;  %v10488_v10 = vld [vmem:[#allocation11 + $0x64] sm:$0xf] }
 0x204   :  { %v11065_v28 = vpop.eup %11064  ;;  %v8329_v52 = vmul.f32 -1.442695, %v1220_v16  ;;  %v960_v13 = vunpack.c.h.bf16 %v12327_v45  ;;  %v8539_v40 = vor.u32 %v10495_v14, %v8538_v38  ;;  %v8540_v16 = vld [vmem:[#allocation11 + $0x98] sm:$0xf0]  ;;  %v12358_v3 = vor.u32 1.1754944e-38, %v1622_v57 }
 0x205   :  { %v12333_v44 = vadd.f32 1.0, %v11065_v28  ;;  %2244 = vmatpush.bf16.msrb.mxu1 %v8551_v60  ;;  %2258 = vmatpush.bf16.msra.mxu2 %v8555_v9  ;;  %v8543_v33 = vor.u32 %v10493_v43, %v8540_v16  ;;  %v12362_v28 = vadd.f32 %v12246_v39, %v1614_v32  ;;  %v8522_v46 = vld [vmem:[#allocation11 + $0x68] sm:$0xf]  ;;  %v10491_v32 = vld [vmem:[#allocation11 + $0x74] sm:$0xf0]  ;;  %v12376_v37 = vmul.f32 %v12299_v11, %v1666_v63 }
 0x206   :  { %v12346_v1 = vpop.f32.mrf.mxu2  ;;  %2231 = vmatpush.bf16.msrb.mxu0 %v8531_v62  ;;  %v8523_v14 = vor.u32 %v10491_v32, %v8522_v46  ;;  %v10485_v46 = vld [vmem:[#allocation11 + $0x4c] sm:$0xf]  ;;  %v8508_v32 = vld [vmem:[#allocation11 + $0x58] sm:$0xf0]  ;;  %vm12403_vm10 = vcmp.eq.f32.partialorder %v1620_v42, 8.507059e+37 }
 0x207   :  { %11068 = vrcp.f32 %v12333_v44  ;;  %2272 = vmatpush.bf16.msra.mxu3 %v8559_v50  ;;  %v11067_v29 = vpop.eup %11066  ;;  %v8514_v50 = vld [vmem:[#allocation11 + $0x60] sm:$0xf]  ;;  %vm1568_vm15 = vweird.f32 %v12333_v44 }
 0x208   :  { %11070 = vpow2.f32 %v8329_v52  ;;  %v1596_v49 = vmul.f32 %v11067_v29, %v1513_v21  ;;  %v8515_v57 = vor.u32 %v10490_v27, %v8514_v50  ;;  %v8516_v21 = vld [vmem:[#allocation11 + $0x70] sm:$0xf0]  ;;  %v8498_v29 = vld [vmem:[#allocation11 + $0x40] sm:$0xf]  ;;  %v10487_v27 = vld [vmem:[#allocation11 + $0x54] sm:$0xf0] }
 0x209   :  { %v1464_v9 = vpop.f32.mrf.mxu3  ;;  %2245 = vmatpush.bf16.msrb.mxu1 %v8535_v61  ;;  %2259 = vmatpush.bf16.msra.mxu2 %v8539_v40  ;;  %v8519_v38 = vor.u32 %v10488_v10, %v8516_v21  ;;  %v8524_v61 = vld [vmem:[#allocation11 + $0x78] sm:$0xf0]  ;;  %v1629_v40 = vmul.f32 %v12291_v59, %v1628_v4  ;;  %v8500_v50 = vld [vmem:[#allocation11 + $0x50] sm:$0xf0]  ;;  %v8506_v4 = vld [vmem:[#allocation11 + $0x48] sm:$0xf] }
 0x20a   :  { %v1472_v52 = vadd.f32 %v1464_v9, %v960_v13  ;;  %v12371_v24 = vadd.f32 %v1596_v49, %v12259_v18  ;;  %v10489_v13 = vld [vmem:[#allocation11 + $0x6c] sm:$0xf]  ;;  %v10486_v18 = vld [vmem:[#allocation11 + $0x4c] sm:$0xf0]  ;;  %v10484_v9 = vld [vmem:[#allocation11 + $0x44] sm:$0xf]  ;;  %2232 = vmatpush.bf16.msrb.mxu0 %v8515_v57  ;;  %v8507_v21 = vor.u32 %v10487_v27, %v8506_v4  ;;  %v963_v4 = vunpack.c.l.bf16 %v12367_v15 }
 0x20b   :  { %2273 = vmatpush.bf16.msra.mxu3 %v8543_v33  ;;  %v8527_v16 = vor.u32 %v10489_v13, %v8524_v61  ;;  %v8499_v48 = vor.u32 %v10486_v18, %v8498_v29  ;;  %v8503_v57 = vor.u32 %v10484_v9, %v8500_v50  ;;  %v964_v61 = vunpack.c.h.bf16 %v12367_v15  ;;  %v8482_v18 = vld [vmem:[#allocation11 + $0x20] sm:$0xf]  ;;  %v10480_v9 = vld [vmem:[#allocation11 + $0x24] sm:$0xf]  ;;  %v8490_v50 = vld [vmem:[#allocation11 + $0x28] sm:$0xf] }
 0x20c   :  { %v8334_v62 = vmul.f32 -1.442695, %v1472_v52  ;;  %v959_v52 = vunpack.c.l.bf16 %v12327_v45  ;;  %v8511_v29 = vor.u32 %v10485_v46, %v8508_v32  ;;  %v10481_v32 = vld [vmem:[#allocation11 + $0x2c] sm:$0xf] }
 0x20d   :  { %v12373_v43 = vpop.eup %11068  ;;  %2246 = vmatpush.bf16.msrb.mxu1 %v8519_v38  ;;  %2260 = vmatpush.bf16.msra.mxu2 %v8523_v14 }
 0x20e   :  { %v11071_v49 = vpop.eup %11070  ;;  %v1564_v33 = vmul.f32 %v12373_v43, %v12333_v44  ;;  %11072 = vpow2.f32 %v8334_v62  ;;  %v1471_v13 = vadd.f32 %v12346_v1, %v959_v52  ;;  %v12408_v62 = vadd.f32 %v12291_v59, %v1629_v40  ;;  %2233 = vmatpush.bf16.msrb.mxu0 %v8499_v48  ;;  %v8484_v52 = vld [vmem:[#allocation11 + $0x30] sm:$0xf0]  ;;  %v10483_v40 = vld [vmem:[#allocation11 + $0x34] sm:$0xf0]  ;;  %v8466_v48 = vld [vmem:[#allocation11] sm:$0xf] }
 0x20f   :  { %v12390_v10 = vadd.f32 1.0, %v11071_v49  ;;  %2274 = vmatpush.bf16.msra.mxu3 %v8527_v16  ;;  %v10482_v49 = vld [vmem:[#allocation11 + $0x2c] sm:$0xf0]  ;;  %v8487_v46 = vor.u32 %v10480_v9, %v8484_v52  ;;  %vm1569_vm13 = vweird.f32 %v12373_v43  ;;  %v8491_v15 = vor.u32 %v10483_v40, %v8490_v50  ;;  %v10477_v52 = vld [vmem:[#allocation11 + $0xc] sm:$0xf] }
 0x210   :  { %v1565_v38 = vsub.f32 1.0, %v1564_v33  ;;  %v1452_v33 = vpop.f32.mrf.mxu2  ;;  %v8483_v27 = vor.u32 %v10482_v49, %v8482_v18  ;;  %v8468_v18 = vld [vmem:[#allocation11 + $0x10] sm:$0xf0]  ;;  %v8474_v49 = vld [vmem:[#allocation11 + $0x8] sm:$0xf]  ;;  %v1574_v9 = vand.u32 2147483648, %v12333_v44  ;;  %vm12441_vm1 = vmor %vm1568_vm15, %vm1569_vm13  ;;  %v1634_v7 = vsel %vm12433_vm0, %v12291_v59, %v12408_v62 }
 0x211   :  { %11074 = vrcp.f32 %v12390_v10  ;;  %v1466_v14 = vpop.f32.mrf.mxu3  ;;  %2247 = vmatpush.bf16.msrb.mxu1 %v8503_v57  ;;  %2261 = vmatpush.bf16.msra.mxu2 %v8507_v21  ;;  %v1475_v60 = vadd.f32 %v1452_v33, %v963_v4  ;;  %v10476_v21 = vld [vmem:[#allocation11 + $0x4] sm:$0xf]  ;;  %v8476_v40 = vld [vmem:[#allocation11 + $0x18] sm:$0xf0]  ;;  %vm1583_vm8 = vweird.f32 %v12390_v10 }
 0x212   :  { %v1566_v1 = vmul.f32 %v12373_v43, %v1565_v38  ;;  %v1476_v42 = vadd.f32 %v1466_v14, %v964_v61  ;;  %11076 = vtanh.f32 %v12330_v6  ;;  %v8492_v38 = vld [vmem:[#allocation11 + $0x38] sm:$0xf0]  ;;  %v10478_v14 = vld [vmem:[#allocation11 + $0xc] sm:$0xf0]  ;;  %2234 = vmatpush.bf16.msrb.mxu0 %v8483_v27 }
 0x213   :  { %11078 = vtanh.f32 %v1471_v13  ;;  %2275 = vmatpush.bf16.msra.mxu3 %v8511_v29  ;;  %v8495_v57 = vor.u32 %v10481_v32, %v8492_v38  ;;  %v10479_v29 = vld [vmem:[#allocation11 + $0x14] sm:$0xf0]  ;;  %v15173_v32 = vand.u32 2147483647, %v12186_v36 }
 0x214   :  { %v8335_v61 = vmul.f32 -1.442695, %v1476_v42  ;;  %v11073_v16 = vpop.eup %11072  ;;  %v1567_v63 = vadd.f32 %v12373_v43, %v1566_v1  ;;  %v8467_v42 = vor.u32 %v10478_v14, %v8466_v48  ;;  %v1572_v1 = vand.u32 2147483647, %v12333_v44 }
 0x215   :  { %v12424_v13 = vadd.f32 1.0, %v11073_v16  ;;  %2248 = vmatpush.bf16.msrb.mxu1 %v8487_v46  ;;  %2262 = vmatpush.bf16.msra.mxu2 %v8491_v15  ;;  %v8471_v16 = vor.u32 %v10476_v21, %v8468_v18  ;;  %v8475_v50 = vor.u32 %v10479_v29, %v8474_v49  ;;  %vm12449_vm2 = vcmp.eq.f32.partialorder %v15173_v32, 8.507059e+37 }
 0x216   :  { %11080 = vpow2.f32 %v8335_v61  ;;  %v1635_v46 = vand.u32 2147483647, %v12226_v34  ;;  %v1571_v44 = vsel %vm12441_vm1, %v12373_v43, %v1567_v63  ;;  %v1668_v48 = vadd.f32 %v12299_v11, %v12376_v37  ;;  %2235 = vmatpush.bf16.msrb.mxu0 %v8467_v42 }
 0x217   :  { %v12426_v0 = vpop.eup %11074  ;;  %11082 = vrcp.f32 %v12424_v13  ;;  %2276 = vmatpush.bf16.msra.mxu3 %v8495_v57  ;;  %v8479_v14 = vor.u32 %v10477_v52, %v8476_v40  ;;  %v1575_v15 = vor.u32 1.1754944e-38, %v1574_v9  ;;  %v15176_v18 = vsel %vm12353_vm5, %v12246_v39, %v12362_v28 }
 0x218   :  { %v1579_v27 = vmul.f32 %v12426_v0, %v12390_v10  ;;  %v11077_v61 = vpop.eup %11076  ;;  %11084 = vtanh.f32 %v1475_v60  ;;  %v1624_v57 = vsel %vm12403_vm10, %v12358_v3, %v15176_v18  ;;  %v1673_v60 = vand.u32 2147483647, %v12228_v26 }
 0x219   :  { %v11079_v36 = vpop.eup %11078  ;;  %vm1573_vm4 = vcmp.eq.f32.partialorder %v1572_v1, 8.507059e+37  ;;  %v15179_v39 = vsel %vm12396_vm9, %v12261_v5, %v12379_v8  ;;  %v15180_v3 = vand.u32 2147483648, %v12226_v34  ;;  %2249 = vmatpush.bf16.msrb.mxu1 %v8471_v16  ;;  %2263 = vmatpush.bf16.msra.mxu2 %v8475_v50  ;;  %11086 = vtanh.f32 %v12371_v24 }
 0x21a   :  { %v1580_v21 = vsub.f32 1.0, %v1579_v27  ;;  %v1662_v22 = vsel %vm12449_vm2, %v12248_v35, %v15179_v39  ;;  %v1589_v5 = vand.u32 2147483648, %v12390_v10  ;;  %v1576_v37 = vsel %vm1573_vm4, %v1575_v15, %v1571_v44 }
 0x21b   :  { %v1638_v28 = vor.u32 1.1754944e-38, %v15180_v3  ;;  %2277 = vmatpush.bf16.msra.mxu3 %v8479_v14  ;;  %vm1584_vm5 = vweird.f32 %v12426_v0  ;;  %v1587_v35 = vand.u32 2147483647, %v12390_v10  ;;  %vm1636_vm6 = vcmp.eq.f32.partialorder %v1635_v46, 8.507059e+37 }
 0x21c   :  { %v1581_v26 = vmul.f32 %v12426_v0, %v1580_v21  ;;  %v11081_v8 = vpop.eup %11080  ;;  %v1672_v34 = vsel %vm12472_vm3, %v12299_v11, %v1668_v48  ;;  %v1721_v45 = vmul.f32 %v11079_v36, %v1624_v57  ;;  %vm1674_vm7 = vcmp.eq.f32.partialorder %v1673_v60, 8.507059e+37  ;;  %vm1585_vm9 = vmor %vm1583_vm8, %vm1584_vm5 }
 0x21d   :  { %v11083_v59 = vpop.eup %11082  ;;  %v1688_v62 = vadd.f32 1.0, %v11081_v8  ;;  %v1601_v42 = vmul.f32 %v11077_v61, %v1576_v37  ;;  %v1590_v29 = vor.u32 1.1754944e-38, %v1589_v5  ;;  %v1719_v52 = vmul.f32 0.0, %v1662_v22 }
 0x21e   :  { %v1582_v63 = vadd.f32 %v12426_v0, %v1581_v26  ;;  %v11085_v49 = vpop.eup %11084  ;;  %v1690_v9 = vmul.f32 %v11083_v59, %v12424_v13  ;;  %v1639_v1 = vsel %vm1636_vm6, %v1638_v28, %v1634_v7  ;;  %vm1588_vm10 = vcmp.eq.f32.partialorder %v1587_v35, 8.507059e+37 }
 0x21f   :  { %11088 = vrcp.f32 %v1688_v62  ;;  %v1677_v11 = vsel %vm1674_vm7, %v12305_v23, %v1672_v34  ;;  %v11087_v50 = vpop.eup %11086  ;;  %v12504_v40 = vadd.f32 %v1721_v45, %v1719_v52  ;;  %v1722_v4 = vmul.f32 %v11085_v49, %v1639_v1  ;;  %v10538_v52 = vld [vmem:[#allocation10 + $0xec] sm:$0xf0]  ;;  %v10536_v1 = vld [vmem:[#allocation10 + $0xe4] sm:$0xf] }
 0x220   :  { %v1691_v33 = vsub.f32 1.0, %v1690_v9  ;;  %v1586_v16 = vsel %vm1585_vm9, %v12426_v0, %v1582_v63  ;;  %vm1695_vm11 = vweird.f32 %v11083_v59  ;;  %v1729_v38 = vpack.c.bf16 %v1601_v42, %v1601_v42 }
 0x221   :  { %v1591_v27 = vsel %vm1588_vm10, %v1590_v29, %v1586_v16  ;;  %vm1694_vm12 = vweird.f32 %v12424_v13  ;;  %v1700_v46 = vand.u32 2147483648, %v12424_v13  ;;  %v1720_v61 = vmul.f32 0.0, %v1677_v11  ;;  %v8720_v11 = vld [vmem:[#allocation10 + $0xf0] sm:$0xf0]  ;;  %v8726_v16 = vld [vmem:[#allocation10 + $0xe8] sm:$0xf] }
 0x222   :  { %v1692_v10 = vmul.f32 %v11083_v59, %v1691_v33  ;;  %v1602_v32 = vmul.f32 %v11087_v50, %v1591_v27  ;;  %v1698_v48 = vand.u32 2147483647, %v12424_v13  ;;  %11090 = vtanh.f32 %v12504_v40  ;;  %vm1696_vm13 = vmor %vm1694_vm12, %vm1695_vm11  ;;  %v10539_v50 = vld [vmem:[#allocation10 + $0xf4] sm:$0xf0] }
 0x223   :  { %v12510_v36 = vadd.f32 %v1722_v4, %v1720_v61  ;;  %v1802_v18 = vunpack.c.l.b16 %v1729_v38  ;;  %v1701_v43 = vor.u32 1.1754944e-38, %v1700_v46  ;;  %v1715_v13 = vand.u32 2147483648, %v1688_v62  ;;  %v8702_v46 = vld [vmem:[#allocation10 + $0xc0] sm:$0xf]  ;;  %v10534_v61 = vld [vmem:[#allocation10 + $0xcc] sm:$0xf0] }
 0x224   :  { %v1693_v44 = vadd.f32 %v11083_v59, %v1692_v10  ;;  %v1730_v23 = vpack.c.bf16 %v1602_v32, %v1602_v32  ;;  %v10927_v14 = vpack.c.bf16 %v1602_v32, %v1601_v42  ;;  %vm1699_vm14 = vcmp.eq.f32.partialorder %v1698_v48, 8.507059e+37  ;;  %v10537_v10 = vld [vmem:[#allocation10 + $0xec] sm:$0xf]  ;;  %v8728_v32 = vld [vmem:[#allocation10 + $0xf8] sm:$0xf0] }
 0x225   :  { %v11089_v0 = vpop.eup %11088  ;;  %11092 = vtanh.f32 %v12510_v36  ;;  %v1713_v3 = vand.u32 2147483647, %v1688_v62  ;;  %vm1709_vm0 = vweird.f32 %v1688_v62  ;;  %v1716_v37 = vor.u32 1.1754944e-38, %v1715_v13 }
 0x226   :  { %v1697_v15 = vsel %vm1696_vm13, %v11083_v59, %v1693_v44  ;;  %v1705_v21 = vmul.f32 %v11089_v0, %v1688_v62  ;;  %10928 = vst [vmem:[#allocation3 + $0x30] sm:$0xff] %v10927_v14   ;;  %v1803_v57 = vunpack.c.l.b16 %v1730_v23  ;;  %vm1710_vm15 = vweird.f32 %v11089_v0  ;;  %v8718_v62 = vld [vmem:[#allocation10 + $0xe0] sm:$0xf]  ;;  %v10532_v44 = vld [vmem:[#allocation10 + $0xc4] sm:$0xf] }
 0x227   :  { %v1702_v22 = vsel %vm1699_vm14, %v1701_v43, %v1697_v15  ;;  %vm1711_vm1 = vmor %vm1709_vm0, %vm1710_vm15  ;;  %vm1714_vm2 = vcmp.eq.f32.partialorder %v1713_v3, 8.507059e+37  ;;  %v8719_v33 = vor.u32 %v10538_v52, %v8718_v62  ;;  %v8723_v4 = vor.u32 %v10536_v1, %v8720_v11  ;;  %v8704_v23 = vld [vmem:[#allocation10 + $0xd0] sm:$0xf0]  ;;  %v8710_v14 = vld [vmem:[#allocation10 + $0xc8] sm:$0xf] }
 0x228   :  { %v1706_v60 = vsub.f32 1.0, %v1705_v21  ;;  %v1804_v39 = vpack.c.b16 %v1803_v57, %v1802_v18  ;;  %v11091_v28 = vpop.eup %11090  ;;  %v8727_v27 = vor.u32 %v10539_v50, %v8726_v16  ;;  %v8731_v38 = vor.u32 %v10537_v10, %v8728_v32  ;;  %v10533_v18 = vld [vmem:[#allocation10 + $0xcc] sm:$0xf]  ;;  %v8712_v57 = vld [vmem:[#allocation10 + $0xd8] sm:$0xf0] }
 0x229   :  { %v1727_v5 = vmul.f32 %v11091_v28, %v1702_v22  ;;  %v8703_v48 = vor.u32 %v10534_v61, %v8702_v46  ;;  %v8707_v15 = vor.u32 %v10532_v44, %v8704_v23  ;;  %v8715_v43 = vor.u32 %v10533_v18, %v8712_v57  ;;  %v10530_v3 = vld [vmem:[#allocation10 + $0xac] sm:$0xf0]  ;;  %v10528_v28 = vld [vmem:[#allocation10 + $0xa4] sm:$0xf]  ;;  %v8670_v32 = vld [vmem:[#allocation10 + $0x80] sm:$0xf] }
 0x22a   :  { %v1707_v7 = vmul.f32 %v11089_v0, %v1706_v60  ;;  %1974 = vmatmul.bf16.vlgmr.msra.gmra.mxu0 %v1804_v39  ;;  %1988 = vmatmul.bf16.vlgmr.msra.gmra.mxu1 %v1804_v39  ;;  %v1745_v60 = vunpack.c.l.bf16 %v11901_v2  ;;  %v1748_v62 = vunpack.c.h.bf16 %v11977_v30  ;;  %v10526_v44 = vld [vmem:[#allocation10 + $0x8c] sm:$0xf0]  ;;  %v8678_v18 = vld [vmem:[#allocation10 + $0x88] sm:$0xf]  ;;  %v10527_v57 = vld [vmem:[#allocation10 + $0x94] sm:$0xf0] }
 0x22b   :  { %2002 = vmatmul.bf16.vlgmr.msrb.gmra.mxu2 %v1804_v39  ;;  %2016 = vmatmul.bf16.vlgmr.msrb.gmra.mxu3 %v1804_v39  ;;  %v11093_v35 = vpop.eup %11092  ;;  %v1731_v63 = vpack.c.bf16 %v1727_v5, %v1727_v5  ;;  %v1746_v39 = vunpack.c.h.bf16 %v11901_v2  ;;  %v8671_v23 = vor.u32 %v10526_v44, %v8670_v32 }
 0x22c   :  { %v1708_v26 = vadd.f32 %v11089_v0, %v1707_v7  ;;  %2782 = vmatpush.bf16.msra.mxu0 %v8719_v33  ;;  %2796 = vmatpush.bf16.msra.mxu1 %v8723_v4  ;;  %v8686_v7 = vld [vmem:[#allocation10 + $0xa0] sm:$0xf] }
 0x22d   :  { %v2064_v9 = vunpack.c.l.b16 %v1731_v63  ;;  %2810 = vmatpush.bf16.msrb.mxu2 %v8727_v27  ;;  %2824 = vmatpush.bf16.msrb.mxu3 %v8731_v38 }
 0x22e   :  { %v1712_v8 = vsel %vm1711_vm1, %v11089_v0, %v1708_v26  ;;  %v10535_v0 = vld [vmem:[#allocation10 + $0xd4] sm:$0xf0] }
 0x22f   :  { %v1717_v34 = vsel %vm1714_vm2, %v1716_v37, %v1712_v8  ;;  %v8711_v21 = vor.u32 %v10535_v0, %v8710_v14  ;;  %v8687_v37 = vor.u32 %v10530_v3, %v8686_v7  ;;  %v8688_v8 = vld [vmem:[#allocation10 + $0xb0] sm:$0xf0]  ;;  %v10524_v14 = vld [vmem:[#allocation10 + $0x84] sm:$0xf]  ;;  %v12525_v0 = vpack.c.bf16 %v12081_v51, %v12085_v25  ;;  %v8654_v3 = vld [vmem:[#allocation10 + $0x60] sm:$0xf] }
 0x230   :  { %v1728_v59 = vmul.f32 %v11093_v35, %v1717_v34  ;;  %2783 = vmatpush.bf16.msra.mxu0 %v8703_v48  ;;  %2797 = vmatpush.bf16.msra.mxu1 %v8707_v15  ;;  %v8694_v35 = vld [vmem:[#allocation10 + $0xa8] sm:$0xf]  ;;  %v10531_v34 = vld [vmem:[#allocation10 + $0xb4] sm:$0xf0]  ;;  %v1752_v7 = vunpack.c.h.bf16 %v11983_v58  ;;  %v10522_v25 = vld [vmem:[#allocation10 + $0x6c] sm:$0xf0] }
 0x231   :  { %2811 = vmatpush.bf16.msrb.mxu2 %v8711_v21  ;;  %2825 = vmatpush.bf16.msrb.mxu3 %v8715_v43  ;;  %v8695_v63 = vor.u32 %v10531_v34, %v8694_v35  ;;  %v8672_v21 = vld [vmem:[#allocation10 + $0x90] sm:$0xf0]  ;;  %v1747_v43 = vunpack.c.l.bf16 %v11977_v30  ;;  %v10520_v51 = vld [vmem:[#allocation10 + $0x64] sm:$0xf]  ;;  %v8679_v35 = vor.u32 %v10527_v57, %v8678_v18 }
 0x232   :  { %v1732_v45 = vpack.c.bf16 %v1728_v59, %v1728_v59  ;;  %v10932_v49 = vpack.c.bf16 %v1728_v59, %v1727_v5  ;;  %v8691_v59 = vor.u32 %v10528_v28, %v8688_v8  ;;  %v8675_v8 = vor.u32 %v10524_v14, %v8672_v21  ;;  %v8656_v34 = vld [vmem:[#allocation10 + $0x70] sm:$0xf0] }
 0x234   :  { %10933 = vst [vmem:[#allocation4 + $0x38] sm:$0xff] %v10932_v49   ;;  %v2065_v42 = vunpack.c.l.b16 %v1732_v45  ;;  %v10529_v45 = vld [vmem:[#allocation10 + $0xac] sm:$0xf]  ;;  %v8696_v49 = vld [vmem:[#allocation10 + $0xb8] sm:$0xf0]  ;;  %2784 = vmatpush.bf16.msra.mxu0 %v8687_v37  ;;  %2798 = vmatpush.bf16.msra.mxu1 %v8691_v59 }
 0x235   :  { %2812 = vmatpush.bf16.msrb.mxu2 %v8695_v63  ;;  %v1761_v63 = vunpack.c.h.bf16 %v12043_v56 }
 0x236   :  { %v2066_v29 = vpack.c.b16 %v2065_v42, %v2064_v9  ;;  %v819_v9 = vpack.c.bf16 %v11915_v55, %v11913_v53 }
 0x238   :  { %v1749_v1 = vunpack.c.l.bf16 %v819_v9  ;;  %v1750_v33 = vunpack.c.h.bf16 %v819_v9  ;;  %2785 = vmatpush.bf16.msra.mxu0 %v8671_v23  ;;  %2799 = vmatpush.bf16.msra.mxu1 %v8675_v8 }
 0x239   :  { %2813 = vmatpush.bf16.msrb.mxu2 %v8679_v35 }
 0x23a   :  { %2236 = vmatmul.bf16.vlgmr.msrb.gmra.mxu0 %v2066_v29  ;;  %2250 = vmatmul.bf16.vlgmr.msrb.gmra.mxu1 %v2066_v29 }
 0x23b   :  { %2264 = vmatmul.bf16.vlgmr.msra.gmra.mxu2 %v2066_v29  ;;  %2278 = vmatmul.bf16.vlgmr.msra.gmra.mxu3 %v2066_v29  ;;  %v8699_v29 = vor.u32 %v10529_v45, %v8696_v49  ;;  %v1764_v45 = vunpack.c.l.bf16 %v12525_v0 }
 0x23d   :  { %2826 = vmatpush.bf16.msrb.mxu3 %v8699_v29 }
 0x2a7   :  { %v1975_v13 = vpop.f32.mrf.mxu0  ;;  %v1989_v22 = vpop.f32.mrf.mxu1 }
 0x2a8   :  { %v2022_v26 = vadd.f32 %v1975_v13, %v1745_v60  ;;  %v2023_v5 = vadd.f32 %v1989_v22, %v1746_v39  ;;  %v10525_v39 = vld [vmem:[#allocation10 + $0x8c] sm:$0xf]  ;;  %v8680_v13 = vld [vmem:[#allocation10 + $0x98] sm:$0xf0]  ;;  %v1751_v22 = vunpack.c.l.bf16 %v11983_v58 }
 0x2a9   :  { %v8683_v49 = vor.u32 %v10525_v39, %v8680_v13 }
 0x2aa   :  { %v8592_v2 = vmul.f32 -1.442695, %v2022_v26  ;;  %v8594_v42 = vmul.f32 -1.442695, %v2023_v5  ;;  %v1760_v5 = vunpack.c.l.bf16 %v12043_v56  ;;  %v1763_v56 = vunpack.c.h.bf16 %v12136_v17 }
 0x2ab   :  { %2827 = vmatpush.bf16.msrb.mxu3 %v8683_v49 }
 0x2ac   :  { %11094 = vpow2.f32 %v8592_v2 }
 0x2ad   :  { %11096 = vpow2.f32 %v8594_v42 }
 0x2ae   :  { %v2017_v52 = vpop.f32.mrf.mxu3  ;;  %v2003_v15 = vpop.f32.mrf.mxu2 }
 0x2af   :  { %v2025_v11 = vadd.f32 %v2017_v52, %v1748_v62  ;;  %v1977_v16 = vpop.f32.mrf.mxu0  ;;  %v1991_v50 = vpop.f32.mrf.mxu1  ;;  %v2024_v26 = vadd.f32 %v2003_v15, %v1747_v43  ;;  %v8655_v62 = vor.u32 %v10522_v25, %v8654_v3  ;;  %v8659_v52 = vor.u32 %v10520_v51, %v8656_v34 }
 0x2b0   :  { %v2026_v4 = vadd.f32 %v1977_v16, %v1749_v1  ;;  %v2027_v27 = vadd.f32 %v1991_v50, %v1750_v33  ;;  %v12543_v50 = vpack.c.bf16 %v12152_v31, %v12149_v47 }
 0x2b1   :  { %v8596_v53 = vmul.f32 -1.442695, %v2025_v11  ;;  %2786 = vmatpush.bf16.msra.mxu0 %v8655_v62  ;;  %2800 = vmatpush.bf16.msra.mxu1 %v8659_v52 }
 0x2b2   :  { %v11095_v55 = vpop.eup %11094  ;;  %v8593_v10 = vmul.f32 -1.442695, %v2026_v4  ;;  %v8595_v61 = vmul.f32 -1.442695, %v2027_v27 }
 0x2b3   :  { %v11097_v38 = vpop.eup %11096  ;;  %v12518_v46 = vadd.f32 1.0, %v11095_v55  ;;  %11098 = vpow2.f32 %v8596_v53 }
 0x2b4   :  { %v12520_v48 = vadd.f32 1.0, %v11097_v38  ;;  %11100 = vpow2.f32 %v8593_v10 }
 0x2b5   :  { %11102 = vrcp.f32 %v12518_v46  ;;  %v2309_v27 = vand.u32 2147483647, %v12518_v46  ;;  %vm2305_vm5 = vweird.f32 %v12518_v46 }
 0x2b6   :  { %11104 = vrcp.f32 %v12520_v48  ;;  %v2019_v60 = vpop.f32.mrf.mxu3  ;;  %v2349_v38 = vand.u32 2147483648, %v12520_v48  ;;  %v2347_v14 = vand.u32 2147483647, %v12520_v48  ;;  %vm2343_vm6 = vweird.f32 %v12520_v48  ;;  %v2005_v57 = vpop.f32.mrf.mxu2 }
 0x2b7   :  { %11106 = vpow2.f32 %v8595_v61  ;;  %v2237_v37 = vpop.f32.mrf.mxu0  ;;  %v2029_v42 = vadd.f32 %v2019_v60, %v1752_v7  ;;  %v2251_v29 = vpop.f32.mrf.mxu1  ;;  %v2311_v61 = vand.u32 2147483648, %v12518_v46  ;;  %vm2310_vm7 = vcmp.eq.f32.partialorder %v2309_v27, 8.507059e+37 }
 0x2b8   :  { %v2284_v11 = vadd.f32 %v2237_v37, %v1760_v5  ;;  %v2285_v10 = vadd.f32 %v2251_v29, %v1761_v63  ;;  %v2350_v39 = vor.u32 1.1754944e-38, %v2349_v38  ;;  %vm2348_vm10 = vcmp.eq.f32.partialorder %v2347_v14, 8.507059e+37 }
 0x2b9   :  { %v11099_v28 = vpop.eup %11098  ;;  %v8597_v44 = vmul.f32 -1.442695, %v2029_v42  ;;  %v2312_v13 = vor.u32 1.1754944e-38, %v2311_v61  ;;  %v2028_v34 = vadd.f32 %v2005_v57, %v1751_v22  ;;  %v1762_v29 = vunpack.c.l.bf16 %v12136_v17 }
 0x2ba   :  { %v11101_v30 = vpop.eup %11100  ;;  %v12532_v59 = vadd.f32 1.0, %v11099_v28  ;;  %v8598_v31 = vmul.f32 -1.442695, %v2284_v11  ;;  %v8600_v43 = vmul.f32 -1.442695, %v2285_v10 }
 0x2bb   :  { %v11103_v9 = vpop.eup %11102  ;;  %v12536_v2 = vadd.f32 1.0, %v11101_v30 }
 0x2bc   :  { %v11105_v1 = vpop.eup %11104  ;;  %v2301_v33 = vmul.f32 %v11103_v9, %v12518_v46  ;;  %11108 = vrcp.f32 %v12532_v59  ;;  %vm2306_vm3 = vweird.f32 %v11103_v9  ;;  %vm2383_vm2 = vweird.f32 %v12532_v59 }
 0x2bd   :  { %v11107_v16 = vpop.eup %11106  ;;  %v2339_v4 = vmul.f32 %v11105_v1, %v12520_v48  ;;  %11110 = vtanh.f32 %v2024_v26  ;;  %vm2344_vm4 = vweird.f32 %v11105_v1  ;;  %vm2307_vm8 = vmor %vm2305_vm5, %vm2306_vm3  ;;  %vm2320_vm11 = vweird.f32 %v12536_v2 }
 0x2be   :  { %v2302_v53 = vsub.f32 1.0, %v2301_v33  ;;  %11112 = vrcp.f32 %v12536_v2  ;;  %v12548_v55 = vadd.f32 1.0, %v11107_v16  ;;  %v2279_v15 = vpop.f32.mrf.mxu3  ;;  %vm2345_vm9 = vmor %vm2343_vm6, %vm2344_vm4 }
 0x2bf   :  { %v2340_v32 = vsub.f32 1.0, %v2339_v4  ;;  %v2287_v48 = vadd.f32 %v2279_v15, %v1763_v56  ;;  %v2239_v5 = vpop.f32.mrf.mxu0  ;;  %v2389_v56 = vand.u32 2147483648, %v12532_v59  ;;  %v1767_v4 = vunpack.c.h.bf16 %v12543_v50  ;;  %v8638_v15 = vld [vmem:[#allocation10 + $0x40] sm:$0xf] }
 0x2c0   :  { %v2303_v47 = vmul.f32 %v11103_v9, %v2302_v53  ;;  %11114 = vrcp.f32 %v12548_v55  ;;  %v2288_v52 = vadd.f32 %v2239_v5, %v1764_v45  ;;  %v2253_v45 = vpop.f32.mrf.mxu1  ;;  %vm2358_vm14 = vweird.f32 %v12548_v55 }
 0x2c1   :  { %v2341_v23 = vmul.f32 %v11105_v1, %v2340_v32  ;;  %11116 = vpow2.f32 %v8597_v44  ;;  %v8602_v62 = vmul.f32 -1.442695, %v2287_v48  ;;  %v2265_v32 = vpop.f32.mrf.mxu2 }
 0x2c2   :  { %v12555_v21 = vpop.eup %11108  ;;  %v2304_v18 = vadd.f32 %v11103_v9, %v2303_v47  ;;  %11118 = vpow2.f32 %v8598_v31  ;;  %v8599_v16 = vmul.f32 -1.442695, %v2288_v52  ;;  %v2364_v31 = vand.u32 2147483648, %v12548_v55 }
 0x2c3   :  { %v11111_v60 = vpop.eup %11110  ;;  %v2342_v7 = vadd.f32 %v11105_v1, %v2341_v23  ;;  %v2379_v25 = vmul.f32 %v12555_v21, %v12532_v59  ;;  %11120 = vpow2.f32 %v8600_v43  ;;  %v2324_v23 = vand.u32 2147483647, %v12536_v2 }
 0x2c4   :  { %v12559_v3 = vpop.eup %11112  ;;  %v2308_v46 = vsel %vm2307_vm8, %v11103_v9, %v2304_v18  ;;  %v1765_v9 = vunpack.c.h.bf16 %v12525_v0  ;;  %11122 = vtanh.f32 %v2028_v34  ;;  %v2326_v0 = vand.u32 2147483648, %v12536_v2 }
 0x2c5   :  { %v2313_v51 = vsel %vm2310_vm7, %v2312_v13, %v2308_v46  ;;  %v2346_v28 = vsel %vm2345_vm9, %v11105_v1, %v2342_v7  ;;  %v2316_v26 = vmul.f32 %v12559_v3, %v12536_v2  ;;  %v2380_v42 = vsub.f32 1.0, %v2379_v25 }
 0x2c6   :  { %v12566_v37 = vpop.eup %11114  ;;  %v2351_v8 = vsel %vm2348_vm10, %v2350_v39, %v2346_v28  ;;  %v2410_v35 = vmul.f32 %v11111_v60, %v2313_v51  ;;  %vm2321_vm12 = vweird.f32 %v12559_v3  ;;  %11124 = vpow2.f32 %v8602_v62 }
 0x2c7   :  { %v2408_v30 = vmul.f32 %v2351_v8, %v12330_v6  ;;  %v2317_v63 = vsub.f32 1.0, %v2316_v26  ;;  %v2354_v49 = vmul.f32 %v12566_v37, %v12548_v55  ;;  %v11117_v1 = vpop.eup %11116  ;;  %v1766_v6 = vunpack.c.l.bf16 %v12543_v50  ;;  %vm12604_vm15 = vmor %vm2320_vm11, %vm2321_vm12 }
 0x2c8   :  { %v11119_v11 = vpop.eup %11118  ;;  %v2381_v53 = vmul.f32 %v12555_v21, %v2380_v42  ;;  %vm2359_vm13 = vweird.f32 %v12566_v37  ;;  %v12591_v61 = vadd.f32 1.0, %v11117_v1  ;;  %11126 = vpow2.f32 %v8599_v16 }
 0x2c9   :  { %v12577_v33 = vadd.f32 %v2410_v35, %v2408_v30  ;;  %v2355_v58 = vsub.f32 1.0, %v2354_v49  ;;  %v2318_v22 = vmul.f32 %v12559_v3, %v2317_v63  ;;  %v11121_v27 = vpop.eup %11120  ;;  %v12593_v44 = vadd.f32 1.0, %v11119_v11  ;;  %vm12616_vm1 = vmor %vm2358_vm14, %vm2359_vm13  ;;  %v10523_v11 = vld [vmem:[#allocation10 + $0x74] sm:$0xf0] }
 0x2ca   :  { %v12595_v47 = vadd.f32 1.0, %v11121_v27  ;;  %v2289_v14 = vadd.f32 %v2253_v45, %v1765_v9  ;;  %v2362_v18 = vand.u32 2147483647, %v12548_v55  ;;  %v2286_v57 = vadd.f32 %v2265_v32, %v1762_v29  ;;  %v11123_v43 = vpop.eup %11122  ;;  %v8664_v32 = vld [vmem:[#allocation10 + $0x78] sm:$0xf0] }
 0x2cb   :  { %v2356_v17 = vmul.f32 %v12566_v37, %v2355_v58  ;;  %v2319_v10 = vadd.f32 %v12559_v3, %v2318_v22  ;;  %11128 = vrcp.f32 %v12593_v44  ;;  %v12611_v60 = vadd.f32 %v12555_v21, %v2381_v53  ;;  %v2281_v58 = vpop.f32.mrf.mxu3  ;;  %v8662_v22 = vld [vmem:[#allocation10 + $0x68] sm:$0xf] }
 0x2cc   :  { %vm2384_vm0 = vweird.f32 %v12555_v21  ;;  %11130 = vrcp.f32 %v12595_v47  ;;  %v2327_v55 = vor.u32 1.1754944e-38, %v2326_v0  ;;  %v2404_v7 = vand.u32 2147483648, %v12591_v61  ;;  %v11125_v46 = vpop.eup %11124 }
 0x2cd   :  { %v2357_v38 = vadd.f32 %v12566_v37, %v2356_v17  ;;  %v2323_v2 = vsel %vm12604_vm15, %v12559_v3, %v2319_v10  ;;  %v2365_v25 = vor.u32 1.1754944e-38, %v2364_v31  ;;  %vm2325_vm3 = vcmp.eq.f32.partialorder %v2324_v23, 8.507059e+37  ;;  %vm12630_vm4 = vmor %vm2383_vm2, %vm2384_vm0 }
 0x2ce   :  { %11132 = vrcp.f32 %v12591_v61  ;;  %v8601_v48 = vmul.f32 -1.442695, %v2289_v14  ;;  %v2387_v3 = vand.u32 2147483647, %v12532_v59  ;;  %v2328_v28 = vsel %vm2325_vm3, %v2327_v55, %v2323_v2  ;;  %v11127_v26 = vpop.eup %11126  ;;  %v8640_v55 = vld [vmem:[#allocation10 + $0x50] sm:$0xf0] }
 0x2cf   :  { %v2361_v13 = vsel %vm12616_vm1, %v12566_v37, %v2357_v38  ;;  %vm2363_vm5 = vcmp.eq.f32.partialorder %v2362_v18, 8.507059e+37  ;;  %11134 = vtanh.f32 %v2286_v57  ;;  %v2386_v5 = vsel %vm12630_vm4, %v12555_v21, %v12611_v60  ;;  %v10518_v18 = vld [vmem:[#allocation10 + $0x4c] sm:$0xf0]  ;;  %v10516_v57 = vld [vmem:[#allocation10 + $0x44] sm:$0xf] }
 0x2d0   :  { %11136 = vtanh.f32 %v12577_v33  ;;  %v12640_v37 = vor.u32 1.1754944e-38, %v2389_v56  ;;  %v2366_v8 = vsel %vm2363_vm5, %v2365_v25, %v2361_v13  ;;  %v2402_v34 = vand.u32 2147483647, %v12591_v61  ;;  %v8646_v13 = vld [vmem:[#allocation10 + $0x48] sm:$0xf] }
 0x2d1   :  { %v12642_v35 = vpop.eup %11128  ;;  %v12645_v30 = vor.u32 1.1754944e-38, %v2404_v7  ;;  %v2475_v63 = vand.u32 2147483648, %v12595_v47  ;;  %v12648_v49 = vadd.f32 1.0, %v11125_v46  ;;  %v2411_v42 = vmul.f32 %v11123_v43, %v2328_v28  ;;  %v10519_v7 = vld [vmem:[#allocation10 + $0x54] sm:$0xf0] }
 0x2d2   :  { %v12650_v9 = vpop.eup %11130  ;;  %v2427_v29 = vmul.f32 %v12642_v35, %v12593_v44  ;;  %v12654_v62 = vadd.f32 1.0, %v11127_v26  ;;  %11138 = vpow2.f32 %v8601_v48  ;;  %v2409_v52 = vmul.f32 %v2366_v8, %v12371_v24  ;;  %v10521_v24 = vld [vmem:[#allocation10 + $0x6c] sm:$0xf]  ;;  %v12728_v25 = vld [vmem:[#allocation10 + $0x4] sm:$0xf] }
 0x2d3   :  { %v2465_v1 = vmul.f32 %v12650_v9, %v12595_v47  ;;  %vm2469_vm6 = vweird.f32 %v12595_v47  ;;  %vm2431_vm7 = vweird.f32 %v12593_v44  ;;  %v2435_v17 = vand.u32 2147483647, %v12593_v44 }
 0x2d4   :  { %v12661_v56 = vpop.eup %11132  ;;  %v2428_v16 = vsub.f32 1.0, %v2427_v29  ;;  %v2437_v0 = vand.u32 2147483648, %v12593_v44  ;;  %11140 = vrcp.f32 %v12654_v62  ;;  %v2476_v53 = vor.u32 1.1754944e-38, %v2475_v63  ;;  %v2267_v29 = vpop.f32.mrf.mxu2 }
 0x2d5   :  { %v11135_v45 = vpop.eup %11134  ;;  %v2466_v27 = vsub.f32 1.0, %v2465_v1  ;;  %v2473_v10 = vand.u32 2147483647, %v12595_v47  ;;  %11142 = vrcp.f32 %v12648_v49  ;;  %vm2432_vm8 = vweird.f32 %v12642_v35  ;;  %v10517_v1 = vld [vmem:[#allocation10 + $0x4c] sm:$0xf] }
 0x2d6   :  { %v12668_v38 = vpop.eup %11136  ;;  %v2429_v31 = vmul.f32 %v12642_v35, %v2428_v16  ;;  %v2291_v23 = vadd.f32 %v2281_v58, %v1767_v4  ;;  %v8663_v14 = vor.u32 %v10523_v11, %v8662_v22  ;;  %v12674_v43 = vadd.f32 %v2411_v42, %v2409_v52  ;;  %vm12691_vm11 = vmor %vm2431_vm7, %vm2432_vm8  ;;  %v8648_v58 = vld [vmem:[#allocation10 + $0x58] sm:$0xf0] }
 0x2d7   :  { %v12678_v39 = vmul.f32 %v12661_v56, %v12591_v61  ;;  %v2467_v2 = vmul.f32 %v12650_v9, %v2466_v27  ;;  %vm2470_vm9 = vweird.f32 %v12650_v9  ;;  %vm12683_vm10 = vcmp.eq.f32.partialorder %v2435_v17, 8.507059e+37 }
 0x2d8   :  { %v11139_v46 = vpop.eup %11138  ;;  %v2430_v4 = vadd.f32 %v12642_v35, %v2429_v31  ;;  %v8603_v48 = vmul.f32 -1.442695, %v2291_v23  ;;  %2814 = vmatpush.bf16.msrb.mxu2 %v8663_v14  ;;  %v8667_v28 = vor.u32 %v10521_v24, %v8664_v32  ;;  %v2438_v8 = vor.u32 1.1754944e-38, %v2437_v0  ;;  %vm12704_vm12 = vmor %vm2469_vm6, %vm2470_vm9  ;;  %v8622_v0 = vld [vmem:[#allocation10 + $0x20] sm:$0xf] }
 0x2d9   :  { %v2468_v63 = vadd.f32 %v12650_v9, %v2467_v2  ;;  %v12696_v42 = vadd.f32 1.0, %v11139_v46  ;;  %v8639_v52 = vor.u32 %v10518_v18, %v8638_v15  ;;  %v8643_v16 = vor.u32 %v10516_v57, %v8640_v55  ;;  %v10514_v24 = vld [vmem:[#allocation10 + $0x2c] sm:$0xf0]  ;;  %v8624_v23 = vld [vmem:[#allocation10 + $0x30] sm:$0xf0] }
 0x2da   :  { %v12698_v22 = vpop.eup %11140  ;;  %v2434_v11 = vsel %vm12691_vm11, %v12642_v35, %v2430_v4  ;;  %11144 = vpow2.f32 %v8603_v48  ;;  %2828 = vmatpush.bf16.msrb.mxu3 %v8667_v28  ;;  %v8647_v17 = vor.u32 %v10519_v7, %v8646_v13  ;;  %vm2474_vm13 = vcmp.eq.f32.partialorder %v2473_v10, 8.507059e+37  ;;  %v10512_v35 = vld [vmem:[#allocation10 + $0x24] sm:$0xf]  ;;  %v8630_v14 = vld [vmem:[#allocation10 + $0x28] sm:$0xf] }
 0x2db   :  { %v12711_v27 = vpop.eup %11142  ;;  %v2439_v32 = vsel %vm12683_vm10, %v2438_v8, %v2434_v11  ;;  %v2472_v47 = vsel %vm12704_vm12, %v12650_v9, %v2468_v63  ;;  %v2442_v31 = vmul.f32 %v12698_v22, %v12654_v62  ;;  %2787 = vmatpush.bf16.msra.mxu0 %v8639_v52  ;;  %v10515_v15 = vld [vmem:[#allocation10 + $0x34] sm:$0xf0]  ;;  %v12720_v18 = vld [vmem:[#allocation10 + $0x2c] sm:$0xf]  ;;  %11146 = vrcp.f32 %v12696_v42  ;;  %2801 = vmatpush.bf16.msra.mxu1 %v8643_v16  ;;  %v8632_v9 = vld [vmem:[#allocation10 + $0x38] sm:$0xf0] }
 0x2dc   :  { %v2477_v57 = vsel %vm2474_vm13, %v2476_v53, %v2472_v47  ;;  %v2536_v2 = vmul.f32 %v11135_v45, %v2439_v32  ;;  %v2290_v55 = vadd.f32 %v2267_v29, %v1766_v6  ;;  %2815 = vmatpush.bf16.msrb.mxu2 %v8647_v17  ;;  %v8606_v10 = vld [vmem:[#allocation10] sm:$0xf]  ;;  %v10510_v13 = vld [vmem:[#allocation10 + $0xc] sm:$0xf0]  ;;  %11148 = vtanh.f32 %v12674_v43  ;;  %v12730_v45 = vld [vmem:[#allocation10 + $0x10] sm:$0xf0] }
 0x2dd   :  { %v2395_v7 = vsub.f32 1.0, %v12678_v39  ;;  %v2534_v46 = vmul.f32 %v2477_v57, %v12504_v40  ;;  %v2443_v4 = vsub.f32 1.0, %v2442_v31  ;;  %v2513_v53 = vand.u32 2147483647, %v12648_v49  ;;  %v8614_v28 = vld [vmem:[#allocation10 + $0x8] sm:$0xf] }
 0x2de   :  { %v2450_v50 = vand.u32 2147483647, %v12654_v62  ;;  %v8651_v6 = vor.u32 %v10517_v1, %v8648_v58  ;;  %v8623_v48 = vor.u32 %v10514_v24, %v8622_v0  ;;  %v12738_v8 = vmul.f32 %v12711_v27, %v12648_v49  ;;  %v10511_v39 = vld [vmem:[#allocation10 + $0x14] sm:$0xf0]  ;;  %v12742_v63 = vld [vmem:[#allocation10 + $0xc] sm:$0xf] }
 0x2df   :  { %v12734_v26 = vadd.f32 %v2536_v2, %v2534_v46  ;;  %v2444_v40 = vmul.f32 %v12698_v22, %v2443_v4  ;;  %vm2447_vm14 = vweird.f32 %v12698_v22  ;;  %v12744_v29 = vld [vmem:[#allocation10 + $0x18] sm:$0xf0]  ;;  %v2452_v1 = vand.u32 2147483648, %v12654_v62  ;;  %v8846_v16 = vld [vmem:[#allocation11 + $0xe0] sm:$0xf] }
 0x2e0   :  { %v11145_v52 = vpop.eup %11144  ;;  %2829 = vmatpush.bf16.msrb.mxu3 %v8651_v6  ;;  %2788 = vmatpush.bf16.msra.mxu0 %v8623_v48  ;;  %v8627_v58 = vor.u32 %v10512_v35, %v8624_v23  ;;  %v8631_v44 = vor.u32 %v10515_v15, %v8630_v14  ;;  %v8635_v11 = vor.u32 %v12720_v18, %v8632_v9  ;;  %v10570_v17 = vld [vmem:[#allocation11 + $0xec] sm:$0xf0]  ;;  %v10568_v0 = vld [vmem:[#allocation11 + $0xe4] sm:$0xf]  ;;  %v8848_v24 = vld [vmem:[#allocation11 + $0xf0] sm:$0xf0]  ;;  %vm2446_vm15 = vweird.f32 %v12654_v62 }
 0x2e1   :  { %v2445_v32 = vadd.f32 %v12698_v22, %v2444_v40  ;;  %v12750_v47 = vadd.f32 1.0, %v11145_v52  ;;  %v8607_v31 = vor.u32 %v10510_v13, %v8606_v10  ;;  %v8854_v57 = vld [vmem:[#allocation11 + $0xe8] sm:$0xf]  ;;  %v10571_v2 = vld [vmem:[#allocation11 + $0xf4] sm:$0xf0]  ;;  %v12752_v46 = vpop.eup %11146  ;;  %vm2398_vm0 = vweird.f32 %v12591_v61  ;;  %vm12758_vm1 = vmor %vm2446_vm15, %vm2447_vm14 }
 0x2e2   :  { %v2515_v35 = vand.u32 2147483648, %v12648_v49  ;;  %11150 = vtanh.f32 %v2290_v55  ;;  %2802 = vmatpush.bf16.msra.mxu1 %v8627_v58  ;;  %2816 = vmatpush.bf16.msrb.mxu2 %v8631_v44  ;;  %v8611_v62 = vor.u32 %v12728_v25, %v12730_v45  ;;  %v8615_v14 = vor.u32 %v10511_v39, %v8614_v28  ;;  %v10569_v15 = vld [vmem:[#allocation11 + $0xec] sm:$0xf]  ;;  %v8856_v18 = vld [vmem:[#allocation11 + $0xf8] sm:$0xf0]  ;;  %v12764_v9 = vpop.eup %11148 }
 0x2e3   :  { %vm12768_vm2 = vcmp.eq.f32.partialorder %v2387_v3, 8.507059e+37  ;;  %v2396_v13 = vmul.f32 %v12661_v56, %v2395_v7  ;;  %v2480_v55 = vmul.f32 %v12752_v46, %v12696_v42  ;;  %v2449_v4 = vsel %vm12758_vm1, %v12698_v22, %v2445_v32  ;;  %v8830_v25 = vld [vmem:[#allocation11 + $0xc0] sm:$0xf]  ;;  %v10566_v45 = vld [vmem:[#allocation11 + $0xcc] sm:$0xf0] }
 0x2e4   :  { %11152 = vrcp.f32 %v12750_v47  ;;  %v10564_v6 = vld [vmem:[#allocation11 + $0xc4] sm:$0xf]  ;;  %vm12781_vm3 = vcmp.eq.f32.partialorder %v2402_v34, 8.507059e+37  ;;  %v2506_v3 = vsub.f32 1.0, %v12738_v8  ;;  %vm2451_vm5 = vcmp.eq.f32.partialorder %v2450_v50, 8.507059e+37  ;;  %2830 = vmatpush.bf16.msrb.mxu3 %v8635_v11  ;;  %2789 = vmatpush.bf16.msra.mxu0 %v8607_v31 }
 0x2e5   :  { %v2453_v7 = vor.u32 1.1754944e-38, %v2452_v1  ;;  %v8619_v22 = vor.u32 %v12742_v63, %v12744_v29  ;;  %v8832_v48 = vld [vmem:[#allocation11 + $0xd0] sm:$0xf0]  ;;  %v2481_v28 = vsub.f32 1.0, %v2480_v55  ;;  %v2490_v40 = vand.u32 2147483648, %v12696_v42 }
 0x2e6   :  { %v8847_v39 = vor.u32 %v10570_v17, %v8846_v16  ;;  %v8851_v52 = vor.u32 %v10568_v0, %v8848_v24  ;;  %v8838_v58 = vld [vmem:[#allocation11 + $0xc8] sm:$0xf]  ;;  %v10567_v34 = vld [vmem:[#allocation11 + $0xd4] sm:$0xf0]  ;;  %v2488_v32 = vand.u32 2147483647, %v12696_v42  ;;  %2803 = vmatpush.bf16.msra.mxu1 %v8611_v62  ;;  %2817 = vmatpush.bf16.msrb.mxu2 %v8615_v14  ;;  %v8855_v50 = vor.u32 %v10571_v2, %v8854_v57 }
 0x2e7   :  { %v2454_v44 = vsel %vm2451_vm5, %v2453_v7, %v2449_v4  ;;  %v8859_v8 = vor.u32 %v10569_v15, %v8856_v18  ;;  %v10565_v1 = vld [vmem:[#allocation11 + $0xcc] sm:$0xf]  ;;  %v8840_v11 = vld [vmem:[#allocation11 + $0xd8] sm:$0xf0]  ;;  %v2482_v31 = vmul.f32 %v12752_v46, %v2481_v28  ;;  %vm2485_vm6 = vweird.f32 %v12752_v46  ;;  %v8814_v16 = vld [vmem:[#allocation11 + $0xa0] sm:$0xf] }
 0x2e8   :  { %3044 = vmatpush.bf16.msrb.mxu0 %v8847_v39  ;;  %v8831_v63 = vor.u32 %v10566_v45, %v8830_v25  ;;  %v8835_v29 = vor.u32 %v10564_v6, %v8832_v48  ;;  %v10562_v17 = vld [vmem:[#allocation11 + $0xac] sm:$0xf0]  ;;  %v10560_v0 = vld [vmem:[#allocation11 + $0xa4] sm:$0xf]  ;;  %v11151_v24 = vpop.eup %11150  ;;  %v2397_v23 = vadd.f32 %v12661_v56, %v2396_v13  ;;  %vm2399_vm7 = vweird.f32 %v12661_v56  ;;  %2831 = vmatpush.bf16.msrb.mxu3 %v8619_v22  ;;  %v8816_v2 = vld [vmem:[#allocation11 + $0xb0] sm:$0xf0] }
 0x2e9   :  { %vm2510_vm8 = vweird.f32 %v12711_v27  ;;  %v8839_v57 = vor.u32 %v10567_v34, %v8838_v58  ;;  %v8822_v62 = vld [vmem:[#allocation11 + $0xa8] sm:$0xf]  ;;  %v10563_v14 = vld [vmem:[#allocation11 + $0xb4] sm:$0xf0]  ;;  %v2507_v18 = vmul.f32 %v12711_v27, %v2506_v3  ;;  %vm2484_vm9 = vweird.f32 %v12696_v42  ;;  %v10561_v22 = vld [vmem:[#allocation11 + $0xac] sm:$0xf] }
 0x2ea   :  { %3058 = vmatpush.bf16.msrb.mxu1 %v8851_v52  ;;  %3072 = vmatpush.bf16.msra.mxu2 %v8855_v50  ;;  %v12795_v15 = vpop.eup %11152  ;;  %v2483_v55 = vadd.f32 %v12752_v46, %v2482_v31  ;;  %v8843_v13 = vor.u32 %v10565_v1, %v8840_v11  ;;  %vm12802_vm10 = vmor %vm2484_vm9, %vm2485_vm6  ;;  %v2491_v25 = vor.u32 1.1754944e-38, %v2490_v40  ;;  %v2537_v45 = vmul.f32 %v11151_v24, %v2454_v44  ;;  %v8824_v3 = vld [vmem:[#allocation11 + $0xb8] sm:$0xf0]  ;;  %v8798_v39 = vld [vmem:[#allocation11 + $0x80] sm:$0xf] }
 0x2eb   :  { %v2520_v6 = vmul.f32 %v12795_v15, %v12750_v47  ;;  %v8815_v7 = vor.u32 %v10562_v17, %v8814_v16  ;;  %vm12812_vm11 = vmor %vm2398_vm0, %vm2399_vm7  ;;  %vm2489_vm12 = vcmp.eq.f32.partialorder %v2488_v32, 8.507059e+37  ;;  %v8819_v28 = vor.u32 %v10560_v0, %v8816_v2  ;;  %v10558_v52 = vld [vmem:[#allocation11 + $0x8c] sm:$0xf0]  ;;  %v10556_v44 = vld [vmem:[#allocation11 + $0x84] sm:$0xf] }
 0x2ec   :  { %3086 = vmatpush.bf16.msra.mxu3 %v8859_v8  ;;  %v2487_v48 = vsel %vm12802_vm10, %v12752_v46, %v2483_v55  ;;  %3045 = vmatpush.bf16.msrb.mxu0 %v8831_v63  ;;  %v8823_v40 = vor.u32 %v10563_v14, %v8822_v62  ;;  %v8800_v61 = vld [vmem:[#allocation11 + $0x90] sm:$0xf0]  ;;  %v2391_v46 = vsel %vm12768_vm2, %v12640_v37, %v2386_v5  ;;  %v8806_v1 = vld [vmem:[#allocation11 + $0x88] sm:$0xf]  ;;  %v10559_v11 = vld [vmem:[#allocation11 + $0x94] sm:$0xf0]  ;;  %11154 = vtanh.f32 %v12734_v26 }
 0x2ed   :  { %v2492_v58 = vsel %vm2489_vm12, %v2491_v25, %v2487_v48  ;;  %v2521_v34 = vsub.f32 1.0, %v2520_v6  ;;  %v2401_v32 = vsel %vm12812_vm11, %v12661_v56, %v2397_v23  ;;  %v8827_v8 = vor.u32 %v10561_v22, %v8824_v3  ;;  %v10557_v10 = vld [vmem:[#allocation11 + $0x8c] sm:$0xf]  ;;  %v8808_v56 = vld [vmem:[#allocation11 + $0x98] sm:$0xf0] }
 0x2ee   :  { %3059 = vmatpush.bf16.msrb.mxu1 %v8835_v29  ;;  %3073 = vmatpush.bf16.msra.mxu2 %v8839_v57  ;;  %v2535_v50 = vmul.f32 %v2492_v58, %v12510_v36  ;;  %v2406_v51 = vsel %vm12781_vm3, %v12645_v30, %v2401_v32  ;;  %v2416_v21 = vmul.f32 %v12668_v38, %v2391_v46  ;;  %v8782_v63 = vld [vmem:[#allocation11 + $0x60] sm:$0xf]  ;;  %v10554_v38 = vld [vmem:[#allocation11 + $0x6c] sm:$0xf0]  ;;  %v2530_v29 = vand.u32 2147483648, %v12750_v47 }
 0x2ef   :  { %v12836_v60 = vadd.f32 %v12711_v27, %v2507_v18  ;;  %v2522_v5 = vmul.f32 %v12795_v15, %v2521_v34  ;;  %v8799_v37 = vor.u32 %v10558_v52, %v8798_v39  ;;  %v2417_v36 = vmul.f32 %v12764_v9, %v2406_v51  ;;  %v10552_v24 = vld [vmem:[#allocation11 + $0x64] sm:$0xf]  ;;  %v8784_v23 = vld [vmem:[#allocation11 + $0x70] sm:$0xf0]  ;;  %v8790_v2 = vld [vmem:[#allocation11 + $0x68] sm:$0xf] }
 0x2f0   :  { %3087 = vmatpush.bf16.msra.mxu3 %v8843_v13  ;;  %v12841_v31 = vadd.f32 %v2537_v45, %v2535_v50  ;;  %3046 = vmatpush.bf16.msrb.mxu0 %v8815_v7  ;;  %v8803_v59 = vor.u32 %v10556_v44, %v8800_v61  ;;  %v2544_v30 = vpack.c.bf16 %v2416_v21, %v2416_v21  ;;  %vm2525_vm4 = vweird.f32 %v12795_v15  ;;  %v10555_v62 = vld [vmem:[#allocation11 + $0x74] sm:$0xf0]  ;;  %v10553_v14 = vld [vmem:[#allocation11 + $0x6c] sm:$0xf]  ;;  %v8792_v4 = vld [vmem:[#allocation11 + $0x78] sm:$0xf0] }
 0x2f1   :  { %v8807_v16 = vor.u32 %v10559_v11, %v8806_v1  ;;  %v2545_v17 = vpack.c.bf16 %v2417_v36, %v2417_v36  ;;  %v10937_v0 = vpack.c.bf16 %v2417_v36, %v2416_v21  ;;  %v2523_v9 = vadd.f32 %v12795_v15, %v2522_v5  ;;  %v8766_v6 = vld [vmem:[#allocation11 + $0x40] sm:$0xf]  ;;  %v10550_v7 = vld [vmem:[#allocation11 + $0x4c] sm:$0xf0]  ;;  %v8774_v34 = vld [vmem:[#allocation11 + $0x48] sm:$0xf] }
 0x2f2   :  { %3060 = vmatpush.bf16.msrb.mxu1 %v8819_v28  ;;  %3074 = vmatpush.bf16.msra.mxu2 %v8823_v40  ;;  %11156 = vtanh.f32 %v12841_v31  ;;  %v8811_v57 = vor.u32 %v10557_v10, %v8808_v56  ;;  %vm2509_vm13 = vweird.f32 %v12648_v49  ;;  %v2528_v18 = vand.u32 2147483647, %v12750_v47  ;;  %v8768_v28 = vld [vmem:[#allocation11 + $0x50] sm:$0xf0]  ;;  %v11155_v40 = vpop.eup %11154  ;;  %v10551_v44 = vld [vmem:[#allocation11 + $0x54] sm:$0xf0] }
 0x2f3   :  { %10938 = vst [vmem:[#allocation3] sm:$0xff] %v10937_v0   ;;  %v2618_v55 = vunpack.c.l.b16 %v2544_v30  ;;  %v2619_v13 = vunpack.c.l.b16 %v2545_v17  ;;  %vm12851_vm14 = vmor %vm2509_vm13, %vm2510_vm8  ;;  %v2516_v45 = vor.u32 1.1754944e-38, %v2515_v35  ;;  %vm2524_vm15 = vweird.f32 %v12750_v47  ;;  %v10548_v47 = vld [vmem:[#allocation11 + $0x44] sm:$0xf]  ;;  %v10549_v61 = vld [vmem:[#allocation11 + $0x4c] sm:$0xf] }
 0x2f4   :  { %3088 = vmatpush.bf16.msra.mxu3 %v8827_v8  ;;  %3047 = vmatpush.bf16.msrb.mxu0 %v8799_v37  ;;  %v2512_v22 = vsel %vm12851_vm14, %v12711_v27, %v12836_v60  ;;  %vm12864_vm0 = vmor %vm2524_vm15, %vm2525_vm4  ;;  %v8783_v35 = vor.u32 %v10554_v38, %v8782_v63  ;;  %v8787_v48 = vor.u32 %v10552_v24, %v8784_v23  ;;  %v2531_v39 = vor.u32 1.1754944e-38, %v2530_v29  ;;  %v8776_v46 = vld [vmem:[#allocation11 + $0x58] sm:$0xf0]  ;;  %v8750_v51 = vld [vmem:[#allocation11 + $0x20] sm:$0xf] }
 0x2f5   :  { %v2620_v42 = vpack.c.b16 %v2619_v13, %v2618_v55  ;;  %v8791_v52 = vor.u32 %v10555_v62, %v8790_v2  ;;  %v8795_v58 = vor.u32 %v10553_v14, %v8792_v4  ;;  %v2527_v27 = vsel %vm12864_vm0, %v12795_v15, %v2523_v9  ;;  %v10546_v21 = vld [vmem:[#allocation11 + $0x2c] sm:$0xf0]  ;;  %v10544_v5 = vld [vmem:[#allocation11 + $0x24] sm:$0xf]  ;;  %v8752_v37 = vld [vmem:[#allocation11 + $0x30] sm:$0xf0] }
 0x2f6   :  { %3061 = vmatpush.bf16.msrb.mxu1 %v8803_v59  ;;  %3075 = vmatpush.bf16.msra.mxu2 %v8807_v16  ;;  %vm2514_vm1 = vcmp.eq.f32.partialorder %v2513_v53, 8.507059e+37  ;;  %vm2529_vm2 = vcmp.eq.f32.partialorder %v2528_v18, 8.507059e+37  ;;  %v8767_v50 = vor.u32 %v10550_v7, %v8766_v6  ;;  %v8771_v11 = vor.u32 %v10548_v47, %v8768_v28  ;;  %v8758_v10 = vld [vmem:[#allocation11 + $0x28] sm:$0xf]  ;;  %v10547_v56 = vld [vmem:[#allocation11 + $0x34] sm:$0xf0] }
 0x2f7   :  { %2790 = vmatmul.bf16.vlgmr.msra.gmra.mxu0 %v2620_v42  ;;  %2804 = vmatmul.bf16.vlgmr.msra.gmra.mxu1 %v2620_v42  ;;  %v2517_v8 = vsel %vm2514_vm1, %v2516_v45, %v2512_v22  ;;  %v2532_v1 = vsel %vm2529_vm2, %v2531_v39, %v2527_v27  ;;  %v8775_v49 = vor.u32 %v10551_v44, %v8774_v34  ;;  %v10545_v36 = vld [vmem:[#allocation11 + $0x2c] sm:$0xf]  ;;  %v8760_v59 = vld [vmem:[#allocation11 + $0x38] sm:$0xf0]  ;;  %v8734_v16 = vld [vmem:[#allocation11] sm:$0xf] }
 0x2f8   :  { %3089 = vmatpush.bf16.msra.mxu3 %v8811_v57  ;;  %v11157_v32 = vpop.eup %11156  ;;  %2818 = vmatmul.bf16.vlgmr.msrb.gmra.mxu2 %v2620_v42  ;;  %v2542_v15 = vmul.f32 %v11155_v40, %v2517_v8  ;;  %v8779_v53 = vor.u32 %v10549_v61, %v8776_v46  ;;  %v8751_v38 = vor.u32 %v10546_v21, %v8750_v51  ;;  %v10542_v17 = vld [vmem:[#allocation11 + $0xc] sm:$0xf0]  ;;  %v10540_v23 = vld [vmem:[#allocation11 + $0x4] sm:$0xf]  ;;  %v8736_v9 = vld [vmem:[#allocation11 + $0x10] sm:$0xf0] }
 0x2f9   :  { %2832 = vmatmul.bf16.vlgmr.msrb.gmra.mxu3 %v2620_v42  ;;  %3048 = vmatpush.bf16.msrb.mxu0 %v8783_v35  ;;  %v2543_v60 = vmul.f32 %v11157_v32, %v2532_v1  ;;  %v8755_v29 = vor.u32 %v10544_v5, %v8752_v37  ;;  %v8759_v0 = vor.u32 %v10547_v56, %v8758_v10  ;;  %v8742_v57 = vld [vmem:[#allocation11 + $0x8] sm:$0xf]  ;;  %v10543_v62 = vld [vmem:[#allocation11 + $0x14] sm:$0xf0]  ;;  %v10541_v14 = vld [vmem:[#allocation11 + $0xc] sm:$0xf] }
 0x2fa   :  { %3062 = vmatpush.bf16.msrb.mxu1 %v8787_v48  ;;  %3076 = vmatpush.bf16.msra.mxu2 %v8791_v52  ;;  %v8763_v24 = vor.u32 %v10545_v36, %v8760_v59  ;;  %v2546_v2 = vpack.c.bf16 %v2542_v15, %v2542_v15  ;;  %v8744_v18 = vld [vmem:[#allocation11 + $0x18] sm:$0xf0]  ;;  %v8735_v13 = vor.u32 %v10542_v17, %v8734_v16  ;;  %v8986_v22 = vld [vmem:[#allocation10 + $0xe0] sm:$0xf]  ;;  %v10602_v3 = vld [vmem:[#allocation10 + $0xec] sm:$0xf0] }
 0x2fb   :  { %v10942_v30 = vpack.c.bf16 %v2543_v60, %v2542_v15  ;;  %v2547_v63 = vpack.c.bf16 %v2543_v60, %v2543_v60  ;;  %v8739_v4 = vor.u32 %v10540_v23, %v8736_v9  ;;  %v8743_v25 = vor.u32 %v10543_v62, %v8742_v57  ;;  %v10600_v42 = vld [vmem:[#allocation10 + $0xe4] sm:$0xf]  ;;  %v8988_v48 = vld [vmem:[#allocation10 + $0xf0] sm:$0xf0]  ;;  %v8994_v47 = vld [vmem:[#allocation10 + $0xe8] sm:$0xf] }
 0x2fc   :  { %3090 = vmatpush.bf16.msra.mxu3 %v8795_v58  ;;  %v8747_v45 = vor.u32 %v10541_v14, %v8744_v18  ;;  %v2880_v6 = vunpack.c.l.b16 %v2546_v2  ;;  %v8987_v35 = vor.u32 %v10602_v3, %v8986_v22  ;;  %v10603_v28 = vld [vmem:[#allocation10 + $0xf4] sm:$0xf0]  ;;  %v8991_v40 = vor.u32 %v10600_v42, %v8988_v48  ;;  %v10601_v52 = vld [vmem:[#allocation10 + $0xec] sm:$0xf]  ;;  %v8996_v58 = vld [vmem:[#allocation10 + $0xf8] sm:$0xf0] }
 0x2fd   :  { %3049 = vmatpush.bf16.msrb.mxu0 %v8767_v50  ;;  %10943 = vst [vmem:[#allocation4 + $0x20] sm:$0xff] %v10942_v30   ;;  %v2881_v55 = vunpack.c.l.b16 %v2547_v63  ;;  %v8995_v39 = vor.u32 %v10603_v28, %v8994_v47  ;;  %v8999_v34 = vor.u32 %v10601_v52, %v8996_v58  ;;  %v8970_v44 = vld [vmem:[#allocation10 + $0xc0] sm:$0xf]  ;;  %v10598_v27 = vld [vmem:[#allocation10 + $0xcc] sm:$0xf0]  ;;  %v2561_v60 = vunpack.c.l.bf16 %v11919_v12 }
 0x2fe   :  { %3063 = vmatpush.bf16.msrb.mxu1 %v8771_v11  ;;  %3077 = vmatpush.bf16.msra.mxu2 %v8775_v49  ;;  %v10596_v61 = vld [vmem:[#allocation10 + $0xc4] sm:$0xf]  ;;  %v8971_v46 = vor.u32 %v10598_v27, %v8970_v44  ;;  %v8972_v32 = vld [vmem:[#allocation10 + $0xd0] sm:$0xf0]  ;;  %v8978_v50 = vld [vmem:[#allocation10 + $0xc8] sm:$0xf]  ;;  %v2562_v49 = vunpack.c.h.bf16 %v11919_v12  ;;  %v827_v12 = vpack.c.bf16 %v11933_v20, %v11931_v19  ;;  %v2564_v2 = vunpack.c.h.bf16 %v11991_v41 }
 0x2ff   :  { %v2882_v7 = vpack.c.b16 %v2881_v55, %v2880_v6  ;;  %v10599_v8 = vld [vmem:[#allocation10 + $0xd4] sm:$0xf0]  ;;  %v8975_v1 = vor.u32 %v10596_v61, %v8972_v32  ;;  %v10597_v51 = vld [vmem:[#allocation10 + $0xcc] sm:$0xf]  ;;  %v8980_v21 = vld [vmem:[#allocation10 + $0xd8] sm:$0xf0] }
 0x300   :  { %3091 = vmatpush.bf16.msra.mxu3 %v8779_v53  ;;  %v8979_v11 = vor.u32 %v10599_v8, %v8978_v50  ;;  %v8983_v15 = vor.u32 %v10597_v51, %v8980_v21  ;;  %v8954_v37 = vld [vmem:[#allocation10 + $0xa0] sm:$0xf]  ;;  %v10594_v10 = vld [vmem:[#allocation10 + $0xac] sm:$0xf0]  ;;  %v10592_v56 = vld [vmem:[#allocation10 + $0xa4] sm:$0xf]  ;;  %v2565_v14 = vunpack.c.l.bf16 %v827_v12  ;;  %v2566_v18 = vunpack.c.h.bf16 %v827_v12 }
 0x301   :  { %3050 = vmatpush.bf16.msrb.mxu0 %v8751_v38  ;;  %v8955_v30 = vor.u32 %v10594_v10, %v8954_v37  ;;  %v8956_v63 = vld [vmem:[#allocation10 + $0xb0] sm:$0xf0]  ;;  %v8962_v38 = vld [vmem:[#allocation10 + $0xa8] sm:$0xf]  ;;  %v10588_v28 = vld [vmem:[#allocation10 + $0x84] sm:$0xf] }
 0x302   :  { %3064 = vmatpush.bf16.msrb.mxu1 %v8755_v29  ;;  %3078 = vmatpush.bf16.msra.mxu2 %v8759_v0  ;;  %v10595_v29 = vld [vmem:[#allocation10 + $0xb4] sm:$0xf0]  ;;  %v8959_v16 = vor.u32 %v10592_v56, %v8956_v63  ;;  %v10593_v0 = vld [vmem:[#allocation10 + $0xac] sm:$0xf]  ;;  %v8946_v52 = vld [vmem:[#allocation10 + $0x88] sm:$0xf] }
 0x303   :  { %v8963_v17 = vor.u32 %v10595_v29, %v8962_v38  ;;  %v10591_v58 = vld [vmem:[#allocation10 + $0x94] sm:$0xf0]  ;;  %v10589_v27 = vld [vmem:[#allocation10 + $0x8c] sm:$0xf]  ;;  %v8948_v61 = vld [vmem:[#allocation10 + $0x98] sm:$0xf0] }
 0x304   :  { %3092 = vmatpush.bf16.msra.mxu3 %v8763_v24  ;;  %v8964_v24 = vld [vmem:[#allocation10 + $0xb8] sm:$0xf0]  ;;  %v15207_v32 = vld [vmem:[#allocation55_spill] sm:$0xff]  ;;  %v15208_v8 = vld [vmem:[#allocation42_spill] sm:$0xff] }
 0x305   :  { %3051 = vmatpush.bf16.msrb.mxu0 %v8735_v13  ;;  %v8967_v57 = vor.u32 %v10593_v0, %v8964_v24  ;;  %v12887_v50 = vpack.c.bf16 %v15207_v32, %v12037_v54  ;;  %v10586_v51 = vld [vmem:[#allocation10 + $0x6c] sm:$0xf0]  ;;  %v10584_v21 = vld [vmem:[#allocation10 + $0x64] sm:$0xf]  ;;  %v15209_v56 = vld [vmem:[#allocation53_spill] sm:$0xff]  ;;  %v8951_v54 = vor.u32 %v10589_v27, %v8948_v61 }
 0x306   :  { %3065 = vmatpush.bf16.msrb.mxu1 %v8739_v4  ;;  %3079 = vmatpush.bf16.msra.mxu2 %v8743_v25 }
 0x308   :  { %3093 = vmatpush.bf16.msra.mxu3 %v8747_v45  ;;  %3052 = vmatmul.bf16.vlgmr.msrb.gmra.mxu0 %v2882_v7 }
 0x309   :  { %3066 = vmatmul.bf16.vlgmr.msrb.gmra.mxu1 %v2882_v7  ;;  %3080 = vmatmul.bf16.vlgmr.msra.gmra.mxu2 %v2882_v7 }
 0x30a   :  { %3598 = vmatpush.bf16.msra.mxu0 %v8987_v35  ;;  %3612 = vmatpush.bf16.msra.mxu1 %v8991_v40  ;;  %v10590_v35 = vld [vmem:[#allocation10 + $0x8c] sm:$0xf0]  ;;  %v8940_v40 = vld [vmem:[#allocation10 + $0x90] sm:$0xf0] }
 0x30b   :  { %3094 = vmatmul.bf16.vlgmr.msra.gmra.mxu3 %v2882_v7  ;;  %3626 = vmatpush.bf16.msrb.mxu2 %v8995_v39  ;;  %v8938_v7 = vld [vmem:[#allocation10 + $0x80] sm:$0xf] }
 0x30c   :  { %3640 = vmatpush.bf16.msrb.mxu3 %v8999_v34  ;;  %v8939_v47 = vor.u32 %v10590_v35, %v8938_v7  ;;  %v2563_v34 = vunpack.c.l.bf16 %v11991_v41  ;;  %v8947_v41 = vor.u32 %v10591_v58, %v8946_v52 }
 0x30e   :  { %3599 = vmatpush.bf16.msra.mxu0 %v8971_v46  ;;  %3613 = vmatpush.bf16.msra.mxu1 %v8975_v1  ;;  %v8922_v46 = vld [vmem:[#allocation10 + $0x60] sm:$0xf]  ;;  %v2568_v1 = vunpack.c.h.bf16 %v15208_v8 }
 0x30f   :  { %3627 = vmatpush.bf16.msrb.mxu2 %v8979_v11  ;;  %v8943_v11 = vor.u32 %v10588_v28, %v8940_v40 }
 0x310   :  { %3641 = vmatpush.bf16.msrb.mxu3 %v8983_v15 }
 0x312   :  { %3600 = vmatpush.bf16.msra.mxu0 %v8955_v30  ;;  %3614 = vmatpush.bf16.msra.mxu1 %v8959_v16  ;;  %v8923_v30 = vor.u32 %v10586_v51, %v8922_v46  ;;  %v2577_v16 = vunpack.c.h.bf16 %v15209_v56 }
 0x313   :  { %3628 = vmatpush.bf16.msrb.mxu2 %v8963_v17 }
 0x314   :  { %3642 = vmatpush.bf16.msrb.mxu3 %v8967_v57  ;;  %v2580_v57 = vunpack.c.l.bf16 %v12887_v50 }
 0x316   :  { %3601 = vmatpush.bf16.msra.mxu0 %v8939_v47  ;;  %3615 = vmatpush.bf16.msra.mxu1 %v8943_v11 }
 0x317   :  { %3629 = vmatpush.bf16.msrb.mxu2 %v8947_v41 }
 0x318   :  { %3643 = vmatpush.bf16.msrb.mxu3 %v8951_v54 }
 0x31a   :  { %3602 = vmatpush.bf16.msra.mxu0 %v8923_v30 }
 0x374   :  { %v2791_v53 = vpop.f32.mrf.mxu0  ;;  %v2805_v5 = vpop.f32.mrf.mxu1 }
 0x375   :  { %v2838_v36 = vadd.f32 %v2791_v53, %v2561_v60  ;;  %v2839_v59 = vadd.f32 %v2805_v5, %v2562_v49  ;;  %v2567_v49 = vunpack.c.l.bf16 %v15208_v8  ;;  %v8924_v5 = vld [vmem:[#allocation10 + $0x70] sm:$0xf0] }
 0x376   :  { %v8927_v17 = vor.u32 %v10584_v21, %v8924_v5  ;;  %v2581_v21 = vunpack.c.h.bf16 %v12887_v50 }
 0x377   :  { %v8860_v23 = vmul.f32 -1.442695, %v2838_v36  ;;  %v8862_v9 = vmul.f32 -1.442695, %v2839_v59  ;;  %v2576_v36 = vunpack.c.l.bf16 %v15209_v56 }
 0x378   :  { %3616 = vmatpush.bf16.msra.mxu1 %v8927_v17 }
 0x379   :  { %11158 = vpow2.f32 %v8860_v23  ;;  %v15210_v23 = vld [vmem:[#allocation78_spill] sm:$0xff] }
 0x37a   :  { %11160 = vpow2.f32 %v8862_v9  ;;  %v2579_v9 = vunpack.c.h.bf16 %v15210_v23  ;;  %v2578_v56 = vunpack.c.l.bf16 %v15210_v23 }
 0x37b   :  { %v2819_v39 = vpop.f32.mrf.mxu2 }
 0x37c   :  { %v2833_v62 = vpop.f32.mrf.mxu3  ;;  %v2793_v13 = vpop.f32.mrf.mxu0  ;;  %v2840_v60 = vadd.f32 %v2819_v39, %v2563_v34 }
 0x37d   :  { %v2841_v55 = vadd.f32 %v2833_v62, %v2564_v2  ;;  %v2807_v4 = vpop.f32.mrf.mxu1  ;;  %v2842_v25 = vadd.f32 %v2793_v13, %v2565_v14 }
 0x37e   :  { %v2843_v45 = vadd.f32 %v2807_v4, %v2566_v18 }
 0x37f   :  { %v8864_v19 = vmul.f32 -1.442695, %v2841_v55  ;;  %v11159_v20 = vpop.eup %11158  ;;  %v8861_v6 = vmul.f32 -1.442695, %v2842_v25 }
 0x380   :  { %v11161_v22 = vpop.eup %11160  ;;  %v12878_v3 = vadd.f32 1.0, %v11159_v20  ;;  %v8863_v42 = vmul.f32 -1.442695, %v2843_v45 }
 0x381   :  { %11162 = vpow2.f32 %v8864_v19  ;;  %v12880_v48 = vadd.f32 1.0, %v11161_v22 }
 0x382   :  { %11164 = vpow2.f32 %v8861_v6  ;;  %v3125_v14 = vand.u32 2147483647, %v12878_v3  ;;  %v3127_v19 = vand.u32 2147483648, %v12878_v3  ;;  %vm3121_vm6 = vweird.f32 %v12878_v3 }
 0x383   :  { %11166 = vrcp.f32 %v12878_v3  ;;  %v3165_v45 = vand.u32 2147483648, %v12880_v48  ;;  %v2821_v6 = vpop.f32.mrf.mxu2  ;;  %vm3159_vm7 = vweird.f32 %v12880_v48 }
 0x384   :  { %11168 = vrcp.f32 %v12880_v48  ;;  %v2835_v44 = vpop.f32.mrf.mxu3  ;;  %vm3126_vm9 = vcmp.eq.f32.partialorder %v3125_v14, 8.507059e+37  ;;  %v3128_v39 = vor.u32 1.1754944e-38, %v3127_v19  ;;  %v2844_v58 = vadd.f32 %v2821_v6, %v2567_v49 }
 0x385   :  { %11170 = vpow2.f32 %v8863_v42  ;;  %v3053_v53 = vpop.f32.mrf.mxu0  ;;  %v2845_v10 = vadd.f32 %v2835_v44, %v2568_v1  ;;  %v3163_v42 = vand.u32 2147483647, %v12880_v48  ;;  %v3166_v44 = vor.u32 1.1754944e-38, %v3165_v45 }
 0x386   :  { %v3067_v59 = vpop.f32.mrf.mxu1  ;;  %v3100_v12 = vadd.f32 %v3053_v53, %v2576_v36  ;;  %11172 = vtanh.f32 %v2840_v60  ;;  %v15212_v60 = vld [vmem:[#allocation80_spill] sm:$0xff] }
 0x387   :  { %v11163_v15 = vpop.eup %11162  ;;  %v3101_v18 = vadd.f32 %v3067_v59, %v2577_v16  ;;  %v8865_v4 = vmul.f32 -1.442695, %v2845_v10  ;;  %vm3164_vm11 = vcmp.eq.f32.partialorder %v3163_v42, 8.507059e+37 }
 0x388   :  { %v11165_v37 = vpop.eup %11164  ;;  %v12892_v38 = vadd.f32 1.0, %v11163_v15  ;;  %v8866_v7 = vmul.f32 -1.442695, %v3100_v12  ;;  %v15211_v15 = vld [vmem:[#allocation79_spill] sm:$0xff] }
 0x389   :  { %v11167_v63 = vpop.eup %11166  ;;  %v12894_v29 = vadd.f32 1.0, %v11165_v37  ;;  %v8868_v28 = vmul.f32 -1.442695, %v3101_v18  ;;  %v12924_v49 = vpack.c.bf16 %v15212_v60, %v15211_v15 }
 0x38a   :  { %v11169_v0 = vpop.eup %11168  ;;  %v3117_v24 = vmul.f32 %v11167_v63, %v12878_v3  ;;  %vm3122_vm3 = vweird.f32 %v11167_v63 }
 0x38b   :  { %v11171_v2 = vpop.eup %11170  ;;  %v3155_v62 = vmul.f32 %v11169_v0, %v12880_v48  ;;  %11174 = vrcp.f32 %v12894_v29  ;;  %vm3160_vm5 = vweird.f32 %v11169_v0  ;;  %vm3123_vm8 = vmor %vm3121_vm6, %vm3122_vm3  ;;  %vm3136_vm12 = vweird.f32 %v12894_v29 }
 0x38c   :  { %v3118_v55 = vsub.f32 1.0, %v3117_v24  ;;  %v12903_v13 = vadd.f32 1.0, %v11171_v2  ;;  %11176 = vrcp.f32 %v12892_v38  ;;  %v11173_v40 = vpop.eup %11172  ;;  %vm3161_vm10 = vmor %vm3159_vm7, %vm3160_vm5  ;;  %v3142_v2 = vand.u32 2147483648, %v12894_v29 }
 0x38d   :  { %v3156_v25 = vsub.f32 1.0, %v3155_v62  ;;  %v3055_v8 = vpop.f32.mrf.mxu0  ;;  %v3081_v62 = vpop.f32.mrf.mxu2 }
 0x38e   :  { %v3119_v20 = vmul.f32 %v11167_v63, %v3118_v55  ;;  %11178 = vrcp.f32 %v12903_v13  ;;  %v3095_v35 = vpop.f32.mrf.mxu3  ;;  %v3104_v59 = vadd.f32 %v3055_v8, %v2580_v57  ;;  %v3069_v12 = vpop.f32.mrf.mxu1  ;;  %v3140_v57 = vand.u32 2147483647, %v12894_v29 }
 0x38f   :  { %v3157_v22 = vmul.f32 %v11169_v0, %v3156_v25  ;;  %11180 = vpow2.f32 %v8865_v4  ;;  %v3103_v27 = vadd.f32 %v3095_v35, %v2579_v9  ;;  %vm3174_vm14 = vweird.f32 %v12903_v13 }
 0x390   :  { %v3120_v47 = vadd.f32 %v11167_v63, %v3119_v20  ;;  %11182 = vpow2.f32 %v8866_v7  ;;  %v8867_v17 = vmul.f32 -1.442695, %v3104_v59  ;;  %v3180_v4 = vand.u32 2147483648, %v12903_v13 }
 0x391   :  { %v3158_v52 = vadd.f32 %v11169_v0, %v3157_v22  ;;  %v12912_v34 = vpop.eup %11174  ;;  %11184 = vpow2.f32 %v8868_v28  ;;  %v8870_v36 = vmul.f32 -1.442695, %v3103_v27  ;;  %v3105_v45 = vadd.f32 %v3069_v12, %v2581_v21 }
 0x392   :  { %v3124_v3 = vsel %vm3123_vm8, %v11167_v63, %v3120_v47  ;;  %v12915_v61 = vpop.eup %11176  ;;  %v3132_v32 = vmul.f32 %v12912_v34, %v12894_v29  ;;  %11186 = vtanh.f32 %v2844_v58  ;;  %vm3137_vm4 = vweird.f32 %v12912_v34 }
 0x393   :  { %v3129_v48 = vsel %vm3126_vm9, %v3128_v39, %v3124_v3  ;;  %v3162_v46 = vsel %vm3161_vm10, %v11169_v0, %v3158_v52  ;;  %v3195_v10 = vmul.f32 %v12915_v61, %v12892_v38  ;;  %11188 = vpow2.f32 %v8870_v36  ;;  %vm12955_vm15 = vmor %vm3136_vm12, %vm3137_vm4  ;;  %v10587_v36 = vld [vmem:[#allocation10 + $0x74] sm:$0xf0] }
 0x394   :  { %v12919_v1 = vpop.eup %11178  ;;  %v3167_v11 = vsel %vm3164_vm11, %v3166_v44, %v3162_v46  ;;  %v3226_v51 = vmul.f32 %v11173_v40, %v3129_v48  ;;  %v3133_v41 = vsub.f32 1.0, %v3132_v32  ;;  %v3178_v6 = vand.u32 2147483647, %v12903_v13 }
 0x395   :  { %v3224_v53 = vmul.f32 %v3167_v11, %v12577_v33  ;;  %v3170_v5 = vmul.f32 %v12919_v1, %v12903_v13  ;;  %v11181_v37 = vpop.eup %11180  ;;  %v3205_v33 = vand.u32 2147483648, %v12892_v38  ;;  %v3196_v9 = vsub.f32 1.0, %v3195_v10 }
 0x396   :  { %v3134_v30 = vmul.f32 %v12912_v34, %v3133_v41  ;;  %v11183_v63 = vpop.eup %11182  ;;  %v12936_v16 = vadd.f32 1.0, %v11181_v37  ;;  %vm3175_vm13 = vweird.f32 %v12919_v1  ;;  %v3102_v7 = vadd.f32 %v3081_v62, %v2578_v56  ;;  %v3097_v10 = vpop.f32.mrf.mxu3  ;;  %v8930_v56 = vld [vmem:[#allocation10 + $0x68] sm:$0xf]  ;;  %v8906_v62 = vld [vmem:[#allocation10 + $0x40] sm:$0xf] }
 0x397   :  { %v12932_v54 = vadd.f32 %v3226_v51, %v3224_v53  ;;  %v3171_v50 = vsub.f32 1.0, %v3170_v5  ;;  %v11185_v23 = vpop.eup %11184  ;;  %v12947_v18 = vadd.f32 1.0, %v11183_v63  ;;  %v3197_v42 = vmul.f32 %v12915_v61, %v3196_v9  ;;  %vm12967_vm0 = vmor %vm3174_vm14, %vm3175_vm13  ;;  %v3083_v53 = vpop.f32.mrf.mxu2 }
 0x398   :  { %v3135_v24 = vadd.f32 %v12912_v34, %v3134_v30  ;;  %11190 = vrcp.f32 %v12936_v16  ;;  %v12949_v55 = vadd.f32 1.0, %v11185_v23  ;;  %v11187_v19 = vpop.eup %11186  ;;  %v3143_v29 = vor.u32 1.1754944e-38, %v3142_v2  ;;  %v8932_v2 = vld [vmem:[#allocation10 + $0x78] sm:$0xf0] }
 0x399   :  { %v3172_v0 = vmul.f32 %v12919_v1, %v3171_v50  ;;  %11192 = vpow2.f32 %v8867_v17  ;;  %v11189_v22 = vpop.eup %11188  ;;  %v2582_v47 = vunpack.c.l.bf16 %v12924_v49  ;;  %vm3141_vm1 = vcmp.eq.f32.partialorder %v3140_v57, 8.507059e+37 }
 0x39a   :  { %v3139_v20 = vsel %vm12955_vm15, %v12912_v34, %v3135_v24  ;;  %11194 = vrcp.f32 %v12947_v18  ;;  %v3220_v28 = vand.u32 2147483648, %v12936_v16  ;;  %v2583_v40 = vunpack.c.h.bf16 %v12924_v49  ;;  %v10585_v24 = vld [vmem:[#allocation10 + $0x6c] sm:$0xf] }
 0x39b   :  { %v3173_v14 = vadd.f32 %v12919_v1, %v3172_v0  ;;  %11196 = vrcp.f32 %v12949_v55  ;;  %v3144_v39 = vsel %vm3141_vm1, %v3143_v29, %v3139_v20  ;;  %v3181_v52 = vor.u32 1.1754944e-38, %v3180_v4  ;;  %v10580_v20 = vld [vmem:[#allocation10 + $0x44] sm:$0xf] }
 0x39c   :  { %v12978_v58 = vadd.f32 1.0, %v11189_v22  ;;  %v8869_v34 = vmul.f32 -1.442695, %v3105_v45  ;;  %v3203_v3 = vand.u32 2147483647, %v12892_v38  ;;  %v12983_v27 = vor.u32 1.1754944e-38, %v3205_v33 }
 0x39d   :  { %v3177_v13 = vsel %vm12967_vm0, %v12919_v1, %v3173_v14  ;;  %vm3179_vm2 = vcmp.eq.f32.partialorder %v3178_v6, 8.507059e+37  ;;  %11198 = vtanh.f32 %v3102_v7  ;;  %v12987_v46 = vadd.f32 %v12915_v61, %v3197_v42  ;;  %v10582_v14 = vld [vmem:[#allocation10 + $0x4c] sm:$0xf0]  ;;  %v8908_v6 = vld [vmem:[#allocation10 + $0x50] sm:$0xf0] }
 0x39e   :  { %v12980_v44 = vpop.eup %11190  ;;  %11200 = vtanh.f32 %v12932_v54  ;;  %v3182_v32 = vsel %vm3179_vm2, %v3181_v52, %v3177_v13  ;;  %v3218_v8 = vand.u32 2147483647, %v12936_v16  ;;  %v3227_v11 = vmul.f32 %v11187_v19, %v3144_v39  ;;  %v8914_v52 = vld [vmem:[#allocation10 + $0x48] sm:$0xf]  ;;  %v13096_v19 = vld [vmem:[#allocation10 + $0x10] sm:$0xf0] }
 0x39f   :  { %v11193_v48 = vpop.eup %11192  ;;  %v12992_v51 = vor.u32 1.1754944e-38, %v3220_v28  ;;  %v3291_v21 = vand.u32 2147483648, %v12949_v55  ;;  %11202 = vrcp.f32 %v12978_v58  ;;  %vm3285_vm3 = vweird.f32 %v12949_v55 }
 0x3a0   :  { %v12990_v1 = vpop.eup %11194  ;;  %v13001_v49 = vadd.f32 1.0, %v11193_v48  ;;  %11204 = vpow2.f32 %v8869_v34  ;;  %v3225_v41 = vmul.f32 %v3182_v32, %v12674_v43  ;;  %vm3247_vm5 = vweird.f32 %v12947_v18  ;;  %v10583_v34 = vld [vmem:[#allocation10 + $0x54] sm:$0xf0] }
 0x3a1   :  { %v12996_v15 = vpop.eup %11196  ;;  %v3243_v60 = vmul.f32 %v12990_v1, %v12947_v18  ;;  %v3251_v37 = vand.u32 2147483647, %v12947_v18  ;;  %v3253_v50 = vand.u32 2147483648, %v12947_v18  ;;  %v3289_v30 = vand.u32 2147483647, %v12949_v55 }
 0x3a2   :  { %v3281_v5 = vmul.f32 %v12996_v15, %v12949_v55  ;;  %11206 = vrcp.f32 %v13001_v49  ;;  %v13013_v43 = vmul.f32 %v12980_v44, %v12936_v16  ;;  %v3292_v17 = vor.u32 1.1754944e-38, %v3291_v21 }
 0x3a3   :  { %v3244_v59 = vsub.f32 1.0, %v3243_v60  ;;  %v11199_v63 = vpop.eup %11198  ;;  %v13015_v0 = vadd.f32 %v3083_v53, %v2582_v47  ;;  %vm3248_vm6 = vweird.f32 %v12990_v1  ;;  %v3107_v9 = vadd.f32 %v3097_v10, %v2583_v40  ;;  %v10581_v60 = vld [vmem:[#allocation10 + $0x4c] sm:$0xf]  ;;  %v8916_v53 = vld [vmem:[#allocation10 + $0x58] sm:$0xf0] }
 0x3a4   :  { %v3282_v33 = vsub.f32 1.0, %v3281_v5  ;;  %v13017_v12 = vpop.eup %11200  ;;  %v8931_v57 = vor.u32 %v10587_v36, %v8930_v56  ;;  %v13023_v25 = vadd.f32 %v3227_v11, %v3225_v41  ;;  %vm3286_vm7 = vweird.f32 %v12996_v15  ;;  %vm13041_vm10 = vmor %vm3247_vm5, %vm3248_vm6  ;;  %v10578_v10 = vld [vmem:[#allocation10 + $0x2c] sm:$0xf0]  ;;  %v10576_v56 = vld [vmem:[#allocation10 + $0x24] sm:$0xf] }
 0x3a5   :  { %v3245_v23 = vmul.f32 %v12990_v1, %v3244_v59  ;;  %v13021_v4 = vpop.eup %11202  ;;  %vm13027_vm8 = vcmp.eq.f32.partialorder %v3251_v37, 8.507059e+37  ;;  %v3254_v42 = vor.u32 1.1754944e-38, %v3253_v50  ;;  %vm13032_vm9 = vcmp.eq.f32.partialorder %v3289_v30, 8.507059e+37  ;;  %vm13055_vm12 = vmor %vm3285_vm3, %vm3286_vm7  ;;  %v8892_v36 = vld [vmem:[#allocation10 + $0x30] sm:$0xf0] }
 0x3a6   :  { %v3283_v45 = vmul.f32 %v12996_v15, %v3282_v33  ;;  %v11205_v7 = vpop.eup %11204  ;;  %v8871_v35 = vmul.f32 -1.442695, %v3107_v9  ;;  %3630 = vmatpush.bf16.msrb.mxu2 %v8931_v57  ;;  %v3211_v47 = vsub.f32 1.0, %v13013_v43  ;;  %v8935_v39 = vor.u32 %v10585_v24, %v8932_v2  ;;  %v13073_v59 = vld [vmem:[#allocation10 + $0x28] sm:$0xf] }
 0x3a7   :  { %v3246_v22 = vadd.f32 %v12990_v1, %v3245_v23  ;;  %v13046_v40 = vadd.f32 1.0, %v11205_v7  ;;  %vm3200_vm11 = vweird.f32 %v12915_v61  ;;  %v8907_v11 = vor.u32 %v10582_v14, %v8906_v62  ;;  %v13080_v30 = vld [vmem:[#allocation10 + $0x34] sm:$0xf0]  ;;  %v13082_v43 = vld [vmem:[#allocation10 + $0x2c] sm:$0xf] }
 0x3a8   :  { %v3284_v28 = vadd.f32 %v12996_v15, %v3283_v45  ;;  %v13048_v48 = vpop.eup %11206  ;;  %11208 = vpow2.f32 %v8871_v35  ;;  %v8911_v21 = vor.u32 %v10580_v20, %v8908_v6  ;;  %v13069_v5 = vmul.f32 %v13021_v4, %v12978_v58  ;;  %3644 = vmatpush.bf16.msrb.mxu3 %v8935_v39  ;;  %v8900_v33 = vld [vmem:[#allocation10 + $0x38] sm:$0xf0]  ;;  %v13094_v45 = vld [vmem:[#allocation10 + $0x4] sm:$0xf] }
 0x3a9   :  { %v3250_v32 = vsel %vm13041_vm10, %v12990_v1, %v3246_v22  ;;  %v3258_v37 = vmul.f32 %v13048_v48, %v13001_v49  ;;  %v8890_v1 = vld [vmem:[#allocation10 + $0x20] sm:$0xf]  ;;  %vm3199_vm4 = vweird.f32 %v12892_v38  ;;  %vm3215_vm13 = vweird.f32 %v12980_v44  ;;  %3603 = vmatpush.bf16.msra.mxu0 %v8907_v11  ;;  %v13103_v22 = vld [vmem:[#allocation10 + $0x8] sm:$0xf]  ;;  %v13112_v39 = vld [vmem:[#allocation10 + $0x18] sm:$0xf0] }
 0x3aa   :  { %v3255_v41 = vsel %vm13027_vm8, %v3254_v42, %v3250_v32  ;;  %v3288_v55 = vsel %vm13055_vm12, %v12996_v15, %v3284_v28  ;;  %11210 = vrcp.f32 %v13046_v40  ;;  %3617 = vmatpush.bf16.msra.mxu1 %v8911_v21  ;;  %vm3214_vm14 = vweird.f32 %v12936_v16  ;;  %v13105_v42 = vld [vmem:[#allocation10 + $0x14] sm:$0xf0]  ;;  %v13110_v28 = vld [vmem:[#allocation10 + $0xc] sm:$0xf]  ;;  %vm13181_vm6 = vmor %vm3199_vm4, %vm3200_vm11 }
 0x3ab   :  { %v3293_v15 = vsel %vm13032_vm9, %v3292_v17, %v3288_v55  ;;  %v3352_v50 = vmul.f32 %v11199_v63, %v3255_v41  ;;  %11212 = vtanh.f32 %v13023_v25  ;;  %v3329_v23 = vand.u32 2147483647, %v12978_v58  ;;  %v13088_v17 = vld [vmem:[#allocation10] sm:$0xf]  ;;  %v13090_v63 = vld [vmem:[#allocation10 + $0xc] sm:$0xf0]  ;;  %vm13192_vm7 = vmor %vm3214_vm14, %vm3215_vm13 }
 0x3ac   :  { %v3350_v24 = vmul.f32 %v3293_v15, %v12734_v26  ;;  %v3259_v9 = vsub.f32 1.0, %v3258_v37  ;;  %v3212_v57 = vmul.f32 %v12980_v44, %v3211_v47  ;;  %v3266_v2 = vand.u32 2147483647, %v13001_v49  ;;  %v13123_v41 = vld [vmem:[#allocation11 + $0xe8] sm:$0xf] }
 0x3ad   :  { %v8915_v62 = vor.u32 %v10583_v34, %v8914_v52  ;;  %v8919_v14 = vor.u32 %v10581_v60, %v8916_v53  ;;  %v3322_v26 = vsub.f32 1.0, %v13069_v5  ;;  %v3268_v7 = vand.u32 2147483648, %v13001_v49  ;;  %v9114_v52 = vld [vmem:[#allocation11 + $0xe0] sm:$0xf]  ;;  %v10634_v34 = vld [vmem:[#allocation11 + $0xec] sm:$0xf0] }
 0x3ae   :  { %v13098_v20 = vadd.f32 %v3352_v50, %v3350_v24  ;;  %v3260_v6 = vmul.f32 %v13048_v48, %v3259_v9  ;;  %v11209_v29 = vpop.eup %11208  ;;  %vm3263_vm15 = vweird.f32 %v13048_v48  ;;  %v8891_v35 = vor.u32 %v10578_v10, %v8890_v1  ;;  %v13119_v60 = vld [vmem:[#allocation11 + $0xe4] sm:$0xf]  ;;  %v13121_v53 = vld [vmem:[#allocation11 + $0xf0] sm:$0xf0]  ;;  %v10635_v1 = vld [vmem:[#allocation11 + $0xf4] sm:$0xf0] }
 0x3af   :  { %3631 = vmatpush.bf16.msrb.mxu2 %v8915_v62  ;;  %3645 = vmatpush.bf16.msrb.mxu3 %v8919_v14  ;;  %v8895_v47 = vor.u32 %v10576_v56, %v8892_v36  ;;  %v8899_v13 = vor.u32 %v13080_v30, %v13073_v59  ;;  %v3331_v18 = vand.u32 2147483648, %v12978_v58  ;;  %v13116_v11 = vadd.f32 1.0, %v11209_v29  ;;  %v13133_v10 = vld [vmem:[#allocation11 + $0xec] sm:$0xf]  ;;  %v13135_v56 = vld [vmem:[#allocation11 + $0xf8] sm:$0xf0] }
 0x3b0   :  { %v3261_v32 = vadd.f32 %v13048_v48, %v3260_v6  ;;  %v8903_v21 = vor.u32 %v13082_v43, %v8900_v33  ;;  %v13125_v55 = vpop.eup %11210  ;;  %vm3262_vm0 = vweird.f32 %v13001_v49  ;;  %11214 = vtanh.f32 %v13015_v0  ;;  %3604 = vmatpush.bf16.msra.mxu0 %v8891_v35  ;;  %v9098_v30 = vld [vmem:[#allocation11 + $0xc0] sm:$0xf] }
 0x3b1   :  { %3618 = vmatpush.bf16.msra.mxu1 %v8895_v47  ;;  %v8875_v5 = vor.u32 %v13090_v63, %v13088_v17  ;;  %v8879_v37 = vor.u32 %v13094_v45, %v13096_v19  ;;  %v13137_v36 = vpop.eup %11212  ;;  %vm13141_vm1 = vcmp.eq.f32.partialorder %v3203_v3, 8.507059e+37  ;;  %v13146_v0 = vadd.f32 %v12980_v44, %v3212_v57  ;;  %vm13158_vm3 = vmor %vm3262_vm0, %vm3263_vm15  ;;  %v13173_v17 = vld [vmem:[#allocation11 + $0xc4] sm:$0xf]  ;;  %v13175_v63 = vld [vmem:[#allocation11 + $0xd0] sm:$0xf0] }
 0x3b2   :  { %vm13150_vm2 = vcmp.eq.f32.partialorder %v3218_v8, 8.507059e+37  ;;  %v3296_v15 = vmul.f32 %v13125_v55, %v13046_v40  ;;  %vm13162_vm5 = vcmp.eq.f32.partialorder %v3266_v2, 8.507059e+37  ;;  %11216 = vrcp.f32 %v13116_v11  ;;  %v10630_v8 = vld [vmem:[#allocation11 + $0xcc] sm:$0xf0]  ;;  %v9106_v45 = vld [vmem:[#allocation11 + $0xc8] sm:$0xf] }
 0x3b3   :  { %v3323_v43 = vmul.f32 %v13021_v4, %v3322_v26  ;;  %v3265_v33 = vsel %vm13158_vm3, %v13048_v48, %v3261_v32  ;;  %v3269_v24 = vor.u32 1.1754944e-38, %v3268_v7  ;;  %3632 = vmatpush.bf16.msrb.mxu2 %v8899_v13  ;;  %3646 = vmatpush.bf16.msrb.mxu3 %v8903_v21  ;;  %v8883_v9 = vor.u32 %v13105_v42, %v13103_v22  ;;  %v10631_v19 = vld [vmem:[#allocation11 + $0xd4] sm:$0xf0]  ;;  %v10629_v22 = vld [vmem:[#allocation11 + $0xcc] sm:$0xf] }
 0x3b4   :  { %v3297_v2 = vsub.f32 1.0, %v3296_v15  ;;  %v3306_v48 = vand.u32 2147483648, %v13046_v40  ;;  %v8887_v62 = vor.u32 %v13110_v28, %v13112_v39  ;;  %v9115_v14 = vor.u32 %v10634_v34, %v9114_v52  ;;  %3605 = vmatpush.bf16.msra.mxu0 %v8875_v5  ;;  %v9108_v42 = vld [vmem:[#allocation11 + $0xd8] sm:$0xf0]  ;;  %v9082_v13 = vld [vmem:[#allocation11 + $0xa0] sm:$0xf] }
 0x3b5   :  { %vm3301_vm8 = vweird.f32 %v13125_v55  ;;  %v3304_v38 = vand.u32 2147483647, %v13046_v40  ;;  %3619 = vmatpush.bf16.msra.mxu1 %v8879_v37  ;;  %v9119_v6 = vor.u32 %v13119_v60, %v13121_v53  ;;  %v9123_v7 = vor.u32 %v10635_v1, %v13123_v41  ;;  %v10626_v28 = vld [vmem:[#allocation11 + $0xac] sm:$0xf0]  ;;  %v13206_v39 = vld [vmem:[#allocation11 + $0xa4] sm:$0xf] }
 0x3b6   :  { %v3298_v29 = vmul.f32 %v13125_v55, %v3297_v2  ;;  %v3270_v16 = vsel %vm13162_vm5, %v3269_v24, %v3265_v33  ;;  %v9127_v35 = vor.u32 %v13133_v10, %v13135_v56  ;;  %v9099_v47 = vor.u32 %v10630_v8, %v9098_v30  ;;  %v11215_v52 = vpop.eup %11214  ;;  %v9084_v60 = vld [vmem:[#allocation11 + $0xb0] sm:$0xf0]  ;;  %v9090_v53 = vld [vmem:[#allocation11 + $0xa8] sm:$0xf]  ;;  %v10627_v41 = vld [vmem:[#allocation11 + $0xb4] sm:$0xf0] }
 0x3b7   :  { %v3202_v34 = vsel %vm13181_vm6, %v12915_v61, %v12987_v46  ;;  %v3217_v32 = vsel %vm13192_vm7, %v12980_v44, %v13146_v0  ;;  %v13217_v21 = vadd.f32 %v13021_v4, %v3323_v43  ;;  %vm3300_vm9 = vweird.f32 %v13046_v40  ;;  %3633 = vmatpush.bf16.msrb.mxu2 %v8883_v9  ;;  %3647 = vmatpush.bf16.msrb.mxu3 %v8887_v62  ;;  %v10625_v0 = vld [vmem:[#allocation11 + $0xac] sm:$0xf]  ;;  %v9092_v8 = vld [vmem:[#allocation11 + $0xb8] sm:$0xf0]  ;;  %v9066_v43 = vld [vmem:[#allocation11 + $0x80] sm:$0xf] }
 0x3b8   :  { %3860 = vmatpush.bf16.msrb.mxu0 %v9115_v14  ;;  %v13220_v5 = vpop.eup %11216  ;;  %vm3325_vm10 = vweird.f32 %v12978_v58  ;;  %v3299_v61 = vadd.f32 %v13125_v55, %v3298_v29  ;;  %v3307_v46 = vor.u32 1.1754944e-38, %v3306_v48  ;;  %v9103_v44 = vor.u32 %v13173_v17, %v13175_v63  ;;  %vm13228_vm11 = vmor %vm3300_vm9, %vm3301_vm8  ;;  %v10622_v33 = vld [vmem:[#allocation11 + $0x8c] sm:$0xf0]  ;;  %v10620_v57 = vld [vmem:[#allocation11 + $0x84] sm:$0xf] }
 0x3b9   :  { %3874 = vmatpush.bf16.msrb.mxu1 %v9119_v6  ;;  %v9107_v37 = vor.u32 %v10631_v19, %v9106_v45  ;;  %vm3305_vm12 = vcmp.eq.f32.partialorder %v3304_v38, 8.507059e+37  ;;  %v3353_v1 = vmul.f32 %v11215_v52, %v3270_v16  ;;  %v3336_v10 = vmul.f32 %v13220_v5, %v13116_v11  ;;  %v9068_v2 = vld [vmem:[#allocation11 + $0x90] sm:$0xf0]  ;;  %v10623_v14 = vld [vmem:[#allocation11 + $0x94] sm:$0xf0] }
 0x3ba   :  { %v9111_v56 = vor.u32 %v10629_v22, %v9108_v42  ;;  %v3303_v15 = vsel %vm13228_vm11, %v13125_v55, %v3299_v61  ;;  %v9083_v50 = vor.u32 %v10626_v28, %v9082_v13  ;;  %v9087_v3 = vor.u32 %v13206_v39, %v9084_v60  ;;  %v9076_v19 = vld [vmem:[#allocation11 + $0x98] sm:$0xf0]  ;;  %v9050_v22 = vld [vmem:[#allocation11 + $0x60] sm:$0xf]  ;;  %v10618_v42 = vld [vmem:[#allocation11 + $0x6c] sm:$0xf0] }
 0x3bb   :  { %3888 = vmatpush.bf16.msra.mxu2 %v9123_v7  ;;  %3902 = vmatpush.bf16.msra.mxu3 %v9127_v35  ;;  %v9091_v30 = vor.u32 %v10627_v41, %v9090_v53  ;;  %v3308_v24 = vsel %vm3305_vm12, %v3307_v46, %v3303_v15  ;;  %v3337_v9 = vsub.f32 1.0, %v3336_v10  ;;  %v3207_v17 = vsel %vm13141_vm1, %v12983_v27, %v3202_v34  ;;  %v9052_v13 = vld [vmem:[#allocation11 + $0x70] sm:$0xf0]  ;;  %v9058_v34 = vld [vmem:[#allocation11 + $0x68] sm:$0xf] }
 0x3bc   :  { %3861 = vmatpush.bf16.msrb.mxu0 %v9099_v47  ;;  %v3222_v63 = vsel %vm13150_vm2, %v12992_v51, %v3217_v32  ;;  %vm3326_vm4 = vweird.f32 %v13021_v4  ;;  %v3351_v55 = vmul.f32 %v3308_v24, %v12841_v31  ;;  %v3232_v48 = vmul.f32 %v13017_v12, %v3207_v17  ;;  %v9074_v51 = vld [vmem:[#allocation11 + $0x88] sm:$0xf]  ;;  %v10621_v31 = vld [vmem:[#allocation11 + $0x8c] sm:$0xf]  ;;  %v10616_v47 = vld [vmem:[#allocation11 + $0x64] sm:$0xf] }
 0x3bd   :  { %3875 = vmatpush.bf16.msrb.mxu1 %v9103_v44  ;;  %v3233_v62 = vmul.f32 %v13137_v36, %v3222_v63  ;;  %11218 = vtanh.f32 %v13098_v20  ;;  %v3338_v27 = vmul.f32 %v13220_v5, %v3337_v9  ;;  %v9095_v49 = vor.u32 %v10625_v0, %v9092_v8  ;;  %vm13260_vm14 = vmor %vm3325_vm10, %vm3326_vm4  ;;  %v10619_v32 = vld [vmem:[#allocation11 + $0x74] sm:$0xf0]  ;;  %v10617_v41 = vld [vmem:[#allocation11 + $0x6c] sm:$0xf] }
 0x3be   :  { %v9067_v59 = vor.u32 %v10622_v33, %v9066_v43  ;;  %v13250_v45 = vadd.f32 %v3353_v1, %v3351_v55  ;;  %v3360_v26 = vpack.c.bf16 %v3232_v48, %v3232_v48  ;;  %vm3341_vm13 = vweird.f32 %v13220_v5  ;;  %v9060_v61 = vld [vmem:[#allocation11 + $0x78] sm:$0xf0]  ;;  %v9034_v40 = vld [vmem:[#allocation11 + $0x40] sm:$0xf]  ;;  %v10614_v1 = vld [vmem:[#allocation11 + $0x4c] sm:$0xf0] }
 0x3bf   :  { %3889 = vmatpush.bf16.msra.mxu2 %v9107_v37  ;;  %3903 = vmatpush.bf16.msra.mxu3 %v9111_v56  ;;  %v3361_v38 = vpack.c.bf16 %v3233_v62, %v3233_v62  ;;  %v10947_v6 = vpack.c.bf16 %v3233_v62, %v3232_v48  ;;  %v3339_v12 = vadd.f32 %v13220_v5, %v3338_v27  ;;  %v3346_v36 = vand.u32 2147483648, %v13116_v11  ;;  %v9044_v8 = vld [vmem:[#allocation11 + $0x58] sm:$0xf0]  ;;  %v9018_v63 = vld [vmem:[#allocation11 + $0x20] sm:$0xf] }
 0x3c0   :  { %3862 = vmatpush.bf16.msrb.mxu0 %v9083_v50  ;;  %v9071_v7 = vor.u32 %v10620_v57, %v9068_v2  ;;  %11220 = vtanh.f32 %v13250_v45  ;;  %v9075_v29 = vor.u32 %v10623_v14, %v9074_v51  ;;  %v3434_v16 = vunpack.c.l.b16 %v3360_v26  ;;  %v10612_v50 = vld [vmem:[#allocation11 + $0x44] sm:$0xf]  ;;  %v10610_v55 = vld [vmem:[#allocation11 + $0x2c] sm:$0xf0]  ;;  %v9020_v48 = vld [vmem:[#allocation11 + $0x30] sm:$0xf0] }
 0x3c1   :  { %3876 = vmatpush.bf16.msrb.mxu1 %v9087_v3  ;;  %10948 = vst [vmem:[#allocation3 + $0x18] sm:$0xff] %v10947_v6   ;;  %v3435_v35 = vunpack.c.l.b16 %v3361_v38  ;;  %vm3340_vm15 = vweird.f32 %v13116_v11  ;;  %v3344_v39 = vand.u32 2147483647, %v13116_v11  ;;  %v9079_v52 = vor.u32 %v10621_v31, %v9076_v19  ;;  %v9036_v3 = vld [vmem:[#allocation11 + $0x50] sm:$0xf0] }
 0x3c2   :  { %vm13268_vm0 = vmor %vm3340_vm15, %vm3341_vm13  ;;  %v3328_v11 = vsel %vm13260_vm14, %v13021_v4, %v13217_v21  ;;  %v9051_v37 = vor.u32 %v10618_v42, %v9050_v22  ;;  %v3332_v10 = vor.u32 1.1754944e-38, %v3331_v18  ;;  %v3347_v56 = vor.u32 1.1754944e-38, %v3346_v36  ;;  %v9042_v21 = vld [vmem:[#allocation11 + $0x48] sm:$0xf]  ;;  %v10613_v18 = vld [vmem:[#allocation11 + $0x4c] sm:$0xf] }
 0x3c3   :  { %3890 = vmatpush.bf16.msra.mxu2 %v9091_v30  ;;  %3904 = vmatpush.bf16.msra.mxu3 %v9095_v49  ;;  %v3436_v53 = vpack.c.b16 %v3435_v35, %v3434_v16  ;;  %v11219_v46 = vpop.eup %11218  ;;  %v3343_v44 = vsel %vm13268_vm0, %v13220_v5, %v3339_v12  ;;  %v9055_v0 = vor.u32 %v10616_v47, %v9052_v13  ;;  %vm3330_vm1 = vcmp.eq.f32.partialorder %v3329_v23, 8.507059e+37  ;;  %v10615_v5 = vld [vmem:[#allocation11 + $0x54] sm:$0xf0]  ;;  %v10608_v57 = vld [vmem:[#allocation11 + $0x24] sm:$0xf] }
 0x3c4   :  { %3863 = vmatpush.bf16.msrb.mxu0 %v9067_v59  ;;  %v9059_v15 = vor.u32 %v10619_v32, %v9058_v34  ;;  %vm3345_vm2 = vcmp.eq.f32.partialorder %v3344_v39, 8.507059e+37  ;;  %v9063_v4 = vor.u32 %v10617_v41, %v9060_v61  ;;  %v3333_v43 = vsel %vm3330_vm1, %v3332_v10, %v3328_v11  ;;  %v9026_v62 = vld [vmem:[#allocation11 + $0x28] sm:$0xf]  ;;  %v10611_v27 = vld [vmem:[#allocation11 + $0x34] sm:$0xf0] }
 0x3c5   :  { %3877 = vmatpush.bf16.msrb.mxu1 %v9071_v7  ;;  %3606 = vmatmul.bf16.vlgmr.msra.gmra.mxu0 %v3436_v53  ;;  %v3348_v33 = vsel %vm3345_vm2, %v3347_v56, %v3343_v44  ;;  %v9035_v24 = vor.u32 %v10614_v1, %v9034_v40  ;;  %v3358_v9 = vmul.f32 %v11219_v46, %v3333_v43  ;;  %v10609_v59 = vld [vmem:[#allocation11 + $0x2c] sm:$0xf]  ;;  %v9028_v51 = vld [vmem:[#allocation11 + $0x38] sm:$0xf0]  ;;  %v9002_v38 = vld [vmem:[#allocation11] sm:$0xf] }
 0x3c6   :  { %v11221_v30 = vpop.eup %11220  ;;  %3620 = vmatmul.bf16.vlgmr.msra.gmra.mxu1 %v3436_v53  ;;  %3634 = vmatmul.bf16.vlgmr.msrb.gmra.mxu2 %v3436_v53  ;;  %v9039_v58 = vor.u32 %v10612_v50, %v9036_v3  ;;  %v9043_v23 = vor.u32 %v10615_v5, %v9042_v21  ;;  %v9047_v2 = vor.u32 %v10613_v18, %v9044_v8  ;;  %v10606_v6 = vld [vmem:[#allocation11 + $0xc] sm:$0xf0]  ;;  %v10604_v12 = vld [vmem:[#allocation11 + $0x4] sm:$0xf]  ;;  %v9004_v22 = vld [vmem:[#allocation11 + $0x10] sm:$0xf0] }
 0x3c7   :  { %3891 = vmatpush.bf16.msra.mxu2 %v9075_v29  ;;  %3905 = vmatpush.bf16.msra.mxu3 %v9079_v52  ;;  %v3359_v17 = vmul.f32 %v11221_v30, %v3348_v33  ;;  %v9019_v31 = vor.u32 %v10610_v55, %v9018_v63  ;;  %v9023_v19 = vor.u32 %v10608_v57, %v9020_v48  ;;  %v9010_v42 = vld [vmem:[#allocation11 + $0x8] sm:$0xf]  ;;  %v10607_v29 = vld [vmem:[#allocation11 + $0x14] sm:$0xf0]  ;;  %v10605_v16 = vld [vmem:[#allocation11 + $0xc] sm:$0xf] }
 0x3c8   :  { %3648 = vmatmul.bf16.vlgmr.msrb.gmra.mxu3 %v3436_v53  ;;  %3864 = vmatpush.bf16.msrb.mxu0 %v9051_v37  ;;  %v9027_v26 = vor.u32 %v10611_v27, %v9026_v62  ;;  %v3362_v36 = vpack.c.bf16 %v3358_v9, %v3358_v9  ;;  %v9031_v7 = vor.u32 %v10609_v59, %v9028_v51  ;;  %v9012_v35 = vld [vmem:[#allocation11 + $0x18] sm:$0xf0]  ;;  %v9254_v60 = vld [vmem:[#allocation10 + $0xe0] sm:$0xf]  ;;  %v10666_v53 = vld [vmem:[#allocation10 + $0xec] sm:$0xf0] }
 0x3c9   :  { %3878 = vmatpush.bf16.msrb.mxu1 %v9055_v0  ;;  %v10952_v49 = vpack.c.bf16 %v3359_v17, %v3358_v9  ;;  %v3363_v14 = vpack.c.bf16 %v3359_v17, %v3359_v17  ;;  %v9003_v13 = vor.u32 %v10606_v6, %v9002_v38  ;;  %v9007_v28 = vor.u32 %v10604_v12, %v9004_v22  ;;  %v10664_v41 = vld [vmem:[#allocation10 + $0xe4] sm:$0xf]  ;;  %v9256_v46 = vld [vmem:[#allocation10 + $0xf0] sm:$0xf0]  ;;  %v9262_v11 = vld [vmem:[#allocation10 + $0xe8] sm:$0xf] }
 0x3ca   :  { %v9011_v39 = vor.u32 %v10607_v29, %v9010_v42  ;;  %v3696_v52 = vunpack.c.l.b16 %v3362_v36  ;;  %v9015_v34 = vor.u32 %v10605_v16, %v9012_v35  ;;  %v9255_v61 = vor.u32 %v10666_v53, %v9254_v60  ;;  %v10667_v44 = vld [vmem:[#allocation10 + $0xf4] sm:$0xf0]  ;;  %v10665_v1 = vld [vmem:[#allocation10 + $0xec] sm:$0xf]  ;;  %v9264_v10 = vld [vmem:[#allocation10 + $0xf8] sm:$0xf0] }
 0x3cb   :  { %3892 = vmatpush.bf16.msra.mxu2 %v9059_v15  ;;  %3906 = vmatpush.bf16.msra.mxu3 %v9063_v4  ;;  %10953 = vst [vmem:[#allocation4 + $0x28] sm:$0xff] %v10952_v49   ;;  %v3697_v47 = vunpack.c.l.b16 %v3363_v14  ;;  %v9259_v37 = vor.u32 %v10664_v41, %v9256_v46  ;;  %v9263_v40 = vor.u32 %v10667_v44, %v9262_v11  ;;  %v9238_v0 = vld [vmem:[#allocation10 + $0xc0] sm:$0xf]  ;;  %v10662_v15 = vld [vmem:[#allocation10 + $0xcc] sm:$0xf0] }
 0x3cc   :  { %3865 = vmatpush.bf16.msrb.mxu0 %v9035_v24  ;;  %v9267_v56 = vor.u32 %v10665_v1, %v9264_v10  ;;  %v10660_v50 = vld [vmem:[#allocation10 + $0xc4] sm:$0xf]  ;;  %v15243_v3 = vld [vmem:[#allocation28_spill] sm:$0xff]  ;;  %v9239_v21 = vor.u32 %v10662_v15, %v9238_v0  ;;  %v9246_v30 = vld [vmem:[#allocation10 + $0xc8] sm:$0xf] }
 0x3cd   :  { %3879 = vmatpush.bf16.msrb.mxu1 %v9039_v58  ;;  %v3698_v32 = vpack.c.b16 %v3697_v47, %v3696_v52  ;;  %v3377_v4 = vunpack.c.l.bf16 %v15243_v3  ;;  %v9240_v5 = vld [vmem:[#allocation10 + $0xd0] sm:$0xf0]  ;;  %v10663_v18 = vld [vmem:[#allocation10 + $0xd4] sm:$0xf0]  ;;  %v3378_v43 = vunpack.c.h.bf16 %v15243_v3  ;;  %v10661_v9 = vld [vmem:[#allocation10 + $0xcc] sm:$0xf] }
 0x3ce   :  { %v9243_v33 = vor.u32 %v10660_v50, %v9240_v5  ;;  %v9247_v24 = vor.u32 %v10663_v18, %v9246_v30  ;;  %v9248_v17 = vld [vmem:[#allocation10 + $0xd8] sm:$0xf0]  ;;  %v15244_v57 = vld [vmem:[#allocation30_spill] sm:$0xff]  ;;  %v10658_v59 = vld [vmem:[#allocation10 + $0xac] sm:$0xf0] }
 0x3cf   :  { %3893 = vmatpush.bf16.msra.mxu2 %v9043_v23  ;;  %3907 = vmatpush.bf16.msra.mxu3 %v9047_v2  ;;  %v9251_v63 = vor.u32 %v10661_v9, %v9248_v17  ;;  %v15245_v2 = vld [vmem:[#allocation31_spill] sm:$0xff]  ;;  %v9222_v49 = vld [vmem:[#allocation10 + $0xa0] sm:$0xf]  ;;  %v10656_v14 = vld [vmem:[#allocation10 + $0xa4] sm:$0xf] }
 0x3d0   :  { %3866 = vmatpush.bf16.msrb.mxu0 %v9019_v31  ;;  %v835_v48 = vpack.c.bf16 %v15245_v2, %v15244_v57  ;;  %v9223_v51 = vor.u32 %v10658_v59, %v9222_v49  ;;  %v9224_v31 = vld [vmem:[#allocation10 + $0xb0] sm:$0xf0]  ;;  %v10659_v38 = vld [vmem:[#allocation10 + $0xb4] sm:$0xf0]  ;;  %v10657_v6 = vld [vmem:[#allocation10 + $0xac] sm:$0xf] }
 0x3d1   :  { %3880 = vmatpush.bf16.msrb.mxu1 %v9023_v19  ;;  %v9230_v19 = vld [vmem:[#allocation10 + $0xa8] sm:$0xf]  ;;  %v9232_v12 = vld [vmem:[#allocation10 + $0xb8] sm:$0xf0]  ;;  %v15246_v36 = vld [vmem:[#allocation44_spill] sm:$0xff] }
 0x3d2   :  { %v3381_v22 = vunpack.c.l.bf16 %v835_v48  ;;  %v9231_v42 = vor.u32 %v10659_v38, %v9230_v19  ;;  %v9235_v29 = vor.u32 %v10657_v6, %v9232_v12  ;;  %v3382_v47 = vunpack.c.h.bf16 %v835_v48  ;;  %v10652_v60 = vld [vmem:[#allocation10 + $0x84] sm:$0xf]  ;;  %v9208_v46 = vld [vmem:[#allocation10 + $0x90] sm:$0xf0]  ;;  %v15247_v15 = vld [vmem:[#allocation47_spill] sm:$0xff] }
 0x3d3   :  { %3894 = vmatpush.bf16.msra.mxu2 %v9027_v26  ;;  %3908 = vmatpush.bf16.msra.mxu3 %v9031_v7  ;;  %v9227_v26 = vor.u32 %v10656_v14, %v9224_v31  ;;  %v3380_v7 = vunpack.c.h.bf16 %v15246_v36  ;;  %v3384_v50 = vunpack.c.h.bf16 %v15247_v15  ;;  %v10655_v3 = vld [vmem:[#allocation10 + $0x94] sm:$0xf0]  ;;  %v15248_v5 = vld [vmem:[#allocation50_spill] sm:$0xff]  ;;  %v15249_v30 = vld [vmem:[#allocation51_spill] sm:$0xff] }
 0x3d4   :  { %3867 = vmatpush.bf16.msrb.mxu0 %v9003_v13  ;;  %v13297_v18 = vpack.c.bf16 %v15249_v30, %v15248_v5  ;;  %v9190_v9 = vld [vmem:[#allocation10 + $0x60] sm:$0xf]  ;;  %v10650_v17 = vld [vmem:[#allocation10 + $0x6c] sm:$0xf0]  ;;  %v10648_v48 = vld [vmem:[#allocation10 + $0x64] sm:$0xf] }
 0x3d5   :  { %3881 = vmatpush.bf16.msrb.mxu1 %v9007_v28  ;;  %v9198_v14 = vld [vmem:[#allocation10 + $0x68] sm:$0xf]  ;;  %v10651_v31 = vld [vmem:[#allocation10 + $0x74] sm:$0xf0]  ;;  %v10649_v19 = vld [vmem:[#allocation10 + $0x6c] sm:$0xf]  ;;  %v9191_v12 = vor.u32 %v10650_v17, %v9190_v9 }
 0x3d7   :  { %3895 = vmatpush.bf16.msra.mxu2 %v9011_v39  ;;  %3909 = vmatpush.bf16.msra.mxu3 %v9015_v34  ;;  %v9206_v34 = vld [vmem:[#allocation10 + $0x80] sm:$0xf] }
 0x3d8   :  { %3868 = vmatmul.bf16.vlgmr.msrb.gmra.mxu0 %v3698_v32  ;;  %3882 = vmatmul.bf16.vlgmr.msrb.gmra.mxu1 %v3698_v32 }
 0x3d9   :  { %4408 = vmatpush.bf16.msra.mxu0 %v9255_v61  ;;  %4422 = vmatpush.bf16.msra.mxu1 %v9259_v37 }
 0x3da   :  { %3896 = vmatmul.bf16.vlgmr.msra.gmra.mxu2 %v3698_v32  ;;  %3910 = vmatmul.bf16.vlgmr.msra.gmra.mxu3 %v3698_v32  ;;  %v10654_v32 = vld [vmem:[#allocation10 + $0x8c] sm:$0xf0] }
 0x3db   :  { %4436 = vmatpush.bf16.msrb.mxu2 %v9263_v40  ;;  %4450 = vmatpush.bf16.msrb.mxu3 %v9267_v56  ;;  %v9207_v61 = vor.u32 %v10654_v32, %v9206_v34  ;;  %v9211_v40 = vor.u32 %v10652_v60, %v9208_v46  ;;  %v9214_v56 = vld [vmem:[#allocation10 + $0x88] sm:$0xf]  ;;  %v10646_v34 = vld [vmem:[#allocation10 + $0x4c] sm:$0xf0] }
 0x3dc   :  { %v9215_v59 = vor.u32 %v10655_v3, %v9214_v56 }
 0x3dd   :  { %4409 = vmatpush.bf16.msra.mxu0 %v9239_v21  ;;  %4423 = vmatpush.bf16.msra.mxu1 %v9243_v33  ;;  %v9216_v21 = vld [vmem:[#allocation10 + $0x98] sm:$0xf0]  ;;  %v15250_v33 = vld [vmem:[#allocation48_spill] sm:$0xff] }
 0x3de   :  { %v3393_v6 = vunpack.c.h.bf16 %v15250_v33 }
 0x3df   :  { %4437 = vmatpush.bf16.msrb.mxu2 %v9247_v24  ;;  %4451 = vmatpush.bf16.msrb.mxu3 %v9251_v63  ;;  %v3392_v24 = vunpack.c.l.bf16 %v15250_v33 }
 0x3e1   :  { %4410 = vmatpush.bf16.msra.mxu0 %v9223_v51  ;;  %4424 = vmatpush.bf16.msra.mxu1 %v9227_v26 }
 0x3e3   :  { %4438 = vmatpush.bf16.msrb.mxu2 %v9231_v42  ;;  %4452 = vmatpush.bf16.msrb.mxu3 %v9235_v29 }
 0x3e5   :  { %4411 = vmatpush.bf16.msra.mxu0 %v9207_v61  ;;  %4425 = vmatpush.bf16.msra.mxu1 %v9211_v40 }
 0x3e7   :  { %4439 = vmatpush.bf16.msrb.mxu2 %v9215_v59 }
 0x3e9   :  { %4412 = vmatpush.bf16.msra.mxu0 %v9191_v12 }
 0x442   :  { %v3607_v8 = vpop.f32.mrf.mxu0 }
 0x443   :  { %v3654_v58 = vadd.f32 %v3607_v8, %v3377_v4  ;;  %v3621_v23 = vpop.f32.mrf.mxu1  ;;  %v10653_v4 = vld [vmem:[#allocation10 + $0x8c] sm:$0xf]  ;;  %v3379_v8 = vunpack.c.l.bf16 %v15246_v36 }
 0x444   :  { %v3655_v55 = vadd.f32 %v3621_v23, %v3378_v43  ;;  %v15252_v23 = vld [vmem:[#allocation77_spill] sm:$0xff]  ;;  %v9219_v51 = vor.u32 %v10653_v4, %v9216_v21 }
 0x445   :  { %v9128_v62 = vmul.f32 -1.442695, %v3654_v58  ;;  %v15251_v58 = vld [vmem:[#allocation76_spill] sm:$0xff] }
 0x446   :  { %v9130_v27 = vmul.f32 -1.442695, %v3655_v55  ;;  %v13303_v63 = vpack.c.bf16 %v15252_v23, %v15251_v58  ;;  %v3383_v55 = vunpack.c.l.bf16 %v15247_v15  ;;  %4453 = vmatpush.bf16.msrb.mxu3 %v9219_v51 }
 0x447   :  { %11222 = vpow2.f32 %v9128_v62  ;;  %v9192_v62 = vld [vmem:[#allocation10 + $0x70] sm:$0xf0] }
 0x448   :  { %11224 = vpow2.f32 %v9130_v27  ;;  %v9195_v36 = vor.u32 %v10648_v48, %v9192_v62 }
 0x449   :  { %v3635_v0 = vpop.f32.mrf.mxu2 }
 0x44a   :  { %v3609_v35 = vpop.f32.mrf.mxu0  ;;  %v3656_v27 = vadd.f32 %v3635_v0, %v3379_v8  ;;  %4426 = vmatpush.bf16.msra.mxu1 %v9195_v36  ;;  %v3399_v36 = vunpack.c.h.bf16 %v13303_v63 }
 0x44b   :  { %v3649_v16 = vpop.f32.mrf.mxu3  ;;  %v3658_v28 = vadd.f32 %v3609_v35, %v3381_v22  ;;  %v3623_v39 = vpop.f32.mrf.mxu1 }
 0x44c   :  { %v3657_v13 = vadd.f32 %v3649_v16, %v3380_v7  ;;  %v3659_v52 = vadd.f32 %v3623_v39, %v3382_v47  ;;  %v9200_v7 = vld [vmem:[#allocation10 + $0x78] sm:$0xf0]  ;;  %v9199_v16 = vor.u32 %v10651_v31, %v9198_v14  ;;  %v3397_v39 = vunpack.c.h.bf16 %v13297_v18 }
 0x44d   :  { %v11223_v53 = vpop.eup %11222  ;;  %v9129_v37 = vmul.f32 -1.442695, %v3658_v28  ;;  %v9203_v35 = vor.u32 %v10649_v19, %v9200_v7  ;;  %v3396_v28 = vunpack.c.l.bf16 %v13297_v18 }
 0x44e   :  { %v9132_v41 = vmul.f32 -1.442695, %v3657_v13  ;;  %v11225_v11 = vpop.eup %11224  ;;  %v13288_v44 = vadd.f32 1.0, %v11223_v53  ;;  %v9131_v10 = vmul.f32 -1.442695, %v3659_v52  ;;  %4440 = vmatpush.bf16.msrb.mxu2 %v9199_v16 }
 0x44f   :  { %v13290_v1 = vadd.f32 1.0, %v11225_v11  ;;  %v9174_v52 = vld [vmem:[#allocation10 + $0x40] sm:$0xf]  ;;  %4454 = vmatpush.bf16.msrb.mxu3 %v9203_v35 }
 0x450   :  { %11226 = vpow2.f32 %v9132_v41  ;;  %v3941_v53 = vand.u32 2147483647, %v13288_v44  ;;  %v15253_v41 = vld [vmem:[#allocation75_spill] sm:$0xff]  ;;  %vm3937_vm6 = vweird.f32 %v13288_v44 }
 0x451   :  { %11228 = vrcp.f32 %v13288_v44  ;;  %v3394_v61 = vunpack.c.l.bf16 %v15253_v41  ;;  %v3981_v3 = vand.u32 2147483648, %v13290_v1  ;;  %v3979_v5 = vand.u32 2147483647, %v13290_v1  ;;  %v3637_v30 = vpop.f32.mrf.mxu2 }
 0x452   :  { %11230 = vrcp.f32 %v13290_v1  ;;  %vm3975_vm7 = vweird.f32 %v13290_v1  ;;  %vm3942_vm10 = vcmp.eq.f32.partialorder %v3941_v53, 8.507059e+37  ;;  %v3660_v48 = vadd.f32 %v3637_v30, %v3383_v55 }
 0x453   :  { %11232 = vpow2.f32 %v9129_v37  ;;  %v3651_v43 = vpop.f32.mrf.mxu3  ;;  %v3943_v37 = vand.u32 2147483648, %v13288_v44  ;;  %vm3980_vm11 = vcmp.eq.f32.partialorder %v3979_v5, 8.507059e+37 }
 0x454   :  { %11234 = vpow2.f32 %v9131_v10  ;;  %v3661_v57 = vadd.f32 %v3651_v43, %v3384_v50  ;;  %v9175_v50 = vor.u32 %v10646_v34, %v9174_v52 }
 0x455   :  { %v3869_v2 = vpop.f32.mrf.mxu0  ;;  %v3883_v0 = vpop.f32.mrf.mxu1  ;;  %v3944_v17 = vor.u32 1.1754944e-38, %v3943_v37 }
 0x456   :  { %v3916_v49 = vadd.f32 %v3869_v2, %v3392_v24  ;;  %v11227_v26 = vpop.eup %11226  ;;  %v9133_v38 = vmul.f32 -1.442695, %v3661_v57  ;;  %4413 = vmatpush.bf16.msra.mxu0 %v9175_v50  ;;  %v3917_v33 = vadd.f32 %v3883_v0, %v3393_v6  ;;  %v3395_v24 = vunpack.c.h.bf16 %v15253_v41 }
 0x457   :  { %v13307_v22 = vpop.eup %11228  ;;  %v13309_v42 = vadd.f32 1.0, %v11227_v26  ;;  %v3982_v2 = vor.u32 1.1754944e-38, %v3981_v3  ;;  %v10643_v3 = vld [vmem:[#allocation10 + $0x34] sm:$0xf0] }
 0x458   :  { %v9134_v29 = vmul.f32 -1.442695, %v3916_v49  ;;  %v11231_v47 = vpop.eup %11230  ;;  %v3933_v13 = vmul.f32 %v13307_v22, %v13288_v44  ;;  %11236 = vpow2.f32 %v9133_v38  ;;  %vm3938_vm3 = vweird.f32 %v13307_v22 }
 0x459   :  { %v11233_v32 = vpop.eup %11232  ;;  %v3971_v60 = vmul.f32 %v11231_v47, %v13290_v1  ;;  %11238 = vtanh.f32 %v3656_v27  ;;  %vm3976_vm5 = vweird.f32 %v11231_v47  ;;  %vm3939_vm8 = vmor %vm3937_vm6, %vm3938_vm3  ;;  %v4021_v49 = vand.u32 2147483648, %v13309_v42 }
 0x45a   :  { %v11235_v46 = vpop.eup %11234  ;;  %v3934_v11 = vsub.f32 1.0, %v3933_v13  ;;  %11240 = vrcp.f32 %v13309_v42  ;;  %v13320_v40 = vadd.f32 1.0, %v11233_v32  ;;  %vm3977_vm9 = vmor %vm3975_vm7, %vm3976_vm5  ;;  %v9136_v31 = vmul.f32 -1.442695, %v3917_v33 }
 0x45b   :  { %v3972_v10 = vsub.f32 1.0, %v3971_v60  ;;  %v13322_v56 = vadd.f32 1.0, %v11235_v46  ;;  %11242 = vpow2.f32 %v9134_v29  ;;  %v3398_v38 = vunpack.c.l.bf16 %v13303_v63  ;;  %v9326_v63 = vld [vmem:[#allocation11 + $0x68] sm:$0xf] }
 0x45c   :  { %v3935_v4 = vmul.f32 %v13307_v22, %v3934_v11  ;;  %11244 = vrcp.f32 %v13320_v40  ;;  %v4019_v6 = vand.u32 2147483647, %v13309_v42  ;;  %v3958_v32 = vand.u32 2147483648, %v13320_v40 }
 0x45d   :  { %v3973_v21 = vmul.f32 %v11231_v47, %v3972_v10  ;;  %11246 = vrcp.f32 %v13322_v56  ;;  %v3996_v35 = vand.u32 2147483648, %v13322_v56  ;;  %v3911_v13 = vpop.f32.mrf.mxu3  ;;  %vm3990_vm4 = vweird.f32 %v13322_v56  ;;  %v3897_v46 = vpop.f32.mrf.mxu2 }
 0x45e   :  { %v11237_v8 = vpop.eup %11236  ;;  %v3936_v43 = vadd.f32 %v13307_v22, %v3935_v4  ;;  %v3871_v11 = vpop.f32.mrf.mxu0  ;;  %vm3952_vm14 = vweird.f32 %v13320_v40  ;;  %v3994_v10 = vand.u32 2147483647, %v13322_v56  ;;  %v3919_v30 = vadd.f32 %v3911_v13, %v3395_v24  ;;  %v10641_v4 = vld [vmem:[#allocation10 + $0x2c] sm:$0xf] }
 0x45f   :  { %v11239_v9 = vpop.eup %11238  ;;  %v3974_v58 = vadd.f32 %v11231_v47, %v3973_v21  ;;  %v13336_v23 = vadd.f32 1.0, %v11237_v8  ;;  %v3997_v5 = vor.u32 1.1754944e-38, %v3996_v35  ;;  %v3959_v8 = vor.u32 1.1754944e-38, %v3958_v32 }
 0x460   :  { %v13338_v57 = vpop.eup %11240  ;;  %v3940_v44 = vsel %vm3939_vm8, %v13307_v22, %v3936_v43  ;;  %v13362_v22 = vor.u32 1.1754944e-38, %v4021_v49  ;;  %v3918_v33 = vadd.f32 %v3897_v46, %v3394_v61  ;;  %vm3995_vm2 = vcmp.eq.f32.partialorder %v3994_v10, 8.507059e+37  ;;  %v10644_v49 = vld [vmem:[#allocation10 + $0x44] sm:$0xf]  ;;  %v9160_v46 = vld [vmem:[#allocation10 + $0x30] sm:$0xf0] }
 0x461   :  { %v11243_v62 = vpop.eup %11242  ;;  %v3945_v1 = vsel %vm3942_vm10, %v3944_v17, %v3940_v44  ;;  %v3978_v27 = vsel %vm3977_vm9, %v11231_v47, %v3974_v58  ;;  %11248 = vrcp.f32 %v13336_v23  ;;  %v4011_v15 = vmul.f32 %v13338_v57, %v13309_v42  ;;  %v3885_v17 = vpop.f32.mrf.mxu1 }
 0x462   :  { %v13345_v59 = vpop.eup %11244  ;;  %v3983_v51 = vsel %vm3980_vm11, %v3982_v2, %v3978_v27  ;;  %v4042_v14 = vmul.f32 %v11239_v9, %v3945_v1  ;;  %11250 = vtanh.f32 %v3660_v48  ;;  %v13364_v29 = vadd.f32 1.0, %v11243_v62 }
 0x463   :  { %v13348_v19 = vpop.eup %11246  ;;  %v4040_v26 = vmul.f32 %v3983_v51, %v12932_v54  ;;  %v3948_v55 = vmul.f32 %v13345_v59, %v13320_v40  ;;  %v3956_v47 = vand.u32 2147483647, %v13320_v40  ;;  %11252 = vpow2.f32 %v9136_v31 }
 0x464   :  { %v3986_v12 = vmul.f32 %v13348_v19, %v13322_v56  ;;  %v4012_v52 = vsub.f32 1.0, %v4011_v15  ;;  %vm3953_vm12 = vweird.f32 %v13345_v59  ;;  %vm3991_vm13 = vweird.f32 %v13348_v19  ;;  %v10645_v15 = vld [vmem:[#allocation10 + $0x4c] sm:$0xf] }
 0x465   :  { %v13360_v7 = vadd.f32 %v4042_v14, %v4040_v26  ;;  %v3949_v54 = vsub.f32 1.0, %v3948_v55  ;;  %11254 = vrcp.f32 %v13364_v29  ;;  %vm13382_vm15 = vmor %vm3952_vm14, %vm3953_vm12  ;;  %vm13386_vm0 = vcmp.eq.f32.partialorder %v3956_v47, 8.507059e+37  ;;  %v10647_v26 = vld [vmem:[#allocation10 + $0x54] sm:$0xf0] }
 0x466   :  { %v3987_v16 = vsub.f32 1.0, %v3986_v12  ;;  %v4013_v40 = vmul.f32 %v13338_v57, %v4012_v52  ;;  %vm13396_vm1 = vmor %vm3990_vm4, %vm3991_vm13  ;;  %v3920_v9 = vadd.f32 %v3871_v11, %v3396_v28  ;;  %v9138_v44 = vmul.f32 -1.442695, %v3919_v30  ;;  %v9184_v12 = vld [vmem:[#allocation10 + $0x58] sm:$0xf0] }
 0x467   :  { %v3950_v34 = vmul.f32 %v13345_v59, %v3949_v54  ;;  %v13371_v60 = vpop.eup %11248  ;;  %v4034_v48 = vand.u32 2147483647, %v13336_v23  ;;  %v4036_v41 = vand.u32 2147483648, %v13336_v23  ;;  %v4067_v62 = vand.u32 2147483647, %v13364_v29 }
 0x468   :  { %v3988_v53 = vmul.f32 %v13348_v19, %v3987_v16  ;;  %v4026_v0 = vmul.f32 %v13371_v60, %v13336_v23  ;;  %v11251_v50 = vpop.eup %11250  ;;  %11256 = vpow2.f32 %v9138_v44  ;;  %v9135_v1 = vmul.f32 -1.442695, %v3920_v9  ;;  %v9158_v54 = vld [vmem:[#allocation10 + $0x20] sm:$0xf]  ;;  %v10642_v16 = vld [vmem:[#allocation10 + $0x2c] sm:$0xf0] }
 0x469   :  { %v3951_v37 = vadd.f32 %v13345_v59, %v3950_v34  ;;  %v11253_v58 = vpop.eup %11252  ;;  %v3921_v27 = vadd.f32 %v3885_v17, %v3397_v39  ;;  %v13425_v55 = vadd.f32 %v13338_v57, %v4013_v40  ;;  %vm4016_vm3 = vweird.f32 %v13338_v57  ;;  %v3913_v39 = vpop.f32.mrf.mxu3  ;;  %v10640_v52 = vld [vmem:[#allocation10 + $0x24] sm:$0xf]  ;;  %v9166_v11 = vld [vmem:[#allocation10 + $0x28] sm:$0xf] }
 0x46a   :  { %v3989_v21 = vadd.f32 %v13348_v19, %v3988_v53  ;;  %v4027_v2 = vsub.f32 1.0, %v4026_v0  ;;  %v13412_v61 = vadd.f32 1.0, %v11253_v58  ;;  %vm4063_vm5 = vweird.f32 %v13364_v29 }
 0x46b   :  { %v3955_v24 = vsel %vm13382_vm15, %v13345_v59, %v3951_v37  ;;  %v13414_v28 = vpop.eup %11254  ;;  %v9176_v59 = vld [vmem:[#allocation10 + $0x50] sm:$0xf0]  ;;  %vm4031_vm6 = vweird.f32 %v13371_v60  ;;  %v4069_v47 = vand.u32 2147483648, %v13364_v29  ;;  %v9137_v13 = vmul.f32 -1.442695, %v3921_v27 }
 0x46c   :  { %v3993_v56 = vsel %vm13396_vm1, %v13348_v19, %v3989_v21  ;;  %v3960_v51 = vsel %vm13386_vm0, %v3959_v8, %v3955_v24  ;;  %v4059_v31 = vmul.f32 %v13414_v28, %v13364_v29  ;;  %11258 = vrcp.f32 %v13412_v61  ;;  %v9182_v19 = vld [vmem:[#allocation10 + $0x48] sm:$0xf]  ;;  %v9168_v21 = vld [vmem:[#allocation10 + $0x38] sm:$0xf0]  ;;  %v10638_v27 = vld [vmem:[#allocation10 + $0xc] sm:$0xf0] }
 0x46d   :  { %v3998_v14 = vsel %vm3995_vm2, %v3997_v5, %v3993_v56  ;;  %v4028_v18 = vmul.f32 %v13371_v60, %v4027_v2  ;;  %11260 = vtanh.f32 %v3918_v33  ;;  %vm4015_vm7 = vweird.f32 %v13309_v42  ;;  %v3899_v2 = vpop.f32.mrf.mxu2 }
 0x46e   :  { %v4060_v35 = vsub.f32 1.0, %v4059_v31  ;;  %11262 = vpow2.f32 %v9135_v1  ;;  %v4041_v34 = vmul.f32 %v3998_v14, %v13023_v25  ;;  %v4043_v32 = vmul.f32 %v11251_v50, %v3960_v51  ;;  %v11257_v25 = vpop.eup %11256  ;;  %v9142_v1 = vld [vmem:[#allocation10] sm:$0xf]  ;;  %v10636_v14 = vld [vmem:[#allocation10 + $0x4] sm:$0xf]  ;;  %vm13486_vm12 = vmor %vm4015_vm7, %vm4016_vm3 }
 0x46f   :  { %vm4064_vm8 = vweird.f32 %v13414_v28  ;;  %vm13435_vm9 = vcmp.eq.f32.partialorder %v4067_v62, 8.507059e+37  ;;  %11264 = vpow2.f32 %v9137_v13  ;;  %v3923_v10 = vadd.f32 %v3913_v39, %v3399_v36 }
 0x470   :  { %v4061_v37 = vmul.f32 %v13414_v28, %v4060_v35  ;;  %v9179_v0 = vor.u32 %v10644_v49, %v9176_v59  ;;  %v13443_v50 = vadd.f32 %v13371_v60, %v4028_v18  ;;  %v9183_v5 = vor.u32 %v10647_v26, %v9182_v19  ;;  %vm13456_vm10 = vmor %vm4063_vm5, %vm4064_vm8  ;;  %v9144_v18 = vld [vmem:[#allocation10 + $0x10] sm:$0xf0]  ;;  %v10639_v35 = vld [vmem:[#allocation10 + $0x14] sm:$0xf0] }
 0x471   :  { %v9187_v30 = vor.u32 %v10645_v15, %v9184_v12  ;;  %v9159_v40 = vor.u32 %v10642_v16, %v9158_v54  ;;  %v13448_v33 = vadd.f32 1.0, %v11257_v25  ;;  %v9139_v9 = vmul.f32 -1.442695, %v3923_v10  ;;  %v9150_v16 = vld [vmem:[#allocation10 + $0x8] sm:$0xf] }
 0x472   :  { %v13445_v8 = vpop.eup %11258  ;;  %v4062_v43 = vadd.f32 %v13414_v28, %v4061_v37  ;;  %4427 = vmatpush.bf16.msra.mxu1 %v9179_v0  ;;  %v9163_v36 = vor.u32 %v10640_v52, %v9160_v46  ;;  %v4070_v56 = vor.u32 1.1754944e-38, %v4069_v47  ;;  %4441 = vmatpush.bf16.msrb.mxu2 %v9183_v5  ;;  %v9167_v44 = vor.u32 %v10643_v3, %v9166_v11  ;;  %v10637_v52 = vld [vmem:[#allocation10 + $0xc] sm:$0xf]  ;;  %v10698_v46 = vld [vmem:[#allocation11 + $0xec] sm:$0xf0] }
 0x473   :  { %v11261_v17 = vpop.eup %11260  ;;  %v4097_v58 = vmul.f32 %v13445_v8, %v13412_v61  ;;  %4455 = vmatpush.bf16.msrb.mxu3 %v9187_v30  ;;  %v9171_v62 = vor.u32 %v10641_v4, %v9168_v21  ;;  %v13460_v59 = vadd.f32 %v4043_v32, %v4041_v34  ;;  %v4107_v51 = vand.u32 2147483648, %v13412_v61  ;;  %4414 = vmatpush.bf16.msra.mxu0 %v9159_v40  ;;  %v9152_v34 = vld [vmem:[#allocation10 + $0x18] sm:$0xf0]  ;;  %v9382_v32 = vld [vmem:[#allocation11 + $0xe0] sm:$0xf] }
 0x474   :  { %v11263_v49 = vpop.eup %11262  ;;  %v4066_v29 = vsel %vm13456_vm10, %v13414_v28, %v4062_v43  ;;  %11266 = vrcp.f32 %v13448_v33  ;;  %v4105_v26 = vand.u32 2147483647, %v13412_v61  ;;  %v3922_v54 = vadd.f32 %v3899_v2, %v3398_v38  ;;  %v10696_v11 = vld [vmem:[#allocation11 + $0xe4] sm:$0xf]  ;;  %v9384_v0 = vld [vmem:[#allocation11 + $0xf0] sm:$0xf0] }
 0x475   :  { %v4098_v31 = vsub.f32 1.0, %v4097_v58  ;;  %v4071_v19 = vsel %vm13435_vm9, %v4070_v56, %v4066_v29  ;;  %v13470_v15 = vadd.f32 1.0, %v11263_v49  ;;  %v11265_v39 = vpop.eup %11264  ;;  %11268 = vpow2.f32 %v9139_v9  ;;  %v9390_v3 = vld [vmem:[#allocation11 + $0xe8] sm:$0xf]  ;;  %v10699_v5 = vld [vmem:[#allocation11 + $0xf4] sm:$0xf0] }
 0x476   :  { %v13472_v12 = vmul.f32 %v11261_v17, %v4071_v19  ;;  %4428 = vmatpush.bf16.msra.mxu1 %v9163_v36  ;;  %v9143_v28 = vor.u32 %v10638_v27, %v9142_v1  ;;  %vm4102_vm11 = vweird.f32 %v13445_v8  ;;  %v13479_v13 = vadd.f32 1.0, %v11265_v39  ;;  %4442 = vmatpush.bf16.msrb.mxu2 %v9167_v44  ;;  %v10697_v30 = vld [vmem:[#allocation11 + $0xec] sm:$0xf]  ;;  %v9392_v9 = vld [vmem:[#allocation11 + $0xf8] sm:$0xf0] }
 0x477   :  { %v4099_v47 = vmul.f32 %v13445_v8, %v4098_v31  ;;  %11270 = vrcp.f32 %v13470_v15  ;;  %4456 = vmatpush.bf16.msrb.mxu3 %v9171_v62  ;;  %vm4030_vm4 = vweird.f32 %v13336_v23  ;;  %v13493_v38 = vor.u32 1.1754944e-38, %v4036_v41  ;;  %v9366_v2 = vld [vmem:[#allocation11 + $0xc0] sm:$0xf]  ;;  %v10694_v44 = vld [vmem:[#allocation11 + $0xcc] sm:$0xf0] }
 0x478   :  { %11272 = vtanh.f32 %v13360_v7  ;;  %4415 = vmatpush.bf16.msra.mxu0 %v9143_v28  ;;  %v9147_v53 = vor.u32 %v10636_v14, %v9144_v18  ;;  %v4018_v37 = vsel %vm13486_vm12, %v13338_v57, %v13425_v55  ;;  %vm13501_vm13 = vmor %vm4030_vm4, %vm4031_vm6  ;;  %vm4101_vm14 = vweird.f32 %v13412_v61  ;;  %v9368_v29 = vld [vmem:[#allocation11 + $0xd0] sm:$0xf0]  ;;  %v9374_v18 = vld [vmem:[#allocation11 + $0xc8] sm:$0xf] }
 0x479   :  { %v4100_v41 = vadd.f32 %v13445_v8, %v4099_v47  ;;  %11274 = vrcp.f32 %v13479_v13  ;;  %v4033_v21 = vsel %vm13501_vm13, %v13371_v60, %v13443_v50  ;;  %vm4103_vm15 = vmor %vm4101_vm14, %vm4102_vm11  ;;  %v4108_v25 = vor.u32 1.1754944e-38, %v4107_v51  ;;  %v10692_v51 = vld [vmem:[#allocation11 + $0xc4] sm:$0xf]  ;;  %v10695_v39 = vld [vmem:[#allocation11 + $0xd4] sm:$0xf0] }
 0x47a   :  { %v13508_v4 = vpop.eup %11266  ;;  %11276 = vtanh.f32 %v13460_v59  ;;  %4429 = vmatpush.bf16.msra.mxu1 %v9147_v53  ;;  %v9151_v61 = vor.u32 %v10639_v35, %v9150_v16  ;;  %vm4106_vm0 = vcmp.eq.f32.partialorder %v4105_v26, 8.507059e+37  ;;  %v4082_v43 = vand.u32 2147483647, %v13470_v15  ;;  %v9376_v28 = vld [vmem:[#allocation11 + $0xd8] sm:$0xf0] }
 0x47b   :  { %v4104_v40 = vsel %vm4103_vm15, %v13445_v8, %v4100_v41  ;;  %11278 = vtanh.f32 %v3922_v54  ;;  %v11269_v36 = vpop.eup %11268  ;;  %v4084_v58 = vand.u32 2147483648, %v13470_v15  ;;  %v9155_v24 = vor.u32 %v10637_v52, %v9152_v34  ;;  %v10693_v54 = vld [vmem:[#allocation11 + $0xcc] sm:$0xf]  ;;  %v9350_v34 = vld [vmem:[#allocation11 + $0xa0] sm:$0xf] }
 0x47c   :  { %v4109_v17 = vsel %vm4106_vm0, %v4108_v25, %v4104_v40  ;;  %4443 = vmatpush.bf16.msrb.mxu2 %v9151_v61  ;;  %v9383_v56 = vor.u32 %v10698_v46, %v9382_v32  ;;  %v13525_v8 = vmul.f32 %v13508_v4, %v13448_v33  ;;  %v13527_v27 = vadd.f32 1.0, %v11269_v36  ;;  %v10690_v32 = vld [vmem:[#allocation11 + $0xac] sm:$0xf0]  ;;  %v13548_v53 = vld [vmem:[#allocation11 + $0xa4] sm:$0xf] }
 0x47d   :  { %v13520_v62 = vpop.eup %11270  ;;  %v4166_v1 = vmul.f32 %v4109_v17, %v13098_v20  ;;  %v9387_v49 = vor.u32 %v10696_v11, %v9384_v0  ;;  %v4145_v31 = vand.u32 2147483647, %v13448_v33  ;;  %4457 = vmatpush.bf16.msrb.mxu3 %v9155_v24  ;;  %v9391_v26 = vor.u32 %v10699_v5, %v9390_v3  ;;  %v13550_v46 = vld [vmem:[#allocation11 + $0xb0] sm:$0xf0]  ;;  %v9358_v0 = vld [vmem:[#allocation11 + $0xa8] sm:$0xf] }
 0x47e   :  { %v13529_v14 = vpop.eup %11272  ;;  %v4074_v19 = vmul.f32 %v13520_v62, %v13470_v15  ;;  %4670 = vmatpush.bf16.msrb.mxu0 %v9383_v56  ;;  %v9395_v20 = vor.u32 %v10697_v30, %v9392_v9  ;;  %vm13538_vm1 = vcmp.eq.f32.partialorder %v4019_v6, 8.507059e+37  ;;  %v4122_v52 = vand.u32 2147483648, %v13479_v13  ;;  %v10691_v3 = vld [vmem:[#allocation11 + $0xb4] sm:$0xf0]  ;;  %v10689_v25 = vld [vmem:[#allocation11 + $0xac] sm:$0xf] }
 0x47f   :  { %v13534_v16 = vpop.eup %11274  ;;  %v13543_v47 = vadd.f32 %v13472_v12, %v4166_v1  ;;  %vm4078_vm2 = vweird.f32 %v13470_v15  ;;  %11280 = vrcp.f32 %v13527_v27  ;;  %4684 = vmatpush.bf16.msrb.mxu1 %v9387_v49  ;;  %vm13556_vm3 = vcmp.eq.f32.partialorder %v4034_v48, 8.507059e+37  ;;  %v9360_v23 = vld [vmem:[#allocation11 + $0xb8] sm:$0xf0]  ;;  %v13569_v9 = vld [vmem:[#allocation11 + $0x80] sm:$0xf] }
 0x480   :  { %v13552_v42 = vpop.eup %11276  ;;  %v4075_v12 = vsub.f32 1.0, %v4074_v19  ;;  %v4112_v11 = vmul.f32 %v13534_v16, %v13479_v13  ;;  %vm4116_vm5 = vweird.f32 %v13479_v13  ;;  %vm13563_vm6 = vcmp.eq.f32.partialorder %v4082_v43, 8.507059e+37  ;;  %4698 = vmatpush.bf16.msra.mxu2 %v9391_v26  ;;  %v10686_v24 = vld [vmem:[#allocation11 + $0x8c] sm:$0xf0]  ;;  %v13573_v56 = vld [vmem:[#allocation11 + $0x84] sm:$0xf] }
 0x481   :  { %4712 = vmatpush.bf16.msra.mxu3 %v9395_v20  ;;  %v11279_v48 = vpop.eup %11278  ;;  %v4138_v61 = vsub.f32 1.0, %v13525_v8  ;;  %v4085_v5 = vor.u32 1.1754944e-38, %v4084_v58  ;;  %v4120_v30 = vand.u32 2147483647, %v13479_v13  ;;  %v9367_v40 = vor.u32 %v10694_v44, %v9366_v2  ;;  %v9336_v49 = vld [vmem:[#allocation11 + $0x90] sm:$0xf0] }
 0x482   :  { %v4113_v36 = vsub.f32 1.0, %v4112_v11  ;;  %v4076_v43 = vmul.f32 %v13520_v62, %v4075_v12  ;;  %vm4079_vm7 = vweird.f32 %v13520_v62  ;;  %v9371_v17 = vor.u32 %v10692_v51, %v9368_v29  ;;  %v13576_v19 = vld [vmem:[#allocation11 + $0x88] sm:$0xf]  ;;  %v10687_v29 = vld [vmem:[#allocation11 + $0x94] sm:$0xf0] }
 0x483   :  { %vm4117_vm8 = vweird.f32 %v13534_v16  ;;  %v4123_v1 = vor.u32 1.1754944e-38, %v4122_v52  ;;  %4671 = vmatpush.bf16.msrb.mxu0 %v9367_v40  ;;  %v9375_v8 = vor.u32 %v10695_v39, %v9374_v18  ;;  %v9379_v58 = vor.u32 %v10693_v54, %v9376_v28  ;;  %v10685_v20 = vld [vmem:[#allocation11 + $0x8c] sm:$0xf]  ;;  %v9344_v12 = vld [vmem:[#allocation11 + $0x98] sm:$0xf0]  ;;  %vm4080_vm9 = vmor %vm4078_vm2, %vm4079_vm7 }
 0x484   :  { %v4114_v2 = vmul.f32 %v13534_v16, %v4113_v36  ;;  %v4077_v44 = vadd.f32 %v13520_v62, %v4076_v43  ;;  %4685 = vmatpush.bf16.msrb.mxu1 %v9371_v17  ;;  %v9351_v26 = vor.u32 %v10690_v32, %v9350_v34  ;;  %v9355_v51 = vor.u32 %v13548_v53, %v13550_v46  ;;  %vm4118_vm4 = vmor %vm4116_vm5, %vm4117_vm8  ;;  %v10682_v41 = vld [vmem:[#allocation11 + $0x6c] sm:$0xf0]  ;;  %v9320_v55 = vld [vmem:[#allocation11 + $0x70] sm:$0xf0] }
 0x485   :  { %v13582_v11 = vpop.eup %11280  ;;  %v4139_v18 = vmul.f32 %v13508_v4, %v4138_v61  ;;  %vm13589_vm10 = vcmp.eq.f32.partialorder %v4120_v30, 8.507059e+37  ;;  %4699 = vmatpush.bf16.msra.mxu2 %v9375_v8  ;;  %4713 = vmatpush.bf16.msra.mxu3 %v9379_v58  ;;  %v9359_v54 = vor.u32 %v10691_v3, %v9358_v0  ;;  %v9363_v28 = vor.u32 %v10689_v25, %v9360_v23  ;;  %v9318_v3 = vld [vmem:[#allocation11 + $0x60] sm:$0xf]  ;;  %v10683_v10 = vld [vmem:[#allocation11 + $0x74] sm:$0xf0] }
 0x486   :  { %vm4141_vm11 = vweird.f32 %v13448_v33  ;;  %v4081_v52 = vsel %vm4080_vm9, %v13520_v62, %v4077_v44  ;;  %v4115_v34 = vadd.f32 %v13534_v16, %v4114_v2  ;;  %v4152_v32 = vmul.f32 %v13582_v11, %v13527_v27  ;;  %v9302_v36 = vld [vmem:[#allocation11 + $0x40] sm:$0xf]  ;;  %v10678_v43 = vld [vmem:[#allocation11 + $0x4c] sm:$0xf0]  ;;  %v9310_v8 = vld [vmem:[#allocation11 + $0x48] sm:$0xf] }
 0x487   :  { %v9335_v15 = vor.u32 %v10686_v24, %v13569_v9  ;;  %v4086_v53 = vsel %vm13563_vm6, %v4085_v5, %v4081_v52  ;;  %4672 = vmatpush.bf16.msrb.mxu0 %v9351_v26  ;;  %v9339_v46 = vor.u32 %v13573_v56, %v9336_v49  ;;  %v9343_v62 = vor.u32 %v10687_v29, %v13576_v19  ;;  %v10680_v5 = vld [vmem:[#allocation11 + $0x64] sm:$0xf]  ;;  %v9328_v9 = vld [vmem:[#allocation11 + $0x78] sm:$0xf0]  ;;  %v10679_v58 = vld [vmem:[#allocation11 + $0x54] sm:$0xf0] }
 0x488   :  { %v9347_v0 = vor.u32 %v10685_v20, %v9344_v12  ;;  %v4119_v25 = vsel %vm4118_vm4, %v13534_v16, %v4115_v34  ;;  %v4169_v23 = vmul.f32 %v11279_v48, %v4086_v53  ;;  %v4153_v61 = vsub.f32 1.0, %v4152_v32  ;;  %4686 = vmatpush.bf16.msrb.mxu1 %v9355_v51  ;;  %v10681_v48 = vld [vmem:[#allocation11 + $0x6c] sm:$0xf]  ;;  %v9312_v26 = vld [vmem:[#allocation11 + $0x58] sm:$0xf0] }
 0x489   :  { %v4023_v13 = vsel %vm13538_vm1, %v13362_v22, %v4018_v37  ;;  %v4147_v30 = vand.u32 2147483648, %v13448_v33  ;;  %v4124_v40 = vsel %vm13589_vm10, %v4123_v1, %v4119_v25  ;;  %4700 = vmatpush.bf16.msra.mxu2 %v9359_v54  ;;  %4714 = vmatpush.bf16.msra.mxu3 %v9363_v28  ;;  %v4038_v57 = vsel %vm13556_vm3, %v13493_v38, %v4033_v21  ;;  %v9304_v1 = vld [vmem:[#allocation11 + $0x50] sm:$0xf0]  ;;  %v10677_v44 = vld [vmem:[#allocation11 + $0x4c] sm:$0xf] }
 0x48a   :  { %v4048_v22 = vmul.f32 %v13529_v14, %v4023_v13  ;;  %vm4142_vm12 = vweird.f32 %v13508_v4  ;;  %v4167_v37 = vmul.f32 %v4124_v40, %v13250_v45  ;;  %v4154_v16 = vmul.f32 %v13582_v11, %v4153_v61  ;;  %v9286_v12 = vld [vmem:[#allocation11 + $0x20] sm:$0xf]  ;;  %v10674_v34 = vld [vmem:[#allocation11 + $0x2c] sm:$0xf0]  ;;  %v10672_v32 = vld [vmem:[#allocation11 + $0x24] sm:$0xf] }
 0x48b   :  { %v4049_v35 = vmul.f32 %v13552_v42, %v4038_v57  ;;  %11282 = vtanh.f32 %v13543_v47  ;;  %v13634_v60 = vadd.f32 %v13508_v4, %v4139_v18  ;;  %4673 = vmatpush.bf16.msrb.mxu0 %v9335_v15  ;;  %v9319_v38 = vor.u32 %v10682_v41, %v9318_v3  ;;  %v10676_v42 = vld [vmem:[#allocation11 + $0x44] sm:$0xf]  ;;  %vm13646_vm14 = vmor %vm4141_vm11, %vm4142_vm12  ;;  %v10673_v25 = vld [vmem:[#allocation11 + $0x2c] sm:$0xf] }
 0x48c   :  { %v4176_v50 = vpack.c.bf16 %v4048_v22, %v4048_v22  ;;  %v13636_v21 = vadd.f32 %v4169_v23, %v4167_v37  ;;  %4687 = vmatpush.bf16.msrb.mxu1 %v9339_v46  ;;  %v9323_v6 = vor.u32 %v10680_v5, %v9320_v55  ;;  %v4155_v17 = vadd.f32 %v13582_v11, %v4154_v16  ;;  %v9288_v46 = vld [vmem:[#allocation11 + $0x30] sm:$0xf0]  ;;  %v9296_v23 = vld [vmem:[#allocation11 + $0x38] sm:$0xf0]  ;;  %v9270_v5 = vld [vmem:[#allocation11] sm:$0xf] }
 0x48d   :  { %v4177_v14 = vpack.c.bf16 %v4049_v35, %v4049_v35  ;;  %v10957_v45 = vpack.c.bf16 %v4049_v35, %v4048_v22  ;;  %vm4157_vm13 = vweird.f32 %v13582_v11  ;;  %4701 = vmatpush.bf16.msra.mxu2 %v9343_v62  ;;  %4715 = vmatpush.bf16.msra.mxu3 %v9347_v0  ;;  %v9327_v24 = vor.u32 %v10683_v10, %v9326_v63  ;;  %v9294_v62 = vld [vmem:[#allocation11 + $0x28] sm:$0xf]  ;;  %v10675_v0 = vld [vmem:[#allocation11 + $0x34] sm:$0xf0]  ;;  %v10668_v22 = vld [vmem:[#allocation11 + $0x4] sm:$0xf] }
 0x48e   :  { %v9331_v56 = vor.u32 %v10681_v48, %v9328_v9  ;;  %11284 = vtanh.f32 %v13636_v21  ;;  %v4162_v49 = vand.u32 2147483648, %v13527_v27  ;;  %v4244_v19 = vunpack.c.l.b16 %v4176_v50  ;;  %v9272_v55 = vld [vmem:[#allocation11 + $0x10] sm:$0xf0]  ;;  %v9278_v63 = vld [vmem:[#allocation11 + $0x8] sm:$0xf] }
 0x48f   :  { %10958 = vst [vmem:[#allocation3 + $0x10] sm:$0xff] %v10957_v45   ;;  %v4245_v2 = vunpack.c.l.b16 %v4177_v14  ;;  %v4148_v29 = vor.u32 1.1754944e-38, %v4147_v30  ;;  %vm4156_vm15 = vweird.f32 %v13527_v27  ;;  %v4160_v20 = vand.u32 2147483647, %v13527_v27  ;;  %4674 = vmatpush.bf16.msrb.mxu0 %v9319_v38  ;;  %v10670_v30 = vld [vmem:[#allocation11 + $0xc] sm:$0xf0] }
 0x490   :  { %v4144_v18 = vsel %vm13646_vm14, %v13508_v4, %v13634_v60  ;;  %vm13658_vm0 = vmor %vm4156_vm15, %vm4157_vm13  ;;  %4688 = vmatpush.bf16.msrb.mxu1 %v9323_v6  ;;  %v9303_v28 = vor.u32 %v10678_v43, %v9302_v36  ;;  %v9307_v52 = vor.u32 %v10676_v42, %v9304_v1  ;;  %v9311_v4 = vor.u32 %v10679_v58, %v9310_v8  ;;  %v10671_v16 = vld [vmem:[#allocation11 + $0x14] sm:$0xf0]  ;;  %v10669_v35 = vld [vmem:[#allocation11 + $0xc] sm:$0xf] }
 0x491   :  { %v4246_v54 = vpack.c.b16 %v4245_v2, %v4244_v19  ;;  %v11283_v27 = vpop.eup %11282  ;;  %v4159_v15 = vsel %vm13658_vm0, %v13582_v11, %v4155_v17  ;;  %4702 = vmatpush.bf16.msra.mxu2 %v9327_v24  ;;  %4716 = vmatpush.bf16.msra.mxu3 %v9331_v56  ;;  %v9315_v53 = vor.u32 %v10677_v44, %v9312_v26  ;;  %vm4146_vm1 = vcmp.eq.f32.partialorder %v4145_v31, 8.507059e+37  ;;  %v9280_v10 = vld [vmem:[#allocation11 + $0x18] sm:$0xf0]  ;;  %v9522_v42 = vld [vmem:[#allocation10 + $0xe0] sm:$0xf] }
 0x492   :  { %v4163_v3 = vor.u32 1.1754944e-38, %v4162_v49  ;;  %vm4161_vm2 = vcmp.eq.f32.partialorder %v4160_v20, 8.507059e+37  ;;  %v9287_v61 = vor.u32 %v10674_v34, %v9286_v12  ;;  %v4149_v11 = vsel %vm4146_vm1, %v4148_v29, %v4144_v18  ;;  %v10730_v17 = vld [vmem:[#allocation10 + $0xec] sm:$0xf0]  ;;  %v10728_v24 = vld [vmem:[#allocation10 + $0xe4] sm:$0xf] }
 0x493   :  { %4416 = vmatmul.bf16.vlgmr.msra.gmra.mxu0 %v4246_v54  ;;  %4430 = vmatmul.bf16.vlgmr.msra.gmra.mxu1 %v4246_v54  ;;  %v9291_v41 = vor.u32 %v10672_v32, %v9288_v46  ;;  %v4174_v57 = vmul.f32 %v11283_v27, %v4149_v11  ;;  %v9295_v33 = vor.u32 %v10675_v0, %v9294_v62  ;;  %v9524_v1 = vld [vmem:[#allocation10 + $0xf0] sm:$0xf0]  ;;  %v9530_v8 = vld [vmem:[#allocation10 + $0xe8] sm:$0xf]  ;;  %v10731_v58 = vld [vmem:[#allocation10 + $0xf4] sm:$0xf0] }
 0x494   :  { %4444 = vmatmul.bf16.vlgmr.msrb.gmra.mxu2 %v4246_v54  ;;  %4458 = vmatmul.bf16.vlgmr.msrb.gmra.mxu3 %v4246_v54  ;;  %v11285_v13 = vpop.eup %11284  ;;  %v4164_v40 = vsel %vm4161_vm2, %v4163_v3, %v4159_v15  ;;  %v9299_v31 = vor.u32 %v10673_v25, %v9296_v23  ;;  %v9271_v60 = vor.u32 %v10670_v30, %v9270_v5  ;;  %v10729_v2 = vld [vmem:[#allocation10 + $0xec] sm:$0xf]  ;;  %v9532_v44 = vld [vmem:[#allocation10 + $0xf8] sm:$0xf0]  ;;  %v9506_v51 = vld [vmem:[#allocation10 + $0xc0] sm:$0xf] }
 0x495   :  { %4675 = vmatpush.bf16.msrb.mxu0 %v9303_v28  ;;  %4689 = vmatpush.bf16.msrb.mxu1 %v9307_v52  ;;  %v4175_v37 = vmul.f32 %v11285_v13, %v4164_v40  ;;  %v9275_v50 = vor.u32 %v10668_v22, %v9272_v55  ;;  %v4178_v38 = vpack.c.bf16 %v4174_v57, %v4174_v57  ;;  %v10726_v29 = vld [vmem:[#allocation10 + $0xcc] sm:$0xf0]  ;;  %v10724_v20 = vld [vmem:[#allocation10 + $0xc4] sm:$0xf]  ;;  %v9508_v18 = vld [vmem:[#allocation10 + $0xd0] sm:$0xf0] }
 0x496   :  { %4703 = vmatpush.bf16.msra.mxu2 %v9311_v4  ;;  %4717 = vmatpush.bf16.msra.mxu3 %v9315_v53  ;;  %v9279_v14 = vor.u32 %v10671_v16, %v9278_v63  ;;  %v9283_v45 = vor.u32 %v10669_v35, %v9280_v10  ;;  %v9523_v56 = vor.u32 %v10730_v17, %v9522_v42  ;;  %v9514_v39 = vld [vmem:[#allocation10 + $0xc8] sm:$0xf]  ;;  %v10727_v54 = vld [vmem:[#allocation10 + $0xd4] sm:$0xf0]  ;;  %v10725_v34 = vld [vmem:[#allocation10 + $0xcc] sm:$0xf] }
 0x497   :  { %v4179_v48 = vpack.c.bf16 %v4175_v37, %v4175_v37  ;;  %v10962_v9 = vpack.c.bf16 %v4175_v37, %v4174_v57  ;;  %v4506_v36 = vunpack.c.l.b16 %v4178_v38  ;;  %v9527_v49 = vor.u32 %v10728_v24, %v9524_v1  ;;  %v9516_v32 = vld [vmem:[#allocation10 + $0xd8] sm:$0xf0]  ;;  %v15280_v15 = vld [vmem:[#allocation22_spill] sm:$0xff]  ;;  %v10722_v3 = vld [vmem:[#allocation10 + $0xac] sm:$0xf0] }
 0x498   :  { %v9531_v19 = vor.u32 %v10731_v58, %v9530_v8  ;;  %v9535_v26 = vor.u32 %v10729_v2, %v9532_v44  ;;  %v9507_v12 = vor.u32 %v10726_v29, %v9506_v51  ;;  %v9511_v28 = vor.u32 %v10724_v20, %v9508_v18  ;;  %v9490_v0 = vld [vmem:[#allocation10 + $0xa0] sm:$0xf]  ;;  %v10720_v25 = vld [vmem:[#allocation10 + $0xa4] sm:$0xf]  ;;  %v9492_v13 = vld [vmem:[#allocation10 + $0xb0] sm:$0xf0] }
 0x499   :  { %4676 = vmatpush.bf16.msrb.mxu0 %v9287_v61  ;;  %4690 = vmatpush.bf16.msrb.mxu1 %v9291_v41  ;;  %10963 = vst [vmem:[#allocation4 + $0x18] sm:$0xff] %v10962_v9   ;;  %v4507_v6 = vunpack.c.l.b16 %v4179_v48  ;;  %v9515_v52 = vor.u32 %v10727_v54, %v9514_v39  ;;  %v9519_v27 = vor.u32 %v10725_v34, %v9516_v32  ;;  %v4190_v4 = vunpack.c.l.bf16 %v15280_v15  ;;  %v9498_v41 = vld [vmem:[#allocation10 + $0xa8] sm:$0xf]  ;;  %v10723_v5 = vld [vmem:[#allocation10 + $0xb4] sm:$0xf0]  ;;  %v15285_v18 = vld [vmem:[#allocation52_spill] sm:$0xff] }
 0x49a   :  { %4704 = vmatpush.bf16.msra.mxu2 %v9295_v33  ;;  %4718 = vmatpush.bf16.msra.mxu3 %v9299_v31  ;;  %v4191_v53 = vunpack.c.h.bf16 %v15280_v15  ;;  %v9491_v11 = vor.u32 %v10722_v3, %v9490_v0  ;;  %v9495_v30 = vor.u32 %v10720_v25, %v9492_v13  ;;  %v9499_v40 = vor.u32 %v10723_v5, %v9498_v41  ;;  %v10721_v57 = vld [vmem:[#allocation10 + $0xac] sm:$0xf]  ;;  %v9500_v33 = vld [vmem:[#allocation10 + $0xb8] sm:$0xf0]  ;;  %v9474_v42 = vld [vmem:[#allocation10 + $0x80] sm:$0xf] }
 0x49b   :  { %v4508_v43 = vpack.c.b16 %v4507_v6, %v4506_v36  ;;  %v9503_v55 = vor.u32 %v10721_v57, %v9500_v33  ;;  %v15281_v63 = vld [vmem:[#allocation49_spill] sm:$0xff]  ;;  %v15282_v35 = vld [vmem:[#allocation23_spill] sm:$0xff]  ;;  %v9476_v29 = vld [vmem:[#allocation10 + $0x90] sm:$0xf0]  ;;  %v4196_v39 = vunpack.c.l.bf16 %v15285_v18  ;;  %v4197_v34 = vunpack.c.h.bf16 %v15285_v18 }
 0x49c   :  { %v4193_v37 = vunpack.c.h.bf16 %v15281_v63  ;;  %v4194_v10 = vunpack.c.l.bf16 %v15282_v35  ;;  %v4195_v48 = vunpack.c.h.bf16 %v15282_v35  ;;  %v15283_v24 = vld [vmem:[#allocation45_spill] sm:$0xff]  ;;  %v4192_v2 = vunpack.c.l.bf16 %v15281_v63  ;;  %v9482_v20 = vld [vmem:[#allocation10 + $0x88] sm:$0xf]  ;;  %v15287_v25 = vld [vmem:[#allocation72_spill] sm:$0xff] }
 0x49d   :  { %4677 = vmatpush.bf16.msrb.mxu0 %v9271_v60  ;;  %4691 = vmatpush.bf16.msrb.mxu1 %v9275_v50  ;;  %v15286_v32 = vld [vmem:[#allocation43_spill] sm:$0xff]  ;;  %v9460_v41 = vld [vmem:[#allocation10 + $0x70] sm:$0xf0]  ;;  %v4205_v57 = vunpack.c.h.bf16 %v15287_v25 }
 0x49e   :  { %4705 = vmatpush.bf16.msra.mxu2 %v9279_v14  ;;  %4719 = vmatpush.bf16.msra.mxu3 %v9283_v45  ;;  %v4203_v15 = vunpack.c.h.bf16 %v15286_v32 }
 0x4a1   :  { %5218 = vmatpush.bf16.msra.mxu0 %v9523_v56  ;;  %5232 = vmatpush.bf16.msra.mxu1 %v9527_v49  ;;  %v15284_v56 = vld [vmem:[#allocation46_spill] sm:$0xff]  ;;  %v10718_v49 = vld [vmem:[#allocation10 + $0x8c] sm:$0xf0] }
 0x4a2   :  { %5246 = vmatpush.bf16.msrb.mxu2 %v9531_v19  ;;  %5260 = vmatpush.bf16.msrb.mxu3 %v9535_v26  ;;  %v13674_v1 = vpack.c.bf16 %v15284_v56, %v15283_v24  ;;  %v9475_v44 = vor.u32 %v10718_v49, %v9474_v42  ;;  %v10716_v26 = vld [vmem:[#allocation10 + $0x84] sm:$0xf] }
 0x4a3   :  { %4678 = vmatmul.bf16.vlgmr.msrb.gmra.mxu0 %v4508_v43  ;;  %4692 = vmatmul.bf16.vlgmr.msrb.gmra.mxu1 %v4508_v43 }
 0x4a4   :  { %4706 = vmatmul.bf16.vlgmr.msra.gmra.mxu2 %v4508_v43  ;;  %4720 = vmatmul.bf16.vlgmr.msra.gmra.mxu3 %v4508_v43 }
 0x4a5   :  { %5219 = vmatpush.bf16.msra.mxu0 %v9507_v12  ;;  %5233 = vmatpush.bf16.msra.mxu1 %v9511_v28  ;;  %v10719_v12 = vld [vmem:[#allocation10 + $0x94] sm:$0xf0]  ;;  %v10717_v28 = vld [vmem:[#allocation10 + $0x8c] sm:$0xf] }
 0x4a6   :  { %5247 = vmatpush.bf16.msrb.mxu2 %v9515_v52  ;;  %5261 = vmatpush.bf16.msrb.mxu3 %v9519_v27  ;;  %v9484_v52 = vld [vmem:[#allocation10 + $0x98] sm:$0xf0]  ;;  %v4202_v27 = vunpack.c.l.bf16 %v15286_v32  ;;  %v9483_v13 = vor.u32 %v10719_v12, %v9482_v20 }
 0x4a7   :  { %v9487_v33 = vor.u32 %v10717_v28, %v9484_v52 }
 0x4a9   :  { %5220 = vmatpush.bf16.msra.mxu0 %v9491_v11  ;;  %5234 = vmatpush.bf16.msra.mxu1 %v9495_v30  ;;  %v9479_v11 = vor.u32 %v10716_v26, %v9476_v29 }
 0x4aa   :  { %5248 = vmatpush.bf16.msrb.mxu2 %v9499_v40  ;;  %5262 = vmatpush.bf16.msrb.mxu3 %v9503_v55 }
 0x4ad   :  { %5221 = vmatpush.bf16.msra.mxu0 %v9475_v44  ;;  %5235 = vmatpush.bf16.msra.mxu1 %v9479_v11  ;;  %v15292_v44 = vld [vmem:[#allocation73_spill] sm:$0xff] }
 0x4ae   :  { %5249 = vmatpush.bf16.msrb.mxu2 %v9483_v13  ;;  %5263 = vmatpush.bf16.msrb.mxu3 %v9487_v33 }
 0x510   :  { %v4417_v46 = vpop.f32.mrf.mxu0  ;;  %v4431_v62 = vpop.f32.mrf.mxu1 }
 0x511   :  { %v4464_v23 = vadd.f32 %v4417_v46, %v4190_v4  ;;  %v4465_v61 = vadd.f32 %v4431_v62, %v4191_v53  ;;  %v4206_v4 = vunpack.c.l.bf16 %v13674_v1  ;;  %v9458_v53 = vld [vmem:[#allocation10 + $0x60] sm:$0xf]  ;;  %v10714_v46 = vld [vmem:[#allocation10 + $0x6c] sm:$0xf0]  ;;  %v10712_v62 = vld [vmem:[#allocation10 + $0x64] sm:$0xf] }
 0x512   :  { %v9459_v63 = vor.u32 %v10714_v46, %v9458_v53 }
 0x513   :  { %v9396_v31 = vmul.f32 -1.442695, %v4464_v23  ;;  %v9398_v22 = vmul.f32 -1.442695, %v4465_v61  ;;  %v4204_v23 = vunpack.c.l.bf16 %v15287_v25  ;;  %v4207_v61 = vunpack.c.h.bf16 %v13674_v1 }
 0x514   :  { %5222 = vmatpush.bf16.msra.mxu0 %v9459_v63 }
 0x515   :  { %11286 = vpow2.f32 %v9396_v31 }
 0x516   :  { %11288 = vpow2.f32 %v9398_v22 }
 0x517   :  { %v4459_v16 = vpop.f32.mrf.mxu3  ;;  %v4445_v36 = vpop.f32.mrf.mxu2 }
 0x518   :  { %v4467_v9 = vadd.f32 %v4459_v16, %v4193_v37  ;;  %v4419_v60 = vpop.f32.mrf.mxu0  ;;  %v4433_v50 = vpop.f32.mrf.mxu1  ;;  %v4466_v51 = vadd.f32 %v4445_v36, %v4192_v2  ;;  %v9463_v37 = vor.u32 %v10712_v62, %v9460_v41 }
 0x519   :  { %v4468_v38 = vadd.f32 %v4419_v60, %v4194_v10  ;;  %v4469_v14 = vadd.f32 %v4433_v50, %v4195_v48 }
 0x51a   :  { %v9400_v45 = vmul.f32 -1.442695, %v4467_v9  ;;  %5236 = vmatpush.bf16.msra.mxu1 %v9463_v37 }
 0x51b   :  { %v11287_v6 = vpop.eup %11286  ;;  %v9397_v43 = vmul.f32 -1.442695, %v4468_v38  ;;  %v9399_v58 = vmul.f32 -1.442695, %v4469_v14 }
 0x51c   :  { %v11289_v17 = vpop.eup %11288  ;;  %v13676_v8 = vadd.f32 1.0, %v11287_v6  ;;  %11290 = vpow2.f32 %v9400_v45 }
 0x51d   :  { %v13678_v19 = vadd.f32 1.0, %v11289_v17  ;;  %11292 = vpow2.f32 %v9397_v43 }
 0x51e   :  { %11294 = vrcp.f32 %v13676_v8  ;;  %vm4747_vm3 = vweird.f32 %v13676_v8  ;;  %v4751_v10 = vand.u32 2147483647, %v13676_v8  ;;  %v4753_v14 = vand.u32 2147483648, %v13676_v8 }
 0x51f   :  { %11296 = vrcp.f32 %v13678_v19  ;;  %v4461_v54 = vpop.f32.mrf.mxu3  ;;  %v4447_v48 = vpop.f32.mrf.mxu2  ;;  %v4791_v38 = vand.u32 2147483648, %v13678_v19  ;;  %v4789_v17 = vand.u32 2147483647, %v13678_v19  ;;  %vm4785_vm6 = vweird.f32 %v13678_v19 }
 0x520   :  { %11298 = vpow2.f32 %v9399_v58  ;;  %v4679_v3 = vpop.f32.mrf.mxu0  ;;  %v4471_v30 = vadd.f32 %v4461_v54, %v4197_v34  ;;  %v4693_v40 = vpop.f32.mrf.mxu1  ;;  %v4470_v24 = vadd.f32 %v4447_v48, %v4196_v39  ;;  %vm13708_vm8 = vcmp.eq.f32.partialorder %v4751_v10, 8.507059e+37 }
 0x521   :  { %11300 = vtanh.f32 %v4466_v51  ;;  %v4726_v9 = vadd.f32 %v4679_v3, %v4202_v27  ;;  %v4727_v45 = vadd.f32 %v4693_v40, %v4203_v15  ;;  %v4754_v29 = vor.u32 1.1754944e-38, %v4753_v14 }
 0x522   :  { %v11291_v0 = vpop.eup %11290  ;;  %v9401_v43 = vmul.f32 -1.442695, %v4471_v30  ;;  %v4792_v12 = vor.u32 1.1754944e-38, %v4791_v38  ;;  %vm4790_vm10 = vcmp.eq.f32.partialorder %v4789_v17, 8.507059e+37 }
 0x523   :  { %v11293_v5 = vpop.eup %11292  ;;  %v13691_v22 = vadd.f32 1.0, %v11291_v0  ;;  %v9402_v49 = vmul.f32 -1.442695, %v4726_v9  ;;  %v9404_v20 = vmul.f32 -1.442695, %v4727_v45 }
 0x524   :  { %v11295_v31 = vpop.eup %11294  ;;  %v13693_v55 = vadd.f32 1.0, %v11293_v5 }
 0x525   :  { %v11297_v16 = vpop.eup %11296  ;;  %v4743_v35 = vmul.f32 %v11295_v31, %v13676_v8  ;;  %vm4748_vm5 = vweird.f32 %v11295_v31  ;;  %v4831_v25 = vand.u32 2147483648, %v13691_v22 }
 0x526   :  { %v11299_v60 = vpop.eup %11298  ;;  %v4781_v50 = vmul.f32 %v11297_v16, %v13678_v19  ;;  %11302 = vrcp.f32 %v13693_v55  ;;  %vm4786_vm7 = vweird.f32 %v11297_v16  ;;  %vm4749_vm9 = vmor %vm4747_vm3, %vm4748_vm5  ;;  %vm4762_vm4 = vweird.f32 %v13693_v55 }
 0x527   :  { %v4744_v6 = vsub.f32 1.0, %v4743_v35  ;;  %v13702_v36 = vadd.f32 1.0, %v11299_v60  ;;  %11304 = vrcp.f32 %v13691_v22  ;;  %v11301_v56 = vpop.eup %11300  ;;  %v4721_v26 = vpop.f32.mrf.mxu3  ;;  %vm4787_vm11 = vmor %vm4785_vm6, %vm4786_vm7  ;;  %v4766_v8 = vand.u32 2147483647, %v13693_v55 }
 0x528   :  { %v4782_v42 = vsub.f32 1.0, %v4781_v50  ;;  %v4729_v54 = vadd.f32 %v4721_v26, %v4205_v57  ;;  %v4681_v27 = vpop.f32.mrf.mxu0  ;;  %v4768_v5 = vand.u32 2147483648, %v13693_v55  ;;  %v4707_v9 = vpop.f32.mrf.mxu2  ;;  %v15293_v26 = vld [vmem:[#allocation74_spill] sm:$0xff] }
 0x529   :  { %v4745_v58 = vmul.f32 %v11295_v31, %v4744_v6  ;;  %11306 = vrcp.f32 %v13702_v36  ;;  %vm4800_vm12 = vweird.f32 %v13702_v36  ;;  %v4806_v11 = vand.u32 2147483648, %v13702_v36  ;;  %v4695_v60 = vpop.f32.mrf.mxu1 }
 0x52a   :  { %v4783_v2 = vmul.f32 %v11297_v16, %v4782_v42  ;;  %11308 = vpow2.f32 %v9401_v43  ;;  %v9406_v30 = vmul.f32 -1.442695, %v4729_v54  ;;  %v4730_v40 = vadd.f32 %v4681_v27, %v4206_v4 }
 0x52b   :  { %v4746_v51 = vadd.f32 %v11295_v31, %v4745_v58  ;;  %11310 = vtanh.f32 %v4470_v24  ;;  %vm13732_vm14 = vcmp.eq.f32.partialorder %v4766_v8, 8.507059e+37  ;;  %v4804_v4 = vand.u32 2147483647, %v13702_v36 }
 0x52c   :  { %v4784_v18 = vadd.f32 %v11297_v16, %v4783_v2  ;;  %v11303_v39 = vpop.eup %11302  ;;  %11312 = vpow2.f32 %v9402_v49  ;;  %v9403_v35 = vmul.f32 -1.442695, %v4730_v40  ;;  %v4769_v14 = vor.u32 1.1754944e-38, %v4768_v5 }
 0x52d   :  { %v4750_v19 = vsel %vm4749_vm9, %v11295_v31, %v4746_v51  ;;  %v13715_v28 = vpop.eup %11304  ;;  %v4758_v32 = vmul.f32 %v11303_v39, %v13693_v55  ;;  %11314 = vpow2.f32 %v9404_v20  ;;  %vm4763_vm13 = vweird.f32 %v11303_v39 }
 0x52e   :  { %v4755_v52 = vsel %vm13708_vm8, %v4754_v29, %v4750_v19  ;;  %v4788_v34 = vsel %vm4787_vm11, %v11297_v16, %v4784_v18  ;;  %v4821_v41 = vmul.f32 %v13715_v28, %v13691_v22  ;;  %11316 = vpow2.f32 %v9406_v30  ;;  %vm4764_vm0 = vmor %vm4762_vm4, %vm4763_vm13 }
 0x52f   :  { %v11307_v15 = vpop.eup %11306  ;;  %v4793_v53 = vsel %vm4790_vm10, %v4792_v12, %v4788_v34  ;;  %v4852_v46 = vmul.f32 %v11301_v56, %v4755_v52  ;;  %v4759_v0 = vsub.f32 1.0, %v4758_v32  ;;  %v4807_v45 = vor.u32 1.1754944e-38, %v4806_v11 }
 0x530   :  { %v4850_v62 = vmul.f32 %v4793_v53, %v13360_v7  ;;  %v4796_v3 = vmul.f32 %v11307_v15, %v13702_v36  ;;  %v11309_v13 = vpop.eup %11308  ;;  %vm4801_vm15 = vweird.f32 %v11307_v15  ;;  %v4822_v38 = vsub.f32 1.0, %v4821_v41  ;;  %v10715_v41 = vld [vmem:[#allocation10 + $0x74] sm:$0xf0] }
 0x531   :  { %v11311_v57 = vpop.eup %11310  ;;  %v4760_v7 = vmul.f32 %v11303_v39, %v4759_v0  ;;  %v13736_v16 = vadd.f32 1.0, %v11309_v13  ;;  %vm4802_vm1 = vmor %vm4800_vm12, %vm4801_vm15  ;;  %v4728_v55 = vadd.f32 %v4707_v9, %v4204_v23  ;;  %v4731_v56 = vadd.f32 %v4695_v60, %v4207_v61  ;;  %v4723_v13 = vpop.f32.mrf.mxu3  ;;  %v9468_v60 = vld [vmem:[#allocation10 + $0x78] sm:$0xf0] }
 0x532   :  { %v13730_v33 = vadd.f32 %v4852_v46, %v4850_v62  ;;  %v4797_v31 = vsub.f32 1.0, %v4796_v3  ;;  %v11313_v63 = vpop.eup %11312  ;;  %vm4805_vm2 = vcmp.eq.f32.partialorder %v4804_v4, 8.507059e+37  ;;  %v838_v51 = vpack.c.bf16 %v15293_v26, %v15292_v44  ;;  %v9466_v62 = vld [vmem:[#allocation10 + $0x68] sm:$0xf] }
 0x533   :  { %v4761_v48 = vadd.f32 %v11303_v39, %v4760_v7  ;;  %v11315_v50 = vpop.eup %11314  ;;  %11318 = vrcp.f32 %v13736_v16  ;;  %v13742_v42 = vadd.f32 1.0, %v11313_v63  ;;  %v4823_v36 = vmul.f32 %v13715_v28, %v4822_v38  ;;  %v10710_v38 = vld [vmem:[#allocation10 + $0x4c] sm:$0xf0] }
 0x534   :  { %v4798_v10 = vmul.f32 %v11307_v15, %v4797_v31  ;;  %v13744_v17 = vadd.f32 1.0, %v11315_v50  ;;  %11320 = vpow2.f32 %v9403_v35  ;;  %v11317_v2 = vpop.eup %11316  ;;  %v9405_v20 = vmul.f32 -1.442695, %v4731_v56  ;;  %v10713_v35 = vld [vmem:[#allocation10 + $0x6c] sm:$0xf] }
 0x535   :  { %v4765_v6 = vsel %vm4764_vm0, %v11303_v39, %v4761_v48  ;;  %11322 = vrcp.f32 %v13742_v42  ;;  %v13764_v61 = vadd.f32 1.0, %v11317_v2  ;;  %v4846_v18 = vand.u32 2147483648, %v13736_v16  ;;  %v9442_v50 = vld [vmem:[#allocation10 + $0x40] sm:$0xf] }
 0x536   :  { %v4799_v43 = vadd.f32 %v11307_v15, %v4798_v10  ;;  %v4770_v24 = vsel %vm13732_vm14, %v4769_v14, %v4765_v6  ;;  %11324 = vrcp.f32 %v13744_v17  ;;  %v4829_v19 = vand.u32 2147483647, %v13691_v22  ;;  %v13880_v6 = vld [vmem:[#allocation10 + $0x10] sm:$0xf0] }
 0x537   :  { %v4853_v49 = vmul.f32 %v11311_v57, %v4770_v24  ;;  %11326 = vtanh.f32 %v4728_v55  ;;  %v4208_v54 = vunpack.c.l.bf16 %v838_v51  ;;  %v4209_v52 = vunpack.c.h.bf16 %v838_v51  ;;  %v4709_v57 = vpop.f32.mrf.mxu2  ;;  %v10708_v24 = vld [vmem:[#allocation10 + $0x44] sm:$0xf]  ;;  %v9444_v55 = vld [vmem:[#allocation10 + $0x50] sm:$0xf0] }
 0x538   :  { %v4803_v58 = vsel %vm4802_vm1, %v11307_v15, %v4799_v43  ;;  %11328 = vtanh.f32 %v13730_v33  ;;  %v13776_v32 = vor.u32 1.1754944e-38, %v4831_v25  ;;  %v4917_v8 = vand.u32 2147483648, %v13744_v17 }
 0x539   :  { %v4808_v29 = vsel %vm4805_vm2, %v4807_v45, %v4803_v58  ;;  %v13762_v1 = vpop.eup %11318  ;;  %11330 = vrcp.f32 %v13764_v61  ;;  %v4844_v15 = vand.u32 2147483647, %v13736_v16  ;;  %v13787_v0 = vor.u32 1.1754944e-38, %v4846_v18 }
 0x53a   :  { %v4851_v23 = vmul.f32 %v4808_v29, %v13460_v59  ;;  %v11321_v39 = vpop.eup %11320  ;;  %v13774_v59 = vadd.f32 %v13715_v28, %v4823_v36  ;;  %11332 = vpow2.f32 %v9405_v20  ;;  %vm4911_vm3 = vweird.f32 %v13744_v17  ;;  %v10711_v20 = vld [vmem:[#allocation10 + $0x54] sm:$0xf0] }
 0x53b   :  { %v13771_v34 = vpop.eup %11322  ;;  %v13785_v46 = vadd.f32 1.0, %v11321_v39  ;;  %v4877_v11 = vand.u32 2147483647, %v13742_v42  ;;  %v4879_v30 = vand.u32 2147483648, %v13742_v42  ;;  %v4915_v40 = vand.u32 2147483647, %v13744_v17 }
 0x53c   :  { %v13766_v12 = vadd.f32 %v4853_v49, %v4851_v23  ;;  %v13780_v27 = vpop.eup %11324  ;;  %v4869_v53 = vmul.f32 %v13771_v34, %v13742_v42  ;;  %v13798_v7 = vmul.f32 %v13762_v1, %v13736_v16  ;;  %v4918_v37 = vor.u32 1.1754944e-38, %v4917_v8  ;;  %v9450_v23 = vld [vmem:[#allocation10 + $0x48] sm:$0xf]  ;;  %v10709_v8 = vld [vmem:[#allocation10 + $0x4c] sm:$0xf] }
 0x53d   :  { %v4907_v3 = vmul.f32 %v13780_v27, %v13744_v17  ;;  %11334 = vrcp.f32 %v13785_v46  ;;  %v11327_v31 = vpop.eup %11326  ;;  %vm4873_vm5 = vweird.f32 %v13742_v42  ;;  %vm4874_vm6 = vweird.f32 %v13771_v34 }
 0x53e   :  { %v4870_v5 = vsub.f32 1.0, %v4869_v53  ;;  %v13801_v10 = vpop.eup %11328  ;;  %v4733_v4 = vadd.f32 %v4723_v13, %v4209_v52  ;;  %v9467_v9 = vor.u32 %v10715_v41, %v9466_v62  ;;  %vm4912_vm7 = vweird.f32 %v13780_v27  ;;  %vm13825_vm10 = vmor %vm4873_vm5, %vm4874_vm6  ;;  %v9452_v53 = vld [vmem:[#allocation10 + $0x58] sm:$0xf0]  ;;  %v10706_v13 = vld [vmem:[#allocation10 + $0x2c] sm:$0xf0] }
 0x53f   :  { %v4908_v63 = vsub.f32 1.0, %v4907_v3  ;;  %v13805_v14 = vpop.eup %11330  ;;  %vm13809_vm8 = vcmp.eq.f32.partialorder %v4877_v11, 8.507059e+37  ;;  %v13813_v43 = vadd.f32 %v4709_v57, %v4208_v54  ;;  %v4880_v49 = vor.u32 1.1754944e-38, %v4879_v30  ;;  %vm13839_vm4 = vmor %vm4911_vm3, %vm4912_vm7  ;;  %v10704_v41 = vld [vmem:[#allocation10 + $0x24] sm:$0xf] }
 0x540   :  { %v4871_v48 = vmul.f32 %v13771_v34, %v4870_v5  ;;  %v11333_v56 = vpop.eup %11332  ;;  %vm13816_vm9 = vcmp.eq.f32.partialorder %v4915_v40, 8.507059e+37  ;;  %v9407_v44 = vmul.f32 -1.442695, %v4733_v4  ;;  %5250 = vmatpush.bf16.msrb.mxu2 %v9467_v9  ;;  %v4837_v26 = vsub.f32 1.0, %v13798_v7  ;;  %v9428_v5 = vld [vmem:[#allocation10 + $0x30] sm:$0xf0] }
 0x541   :  { %v4909_v45 = vmul.f32 %v13780_v27, %v4908_v63  ;;  %v13830_v36 = vadd.f32 1.0, %v11333_v56  ;;  %v9471_v25 = vor.u32 %v10713_v35, %v9468_v60  ;;  %vm4826_vm11 = vweird.f32 %v13715_v28  ;;  %v13857_v30 = vld [vmem:[#allocation10 + $0x28] sm:$0xf]  ;;  %v13864_v57 = vld [vmem:[#allocation10 + $0x34] sm:$0xf0] }
 0x542   :  { %v4872_v58 = vadd.f32 %v13771_v34, %v4871_v48  ;;  %11336 = vpow2.f32 %v9407_v44  ;;  %v9443_v54 = vor.u32 %v10710_v38, %v9442_v50  ;;  %v9447_v52 = vor.u32 %v10708_v24, %v9444_v55  ;;  %v13866_v7 = vld [vmem:[#allocation10 + $0x2c] sm:$0xf]  ;;  %v9436_v63 = vld [vmem:[#allocation10 + $0x38] sm:$0xf0] }
 0x543   :  { %v4910_v29 = vadd.f32 %v13780_v27, %v4909_v45  ;;  %v13832_v18 = vpop.eup %11334  ;;  %v13853_v3 = vmul.f32 %v13805_v14, %v13764_v61  ;;  %5264 = vmatpush.bf16.msrb.mxu3 %v9471_v25  ;;  %vm4825_vm12 = vweird.f32 %v13691_v22  ;;  %vm4841_vm13 = vweird.f32 %v13762_v1  ;;  %v13878_v45 = vld [vmem:[#allocation10 + $0x4] sm:$0xf]  ;;  %v13896_v25 = vld [vmem:[#allocation10 + $0x18] sm:$0xf0] }
 0x544   :  { %v4876_v39 = vsel %vm13825_vm10, %v13771_v34, %v4872_v58  ;;  %v4884_v11 = vmul.f32 %v13832_v18, %v13785_v46  ;;  %v9426_v34 = vld [vmem:[#allocation10 + $0x20] sm:$0xf]  ;;  %11338 = vrcp.f32 %v13830_v36  ;;  %5223 = vmatpush.bf16.msra.mxu0 %v9443_v54  ;;  %5237 = vmatpush.bf16.msra.mxu1 %v9447_v52  ;;  %vm4840_vm14 = vweird.f32 %v13736_v16  ;;  %v13887_v58 = vld [vmem:[#allocation10 + $0x8] sm:$0xf]  ;;  %vm13965_vm6 = vmor %vm4825_vm12, %vm4826_vm11 }
 0x545   :  { %v4881_v62 = vsel %vm13809_vm8, %v4880_v49, %v4876_v39  ;;  %v4914_v17 = vsel %vm13839_vm4, %v13780_v27, %v4910_v29  ;;  %11340 = vtanh.f32 %v13766_v12  ;;  %v4955_v48 = vand.u32 2147483647, %v13764_v61  ;;  %v13889_v49 = vld [vmem:[#allocation10 + $0x14] sm:$0xf0]  ;;  %v13894_v29 = vld [vmem:[#allocation10 + $0xc] sm:$0xf]  ;;  %vm13976_vm7 = vmor %vm4840_vm14, %vm4841_vm13 }
 0x546   :  { %v4919_v27 = vsel %vm13816_vm9, %v4918_v37, %v4914_v17  ;;  %v4978_v40 = vmul.f32 %v11327_v31, %v4881_v62  ;;  %v4885_v4 = vsub.f32 1.0, %v4884_v11  ;;  %v13872_v37 = vld [vmem:[#allocation10] sm:$0xf]  ;;  %v13874_v31 = vld [vmem:[#allocation10 + $0xc] sm:$0xf0]  ;;  %v4838_v9 = vmul.f32 %v13762_v1, %v4837_v26 }
 0x547   :  { %v4976_v35 = vmul.f32 %v4919_v27, %v13543_v47  ;;  %v4892_v60 = vand.u32 2147483647, %v13785_v46  ;;  %v9451_v50 = vor.u32 %v10711_v20, %v9450_v23  ;;  %v9455_v38 = vor.u32 %v10709_v8, %v9452_v53  ;;  %v9650_v23 = vld [vmem:[#allocation11 + $0xe0] sm:$0xf]  ;;  %v10762_v20 = vld [vmem:[#allocation11 + $0xec] sm:$0xf0] }
 0x548   :  { %v4948_v47 = vsub.f32 1.0, %v13853_v3  ;;  %v4886_v55 = vmul.f32 %v13832_v18, %v4885_v4  ;;  %v4894_v56 = vand.u32 2147483648, %v13785_v46  ;;  %v11337_v2 = vpop.eup %11336  ;;  %vm4889_vm15 = vweird.f32 %v13832_v18  ;;  %v13903_v8 = vld [vmem:[#allocation11 + $0xe4] sm:$0xf]  ;;  %v13905_v53 = vld [vmem:[#allocation11 + $0xf0] sm:$0xf0] }
 0x549   :  { %v13882_v24 = vadd.f32 %v4978_v40, %v4976_v35  ;;  %5251 = vmatpush.bf16.msrb.mxu2 %v9451_v50  ;;  %5265 = vmatpush.bf16.msrb.mxu3 %v9455_v38  ;;  %v9427_v44 = vor.u32 %v10706_v13, %v9426_v34  ;;  %v9431_v26 = vor.u32 %v10704_v41, %v9428_v5  ;;  %v4957_v42 = vand.u32 2147483648, %v13764_v61  ;;  %v13907_v62 = vld [vmem:[#allocation11 + $0xe8] sm:$0xf]  ;;  %v10763_v34 = vld [vmem:[#allocation11 + $0xf4] sm:$0xf0] }
 0x54a   :  { %v9435_v51 = vor.u32 %v13864_v57, %v13857_v30  ;;  %v4887_v39 = vadd.f32 %v13832_v18, %v4886_v55  ;;  %v13900_v54 = vadd.f32 1.0, %v11337_v2  ;;  %v9439_v52 = vor.u32 %v13866_v7, %v9436_v63  ;;  %v13909_v17 = vpop.eup %11338  ;;  %v13917_v13 = vld [vmem:[#allocation11 + $0xec] sm:$0xf]  ;;  %v13919_v41 = vld [vmem:[#allocation11 + $0xf8] sm:$0xf0] }
 0x54b   :  { %vm4888_vm0 = vweird.f32 %v13785_v46  ;;  %11342 = vtanh.f32 %v13813_v43  ;;  %5224 = vmatpush.bf16.msra.mxu0 %v9427_v44  ;;  %5238 = vmatpush.bf16.msra.mxu1 %v9431_v26  ;;  %v9411_v3 = vor.u32 %v13874_v31, %v13872_v37  ;;  %v9415_v11 = vor.u32 %v13878_v45, %v13880_v6  ;;  %v13921_v5 = vpop.eup %11340  ;;  %v9634_v57 = vld [vmem:[#allocation11 + $0xc0] sm:$0xf]  ;;  %v13957_v37 = vld [vmem:[#allocation11 + $0xc4] sm:$0xf]  ;;  %v13959_v31 = vld [vmem:[#allocation11 + $0xd0] sm:$0xf0] }
 0x54c   :  { %vm13925_vm1 = vcmp.eq.f32.partialorder %v4829_v19, 8.507059e+37  ;;  %v13930_v43 = vadd.f32 %v13762_v1, %v4838_v9  ;;  %vm13934_vm2 = vcmp.eq.f32.partialorder %v4844_v15, 8.507059e+37  ;;  %v4922_v27 = vmul.f32 %v13909_v17, %v13830_v36  ;;  %vm13942_vm3 = vmor %vm4888_vm0, %vm4889_vm15  ;;  %v10758_v15 = vld [vmem:[#allocation11 + $0xcc] sm:$0xf0]  ;;  %v9642_v45 = vld [vmem:[#allocation11 + $0xc8] sm:$0xf] }
 0x54d   :  { %vm13946_vm5 = vcmp.eq.f32.partialorder %v4892_v60, 8.507059e+37  ;;  %11344 = vrcp.f32 %v13900_v54  ;;  %v4949_v7 = vmul.f32 %v13805_v14, %v4948_v47  ;;  %v4891_v63 = vsel %vm13942_vm3, %v13832_v18, %v4887_v39  ;;  %5252 = vmatpush.bf16.msrb.mxu2 %v9435_v51  ;;  %5266 = vmatpush.bf16.msrb.mxu3 %v9439_v52  ;;  %v10759_v6 = vld [vmem:[#allocation11 + $0xd4] sm:$0xf0]  ;;  %v9618_v51 = vld [vmem:[#allocation11 + $0xa0] sm:$0xf] }
 0x54e   :  { %v4895_v35 = vor.u32 1.1754944e-38, %v4894_v56  ;;  %v9419_v4 = vor.u32 %v13889_v49, %v13887_v58  ;;  %v4923_v60 = vsub.f32 1.0, %v4922_v27  ;;  %v4932_v18 = vand.u32 2147483648, %v13830_v36  ;;  %v10757_v58 = vld [vmem:[#allocation11 + $0xcc] sm:$0xf] }
 0x54f   :  { %v9423_v50 = vor.u32 %v13894_v29, %v13896_v25  ;;  %v9651_v38 = vor.u32 %v10762_v20, %v9650_v23  ;;  %vm4927_vm8 = vweird.f32 %v13909_v17  ;;  %v4930_v22 = vand.u32 2147483647, %v13830_v36  ;;  %5225 = vmatpush.bf16.msra.mxu0 %v9411_v3  ;;  %5239 = vmatpush.bf16.msra.mxu1 %v9415_v11  ;;  %v9644_v49 = vld [vmem:[#allocation11 + $0xd8] sm:$0xf0]  ;;  %v10754_v29 = vld [vmem:[#allocation11 + $0xac] sm:$0xf0] }
 0x550   :  { %v9655_v55 = vor.u32 %v13903_v8, %v13905_v53  ;;  %v9659_v56 = vor.u32 %v10763_v34, %v13907_v62  ;;  %v4924_v2 = vmul.f32 %v13909_v17, %v4923_v60  ;;  %v4896_v16 = vsel %vm13946_vm5, %v4895_v35, %v4891_v63  ;;  %v13990_v25 = vld [vmem:[#allocation11 + $0xa4] sm:$0xf]  ;;  %v9620_v8 = vld [vmem:[#allocation11 + $0xb0] sm:$0xf0]  ;;  %v9626_v53 = vld [vmem:[#allocation11 + $0xa8] sm:$0xf] }
 0x551   :  { %v9663_v44 = vor.u32 %v13917_v13, %v13919_v41  ;;  %v9635_v26 = vor.u32 %v10758_v15, %v9634_v57  ;;  %v11343_v23 = vpop.eup %11342  ;;  %v4828_v20 = vsel %vm13965_vm6, %v13715_v28, %v13774_v59  ;;  %v4843_v39 = vsel %vm13976_vm7, %v13762_v1, %v13930_v43  ;;  %5253 = vmatpush.bf16.msrb.mxu2 %v9419_v4  ;;  %v10755_v62 = vld [vmem:[#allocation11 + $0xb4] sm:$0xf0]  ;;  %v10753_v43 = vld [vmem:[#allocation11 + $0xac] sm:$0xf]  ;;  %v9628_v15 = vld [vmem:[#allocation11 + $0xb8] sm:$0xf0] }
 0x552   :  { %v14001_v52 = vadd.f32 %v13805_v14, %v4949_v7  ;;  %vm4926_vm9 = vweird.f32 %v13830_v36  ;;  %5267 = vmatpush.bf16.msrb.mxu3 %v9423_v50  ;;  %vm4951_vm10 = vweird.f32 %v13764_v61  ;;  %v4925_v28 = vadd.f32 %v13909_v17, %v4924_v2  ;;  %v9602_v7 = vld [vmem:[#allocation11 + $0x80] sm:$0xf]  ;;  %v10750_v63 = vld [vmem:[#allocation11 + $0x8c] sm:$0xf0]  ;;  %v10748_v9 = vld [vmem:[#allocation11 + $0x84] sm:$0xf] }
 0x553   :  { %5480 = vmatpush.bf16.msrb.mxu0 %v9651_v38  ;;  %v14004_v3 = vpop.eup %11344  ;;  %v4933_v59 = vor.u32 1.1754944e-38, %v4932_v18  ;;  %5494 = vmatpush.bf16.msrb.mxu1 %v9655_v55  ;;  %v9639_v1 = vor.u32 %v13957_v37, %v13959_v31  ;;  %v9643_v11 = vor.u32 %v10759_v6, %v9642_v45  ;;  %vm14012_vm11 = vmor %vm4926_vm9, %vm4927_vm8  ;;  %vm4931_vm4 = vcmp.eq.f32.partialorder %v4930_v22, 8.507059e+37  ;;  %v9604_v60 = vld [vmem:[#allocation11 + $0x90] sm:$0xf0]  ;;  %v10751_v38 = vld [vmem:[#allocation11 + $0x94] sm:$0xf0] }
 0x554   :  { %v4979_v34 = vmul.f32 %v11343_v23, %v4896_v16  ;;  %v4962_v13 = vmul.f32 %v14004_v3, %v13900_v54  ;;  %v9647_v41 = vor.u32 %v10757_v58, %v9644_v49  ;;  %v4929_v27 = vsel %vm14012_vm11, %v13909_v17, %v4925_v28  ;;  %v9612_v6 = vld [vmem:[#allocation11 + $0x98] sm:$0xf0]  ;;  %v9586_v58 = vld [vmem:[#allocation11 + $0x60] sm:$0xf]  ;;  %v10746_v49 = vld [vmem:[#allocation11 + $0x6c] sm:$0xf0] }
 0x555   :  { %5508 = vmatpush.bf16.msra.mxu2 %v9659_v56  ;;  %v9619_v40 = vor.u32 %v10754_v29, %v9618_v51  ;;  %v9623_v19 = vor.u32 %v13990_v25, %v9620_v8  ;;  %v9627_v57 = vor.u32 %v10755_v62, %v9626_v53  ;;  %v4934_v35 = vsel %vm4931_vm4, %v4933_v59, %v4929_v27  ;;  %v9588_v51 = vld [vmem:[#allocation11 + $0x70] sm:$0xf0]  ;;  %v10745_v62 = vld [vmem:[#allocation11 + $0x6c] sm:$0xf]  ;;  %v9596_v28 = vld [vmem:[#allocation11 + $0x78] sm:$0xf0] }
 0x556   :  { %5522 = vmatpush.bf16.msra.mxu3 %v9663_v44  ;;  %v4963_v4 = vsub.f32 1.0, %v4962_v13  ;;  %v4833_v37 = vsel %vm13925_vm1, %v13776_v32, %v4828_v20  ;;  %v4848_v31 = vsel %vm13934_vm2, %v13787_v0, %v4843_v39  ;;  %vm4952_vm12 = vweird.f32 %v13805_v14  ;;  %v9610_v0 = vld [vmem:[#allocation11 + $0x88] sm:$0xf]  ;;  %v10747_v39 = vld [vmem:[#allocation11 + $0x74] sm:$0xf0] }
 0x557   :  { %5481 = vmatpush.bf16.msrb.mxu0 %v9635_v26  ;;  %v4977_v17 = vmul.f32 %v4934_v35, %v13636_v21  ;;  %5495 = vmatpush.bf16.msrb.mxu1 %v9639_v1  ;;  %v4858_v18 = vmul.f32 %v13801_v10, %v4833_v37  ;;  %v4859_v50 = vmul.f32 %v13921_v5, %v4848_v31  ;;  %11346 = vtanh.f32 %v13882_v24  ;;  %v10749_v21 = vld [vmem:[#allocation11 + $0x8c] sm:$0xf]  ;;  %v10744_v26 = vld [vmem:[#allocation11 + $0x64] sm:$0xf]  ;;  %vm14044_vm14 = vmor %vm4951_vm10, %vm4952_vm12 }
 0x558   :  { %v4964_v32 = vmul.f32 %v14004_v3, %v4963_v4  ;;  %v9631_v46 = vor.u32 %v10753_v43, %v9628_v15  ;;  %v9603_v30 = vor.u32 %v10750_v63, %v9602_v7  ;;  %vm4967_vm13 = vweird.f32 %v14004_v3  ;;  %v9594_v20 = vld [vmem:[#allocation11 + $0x68] sm:$0xf]  ;;  %v9570_v36 = vld [vmem:[#allocation11 + $0x40] sm:$0xf]  ;;  %v9580_v15 = vld [vmem:[#allocation11 + $0x58] sm:$0xf0] }
 0x559   :  { %5509 = vmatpush.bf16.msra.mxu2 %v9643_v11  ;;  %v14034_v45 = vadd.f32 %v4979_v34, %v4977_v17  ;;  %v4986_v47 = vpack.c.bf16 %v4858_v18, %v4858_v18  ;;  %v4987_v22 = vpack.c.bf16 %v4859_v50, %v4859_v50  ;;  %v10967_v55 = vpack.c.bf16 %v4859_v50, %v4858_v18  ;;  %v10742_v34 = vld [vmem:[#allocation11 + $0x4c] sm:$0xf0]  ;;  %v9554_v31 = vld [vmem:[#allocation11 + $0x20] sm:$0xf]  ;;  %v9556_v18 = vld [vmem:[#allocation11 + $0x30] sm:$0xf0] }
 0x55a   :  { %5523 = vmatpush.bf16.msra.mxu3 %v9647_v41  ;;  %v4965_v10 = vadd.f32 %v14004_v3, %v4964_v32  ;;  %v4972_v5 = vand.u32 2147483648, %v13900_v54  ;;  %v9607_v56 = vor.u32 %v10748_v9, %v9604_v60  ;;  %v9611_v2 = vor.u32 %v10751_v38, %v9610_v0  ;;  %v10738_v17 = vld [vmem:[#allocation11 + $0x2c] sm:$0xf0]  ;;  %v10736_v9 = vld [vmem:[#allocation11 + $0x24] sm:$0xf] }
 0x55b   :  { %5482 = vmatpush.bf16.msrb.mxu0 %v9619_v40  ;;  %11348 = vtanh.f32 %v14034_v45  ;;  %5496 = vmatpush.bf16.msrb.mxu1 %v9623_v19  ;;  %10968 = vst [vmem:[#allocation3 + $0x8] sm:$0xff] %v10967_v55   ;;  %v5054_v16 = vunpack.c.l.b16 %v4986_v47  ;;  %v5055_v44 = vunpack.c.l.b16 %v4987_v22  ;;  %vm4966_vm15 = vweird.f32 %v13900_v54  ;;  %v10740_v40 = vld [vmem:[#allocation11 + $0x44] sm:$0xf]  ;;  %v9572_v19 = vld [vmem:[#allocation11 + $0x50] sm:$0xf0] }
 0x55c   :  { %v4970_v25 = vand.u32 2147483647, %v13900_v54  ;;  %v9615_v23 = vor.u32 %v10749_v21, %v9612_v6  ;;  %vm14052_vm0 = vmor %vm4966_vm15, %vm4967_vm13  ;;  %v4954_v54 = vsel %vm14044_vm14, %v13805_v14, %v14001_v52  ;;  %v9587_v11 = vor.u32 %v10746_v49, %v9586_v58  ;;  %v9578_v52 = vld [vmem:[#allocation11 + $0x48] sm:$0xf]  ;;  %v10739_v32 = vld [vmem:[#allocation11 + $0x34] sm:$0xf0] }
 0x55d   :  { %5510 = vmatpush.bf16.msra.mxu2 %v9627_v57  ;;  %v5056_v53 = vpack.c.b16 %v5055_v44, %v5054_v16  ;;  %v11347_v59 = vpop.eup %11346  ;;  %v4969_v1 = vsel %vm14052_vm0, %v14004_v3, %v4965_v10  ;;  %v4958_v13 = vor.u32 1.1754944e-38, %v4957_v42  ;;  %v4973_v41 = vor.u32 1.1754944e-38, %v4972_v5  ;;  %v10743_v3 = vld [vmem:[#allocation11 + $0x54] sm:$0xf0]  ;;  %v10741_v42 = vld [vmem:[#allocation11 + $0x4c] sm:$0xf] }
 0x55e   :  { %5524 = vmatpush.bf16.msra.mxu3 %v9631_v46  ;;  %v9591_v43 = vor.u32 %v10744_v26, %v9588_v51  ;;  %v9595_v27 = vor.u32 %v10747_v39, %v9594_v20  ;;  %vm4956_vm1 = vcmp.eq.f32.partialorder %v4955_v48, 8.507059e+37  ;;  %vm4971_vm2 = vcmp.eq.f32.partialorder %v4970_v25, 8.507059e+37  ;;  %v9562_v50 = vld [vmem:[#allocation11 + $0x28] sm:$0xf]  ;;  %v9564_v0 = vld [vmem:[#allocation11 + $0x38] sm:$0xf0] }
 0x55f   :  { %5483 = vmatpush.bf16.msrb.mxu0 %v9603_v30  ;;  %5497 = vmatpush.bf16.msrb.mxu1 %v9607_v56  ;;  %v9599_v14 = vor.u32 %v10745_v62, %v9596_v28  ;;  %v4959_v7 = vsel %vm4956_vm1, %v4958_v13, %v4954_v54  ;;  %v4974_v63 = vsel %vm4971_vm2, %v4973_v41, %v4969_v1  ;;  %v10737_v30 = vld [vmem:[#allocation11 + $0x2c] sm:$0xf]  ;;  %v9538_v22 = vld [vmem:[#allocation11] sm:$0xf]  ;;  %v10734_v55 = vld [vmem:[#allocation11 + $0xc] sm:$0xf0] }
 0x560   :  { %5226 = vmatmul.bf16.vlgmr.msra.gmra.mxu0 %v5056_v53  ;;  %5240 = vmatmul.bf16.vlgmr.msra.gmra.mxu1 %v5056_v53  ;;  %v9571_v35 = vor.u32 %v10742_v34, %v9570_v36  ;;  %v4984_v4 = vmul.f32 %v11347_v59, %v4959_v7  ;;  %v9575_v61 = vor.u32 %v10740_v40, %v9572_v19  ;;  %v10732_v10 = vld [vmem:[#allocation11 + $0x4] sm:$0xf]  ;;  %v9540_v58 = vld [vmem:[#allocation11 + $0x10] sm:$0xf0]  ;;  %v9546_v49 = vld [vmem:[#allocation11 + $0x8] sm:$0xf] }
 0x561   :  { %5511 = vmatpush.bf16.msra.mxu2 %v9611_v2  ;;  %v11349_v57 = vpop.eup %11348  ;;  %5268 = vmatmul.bf16.vlgmr.msrb.gmra.mxu3 %v5056_v53  ;;  %v9579_v48 = vor.u32 %v10743_v3, %v9578_v52  ;;  %v9583_v60 = vor.u32 %v10741_v42, %v9580_v15  ;;  %v9555_v21 = vor.u32 %v10738_v17, %v9554_v31  ;;  %v10735_v2 = vld [vmem:[#allocation11 + $0x14] sm:$0xf0]  ;;  %v10733_v16 = vld [vmem:[#allocation11 + $0xc] sm:$0xf]  ;;  %v9548_v44 = vld [vmem:[#allocation11 + $0x18] sm:$0xf0] }
 0x562   :  { %5525 = vmatpush.bf16.msra.mxu3 %v9615_v23  ;;  %5254 = vmatmul.bf16.vlgmr.msrb.gmra.mxu2 %v5056_v53  ;;  %v4985_v37 = vmul.f32 %v11349_v57, %v4974_v63  ;;  %v9559_v6 = vor.u32 %v10736_v9, %v9556_v18  ;;  %v9563_v47 = vor.u32 %v10739_v32, %v9562_v50  ;;  %v9790_v8 = vld [vmem:[#allocation10 + $0xe0] sm:$0xf]  ;;  %v10794_v53 = vld [vmem:[#allocation10 + $0xec] sm:$0xf0]  ;;  %v10792_v62 = vld [vmem:[#allocation10 + $0xe4] sm:$0xf] }
 0x563   :  { %5484 = vmatpush.bf16.msrb.mxu0 %v9587_v11  ;;  %5498 = vmatpush.bf16.msrb.mxu1 %v9591_v43  ;;  %v4988_v5 = vpack.c.bf16 %v4984_v4, %v4984_v4  ;;  %v9567_v56 = vor.u32 %v10737_v30, %v9564_v0  ;;  %v9539_v51 = vor.u32 %v10734_v55, %v9538_v22  ;;  %v9792_v59 = vld [vmem:[#allocation10 + $0xf0] sm:$0xf0]  ;;  %v9798_v54 = vld [vmem:[#allocation10 + $0xe8] sm:$0xf]  ;;  %v10795_v1 = vld [vmem:[#allocation10 + $0xf4] sm:$0xf0] }
 0x564   :  { %v10972_v46 = vpack.c.bf16 %v4985_v37, %v4984_v4  ;;  %v4989_v38 = vpack.c.bf16 %v4985_v37, %v4985_v37  ;;  %v9543_v29 = vor.u32 %v10732_v10, %v9540_v58  ;;  %v9547_v25 = vor.u32 %v10735_v2, %v9546_v49  ;;  %v10793_v34 = vld [vmem:[#allocation10 + $0xec] sm:$0xf]  ;;  %v9800_v13 = vld [vmem:[#allocation10 + $0xf8] sm:$0xf0]  ;;  %v9774_v43 = vld [vmem:[#allocation10 + $0xc0] sm:$0xf] }
 0x565   :  { %5512 = vmatpush.bf16.msra.mxu2 %v9595_v27  ;;  %v5316_v23 = vunpack.c.l.b16 %v4988_v5  ;;  %v9551_v20 = vor.u32 %v10733_v16, %v9548_v44  ;;  %v9791_v28 = vor.u32 %v10794_v53, %v9790_v8  ;;  %v9795_v11 = vor.u32 %v10792_v62, %v9792_v59  ;;  %v10790_v27 = vld [vmem:[#allocation10 + $0xcc] sm:$0xf0]  ;;  %v10788_v40 = vld [vmem:[#allocation10 + $0xc4] sm:$0xf]  ;;  %v9776_v3 = vld [vmem:[#allocation10 + $0xd0] sm:$0xf0] }
 0x566   :  { %5526 = vmatpush.bf16.msra.mxu3 %v9599_v14  ;;  %10973 = vst [vmem:[#allocation4 + $0x10] sm:$0xff] %v10972_v46   ;;  %v5317_v26 = vunpack.c.l.b16 %v4989_v38  ;;  %v9799_v36 = vor.u32 %v10795_v1, %v9798_v54  ;;  %v9803_v41 = vor.u32 %v10793_v34, %v9800_v13  ;;  %v15320_v19 = vld [vmem:[#allocation24_spill] sm:$0xff]  ;;  %v9775_v52 = vor.u32 %v10790_v27, %v9774_v43  ;;  %v9782_v57 = vld [vmem:[#allocation10 + $0xc8] sm:$0xf]  ;;  %v10791_v42 = vld [vmem:[#allocation10 + $0xd4] sm:$0xf0] }
 0x567   :  { %5485 = vmatpush.bf16.msrb.mxu0 %v9571_v35  ;;  %5499 = vmatpush.bf16.msrb.mxu1 %v9575_v61  ;;  %v5000_v14 = vunpack.c.l.bf16 %v15320_v19  ;;  %v5001_v7 = vunpack.c.h.bf16 %v15320_v19  ;;  %v9779_v63 = vor.u32 %v10788_v40, %v9776_v3  ;;  %v9783_v35 = vor.u32 %v10791_v42, %v9782_v57  ;;  %v10789_v4 = vld [vmem:[#allocation10 + $0xcc] sm:$0xf]  ;;  %v9784_v37 = vld [vmem:[#allocation10 + $0xd8] sm:$0xf0]  ;;  %v9758_v18 = vld [vmem:[#allocation10 + $0xa0] sm:$0xf] }
 0x568   :  { %v5318_v39 = vpack.c.b16 %v5317_v26, %v5316_v23  ;;  %v9787_v31 = vor.u32 %v10789_v4, %v9784_v37  ;;  %v10786_v50 = vld [vmem:[#allocation10 + $0xac] sm:$0xf0]  ;;  %v10784_v46 = vld [vmem:[#allocation10 + $0xa4] sm:$0xf]  ;;  %v9760_v30 = vld [vmem:[#allocation10 + $0xb0] sm:$0xf0] }
 0x569   :  { %5513 = vmatpush.bf16.msra.mxu2 %v9579_v48  ;;  %v9759_v32 = vor.u32 %v10786_v50, %v9758_v18  ;;  %v9766_v0 = vld [vmem:[#allocation10 + $0xa8] sm:$0xf]  ;;  %v9763_v38 = vor.u32 %v10784_v46, %v9760_v30  ;;  %v15321_v22 = vld [vmem:[#allocation54_spill] sm:$0xff]  ;;  %v15322_v10 = vld [vmem:[#allocation25_spill] sm:$0xff] }
 0x56a   :  { %5527 = vmatpush.bf16.msra.mxu3 %v9583_v60  ;;  %v5003_v55 = vunpack.c.h.bf16 %v15321_v22  ;;  %v5004_v5 = vunpack.c.l.bf16 %v15322_v10  ;;  %v5005_v16 = vunpack.c.h.bf16 %v15322_v10  ;;  %v10782_v23 = vld [vmem:[#allocation10 + $0x8c] sm:$0xf0]  ;;  %v9744_v62 = vld [vmem:[#allocation10 + $0x90] sm:$0xf0]  ;;  %v9750_v34 = vld [vmem:[#allocation10 + $0x88] sm:$0xf] }
 0x56b   :  { %5486 = vmatpush.bf16.msrb.mxu0 %v9555_v21  ;;  %5500 = vmatpush.bf16.msrb.mxu1 %v9559_v6  ;;  %v10787_v21 = vld [vmem:[#allocation10 + $0xb4] sm:$0xf0]  ;;  %v10785_v6 = vld [vmem:[#allocation10 + $0xac] sm:$0xf]  ;;  %v15323_v13 = vld [vmem:[#allocation40_spill] sm:$0xff] }
 0x56c   :  { %v15325_v40 = vld [vmem:[#allocation56_spill] sm:$0xff]  ;;  %v9752_v3 = vld [vmem:[#allocation10 + $0x98] sm:$0xf0]  ;;  %v15326_v57 = vld [vmem:[#allocation70_spill] sm:$0xff] }
 0x56d   :  { %5514 = vmatpush.bf16.msra.mxu2 %v9563_v47  ;;  %v9768_v47 = vld [vmem:[#allocation10 + $0xb8] sm:$0xf0]  ;;  %v5007_v19 = vunpack.c.h.bf16 %v15325_v40  ;;  %v15327_v42 = vld [vmem:[#allocation71_spill] sm:$0xff]  ;;  %v9726_v37 = vld [vmem:[#allocation10 + $0x60] sm:$0xf] }
 0x56e   :  { %5528 = vmatpush.bf16.msra.mxu3 %v9567_v56  ;;  %v9767_v56 = vor.u32 %v10787_v21, %v9766_v0  ;;  %v9771_v58 = vor.u32 %v10785_v6, %v9768_v47  ;;  %v9728_v18 = vld [vmem:[#allocation10 + $0x70] sm:$0xf0]  ;;  %v9734_v0 = vld [vmem:[#allocation10 + $0x68] sm:$0xf]  ;;  %v10777_v21 = vld [vmem:[#allocation10 + $0x6c] sm:$0xf] }
 0x56f   :  { %5487 = vmatpush.bf16.msrb.mxu0 %v9539_v51  ;;  %5501 = vmatpush.bf16.msrb.mxu1 %v9543_v29 }
 0x571   :  { %5515 = vmatpush.bf16.msra.mxu2 %v9547_v25  ;;  %v9742_v25 = vld [vmem:[#allocation10 + $0x80] sm:$0xf] }
 0x572   :  { %5529 = vmatpush.bf16.msra.mxu3 %v9551_v20  ;;  %5488 = vmatmul.bf16.vlgmr.msrb.gmra.mxu0 %v5318_v39  ;;  %v10780_v20 = vld [vmem:[#allocation10 + $0x84] sm:$0xf]  ;;  %v9743_v53 = vor.u32 %v10782_v23, %v9742_v25  ;;  %v9710_v23 = vld [vmem:[#allocation10 + $0x40] sm:$0xf] }
 0x573   :  { %5502 = vmatmul.bf16.vlgmr.msrb.gmra.mxu1 %v5318_v39  ;;  %6028 = vmatpush.bf16.msra.mxu0 %v9791_v28  ;;  %v9747_v1 = vor.u32 %v10780_v20, %v9744_v62  ;;  %v10774_v20 = vld [vmem:[#allocation10 + $0x4c] sm:$0xf0] }
 0x574   :  { %5516 = vmatmul.bf16.vlgmr.msra.gmra.mxu2 %v5318_v39  ;;  %6042 = vmatpush.bf16.msra.mxu1 %v9795_v11 }
 0x575   :  { %5530 = vmatmul.bf16.vlgmr.msra.gmra.mxu3 %v5318_v39  ;;  %6056 = vmatpush.bf16.msrb.mxu2 %v9799_v36 }
 0x576   :  { %6070 = vmatpush.bf16.msrb.mxu3 %v9803_v41  ;;  %v15324_v41 = vld [vmem:[#allocation41_spill] sm:$0xff] }
 0x577   :  { %6029 = vmatpush.bf16.msra.mxu0 %v9775_v52  ;;  %v14079_v43 = vpack.c.bf16 %v15324_v41, %v15323_v13  ;;  %v10781_v52 = vld [vmem:[#allocation10 + $0x8c] sm:$0xf] }
 0x578   :  { %6043 = vmatpush.bf16.msra.mxu1 %v9779_v63  ;;  %v9755_v30 = vor.u32 %v10781_v52, %v9752_v3 }
 0x579   :  { %6057 = vmatpush.bf16.msrb.mxu2 %v9783_v35  ;;  %v15328_v35 = vld [vmem:[#allocation39_spill] sm:$0xff]  ;;  %v5017_v25 = vunpack.c.h.bf16 %v14079_v43 }
 0x57a   :  { %6071 = vmatpush.bf16.msrb.mxu3 %v9787_v31  ;;  %v5012_v4 = vunpack.c.l.bf16 %v15328_v35 }
 0x57b   :  { %6030 = vmatpush.bf16.msra.mxu0 %v9759_v32 }
 0x57c   :  { %6044 = vmatpush.bf16.msra.mxu1 %v9763_v38  ;;  %v10779_v38 = vld [vmem:[#allocation10 + $0x74] sm:$0xf0] }
 0x57d   :  { %6058 = vmatpush.bf16.msrb.mxu2 %v9767_v56 }
 0x57e   :  { %6072 = vmatpush.bf16.msrb.mxu3 %v9771_v58 }
 0x57f   :  { %6031 = vmatpush.bf16.msra.mxu0 %v9743_v53 }
 0x580   :  { %6045 = vmatpush.bf16.msra.mxu1 %v9747_v1 }
 0x582   :  { %6073 = vmatpush.bf16.msrb.mxu3 %v9755_v30 }
 0x5dd   :  { %v5227_v15 = vpop.f32.mrf.mxu0  ;;  %v5241_v48 = vpop.f32.mrf.mxu1 }
 0x5de   :  { %v5274_v61 = vadd.f32 %v5227_v15, %v5000_v14  ;;  %v5275_v17 = vadd.f32 %v5241_v48, %v5001_v7  ;;  %v10783_v14 = vld [vmem:[#allocation10 + $0x94] sm:$0xf0]  ;;  %v14085_v15 = vpack.c.bf16 %v15327_v42, %v15326_v57  ;;  %v5002_v7 = vunpack.c.l.bf16 %v15321_v22 }
 0x5df   :  { %v5006_v48 = vunpack.c.l.bf16 %v15325_v40  ;;  %v9751_v46 = vor.u32 %v10783_v14, %v9750_v34  ;;  %v5016_v22 = vunpack.c.l.bf16 %v14079_v43 }
 0x5e0   :  { %v9664_v9 = vmul.f32 -1.442695, %v5274_v61  ;;  %v9666_v60 = vmul.f32 -1.442695, %v5275_v17  ;;  %v10778_v61 = vld [vmem:[#allocation10 + $0x6c] sm:$0xf0] }
 0x5e1   :  { %6059 = vmatpush.bf16.msrb.mxu2 %v9751_v46 }
 0x5e2   :  { %11350 = vpow2.f32 %v9664_v9  ;;  %v5013_v9 = vunpack.c.h.bf16 %v15328_v35 }
 0x5e3   :  { %11352 = vpow2.f32 %v9666_v60  ;;  %v10776_v60 = vld [vmem:[#allocation10 + $0x64] sm:$0xf] }
 0x5e4   :  { %v5269_v49 = vpop.f32.mrf.mxu3  ;;  %v9731_v10 = vor.u32 %v10776_v60, %v9728_v18 }
 0x5e5   :  { %v5229_v2 = vpop.f32.mrf.mxu0  ;;  %v5277_v44 = vadd.f32 %v5269_v49, %v5003_v55  ;;  %v5243_v51 = vpop.f32.mrf.mxu1  ;;  %v9727_v55 = vor.u32 %v10778_v61, %v9726_v37 }
 0x5e6   :  { %v5278_v26 = vadd.f32 %v5229_v2, %v5004_v5  ;;  %v5279_v29 = vadd.f32 %v5243_v51, %v5005_v16  ;;  %v5255_v27 = vpop.f32.mrf.mxu2  ;;  %v9736_v5 = vld [vmem:[#allocation10 + $0x78] sm:$0xf0]  ;;  %v9735_v2 = vor.u32 %v10779_v38, %v9734_v0  ;;  %6046 = vmatpush.bf16.msra.mxu1 %v9731_v10 }
 0x5e7   :  { %v9668_v8 = vmul.f32 -1.442695, %v5277_v44  ;;  %v5276_v50 = vadd.f32 %v5255_v27, %v5002_v7  ;;  %v9739_v16 = vor.u32 %v10777_v21, %v9736_v5  ;;  %v15329_v51 = vld [vmem:[#allocation69_spill] sm:$0xff]  ;;  %6032 = vmatpush.bf16.msra.mxu0 %v9727_v55  ;;  %v9711_v27 = vor.u32 %v10774_v20, %v9710_v23 }
 0x5e8   :  { %v11351_v39 = vpop.eup %11350  ;;  %v9665_v54 = vmul.f32 -1.442695, %v5278_v26  ;;  %v9667_v36 = vmul.f32 -1.442695, %v5279_v29  ;;  %v5014_v29 = vunpack.c.l.bf16 %v15329_v51  ;;  %v5015_v62 = vunpack.c.h.bf16 %v15329_v51  ;;  %6060 = vmatpush.bf16.msrb.mxu2 %v9735_v2 }
 0x5e9   :  { %v11353_v28 = vpop.eup %11352  ;;  %v14072_v59 = vadd.f32 1.0, %v11351_v39  ;;  %11354 = vpow2.f32 %v9668_v8  ;;  %6074 = vmatpush.bf16.msrb.mxu3 %v9739_v16 }
 0x5ea   :  { %v14074_v11 = vadd.f32 1.0, %v11353_v28 }
 0x5eb   :  { %11356 = vrcp.f32 %v14072_v59  ;;  %v5561_v53 = vand.u32 2147483647, %v14072_v59  ;;  %v5563_v1 = vand.u32 2147483648, %v14072_v59  ;;  %6033 = vmatpush.bf16.msra.mxu0 %v9711_v27  ;;  %vm5557_vm7 = vweird.f32 %v14072_v59 }
 0x5ec   :  { %11358 = vrcp.f32 %v14074_v11  ;;  %v5271_v63 = vpop.f32.mrf.mxu3  ;;  %v5599_v3 = vand.u32 2147483647, %v14074_v11  ;;  %vm5595_vm6 = vweird.f32 %v14074_v11 }
 0x5ed   :  { %11360 = vpow2.f32 %v9665_v54  ;;  %v5281_v31 = vadd.f32 %v5271_v63, %v5007_v19  ;;  %v5601_v19 = vand.u32 2147483648, %v14074_v11  ;;  %vm5562_vm9 = vcmp.eq.f32.partialorder %v5561_v53, 8.507059e+37 }
 0x5ee   :  { %11362 = vpow2.f32 %v9667_v36  ;;  %v5257_v57 = vpop.f32.mrf.mxu2  ;;  %v5564_v37 = vor.u32 1.1754944e-38, %v5563_v1  ;;  %vm5600_vm11 = vcmp.eq.f32.partialorder %v5599_v3, 8.507059e+37 }
 0x5ef   :  { %v5489_v17 = vpop.f32.mrf.mxu0  ;;  %v11355_v6 = vpop.eup %11354  ;;  %v9669_v47 = vmul.f32 -1.442695, %v5281_v31  ;;  %v5602_v60 = vor.u32 1.1754944e-38, %v5601_v19 }
 0x5f0   :  { %v5536_v32 = vadd.f32 %v5489_v17, %v5012_v4  ;;  %v14094_v58 = vadd.f32 1.0, %v11355_v6  ;;  %v5503_v41 = vpop.f32.mrf.mxu1 }
 0x5f1   :  { %v14092_v56 = vpop.eup %11356  ;;  %11364 = vpow2.f32 %v9669_v47  ;;  %v5537_v63 = vadd.f32 %v5503_v41, %v5013_v9 }
 0x5f2   :  { %v9670_v49 = vmul.f32 -1.442695, %v5536_v32  ;;  %v11359_v44 = vpop.eup %11358  ;;  %v5553_v26 = vmul.f32 %v14092_v56, %v14072_v59  ;;  %11366 = vtanh.f32 %v5276_v50  ;;  %vm5558_vm3 = vweird.f32 %v14092_v56 }
 0x5f3   :  { %v11361_v39 = vpop.eup %11360  ;;  %v5591_v8 = vmul.f32 %v11359_v44, %v14074_v11  ;;  %11368 = vrcp.f32 %v14094_v58  ;;  %vm5596_vm5 = vweird.f32 %v11359_v44  ;;  %vm5559_vm8 = vmor %vm5557_vm7, %vm5558_vm3  ;;  %v5641_v18 = vand.u32 2147483648, %v14094_v58 }
 0x5f4   :  { %v11363_v28 = vpop.eup %11362  ;;  %v5554_v54 = vsub.f32 1.0, %v5553_v26  ;;  %v14105_v36 = vadd.f32 1.0, %v11361_v39  ;;  %11370 = vpow2.f32 %v9670_v49  ;;  %vm5597_vm10 = vmor %vm5595_vm6, %vm5596_vm5  ;;  %v5280_v59 = vadd.f32 %v5257_v57, %v5006_v48 }
 0x5f5   :  { %v5592_v34 = vsub.f32 1.0, %v5591_v8  ;;  %v14107_v13 = vadd.f32 1.0, %v11363_v28  ;;  %v5018_v32 = vunpack.c.l.bf16 %v14085_v15  ;;  %v9672_v38 = vmul.f32 -1.442695, %v5537_v63 }
 0x5f6   :  { %v5555_v14 = vmul.f32 %v14092_v56, %v5554_v54  ;;  %11372 = vrcp.f32 %v14105_v36  ;;  %v5019_v48 = vunpack.c.h.bf16 %v14085_v15  ;;  %v5639_v55 = vand.u32 2147483647, %v14094_v58  ;;  %v9862_v15 = vld [vmem:[#allocation11 + $0x68] sm:$0xf] }
 0x5f7   :  { %v5593_v52 = vmul.f32 %v11359_v44, %v5592_v34  ;;  %11374 = vrcp.f32 %v14107_v13  ;;  %v11365_v42 = vpop.eup %11364  ;;  %v14137_v10 = vor.u32 1.1754944e-38, %v5641_v18  ;;  %v5616_v2 = vand.u32 2147483648, %v14107_v13  ;;  %v5491_v54 = vpop.f32.mrf.mxu0 }
 0x5f8   :  { %v5556_v7 = vadd.f32 %v14092_v56, %v5555_v14  ;;  %v11367_v4 = vpop.eup %11366  ;;  %v14120_v31 = vadd.f32 1.0, %v11365_v42  ;;  %v5578_v26 = vand.u32 2147483648, %v14105_v36  ;;  %v5531_v23 = vpop.f32.mrf.mxu3  ;;  %v5614_v8 = vand.u32 2147483647, %v14107_v13 }
 0x5f9   :  { %v5594_v61 = vadd.f32 %v11359_v44, %v5593_v52  ;;  %v14122_v17 = vpop.eup %11368  ;;  %vm5610_vm12 = vweird.f32 %v14107_v13  ;;  %vm5572_vm14 = vweird.f32 %v14105_v36  ;;  %v5617_v34 = vor.u32 1.1754944e-38, %v5616_v2  ;;  %v5517_v27 = vpop.f32.mrf.mxu2 }
 0x5fa   :  { %v5560_v11 = vsel %vm5559_vm8, %v14092_v56, %v5556_v7  ;;  %v11371_v35 = vpop.eup %11370  ;;  %11376 = vrcp.f32 %v14120_v31  ;;  %v5631_v47 = vmul.f32 %v14122_v17, %v14094_v58  ;;  %v5579_v14 = vor.u32 1.1754944e-38, %v5578_v26  ;;  %v5505_v7 = vpop.f32.mrf.mxu1 }
 0x5fb   :  { %v5565_v9 = vsel %vm5562_vm9, %v5564_v37, %v5560_v11  ;;  %v5598_v50 = vsel %vm5597_vm10, %v11359_v44, %v5594_v61  ;;  %11378 = vtanh.f32 %v5280_v59  ;;  %v5576_v44 = vand.u32 2147483647, %v14105_v36 }
 0x5fc   :  { %v11373_v46 = vpop.eup %11372  ;;  %v5603_v30 = vsel %vm5600_vm11, %v5602_v60, %v5598_v50  ;;  %v5662_v0 = vmul.f32 %v11367_v4, %v5565_v9  ;;  %11380 = vpow2.f32 %v9672_v38  ;;  %v5632_v20 = vsub.f32 1.0, %v5631_v47  ;;  %v10772_v50 = vld [vmem:[#allocation10 + $0x44] sm:$0xf]  ;;  %v10775_v38 = vld [vmem:[#allocation10 + $0x54] sm:$0xf0] }
 0x5fd   :  { %v11375_v21 = vpop.eup %11374  ;;  %v5660_v6 = vmul.f32 %v5603_v30, %v13730_v33  ;;  %v5568_v40 = vmul.f32 %v11373_v46, %v14105_v36  ;;  %v14143_v33 = vadd.f32 1.0, %v11371_v35  ;;  %vm5573_vm4 = vweird.f32 %v11373_v46 }
 0x5fe   :  { %v5606_v5 = vmul.f32 %v11375_v21, %v14107_v13  ;;  %vm5611_vm13 = vweird.f32 %v11375_v21  ;;  %vm5574_vm15 = vmor %vm5572_vm14, %vm5573_vm4  ;;  %vm5577_vm0 = vcmp.eq.f32.partialorder %v5576_v44, 8.507059e+37  ;;  %v5539_v3 = vadd.f32 %v5531_v23, %v5015_v62  ;;  %v9696_v23 = vld [vmem:[#allocation10 + $0x30] sm:$0xf0] }
 0x5ff   :  { %v14140_v56 = vadd.f32 %v5662_v0, %v5660_v6  ;;  %v5569_v49 = vsub.f32 1.0, %v5568_v40  ;;  %11382 = vrcp.f32 %v14143_v33  ;;  %v5633_v57 = vmul.f32 %v14122_v17, %v5632_v20  ;;  %vm5612_vm1 = vmor %vm5610_vm12, %vm5611_vm13  ;;  %v9718_v0 = vld [vmem:[#allocation10 + $0x48] sm:$0xf]  ;;  %v9694_v40 = vld [vmem:[#allocation10 + $0x20] sm:$0xf] }
 0x600   :  { %v5607_v16 = vsub.f32 1.0, %v5606_v5  ;;  %v14148_v53 = vpop.eup %11376  ;;  %vm5615_vm2 = vcmp.eq.f32.partialorder %v5614_v8, 8.507059e+37  ;;  %v5540_v36 = vadd.f32 %v5491_v54, %v5016_v22  ;;  %v5538_v61 = vadd.f32 %v5517_v27, %v5014_v29  ;;  %v5533_v47 = vpop.f32.mrf.mxu3  ;;  %v10770_v5 = vld [vmem:[#allocation10 + $0x2c] sm:$0xf0]  ;;  %v9702_v20 = vld [vmem:[#allocation10 + $0x28] sm:$0xf] }
 0x601   :  { %v5570_v39 = vmul.f32 %v11373_v46, %v5569_v49  ;;  %v5646_v41 = vmul.f32 %v14148_v53, %v14120_v31  ;;  %v11379_v19 = vpop.eup %11378  ;;  %v9674_v60 = vmul.f32 -1.442695, %v5539_v3  ;;  %v5541_v22 = vadd.f32 %v5505_v7, %v5017_v25  ;;  %v10771_v54 = vld [vmem:[#allocation10 + $0x34] sm:$0xf0] }
 0x602   :  { %v5608_v28 = vmul.f32 %v11375_v21, %v5607_v16  ;;  %v11381_v63 = vpop.eup %11380  ;;  %v9671_v9 = vmul.f32 -1.442695, %v5540_v36  ;;  %v5654_v51 = vand.u32 2147483647, %v14120_v31  ;;  %v5656_v29 = vand.u32 2147483648, %v14120_v31 }
 0x603   :  { %v5571_v1 = vadd.f32 %v11373_v46, %v5570_v39  ;;  %v5647_v18 = vsub.f32 1.0, %v5646_v41  ;;  %v14165_v59 = vadd.f32 1.0, %v11381_v63  ;;  %11384 = vpow2.f32 %v9674_v60  ;;  %v10768_v16 = vld [vmem:[#allocation10 + $0x24] sm:$0xf] }
 0x604   :  { %v5609_v52 = vadd.f32 %v11375_v21, %v5608_v28  ;;  %v14178_v6 = vadd.f32 %v14122_v17, %v5633_v57  ;;  %vm5636_vm3 = vweird.f32 %v14122_v17  ;;  %vm5683_vm5 = vweird.f32 %v14143_v33 }
 0x605   :  { %v5575_v42 = vsel %vm5574_vm15, %v11373_v46, %v5571_v1  ;;  %v14167_v35 = vpop.eup %11382  ;;  %v9712_v46 = vld [vmem:[#allocation10 + $0x50] sm:$0xf0]  ;;  %11386 = vrcp.f32 %v14165_v59  ;;  %v5687_v25 = vand.u32 2147483647, %v14143_v33  ;;  %vm5651_vm6 = vweird.f32 %v14148_v53  ;;  %v10769_v1 = vld [vmem:[#allocation10 + $0x2c] sm:$0xf] }
 0x606   :  { %v5580_v4 = vsel %vm5577_vm0, %v5579_v14, %v5575_v42  ;;  %v5613_v37 = vsel %vm5612_vm1, %v11375_v21, %v5609_v52  ;;  %v5679_v30 = vmul.f32 %v14167_v35, %v14143_v33  ;;  %v10773_v21 = vld [vmem:[#allocation10 + $0x4c] sm:$0xf]  ;;  %11388 = vpow2.f32 %v9671_v9 }
 0x607   :  { %v5618_v62 = vsel %vm5615_vm2, %v5617_v34, %v5613_v37  ;;  %v5663_v11 = vmul.f32 %v11379_v19, %v5580_v4  ;;  %v9673_v2 = vmul.f32 -1.442695, %v5541_v22  ;;  %vm5635_vm7 = vweird.f32 %v14094_v58  ;;  %v9704_v34 = vld [vmem:[#allocation10 + $0x38] sm:$0xf0]  ;;  %v5519_v37 = vpop.f32.mrf.mxu2  ;;  %v10764_v22 = vld [vmem:[#allocation10 + $0x4] sm:$0xf] }
 0x608   :  { %v5661_v13 = vmul.f32 %v5618_v62, %v13766_v12  ;;  %v9720_v12 = vld [vmem:[#allocation10 + $0x58] sm:$0xf0]  ;;  %v5680_v49 = vsub.f32 1.0, %v5679_v30  ;;  %v5648_v44 = vmul.f32 %v14148_v53, %v5647_v18  ;;  %vm5684_vm8 = vweird.f32 %v14167_v35  ;;  %v9678_v62 = vld [vmem:[#allocation10] sm:$0xf]  ;;  %vm14239_vm4 = vmor %vm5635_vm7, %vm5636_vm3 }
 0x609   :  { %v5689_v26 = vand.u32 2147483648, %v14143_v33  ;;  %11390 = vtanh.f32 %v5538_v61  ;;  %v5543_v8 = vadd.f32 %v5533_v47, %v5019_v48  ;;  %v9715_v28 = vor.u32 %v10772_v50, %v9712_v46  ;;  %v11385_v41 = vpop.eup %11384  ;;  %vm14208_vm10 = vmor %vm5683_vm5, %vm5684_vm8 }
 0x60a   :  { %v14181_v43 = vadd.f32 %v5663_v11, %v5661_v13  ;;  %v5681_v39 = vmul.f32 %v14167_v35, %v5680_v49  ;;  %11392 = vpow2.f32 %v9673_v2  ;;  %vm14193_vm9 = vcmp.eq.f32.partialorder %v5687_v25, 8.507059e+37  ;;  %v10766_v11 = vld [vmem:[#allocation10 + $0xc] sm:$0xf0] }
 0x60b   :  { %v9719_v19 = vor.u32 %v10775_v38, %v9718_v0  ;;  %v9723_v14 = vor.u32 %v10773_v21, %v9720_v12  ;;  %v9695_v52 = vor.u32 %v10770_v5, %v9694_v40  ;;  %v14197_v3 = vpop.eup %11386  ;;  %v14200_v42 = vadd.f32 1.0, %v11385_v41  ;;  %6047 = vmatpush.bf16.msra.mxu1 %v9715_v28  ;;  %v9680_v21 = vld [vmem:[#allocation10 + $0x10] sm:$0xf0]  ;;  %v9686_v40 = vld [vmem:[#allocation10 + $0x8] sm:$0xf] }
 0x60c   :  { %v5682_v57 = vadd.f32 %v14167_v35, %v5681_v39  ;;  %v9675_v36 = vmul.f32 -1.442695, %v5543_v8  ;;  %v9699_v48 = vor.u32 %v10768_v16, %v9696_v23  ;;  %v5717_v7 = vmul.f32 %v14197_v3, %v14165_v59  ;;  %v11389_v18 = vpop.eup %11388  ;;  %v10767_v5 = vld [vmem:[#allocation10 + $0x14] sm:$0xf0]  ;;  %v10765_v16 = vld [vmem:[#allocation10 + $0xc] sm:$0xf] }
 0x60d   :  { %v5690_v4 = vor.u32 1.1754944e-38, %v5689_v26  ;;  %6061 = vmatpush.bf16.msrb.mxu2 %v9719_v19  ;;  %6075 = vmatpush.bf16.msrb.mxu3 %v9723_v14  ;;  %v9703_v61 = vor.u32 %v10771_v54, %v9702_v20  ;;  %v9707_v60 = vor.u32 %v10769_v1, %v9704_v34  ;;  %v14213_v13 = vadd.f32 %v14148_v53, %v5648_v44  ;;  %v9688_v44 = vld [vmem:[#allocation10 + $0x18] sm:$0xf0]  ;;  %v9918_v26 = vld [vmem:[#allocation11 + $0xe0] sm:$0xf] }
 0x60e   :  { %v5727_v9 = vand.u32 2147483648, %v14165_v59  ;;  %v5686_v33 = vsel %vm14208_vm10, %v14167_v35, %v5682_v57  ;;  %11394 = vrcp.f32 %v14200_v42  ;;  %6034 = vmatpush.bf16.msra.mxu0 %v9695_v52  ;;  %v5718_v46 = vsub.f32 1.0, %v5717_v7  ;;  %v10826_v20 = vld [vmem:[#allocation11 + $0xec] sm:$0xf0]  ;;  %v10824_v39 = vld [vmem:[#allocation11 + $0xe4] sm:$0xf] }
 0x60f   :  { %v11391_v50 = vpop.eup %11390  ;;  %v5691_v30 = vsel %vm14193_vm9, %v5690_v4, %v5686_v33  ;;  %v5725_v0 = vand.u32 2147483647, %v14165_v59  ;;  %v14223_v38 = vadd.f32 1.0, %v11389_v18  ;;  %v5542_v35 = vadd.f32 %v5519_v37, %v5018_v32  ;;  %6048 = vmatpush.bf16.msra.mxu1 %v9699_v48  ;;  %v9920_v54 = vld [vmem:[#allocation11 + $0xf0] sm:$0xf0] }
 0x610   :  { %v11393_v12 = vpop.eup %11392  ;;  %v14225_v25 = vmul.f32 %v11391_v50, %v5691_v30  ;;  %11396 = vpow2.f32 %v9675_v36  ;;  %v9679_v47 = vor.u32 %v10766_v11, %v9678_v62  ;;  %v5719_v49 = vmul.f32 %v14197_v3, %v5718_v46  ;;  %v9926_v1 = vld [vmem:[#allocation11 + $0xe8] sm:$0xf]  ;;  %v10827_v19 = vld [vmem:[#allocation11 + $0xf4] sm:$0xf0]  ;;  %v10825_v14 = vld [vmem:[#allocation11 + $0xec] sm:$0xf] }
 0x611   :  { %vm5722_vm11 = vweird.f32 %v14197_v3  ;;  %11398 = vrcp.f32 %v14223_v38  ;;  %v14232_v2 = vadd.f32 1.0, %v11393_v12  ;;  %6062 = vmatpush.bf16.msrb.mxu2 %v9703_v61  ;;  %6076 = vmatpush.bf16.msrb.mxu3 %v9707_v60  ;;  %vm5650_vm12 = vweird.f32 %v14120_v31  ;;  %v9928_v36 = vld [vmem:[#allocation11 + $0xf8] sm:$0xf0]  ;;  %v9902_v61 = vld [vmem:[#allocation11 + $0xc0] sm:$0xf] }
 0x612   :  { %11400 = vtanh.f32 %v14140_v56  ;;  %v14246_v32 = vor.u32 1.1754944e-38, %v5656_v29  ;;  %6035 = vmatpush.bf16.msra.mxu0 %v9679_v47  ;;  %v9683_v23 = vor.u32 %v10764_v22, %v9680_v21  ;;  %v5638_v8 = vsel %vm14239_vm4, %v14122_v17, %v14178_v6  ;;  %vm14254_vm13 = vmor %vm5650_vm12, %vm5651_vm6  ;;  %v10822_v60 = vld [vmem:[#allocation11 + $0xcc] sm:$0xf0]  ;;  %v10820_v33 = vld [vmem:[#allocation11 + $0xc4] sm:$0xf] }
 0x613   :  { %vm5721_vm14 = vweird.f32 %v14165_v59  ;;  %v5720_v29 = vadd.f32 %v14197_v3, %v5719_v49  ;;  %11402 = vrcp.f32 %v14232_v2  ;;  %v5653_v41 = vsel %vm14254_vm13, %v14148_v53, %v14213_v13  ;;  %v9904_v22 = vld [vmem:[#allocation11 + $0xd0] sm:$0xf0]  ;;  %v9910_v21 = vld [vmem:[#allocation11 + $0xc8] sm:$0xf]  ;;  %v10823_v12 = vld [vmem:[#allocation11 + $0xd4] sm:$0xf0] }
 0x614   :  { %v14261_v34 = vpop.eup %11394  ;;  %11404 = vtanh.f32 %v14181_v43  ;;  %vm5723_vm15 = vmor %vm5721_vm14, %vm5722_vm11  ;;  %v5728_v27 = vor.u32 1.1754944e-38, %v5727_v9  ;;  %6049 = vmatpush.bf16.msra.mxu1 %v9683_v23  ;;  %v9687_v59 = vor.u32 %v10767_v5, %v9686_v40  ;;  %vm5726_vm0 = vcmp.eq.f32.partialorder %v5725_v0, 8.507059e+37  ;;  %v9912_v47 = vld [vmem:[#allocation11 + $0xd8] sm:$0xf0]  ;;  %v14301_v23 = vld [vmem:[#allocation11 + $0xa4] sm:$0xf] }
 0x615   :  { %v5724_v52 = vsel %vm5723_vm15, %v14197_v3, %v5720_v29  ;;  %v5702_v57 = vand.u32 2147483647, %v14223_v38  ;;  %11406 = vtanh.f32 %v5542_v35  ;;  %v5704_v63 = vand.u32 2147483648, %v14223_v38  ;;  %v10821_v35 = vld [vmem:[#allocation11 + $0xcc] sm:$0xf] }
 0x616   :  { %v11397_v48 = vpop.eup %11396  ;;  %v5729_v7 = vsel %vm5726_vm0, %v5728_v27, %v5724_v52  ;;  %6063 = vmatpush.bf16.msrb.mxu2 %v9687_v59  ;;  %v9691_v4 = vor.u32 %v10765_v16, %v9688_v44  ;;  %v9919_v37 = vor.u32 %v10826_v20, %v9918_v26  ;;  %v14278_v3 = vmul.f32 %v14261_v34, %v14200_v42  ;;  %v9886_v44 = vld [vmem:[#allocation11 + $0xa0] sm:$0xf]  ;;  %v10818_v26 = vld [vmem:[#allocation11 + $0xac] sm:$0xf0]  ;;  %v14303_v20 = vld [vmem:[#allocation11 + $0xb0] sm:$0xf0] }
 0x617   :  { %v14273_v62 = vpop.eup %11398  ;;  %v5786_v11 = vmul.f32 %v5729_v7, %v13882_v24  ;;  %v14280_v18 = vadd.f32 1.0, %v11397_v48  ;;  %v9923_v9 = vor.u32 %v10824_v39, %v9920_v54  ;;  %v5765_v46 = vand.u32 2147483647, %v14200_v42  ;;  %v9894_v54 = vld [vmem:[#allocation11 + $0xa8] sm:$0xf] }
 0x618   :  { %v14282_v50 = vpop.eup %11400  ;;  %v5694_v30 = vmul.f32 %v14273_v62, %v14223_v38  ;;  %6077 = vmatpush.bf16.msrb.mxu3 %v9691_v4  ;;  %6290 = vmatpush.bf16.msrb.mxu0 %v9919_v37  ;;  %v9927_v0 = vor.u32 %v10827_v19, %v9926_v1  ;;  %v9931_v24 = vor.u32 %v10825_v14, %v9928_v36  ;;  %vm14291_vm1 = vcmp.eq.f32.partialorder %v5639_v55, 8.507059e+37  ;;  %v10819_v1 = vld [vmem:[#allocation11 + $0xb4] sm:$0xf0]  ;;  %v10817_v27 = vld [vmem:[#allocation11 + $0xac] sm:$0xf] }
 0x619   :  { %v14287_v40 = vpop.eup %11402  ;;  %v14296_v49 = vadd.f32 %v14225_v25, %v5786_v11  ;;  %v5742_v16 = vand.u32 2147483648, %v14232_v2  ;;  %vm5698_vm2 = vweird.f32 %v14223_v38  ;;  %11408 = vrcp.f32 %v14280_v18  ;;  %6304 = vmatpush.bf16.msrb.mxu1 %v9923_v9  ;;  %v9896_v31 = vld [vmem:[#allocation11 + $0xb8] sm:$0xf0]  ;;  %v14322_v36 = vld [vmem:[#allocation11 + $0x80] sm:$0xf] }
 0x61a   :  { %v14305_v58 = vpop.eup %11404  ;;  %vm14309_vm3 = vcmp.eq.f32.partialorder %v5654_v51, 8.507059e+37  ;;  %v5695_v25 = vsub.f32 1.0, %v5694_v30  ;;  %v5732_v39 = vmul.f32 %v14287_v40, %v14232_v2  ;;  %vm5736_vm5 = vweird.f32 %v14232_v2  ;;  %6318 = vmatpush.bf16.msra.mxu2 %v9927_v0  ;;  %v10814_v4 = vld [vmem:[#allocation11 + $0x8c] sm:$0xf0]  ;;  %v14326_v37 = vld [vmem:[#allocation11 + $0x84] sm:$0xf] }
 0x61b   :  { %vm14316_vm6 = vcmp.eq.f32.partialorder %v5702_v57, 8.507059e+37  ;;  %v11407_v51 = vpop.eup %11406  ;;  %v5758_v59 = vsub.f32 1.0, %v14278_v3  ;;  %v5705_v19 = vor.u32 1.1754944e-38, %v5704_v63  ;;  %v5740_v14 = vand.u32 2147483647, %v14232_v2 }
 0x61c   :  { %6332 = vmatpush.bf16.msra.mxu3 %v9931_v24  ;;  %v9903_v52 = vor.u32 %v10822_v60, %v9902_v61  ;;  %v5733_v48 = vsub.f32 1.0, %v5732_v39  ;;  %v5696_v57 = vmul.f32 %v14273_v62, %v5695_v25  ;;  %vm5699_vm7 = vweird.f32 %v14273_v62  ;;  %v9872_v9 = vld [vmem:[#allocation11 + $0x90] sm:$0xf0]  ;;  %v14329_v30 = vld [vmem:[#allocation11 + $0x88] sm:$0xf] }
 0x61d   :  { %v9907_v7 = vor.u32 %v10820_v33, %v9904_v22  ;;  %vm5737_vm8 = vweird.f32 %v14287_v40  ;;  %v5743_v11 = vor.u32 1.1754944e-38, %v5742_v16  ;;  %v9911_v3 = vor.u32 %v10823_v12, %v9910_v21  ;;  %v10815_v22 = vld [vmem:[#allocation11 + $0x94] sm:$0xf0]  ;;  %v10813_v24 = vld [vmem:[#allocation11 + $0x8c] sm:$0xf]  ;;  %vm5700_vm9 = vmor %vm5698_vm2, %vm5699_vm7 }
 0x61e   :  { %6291 = vmatpush.bf16.msrb.mxu0 %v9903_v52  ;;  %v9915_v63 = vor.u32 %v10821_v35, %v9912_v47  ;;  %v5734_v61 = vmul.f32 %v14287_v40, %v5733_v48  ;;  %v5697_v60 = vadd.f32 %v14273_v62, %v5696_v57  ;;  %v9887_v0 = vor.u32 %v10818_v26, %v9886_v44  ;;  %v9880_v25 = vld [vmem:[#allocation11 + $0x98] sm:$0xf0]  ;;  %vm5738_vm12 = vmor %vm5736_vm5, %vm5737_vm8  ;;  %v10810_v29 = vld [vmem:[#allocation11 + $0x6c] sm:$0xf0] }
 0x61f   :  { %6305 = vmatpush.bf16.msrb.mxu1 %v9907_v7  ;;  %v9891_v33 = vor.u32 %v14301_v23, %v14303_v20  ;;  %v14335_v39 = vpop.eup %11408  ;;  %v5759_v21 = vmul.f32 %v14261_v34, %v5758_v59  ;;  %vm14342_vm10 = vcmp.eq.f32.partialorder %v5740_v14, 8.507059e+37  ;;  %6319 = vmatpush.bf16.msra.mxu2 %v9911_v3  ;;  %v9895_v35 = vor.u32 %v10819_v1, %v9894_v54  ;;  %v9854_v1 = vld [vmem:[#allocation11 + $0x60] sm:$0xf]  ;;  %v9856_v6 = vld [vmem:[#allocation11 + $0x70] sm:$0xf0] }
 0x620   :  { %6333 = vmatpush.bf16.msra.mxu3 %v9915_v63  ;;  %v9899_v47 = vor.u32 %v10817_v27, %v9896_v31  ;;  %vm5761_vm11 = vweird.f32 %v14200_v42  ;;  %v5701_v16 = vsel %vm5700_vm9, %v14273_v62, %v5697_v60  ;;  %v5735_v44 = vadd.f32 %v14287_v40, %v5734_v61  ;;  %v10811_v28 = vld [vmem:[#allocation11 + $0x74] sm:$0xf0]  ;;  %v9838_v48 = vld [vmem:[#allocation11 + $0x40] sm:$0xf]  ;;  %v10806_v57 = vld [vmem:[#allocation11 + $0x4c] sm:$0xf0] }
 0x621   :  { %v5772_v26 = vmul.f32 %v14335_v39, %v14280_v18  ;;  %v9871_v38 = vor.u32 %v10814_v4, %v14322_v36  ;;  %v5706_v23 = vsel %vm14316_vm6, %v5705_v19, %v5701_v16  ;;  %v9875_v20 = vor.u32 %v14326_v37, %v9872_v9  ;;  %v10808_v19 = vld [vmem:[#allocation11 + $0x64] sm:$0xf]  ;;  %v9864_v36 = vld [vmem:[#allocation11 + $0x78] sm:$0xf0]  ;;  %v9846_v3 = vld [vmem:[#allocation11 + $0x48] sm:$0xf] }
 0x622   :  { %6292 = vmatpush.bf16.msrb.mxu0 %v9887_v0  ;;  %v9879_v62 = vor.u32 %v10815_v22, %v14329_v30  ;;  %v9883_v54 = vor.u32 %v10813_v24, %v9880_v25  ;;  %v5739_v27 = vsel %vm5738_vm12, %v14287_v40, %v5735_v44  ;;  %v5789_v31 = vmul.f32 %v11407_v51, %v5706_v23  ;;  %v10809_v51 = vld [vmem:[#allocation11 + $0x6c] sm:$0xf]  ;;  %v10807_v63 = vld [vmem:[#allocation11 + $0x54] sm:$0xf0]  ;;  %v9848_v0 = vld [vmem:[#allocation11 + $0x58] sm:$0xf0] }
 0x623   :  { %v5773_v59 = vsub.f32 1.0, %v5772_v26  ;;  %6306 = vmatpush.bf16.msrb.mxu1 %v9891_v33  ;;  %v5643_v2 = vsel %vm14291_vm1, %v14137_v10, %v5638_v8  ;;  %v5767_v14 = vand.u32 2147483648, %v14200_v42  ;;  %v5744_v52 = vsel %vm14342_vm10, %v5743_v11, %v5739_v27  ;;  %6320 = vmatpush.bf16.msra.mxu2 %v9895_v35  ;;  %v9840_v11 = vld [vmem:[#allocation11 + $0x50] sm:$0xf0]  ;;  %v10805_v60 = vld [vmem:[#allocation11 + $0x4c] sm:$0xf] }
 0x624   :  { %6334 = vmatpush.bf16.msra.mxu3 %v9899_v47  ;;  %v5658_v17 = vsel %vm14309_vm3, %v14246_v32, %v5653_v41  ;;  %v5668_v10 = vmul.f32 %v14282_v50, %v5643_v2  ;;  %vm5762_vm4 = vweird.f32 %v14261_v34  ;;  %v5787_v8 = vmul.f32 %v5744_v52, %v14034_v45  ;;  %v9822_v25 = vld [vmem:[#allocation11 + $0x20] sm:$0xf]  ;;  %v10802_v44 = vld [vmem:[#allocation11 + $0x2c] sm:$0xf0]  ;;  %v10800_v26 = vld [vmem:[#allocation11 + $0x24] sm:$0xf] }
 0x625   :  { %v5774_v40 = vmul.f32 %v14335_v39, %v5773_v59  ;;  %v5669_v5 = vmul.f32 %v14305_v58, %v5658_v17  ;;  %11410 = vtanh.f32 %v14296_v49  ;;  %v14387_v53 = vadd.f32 %v14261_v34, %v5759_v21  ;;  %v10804_v58 = vld [vmem:[#allocation11 + $0x44] sm:$0xf]  ;;  %vm14399_vm14 = vmor %vm5761_vm11, %vm5762_vm4  ;;  %v10801_v27 = vld [vmem:[#allocation11 + $0x2c] sm:$0xf] }
 0x626   :  { %6293 = vmatpush.bf16.msrb.mxu0 %v9871_v38  ;;  %v5796_v13 = vpack.c.bf16 %v5668_v10, %v5668_v10  ;;  %v9855_v32 = vor.u32 %v10810_v29, %v9854_v1  ;;  %v14389_v41 = vadd.f32 %v5789_v31, %v5787_v8  ;;  %v9859_v55 = vor.u32 %v10808_v19, %v9856_v6  ;;  %v9832_v31 = vld [vmem:[#allocation11 + $0x38] sm:$0xf0]  ;;  %v9806_v19 = vld [vmem:[#allocation11] sm:$0xf]  ;;  %v9808_v6 = vld [vmem:[#allocation11 + $0x10] sm:$0xf0] }
 0x627   :  { %6307 = vmatpush.bf16.msrb.mxu1 %v9875_v20  ;;  %v5797_v50 = vpack.c.bf16 %v5669_v5, %v5669_v5  ;;  %v10977_v45 = vpack.c.bf16 %v5669_v5, %v5668_v10  ;;  %v5775_v7 = vadd.f32 %v14335_v39, %v5774_v40  ;;  %vm5777_vm13 = vweird.f32 %v14335_v39  ;;  %6321 = vmatpush.bf16.msra.mxu2 %v9879_v62  ;;  %v9824_v20 = vld [vmem:[#allocation11 + $0x30] sm:$0xf0]  ;;  %v9830_v62 = vld [vmem:[#allocation11 + $0x28] sm:$0xf]  ;;  %v10796_v10 = vld [vmem:[#allocation11 + $0x4] sm:$0xf] }
 0x628   :  { %6335 = vmatpush.bf16.msra.mxu3 %v9883_v54  ;;  %v9863_v4 = vor.u32 %v10811_v28, %v9862_v15  ;;  %v9867_v37 = vor.u32 %v10809_v51, %v9864_v36  ;;  %11412 = vtanh.f32 %v14389_v41  ;;  %v5782_v9 = vand.u32 2147483648, %v14280_v18  ;;  %v10803_v54 = vld [vmem:[#allocation11 + $0x34] sm:$0xf0]  ;;  %v9814_v15 = vld [vmem:[#allocation11 + $0x8] sm:$0xf] }
 0x629   :  { %10978 = vst [vmem:[#allocation3 + $0x20] sm:$0xff] %v10977_v45   ;;  %v5864_v30 = vunpack.c.l.b16 %v5796_v13  ;;  %v5865_v61 = vunpack.c.l.b16 %v5797_v50  ;;  %v5768_v22 = vor.u32 1.1754944e-38, %v5767_v14  ;;  %vm5776_vm15 = vweird.f32 %v14280_v18  ;;  %v10798_v14 = vld [vmem:[#allocation11 + $0xc] sm:$0xf0]  ;;  %v10799_v40 = vld [vmem:[#allocation11 + $0x14] sm:$0xf0] }
 0x62a   :  { %v5780_v24 = vand.u32 2147483647, %v14280_v18  ;;  %6294 = vmatpush.bf16.msrb.mxu0 %v9855_v32  ;;  %v5764_v21 = vsel %vm14399_vm14, %v14261_v34, %v14387_v53  ;;  %vm14411_vm0 = vmor %vm5776_vm15, %vm5777_vm13  ;;  %v9839_v47 = vor.u32 %v10806_v57, %v9838_v48  ;;  %v9843_v16 = vor.u32 %v10804_v58, %v9840_v11  ;;  %v10797_v5 = vld [vmem:[#allocation11 + $0xc] sm:$0xf]  ;;  %v9816_v28 = vld [vmem:[#allocation11 + $0x18] sm:$0xf0] }
 0x62b   :  { %v5866_v35 = vpack.c.b16 %v5865_v61, %v5864_v30  ;;  %6308 = vmatpush.bf16.msrb.mxu1 %v9859_v55  ;;  %v11411_v18 = vpop.eup %11410  ;;  %v5779_v38 = vsel %vm14411_vm0, %v14335_v39, %v5775_v7  ;;  %6322 = vmatpush.bf16.msra.mxu2 %v9863_v4  ;;  %v9847_v34 = vor.u32 %v10807_v63, %v9846_v3  ;;  %vm5766_vm1 = vcmp.eq.f32.partialorder %v5765_v46, 8.507059e+37  ;;  %v10856_v58 = vld [vmem:[#allocation10 + $0xe4] sm:$0xf]  ;;  %v10060_v7 = vld [vmem:[#allocation10 + $0xf0] sm:$0xf0] }
 0x62c   :  { %6336 = vmatpush.bf16.msra.mxu3 %v9867_v37  ;;  %v9851_v23 = vor.u32 %v10805_v60, %v9848_v0  ;;  %v5783_v1 = vor.u32 1.1754944e-38, %v5782_v9  ;;  %vm5781_vm2 = vcmp.eq.f32.partialorder %v5780_v24, 8.507059e+37  ;;  %v9823_v59 = vor.u32 %v10802_v44, %v9822_v25  ;;  %v10852_v37 = vld [vmem:[#allocation10 + $0xc4] sm:$0xf]  ;;  %v10044_v11 = vld [vmem:[#allocation10 + $0xd0] sm:$0xf0] }
 0x62d   :  { %6036 = vmatmul.bf16.vlgmr.msra.gmra.mxu0 %v5866_v35  ;;  %6050 = vmatmul.bf16.vlgmr.msra.gmra.mxu1 %v5866_v35  ;;  %v5769_v39 = vsel %vm5766_vm1, %v5768_v22, %v5764_v21  ;;  %v9827_v29 = vor.u32 %v10800_v26, %v9824_v20  ;;  %v9831_v42 = vor.u32 %v10803_v54, %v9830_v62  ;;  %v10848_v63 = vld [vmem:[#allocation10 + $0xa4] sm:$0xf]  ;;  %v10028_v9 = vld [vmem:[#allocation10 + $0xb0] sm:$0xf0]  ;;  %v10058_v33 = vld [vmem:[#allocation10 + $0xe0] sm:$0xf] }
 0x62e   :  { %6064 = vmatmul.bf16.vlgmr.msrb.gmra.mxu2 %v5866_v35  ;;  %6078 = vmatmul.bf16.vlgmr.msrb.gmra.mxu3 %v5866_v35  ;;  %v11413_v2 = vpop.eup %11412  ;;  %v5784_v52 = vsel %vm5781_vm2, %v5783_v1, %v5779_v38  ;;  %v5794_v17 = vmul.f32 %v11411_v18, %v5769_v39  ;;  %v9835_v46 = vor.u32 %v10801_v27, %v9832_v31  ;;  %v10844_v61 = vld [vmem:[#allocation10 + $0x84] sm:$0xf]  ;;  %v10012_v60 = vld [vmem:[#allocation10 + $0x90] sm:$0xf0]  ;;  %v10858_v22 = vld [vmem:[#allocation10 + $0xec] sm:$0xf0] }
 0x62f   :  { %6295 = vmatpush.bf16.msrb.mxu0 %v9839_v47  ;;  %6309 = vmatpush.bf16.msrb.mxu1 %v9843_v16  ;;  %v5795_v8 = vmul.f32 %v11413_v2, %v5784_v52  ;;  %v9807_v53 = vor.u32 %v10798_v14, %v9806_v19  ;;  %v9811_v13 = vor.u32 %v10796_v10, %v9808_v6  ;;  %v10066_v24 = vld [vmem:[#allocation10 + $0xe8] sm:$0xf]  ;;  %v10859_v21 = vld [vmem:[#allocation10 + $0xf4] sm:$0xf0]  ;;  %v10857_v12 = vld [vmem:[#allocation10 + $0xec] sm:$0xf] }
 0x630   :  { %6323 = vmatpush.bf16.msra.mxu2 %v9847_v34  ;;  %6337 = vmatpush.bf16.msra.mxu3 %v9851_v23  ;;  %v5798_v32 = vpack.c.bf16 %v5794_v17, %v5794_v17  ;;  %v9815_v50 = vor.u32 %v10799_v40, %v9814_v15  ;;  %v9819_v45 = vor.u32 %v10797_v5, %v9816_v28  ;;  %v10068_v35 = vld [vmem:[#allocation10 + $0xf8] sm:$0xf0]  ;;  %v10840_v44 = vld [vmem:[#allocation10 + $0x64] sm:$0xf]  ;;  %v9996_v26 = vld [vmem:[#allocation10 + $0x70] sm:$0xf0] }
 0x631   :  { %v5799_v51 = vpack.c.bf16 %v5795_v8, %v5795_v8  ;;  %v10982_v36 = vpack.c.bf16 %v5795_v8, %v5794_v17  ;;  %v10063_v4 = vor.u32 %v10856_v58, %v10060_v7  ;;  %v10047_v3 = vor.u32 %v10852_v37, %v10044_v11  ;;  %v10042_v38 = vld [vmem:[#allocation10 + $0xc0] sm:$0xf]  ;;  %v10854_v34 = vld [vmem:[#allocation10 + $0xcc] sm:$0xf0]  ;;  %v10050_v23 = vld [vmem:[#allocation10 + $0xc8] sm:$0xf] }
 0x632   :  { %v6126_v48 = vunpack.c.l.b16 %v5798_v32  ;;  %v10031_v30 = vor.u32 %v10848_v63, %v10028_v9  ;;  %v10015_v0 = vor.u32 %v10844_v61, %v10012_v60  ;;  %v10059_v25 = vor.u32 %v10858_v22, %v10058_v33  ;;  %v10855_v62 = vld [vmem:[#allocation10 + $0xd4] sm:$0xf0]  ;;  %v10853_v54 = vld [vmem:[#allocation10 + $0xcc] sm:$0xf]  ;;  %v10052_v1 = vld [vmem:[#allocation10 + $0xd8] sm:$0xf0] }
 0x633   :  { %6296 = vmatpush.bf16.msrb.mxu0 %v9823_v59  ;;  %6310 = vmatpush.bf16.msrb.mxu1 %v9827_v29  ;;  %10983 = vst [vmem:[#allocation4 + $0x30] sm:$0xff] %v10982_v36   ;;  %v6127_v55 = vunpack.c.l.b16 %v5799_v51  ;;  %v10067_v47 = vor.u32 %v10859_v21, %v10066_v24  ;;  %v10071_v16 = vor.u32 %v10857_v12, %v10068_v35  ;;  %v10836_v59 = vld [vmem:[#allocation10 + $0x44] sm:$0xf]  ;;  %v9980_v39 = vld [vmem:[#allocation10 + $0x50] sm:$0xf0]  ;;  %v15351_v32 = vld [vmem:[#allocation57_spill] sm:$0xff] }
 0x634   :  { %6324 = vmatpush.bf16.msra.mxu2 %v9831_v42  ;;  %6338 = vmatpush.bf16.msra.mxu3 %v9835_v46  ;;  %v9999_v18 = vor.u32 %v10840_v44, %v9996_v26  ;;  %v10043_v20 = vor.u32 %v10854_v34, %v10042_v38  ;;  %v10051_v27 = vor.u32 %v10855_v62, %v10050_v23  ;;  %v15350_v2 = vld [vmem:[#allocation26_spill] sm:$0xff]  ;;  %v10850_v46 = vld [vmem:[#allocation10 + $0xac] sm:$0xf0]  ;;  %v10034_v10 = vld [vmem:[#allocation10 + $0xa8] sm:$0xf] }
 0x635   :  { %v6128_v57 = vpack.c.b16 %v6127_v55, %v6126_v48  ;;  %v10055_v31 = vor.u32 %v10853_v54, %v10052_v1  ;;  %v5810_v29 = vunpack.c.l.bf16 %v15350_v2  ;;  %v5811_v19 = vunpack.c.h.bf16 %v15350_v2  ;;  %v10026_v42 = vld [vmem:[#allocation10 + $0xa0] sm:$0xf]  ;;  %v10851_v40 = vld [vmem:[#allocation10 + $0xb4] sm:$0xf0]  ;;  %v10849_v5 = vld [vmem:[#allocation10 + $0xac] sm:$0xf] }
 0x636   :  { %v9983_v14 = vor.u32 %v10836_v59, %v9980_v39  ;;  %v10027_v8 = vor.u32 %v10850_v46, %v10026_v42  ;;  %v10036_v28 = vld [vmem:[#allocation10 + $0xb8] sm:$0xf0]  ;;  %v10035_v51 = vor.u32 %v10851_v40, %v10034_v10  ;;  %v15352_v55 = vld [vmem:[#allocation27_spill] sm:$0xff]  ;;  %v10832_v63 = vld [vmem:[#allocation10 + $0x24] sm:$0xf]  ;;  %v5812_v54 = vunpack.c.l.bf16 %v15351_v32 }
 0x637   :  { %6297 = vmatpush.bf16.msrb.mxu0 %v9807_v53  ;;  %6311 = vmatpush.bf16.msrb.mxu1 %v9811_v13  ;;  %v10039_v36 = vor.u32 %v10849_v5, %v10036_v28  ;;  %v5814_v48 = vunpack.c.l.bf16 %v15352_v55  ;;  %v9964_v9 = vld [vmem:[#allocation10 + $0x30] sm:$0xf0]  ;;  %v15353_v21 = vld [vmem:[#allocation58_spill] sm:$0xff]  ;;  %v15354_v12 = vld [vmem:[#allocation59_spill] sm:$0xff] }
 0x638   :  { %6325 = vmatpush.bf16.msra.mxu2 %v9815_v50  ;;  %6339 = vmatpush.bf16.msra.mxu3 %v9819_v45  ;;  %v5813_v50 = vunpack.c.h.bf16 %v15351_v32  ;;  %v9967_v60 = vor.u32 %v10832_v63, %v9964_v9  ;;  %v14429_v35 = vpack.c.bf16 %v15354_v12, %v15353_v21  ;;  %v10018_v44 = vld [vmem:[#allocation10 + $0x88] sm:$0xf]  ;;  %v10845_v38 = vld [vmem:[#allocation10 + $0x8c] sm:$0xf]  ;;  %v10020_v34 = vld [vmem:[#allocation10 + $0x98] sm:$0xf0] }
 0x639   :  { %v15355_v23 = vld [vmem:[#allocation37_spill] sm:$0xff]  ;;  %v15357_v59 = vld [vmem:[#allocation67_spill] sm:$0xff]  ;;  %v15358_v39 = vld [vmem:[#allocation68_spill] sm:$0xff]  ;;  %v10023_v40 = vor.u32 %v10845_v38, %v10020_v34 }
 0x63a   :  { %v14442_v2 = vpack.c.bf16 %v15358_v39, %v15357_v59  ;;  %v15359_v10 = vld [vmem:[#allocation36_spill] sm:$0xff]  ;;  %v10843_v5 = vld [vmem:[#allocation10 + $0x74] sm:$0xf0] }
 0x63b   :  { %6852 = vmatpush.bf16.msra.mxu1 %v10063_v4  ;;  %6838 = vmatpush.bf16.msra.mxu0 %v10059_v25  ;;  %v10846_v25 = vld [vmem:[#allocation10 + $0x8c] sm:$0xf0] }
 0x63c   :  { %6866 = vmatpush.bf16.msrb.mxu2 %v10067_v47  ;;  %6880 = vmatpush.bf16.msrb.mxu3 %v10071_v16 }
 0x63d   :  { %6298 = vmatmul.bf16.vlgmr.msrb.gmra.mxu0 %v6128_v57  ;;  %6312 = vmatmul.bf16.vlgmr.msrb.gmra.mxu1 %v6128_v57 }
 0x63e   :  { %6326 = vmatmul.bf16.vlgmr.msra.gmra.mxu2 %v6128_v57  ;;  %6340 = vmatmul.bf16.vlgmr.msra.gmra.mxu3 %v6128_v57  ;;  %v5815_v57 = vunpack.c.h.bf16 %v15352_v55 }
 0x63f   :  { %6853 = vmatpush.bf16.msra.mxu1 %v10047_v3  ;;  %6839 = vmatpush.bf16.msra.mxu0 %v10043_v20  ;;  %v15356_v20 = vld [vmem:[#allocation38_spill] sm:$0xff] }
 0x640   :  { %6867 = vmatpush.bf16.msrb.mxu2 %v10051_v27  ;;  %6881 = vmatpush.bf16.msrb.mxu3 %v10055_v31  ;;  %v14437_v62 = vpack.c.bf16 %v15356_v20, %v15355_v23  ;;  %v10828_v27 = vld [vmem:[#allocation10 + $0x4] sm:$0xf]  ;;  %v9948_v31 = vld [vmem:[#allocation10 + $0x10] sm:$0xf0] }
 0x641   :  { %v9951_v32 = vor.u32 %v10828_v27, %v9948_v31 }
 0x642   :  { %v5826_v55 = vunpack.c.l.bf16 %v14437_v62 }
 0x643   :  { %6854 = vmatpush.bf16.msra.mxu1 %v10031_v30  ;;  %6840 = vmatpush.bf16.msra.mxu0 %v10027_v8 }
 0x644   :  { %6868 = vmatpush.bf16.msrb.mxu2 %v10035_v51  ;;  %6882 = vmatpush.bf16.msrb.mxu3 %v10039_v36 }
 0x647   :  { %6855 = vmatpush.bf16.msra.mxu1 %v10015_v0  ;;  %v10010_v0 = vld [vmem:[#allocation10 + $0x80] sm:$0xf] }
 0x648   :  { %v10011_v16 = vor.u32 %v10846_v25, %v10010_v0  ;;  %6883 = vmatpush.bf16.msrb.mxu3 %v10023_v40 }
 0x64a   :  { %6841 = vmatpush.bf16.msra.mxu0 %v10011_v16 }
 0x64b   :  { %6856 = vmatpush.bf16.msra.mxu1 %v9999_v18  ;;  %v10847_v18 = vld [vmem:[#allocation10 + $0x94] sm:$0xf0] }
 0x64c   :  { %v10019_v8 = vor.u32 %v10847_v18, %v10018_v44 }
 0x64e   :  { %6869 = vmatpush.bf16.msrb.mxu2 %v10019_v8 }
 0x64f   :  { %6857 = vmatpush.bf16.msra.mxu1 %v9983_v14  ;;  %v9994_v14 = vld [vmem:[#allocation10 + $0x60] sm:$0xf] }
 0x653   :  { %6858 = vmatpush.bf16.msra.mxu1 %v9967_v60 }
 0x657   :  { %6859 = vmatpush.bf16.msra.mxu1 %v9951_v32 }
 0x6aa   :  { %v6037_v52 = vpop.f32.mrf.mxu0  ;;  %v6051_v17 = vpop.f32.mrf.mxu1 }
 0x6ab   :  { %v6084_v6 = vadd.f32 %v6037_v52, %v5810_v29  ;;  %v6085_v15 = vadd.f32 %v6051_v17, %v5811_v19  ;;  %v5816_v29 = vunpack.c.l.bf16 %v14429_v35  ;;  %v5817_v19 = vunpack.c.h.bf16 %v14429_v35  ;;  %v10842_v52 = vld [vmem:[#allocation10 + $0x6c] sm:$0xf0]  ;;  %v10002_v17 = vld [vmem:[#allocation10 + $0x68] sm:$0xf] }
 0x6ad   :  { %v9932_v53 = vmul.f32 -1.442695, %v6084_v6  ;;  %v9934_v13 = vmul.f32 -1.442695, %v6085_v15  ;;  %v5822_v6 = vunpack.c.l.bf16 %v15359_v10 }
 0x6af   :  { %11414 = vpow2.f32 %v9932_v53  ;;  %v5823_v53 = vunpack.c.h.bf16 %v15359_v10 }
 0x6b0   :  { %11416 = vpow2.f32 %v9934_v13 }
 0x6b1   :  { %v6079_v45 = vpop.f32.mrf.mxu3  ;;  %v6065_v26 = vpop.f32.mrf.mxu2 }
 0x6b2   :  { %v6087_v58 = vadd.f32 %v6079_v45, %v5813_v50  ;;  %v6039_v7 = vpop.f32.mrf.mxu0  ;;  %v6053_v4 = vpop.f32.mrf.mxu1  ;;  %v6086_v46 = vadd.f32 %v6065_v26, %v5812_v54 }
 0x6b3   :  { %v6088_v37 = vadd.f32 %v6039_v7, %v5814_v48  ;;  %v6089_v11 = vadd.f32 %v6053_v4, %v5815_v57  ;;  %v9995_v48 = vor.u32 %v10842_v52, %v9994_v14  ;;  %v10003_v57 = vor.u32 %v10843_v5, %v10002_v17 }
 0x6b4   :  { %v9936_v3 = vmul.f32 -1.442695, %v6087_v58 }
 0x6b5   :  { %v11415_v30 = vpop.eup %11414  ;;  %v9933_v61 = vmul.f32 -1.442695, %v6088_v37  ;;  %v9935_v24 = vmul.f32 -1.442695, %v6089_v11  ;;  %v15360_v37 = vld [vmem:[#allocation66_spill] sm:$0xff]  ;;  %6842 = vmatpush.bf16.msra.mxu0 %v9995_v48  ;;  %6870 = vmatpush.bf16.msrb.mxu2 %v10003_v57 }
 0x6b6   :  { %v11417_v33 = vpop.eup %11416  ;;  %v14425_v22 = vadd.f32 1.0, %v11415_v30  ;;  %11418 = vpow2.f32 %v9936_v3  ;;  %v5825_v11 = vunpack.c.h.bf16 %v15360_v37  ;;  %v5824_v8 = vunpack.c.l.bf16 %v15360_v37 }
 0x6b7   :  { %v14431_v47 = vadd.f32 1.0, %v11417_v33  ;;  %11420 = vpow2.f32 %v9933_v61 }
 0x6b8   :  { %11422 = vrcp.f32 %v14425_v22  ;;  %v6371_v9 = vand.u32 2147483647, %v14425_v22  ;;  %vm6367_vm3 = vweird.f32 %v14425_v22  ;;  %v6373_v25 = vand.u32 2147483648, %v14425_v22 }
 0x6b9   :  { %11424 = vrcp.f32 %v14431_v47  ;;  %v6081_v1 = vpop.f32.mrf.mxu3  ;;  %v6067_v12 = vpop.f32.mrf.mxu2  ;;  %vm6405_vm6 = vweird.f32 %v14431_v47  ;;  %v6409_v26 = vand.u32 2147483647, %v14431_v47 }
 0x6ba   :  { %11426 = vpow2.f32 %v9935_v24  ;;  %v6299_v15 = vpop.f32.mrf.mxu0  ;;  %v6091_v36 = vadd.f32 %v6081_v1, %v5817_v19  ;;  %v6313_v13 = vpop.f32.mrf.mxu1  ;;  %v6411_v24 = vand.u32 2147483648, %v14431_v47  ;;  %vm6372_vm8 = vcmp.eq.f32.partialorder %v6371_v9, 8.507059e+37 }
 0x6bb   :  { %v6346_v4 = vadd.f32 %v6299_v15, %v5822_v6  ;;  %v6347_v30 = vadd.f32 %v6313_v13, %v5823_v53  ;;  %v6374_v1 = vor.u32 1.1754944e-38, %v6373_v25  ;;  %v6090_v31 = vadd.f32 %v6067_v12, %v5816_v29 }
 0x6bc   :  { %v11419_v42 = vpop.eup %11418  ;;  %v9937_v0 = vmul.f32 -1.442695, %v6091_v36  ;;  %v6412_v54 = vor.u32 1.1754944e-38, %v6411_v24  ;;  %vm6410_vm11 = vcmp.eq.f32.partialorder %v6409_v26, 8.507059e+37  ;;  %v5828_v53 = vunpack.c.l.bf16 %v14442_v2 }
 0x6bd   :  { %v11421_v28 = vpop.eup %11420  ;;  %v14447_v51 = vadd.f32 1.0, %v11419_v42  ;;  %v9938_v16 = vmul.f32 -1.442695, %v6346_v4  ;;  %v9940_v23 = vmul.f32 -1.442695, %v6347_v30 }
 0x6be   :  { %v11423_v50 = vpop.eup %11422  ;;  %v14450_v45 = vadd.f32 1.0, %v11421_v28 }
 0x6bf   :  { %v11425_v58 = vpop.eup %11424  ;;  %v6363_v7 = vmul.f32 %v11423_v50, %v14425_v22  ;;  %11428 = vrcp.f32 %v14447_v51  ;;  %vm6368_vm5 = vweird.f32 %v11423_v50  ;;  %vm6445_vm2 = vweird.f32 %v14447_v51 }
 0x6c0   :  { %v11427_v3 = vpop.eup %11426  ;;  %v6401_v63 = vmul.f32 %v11425_v58, %v14431_v47  ;;  %11430 = vtanh.f32 %v6086_v46  ;;  %vm6406_vm7 = vweird.f32 %v11425_v58  ;;  %vm6369_vm9 = vmor %vm6367_vm3, %vm6368_vm5  ;;  %v5827_v47 = vunpack.c.h.bf16 %v14437_v62 }
 0x6c1   :  { %v6364_v61 = vsub.f32 1.0, %v6363_v7  ;;  %11432 = vrcp.f32 %v14450_v45  ;;  %v14459_v60 = vadd.f32 1.0, %v11427_v3  ;;  %v6341_v18 = vpop.f32.mrf.mxu3  ;;  %vm6407_vm10 = vmor %vm6405_vm6, %vm6406_vm7  ;;  %v6451_v7 = vand.u32 2147483648, %v14447_v51 }
 0x6c2   :  { %v6402_v33 = vsub.f32 1.0, %v6401_v63  ;;  %v6349_v14 = vadd.f32 %v6341_v18, %v5825_v11  ;;  %v6301_v35 = vpop.f32.mrf.mxu0  ;;  %vm6382_vm12 = vweird.f32 %v14450_v45  ;;  %v6315_v4 = vpop.f32.mrf.mxu1 }
 0x6c3   :  { %v6365_v21 = vmul.f32 %v11423_v50, %v6364_v61  ;;  %11434 = vrcp.f32 %v14459_v60  ;;  %v6350_v36 = vadd.f32 %v6301_v35, %v5826_v55  ;;  %v6388_v55 = vand.u32 2147483648, %v14450_v45  ;;  %v6327_v63 = vpop.f32.mrf.mxu2 }
 0x6c4   :  { %v6403_v44 = vmul.f32 %v11425_v58, %v6402_v33  ;;  %11436 = vpow2.f32 %v9937_v0  ;;  %v9942_v28 = vmul.f32 -1.442695, %v6349_v14  ;;  %v6426_v0 = vand.u32 2147483648, %v14459_v60 }
 0x6c5   :  { %v14467_v38 = vpop.eup %11428  ;;  %v6366_v34 = vadd.f32 %v11423_v50, %v6365_v21  ;;  %11438 = vpow2.f32 %v9938_v16  ;;  %v9939_v57 = vmul.f32 -1.442695, %v6350_v36  ;;  %v6386_v33 = vand.u32 2147483647, %v14450_v45  ;;  %v10004_v36 = vld [vmem:[#allocation10 + $0x78] sm:$0xf0] }
 0x6c6   :  { %v11431_v20 = vpop.eup %11430  ;;  %v6404_v27 = vadd.f32 %v11425_v58, %v6403_v44  ;;  %v6441_v19 = vmul.f32 %v14467_v38, %v14447_v51  ;;  %11440 = vpow2.f32 %v9940_v23  ;;  %v6351_v24 = vadd.f32 %v6315_v4, %v5827_v47 }
 0x6c7   :  { %v14474_v59 = vpop.eup %11432  ;;  %v6370_v39 = vsel %vm6369_vm9, %v11423_v50, %v6366_v34  ;;  %11442 = vtanh.f32 %v6090_v31  ;;  %vm6420_vm14 = vweird.f32 %v14459_v60  ;;  %v6424_v12 = vand.u32 2147483647, %v14459_v60 }
 0x6c8   :  { %v6375_v52 = vsel %vm6372_vm8, %v6374_v1, %v6370_v39  ;;  %v6408_v22 = vsel %vm6407_vm10, %v11425_v58, %v6404_v27  ;;  %v6378_v17 = vmul.f32 %v14474_v59, %v14450_v45  ;;  %v6442_v5 = vsub.f32 1.0, %v6441_v19 }
 0x6c9   :  { %v14483_v29 = vpop.eup %11434  ;;  %v6413_v42 = vsel %vm6410_vm11, %v6412_v54, %v6408_v22  ;;  %v6472_v46 = vmul.f32 %v11431_v20, %v6375_v52  ;;  %11444 = vpow2.f32 %v9942_v28  ;;  %v5829_v58 = vunpack.c.h.bf16 %v14442_v2  ;;  %v10841_v28 = vld [vmem:[#allocation10 + $0x6c] sm:$0xf] }
 0x6ca   :  { %v6470_v10 = vmul.f32 %v6413_v42, %v14140_v56  ;;  %v6379_v6 = vsub.f32 1.0, %v6378_v17  ;;  %v6416_v15 = vmul.f32 %v14483_v29, %v14459_v60  ;;  %v11437_v40 = vpop.eup %11436  ;;  %v6443_v11 = vmul.f32 %v14467_v38, %v6442_v5  ;;  %v6343_v5 = vpop.f32.mrf.mxu3 }
 0x6cb   :  { %v11439_v56 = vpop.eup %11438  ;;  %v14496_v48 = vadd.f32 1.0, %v11437_v40  ;;  %vm6421_vm4 = vweird.f32 %v14483_v29  ;;  %vm6383_vm13 = vweird.f32 %v14474_v59  ;;  %v6348_v16 = vadd.f32 %v6327_v63, %v5824_v8  ;;  %v10188_v63 = vld [vmem:[#allocation11 + $0xf0] sm:$0xf0] }
 0x6cc   :  { %v14493_v13 = vadd.f32 %v6472_v46, %v6470_v10  ;;  %v6417_v32 = vsub.f32 1.0, %v6416_v15  ;;  %v6380_v50 = vmul.f32 %v14474_v59, %v6379_v6  ;;  %v11441_v37 = vpop.eup %11440  ;;  %v14509_v30 = vadd.f32 1.0, %v11439_v56  ;;  %vm14518_vm15 = vmor %vm6382_vm12, %vm6383_vm13 }
 0x6cd   :  { %11446 = vrcp.f32 %v14496_v48  ;;  %v14511_v61 = vadd.f32 1.0, %v11441_v37  ;;  %v11443_v25 = vpop.eup %11442  ;;  %v14525_v26 = vadd.f32 %v14467_v38, %v6443_v11  ;;  %vm6446_vm0 = vweird.f32 %v14467_v38  ;;  %vm14530_vm1 = vmor %vm6420_vm14, %vm6421_vm4 }
 0x6ce   :  { %v6418_v62 = vmul.f32 %v14483_v29, %v6417_v32  ;;  %v6381_v3 = vadd.f32 %v14474_v59, %v6380_v50  ;;  %11448 = vpow2.f32 %v9939_v57  ;;  %v6389_v60 = vor.u32 1.1754944e-38, %v6388_v55  ;;  %vm14547_vm5 = vmor %vm6445_vm2, %vm6446_vm0  ;;  %v10888_v55 = vld [vmem:[#allocation11 + $0xe4] sm:$0xf] }
 0x6cf   :  { %11450 = vrcp.f32 %v14509_v30  ;;  %v11445_v44 = vpop.eup %11444  ;;  %v6466_v23 = vand.u32 2147483648, %v14496_v48  ;;  %v6427_v20 = vor.u32 1.1754944e-38, %v6426_v0  ;;  %vm6387_vm3 = vcmp.eq.f32.partialorder %v6386_v33, 8.507059e+37  ;;  %v10838_v0 = vld [vmem:[#allocation10 + $0x4c] sm:$0xf0] }
 0x6d0   :  { %v6419_v9 = vadd.f32 %v14483_v29, %v6418_v62  ;;  %v6385_v45 = vsel %vm14518_vm15, %v14474_v59, %v6381_v3  ;;  %11452 = vrcp.f32 %v14511_v61  ;;  %v14543_v54 = vadd.f32 1.0, %v11445_v44 }
 0x6d1   :  { %v9941_v1 = vmul.f32 -1.442695, %v6351_v24  ;;  %v6449_v59 = vand.u32 2147483647, %v14447_v51  ;;  %v6390_v39 = vsel %vm6387_vm3, %v6389_v60, %v6385_v45  ;;  %vm6425_vm6 = vcmp.eq.f32.partialorder %v6424_v12, 8.507059e+37 }
 0x6d2   :  { %v6423_v34 = vsel %vm14530_vm1, %v14483_v29, %v6419_v9  ;;  %11454 = vtanh.f32 %v6348_v16  ;;  %v6448_v14 = vsel %vm14547_vm5, %v14467_v38, %v14525_v26  ;;  %v14557_v52 = vor.u32 1.1754944e-38, %v6451_v7  ;;  %v9978_v9 = vld [vmem:[#allocation10 + $0x40] sm:$0xf]  ;;  %v9986_v12 = vld [vmem:[#allocation10 + $0x48] sm:$0xf] }
 0x6d3   :  { %v14545_v27 = vpop.eup %11446  ;;  %11456 = vtanh.f32 %v14493_v13  ;;  %v6428_v22 = vsel %vm6425_vm6, %v6427_v20, %v6423_v34  ;;  %v6464_v35 = vand.u32 2147483647, %v14496_v48  ;;  %v14562_v29 = vor.u32 1.1754944e-38, %v6466_v23  ;;  %v10839_v16 = vld [vmem:[#allocation10 + $0x54] sm:$0xf0] }
 0x6d4   :  { %v11449_v19 = vpop.eup %11448  ;;  %v6537_v42 = vand.u32 2147483648, %v14511_v61  ;;  %11458 = vrcp.f32 %v14543_v54  ;;  %v6473_v47 = vmul.f32 %v11443_v25, %v6390_v39  ;;  %v6471_v15 = vmul.f32 %v6428_v22, %v14181_v43  ;;  %v6329_v39 = vpop.f32.mrf.mxu2  ;;  %v10837_v22 = vld [vmem:[#allocation10 + $0x4c] sm:$0xf]  ;;  %v10092_v26 = vld [vmem:[#allocation11 + $0x30] sm:$0xf0] }
 0x6d5   :  { %v14559_v17 = vpop.eup %11450  ;;  %v14570_v6 = vadd.f32 1.0, %v11449_v19  ;;  %11460 = vpow2.f32 %v9941_v1  ;;  %vm6531_vm7 = vweird.f32 %v14511_v61  ;;  %v6497_v40 = vand.u32 2147483647, %v14509_v30  ;;  %v14666_v45 = vld [vmem:[#allocation10 + $0xc] sm:$0xf] }
 0x6d6   :  { %v14566_v46 = vpop.eup %11452  ;;  %v6489_v10 = vmul.f32 %v14559_v17, %v14509_v30  ;;  %v6499_v50 = vand.u32 2147483648, %v14509_v30  ;;  %v6535_v56 = vand.u32 2147483647, %v14511_v61  ;;  %v14582_v43 = vmul.f32 %v14545_v27, %v14496_v48 }
 0x6d7   :  { %v6527_v8 = vmul.f32 %v14566_v46, %v14511_v61  ;;  %11462 = vrcp.f32 %v14570_v6  ;;  %v6538_v62 = vor.u32 1.1754944e-38, %v6537_v42  ;;  %vm6493_vm8 = vweird.f32 %v14509_v30  ;;  %v9988_v42 = vld [vmem:[#allocation10 + $0x58] sm:$0xf0]  ;;  %v10890_v30 = vld [vmem:[#allocation11 + $0xec] sm:$0xf0] }
 0x6d8   :  { %v6490_v32 = vsub.f32 1.0, %v6489_v10  ;;  %v11455_v57 = vpop.eup %11454  ;;  %vm6494_vm9 = vweird.f32 %v14559_v17  ;;  %v6353_v11 = vadd.f32 %v6343_v5, %v5829_v58  ;;  %v10007_v3 = vor.u32 %v10841_v28, %v10004_v36  ;;  %v10172_v5 = vld [vmem:[#allocation11 + $0xd0] sm:$0xf0] }
 0x6d9   :  { %v6528_v7 = vsub.f32 1.0, %v6527_v8  ;;  %v14585_v4 = vpop.eup %11456  ;;  %v14593_v24 = vadd.f32 %v6473_v47, %v6471_v15  ;;  %vm6532_vm10 = vweird.f32 %v14566_v46  ;;  %vm14597_vm11 = vcmp.eq.f32.partialorder %v6497_v40, 8.507059e+37  ;;  %vm14611_vm4 = vmor %vm6493_vm8, %vm6494_vm9  ;;  %v10884_v40 = vld [vmem:[#allocation11 + $0xc4] sm:$0xf] }
 0x6da   :  { %v6491_v37 = vmul.f32 %v14559_v17, %v6490_v32  ;;  %v14591_v33 = vpop.eup %11458  ;;  %v6500_v18 = vor.u32 1.1754944e-38, %v6499_v50  ;;  %vm14602_vm12 = vcmp.eq.f32.partialorder %v6535_v56, 8.507059e+37  ;;  %v9943_v60 = vmul.f32 -1.442695, %v6353_v11  ;;  %6884 = vmatpush.bf16.msrb.mxu3 %v10007_v3  ;;  %vm14624_vm13 = vmor %vm6531_vm7, %vm6532_vm10  ;;  %v10834_v50 = vld [vmem:[#allocation10 + $0x2c] sm:$0xf0] }
 0x6db   :  { %v6529_v25 = vmul.f32 %v14566_v46, %v6528_v7  ;;  %v11461_v44 = vpop.eup %11460  ;;  %v6457_v34 = vsub.f32 1.0, %v14582_v43  ;;  %v10191_v19 = vor.u32 %v10888_v55, %v10188_v63  ;;  %v9979_v15 = vor.u32 %v10838_v0, %v9978_v9  ;;  %v9970_v56 = vld [vmem:[#allocation10 + $0x28] sm:$0xf]  ;;  %v10835_v43 = vld [vmem:[#allocation10 + $0x34] sm:$0xf0] }
 0x6dc   :  { %v6492_v58 = vadd.f32 %v14559_v17, %v6491_v37  ;;  %v14616_v1 = vadd.f32 1.0, %v11461_v44  ;;  %11464 = vpow2.f32 %v9943_v60  ;;  %v9987_v8 = vor.u32 %v10839_v16, %v9986_v12  ;;  %v14642_v7 = vld [vmem:[#allocation10 + $0x2c] sm:$0xf]  ;;  %v9972_v11 = vld [vmem:[#allocation10 + $0x38] sm:$0xf0] }
 0x6dd   :  { %v6530_v20 = vadd.f32 %v14566_v46, %v6529_v25  ;;  %v14618_v47 = vpop.eup %11462  ;;  %v14638_v36 = vmul.f32 %v14591_v33, %v14543_v54  ;;  %7114 = vmatpush.bf16.msrb.mxu1 %v10191_v19  ;;  %6843 = vmatpush.bf16.msra.mxu0 %v9979_v15  ;;  %v10880_v3 = vld [vmem:[#allocation11 + $0xa4] sm:$0xf]  ;;  %v10156_v63 = vld [vmem:[#allocation11 + $0xb0] sm:$0xf0]  ;;  %vm6460_vm14 = vweird.f32 %v14496_v48  ;;  %vm6461_vm15 = vweird.f32 %v14545_v27  ;;  %v14655_v0 = vld [vmem:[#allocation10 + $0xc] sm:$0xf0] }
 0x6de   :  { %v6496_v10 = vsel %vm14611_vm4, %v14559_v17, %v6492_v58  ;;  %v6504_v32 = vmul.f32 %v14618_v47, %v14570_v6  ;;  %v9962_v17 = vld [vmem:[#allocation10 + $0x20] sm:$0xf]  ;;  %11466 = vrcp.f32 %v14616_v1  ;;  %6871 = vmatpush.bf16.msrb.mxu2 %v9987_v8  ;;  %v6458_v2 = vmul.f32 %v14545_v27, %v6457_v34  ;;  %v14659_v12 = vld [vmem:[#allocation10 + $0x8] sm:$0xf]  ;;  %v10831_v16 = vld [vmem:[#allocation10 + $0x14] sm:$0xf0] }
 0x6df   :  { %v6501_v28 = vsel %vm14597_vm11, %v6500_v18, %v6496_v10  ;;  %v6534_v61 = vsel %vm14624_vm13, %v14566_v46, %v6530_v20  ;;  %v6352_v46 = vadd.f32 %v6329_v39, %v5828_v53  ;;  %11468 = vtanh.f32 %v14593_v24  ;;  %v14668_v60 = vld [vmem:[#allocation10 + $0x18] sm:$0xf0]  ;;  %v14672_v19 = vld [vmem:[#allocation11 + $0x84] sm:$0xf]  ;;  %vm14738_vm7 = vmor %vm6460_vm14, %vm6461_vm15 }
 0x6e0   :  { %v6539_v55 = vsel %vm14602_vm12, %v6538_v62, %v6534_v61  ;;  %v6598_v37 = vmul.f32 %v11455_v57, %v6501_v28  ;;  %v6505_v62 = vsub.f32 1.0, %v6504_v32  ;;  %v14653_v57 = vld [vmem:[#allocation10] sm:$0xf]  ;;  %v6575_v53 = vand.u32 2147483647, %v14543_v54 }
 0x6e1   :  { %v6596_v9 = vmul.f32 %v6539_v55, %v14296_v49  ;;  %v9991_v25 = vor.u32 %v10837_v22, %v9988_v42  ;;  %v10175_v21 = vor.u32 %v10884_v40, %v10172_v5  ;;  %v6568_v58 = vsub.f32 1.0, %v14638_v36  ;;  %v14674_v22 = vld [vmem:[#allocation11 + $0x90] sm:$0xf0]  ;;  %v10186_v42 = vld [vmem:[#allocation11 + $0xe0] sm:$0xf] }
 0x6e2   :  { %v6506_v49 = vmul.f32 %v14618_v47, %v6505_v62  ;;  %v6514_v18 = vand.u32 2147483648, %v14570_v6  ;;  %v11465_v34 = vpop.eup %11464  ;;  %vm6509_vm0 = vweird.f32 %v14618_v47  ;;  %v9963_v23 = vor.u32 %v10834_v50, %v9962_v17  ;;  %v14680_v40 = vld [vmem:[#allocation11 + $0xe8] sm:$0xf]  ;;  %v14682_v5 = vld [vmem:[#allocation11 + $0xf4] sm:$0xf0] }
 0x6e3   :  { %v14661_v44 = vadd.f32 %v6598_v37, %v6596_v9  ;;  %6885 = vmatpush.bf16.msrb.mxu3 %v9991_v25  ;;  %7115 = vmatpush.bf16.msrb.mxu1 %v10175_v21  ;;  %v9971_v20 = vor.u32 %v10835_v43, %v9970_v56  ;;  %v9975_v39 = vor.u32 %v14642_v7, %v9972_v11  ;;  %vm6508_vm1 = vweird.f32 %v14570_v6  ;;  %v10889_v50 = vld [vmem:[#allocation11 + $0xec] sm:$0xf]  ;;  %v10196_v56 = vld [vmem:[#allocation11 + $0xf8] sm:$0xf0]  ;;  %v10170_v11 = vld [vmem:[#allocation11 + $0xc0] sm:$0xf] }
 0x6e4   :  { %v6507_v10 = vadd.f32 %v14618_v47, %v6506_v49  ;;  %v14678_v15 = vadd.f32 1.0, %v11465_v34  ;;  %v10159_v8 = vor.u32 %v10880_v3, %v10156_v63  ;;  %v14684_v28 = vpop.eup %11466  ;;  %vm14688_vm2 = vcmp.eq.f32.partialorder %v6449_v59, 8.507059e+37  ;;  %6844 = vmatpush.bf16.msra.mxu0 %v9963_v23  ;;  %vm14714_vm6 = vmor %vm6508_vm1, %vm6509_vm0  ;;  %v10886_v62 = vld [vmem:[#allocation11 + $0xcc] sm:$0xf0]  ;;  %v14747_v23 = vld [vmem:[#allocation11 + $0x44] sm:$0xf] }
 0x6e5   :  { %v6512_v36 = vand.u32 2147483647, %v14570_v6  ;;  %11470 = vtanh.f32 %v6352_v46  ;;  %6872 = vmatpush.bf16.msrb.mxu2 %v9971_v20  ;;  %v9947_v32 = vor.u32 %v14655_v0, %v14653_v57  ;;  %v9955_v17 = vor.u32 %v10831_v16, %v14659_v12  ;;  %v14696_v43 = vpop.eup %11468  ;;  %v14719_v46 = vld [vmem:[#allocation11 + $0x64] sm:$0xf]  ;;  %v14729_v57 = vld [vmem:[#allocation11 + $0xc8] sm:$0xf] }
 0x6e6   :  { %v14699_v51 = vadd.f32 %v14545_v27, %v6458_v2  ;;  %vm14703_vm3 = vcmp.eq.f32.partialorder %v6464_v35, 8.507059e+37  ;;  %v6577_v7 = vand.u32 2147483648, %v14543_v54  ;;  %v6542_v55 = vmul.f32 %v14684_v28, %v14616_v1  ;;  %v14721_v35 = vld [vmem:[#allocation11 + $0x70] sm:$0xf0]  ;;  %v10887_v12 = vld [vmem:[#allocation11 + $0xd4] sm:$0xf0] }
 0x6e7   :  { %11472 = vrcp.f32 %v14678_v15  ;;  %v6569_v3 = vmul.f32 %v14591_v33, %v6568_v58  ;;  %v6511_v63 = vsel %vm14714_vm6, %v14618_v47, %v6507_v10  ;;  %v6515_v9 = vor.u32 1.1754944e-38, %v6514_v18  ;;  %6886 = vmatpush.bf16.msrb.mxu3 %v9975_v39  ;;  %7116 = vmatpush.bf16.msrb.mxu1 %v10159_v8  ;;  %v10885_v16 = vld [vmem:[#allocation11 + $0xcc] sm:$0xf]  ;;  %v14749_v20 = vld [vmem:[#allocation11 + $0x50] sm:$0xf0] }
 0x6e8   :  { %v9959_v6 = vor.u32 %v14666_v45, %v14668_v60  ;;  %v6543_v0 = vsub.f32 1.0, %v6542_v55  ;;  %v6552_v2 = vand.u32 2147483648, %v14616_v1  ;;  %v10143_v25 = vor.u32 %v14672_v19, %v14674_v22  ;;  %6845 = vmatpush.bf16.msra.mxu0 %v9947_v32  ;;  %v10180_v45 = vld [vmem:[#allocation11 + $0xd8] sm:$0xf0]  ;;  %v10154_v39 = vld [vmem:[#allocation11 + $0xa0] sm:$0xf] }
 0x6e9   :  { %v10187_v21 = vor.u32 %v10890_v30, %v10186_v42  ;;  %vm6513_vm8 = vcmp.eq.f32.partialorder %v6512_v36, 8.507059e+37  ;;  %v6550_v58 = vand.u32 2147483647, %v14616_v1  ;;  %6873 = vmatpush.bf16.msrb.mxu2 %v9955_v17  ;;  %v10195_v49 = vor.u32 %v14682_v5, %v14680_v40  ;;  %v10882_v10 = vld [vmem:[#allocation11 + $0xac] sm:$0xf0] }
 0x6ea   :  { %v10199_v18 = vor.u32 %v10889_v50, %v10196_v56  ;;  %v6544_v60 = vmul.f32 %v14684_v28, %v6543_v0  ;;  %vm6547_vm9 = vweird.f32 %v14684_v28  ;;  %v6516_v34 = vsel %vm6513_vm8, %v6515_v9, %v6511_v63  ;;  %v10162_v8 = vld [vmem:[#allocation11 + $0xa8] sm:$0xf]  ;;  %v10883_v40 = vld [vmem:[#allocation11 + $0xb4] sm:$0xf0]  ;;  %v10881_v55 = vld [vmem:[#allocation11 + $0xac] sm:$0xf] }
 0x6eb   :  { %v10171_v48 = vor.u32 %v10886_v62, %v10170_v11  ;;  %v11471_v19 = vpop.eup %11470  ;;  %v6463_v22 = vsel %vm14738_vm7, %v14545_v27, %v14699_v51  ;;  %v14756_v42 = vadd.f32 %v14591_v33, %v6569_v3  ;;  %vm6546_vm10 = vweird.f32 %v14616_v1  ;;  %6887 = vmatpush.bf16.msrb.mxu3 %v9959_v6  ;;  %7117 = vmatpush.bf16.msrb.mxu1 %v10143_v25  ;;  %v10164_v37 = vld [vmem:[#allocation11 + $0xb8] sm:$0xf0]  ;;  %v10864_v3 = vld [vmem:[#allocation11 + $0x24] sm:$0xf]  ;;  %v10138_v6 = vld [vmem:[#allocation11 + $0x80] sm:$0xf] }
 0x6ec   :  { %7100 = vmatpush.bf16.msrb.mxu0 %v10187_v21  ;;  %v10127_v30 = vor.u32 %v14719_v46, %v14721_v35  ;;  %vm6571_vm11 = vweird.f32 %v14543_v54  ;;  %v6553_v36 = vor.u32 1.1754944e-38, %v6552_v2  ;;  %v6545_v27 = vadd.f32 %v14684_v28, %v6544_v60  ;;  %vm6548_vm12 = vmor %vm6546_vm10, %vm6547_vm9  ;;  %v10878_v62 = vld [vmem:[#allocation11 + $0x8c] sm:$0xf0]  ;;  %v10877_v59 = vld [vmem:[#allocation11 + $0x8c] sm:$0xf] }
 0x6ed   :  { %v14761_v5 = vpop.eup %11472  ;;  %7128 = vmatpush.bf16.msra.mxu2 %v10195_v49  ;;  %v10179_v32 = vor.u32 %v10887_v12, %v14729_v57  ;;  %v10183_v17 = vor.u32 %v10885_v16, %v10180_v45  ;;  %vm6551_vm4 = vcmp.eq.f32.partialorder %v6550_v58, 8.507059e+37  ;;  %v6599_v50 = vmul.f32 %v11471_v19, %v6516_v34  ;;  %v10860_v16 = vld [vmem:[#allocation11 + $0x4] sm:$0xf]  ;;  %v10076_v49 = vld [vmem:[#allocation11 + $0x10] sm:$0xf0] }
 0x6ee   :  { %v6582_v56 = vmul.f32 %v14761_v5, %v14678_v15  ;;  %v10111_v51 = vor.u32 %v14747_v23, %v14749_v20  ;;  %v6549_v46 = vsel %vm6548_vm12, %v14684_v28, %v6545_v27  ;;  %v10155_v35 = vor.u32 %v10882_v10, %v10154_v39  ;;  %v10874_v45 = vld [vmem:[#allocation11 + $0x6c] sm:$0xf0]  ;;  %v10130_v23 = vld [vmem:[#allocation11 + $0x68] sm:$0xf]  ;;  %v10875_v20 = vld [vmem:[#allocation11 + $0x74] sm:$0xf0] }
 0x6ef   :  { %7142 = vmatpush.bf16.msra.mxu3 %v10199_v18  ;;  %v10163_v11 = vor.u32 %v10883_v40, %v10162_v8  ;;  %v6453_v1 = vsel %vm14688_vm2, %v14557_v52, %v6448_v14  ;;  %v6554_v63 = vsel %vm6551_vm4, %v6553_v36, %v6549_v46  ;;  %7118 = vmatpush.bf16.msrb.mxu1 %v10127_v30  ;;  %vm6572_vm13 = vweird.f32 %v14591_v33  ;;  %v10146_v14 = vld [vmem:[#allocation11 + $0x88] sm:$0xf]  ;;  %v10879_v52 = vld [vmem:[#allocation11 + $0x94] sm:$0xf0]  ;;  %v10122_v18 = vld [vmem:[#allocation11 + $0x60] sm:$0xf] }
 0x6f0   :  { %7101 = vmatpush.bf16.msrb.mxu0 %v10171_v48  ;;  %v6583_v9 = vsub.f32 1.0, %v6582_v56  ;;  %v6468_v28 = vsel %vm14703_vm3, %v14562_v29, %v6463_v22  ;;  %v6478_v57 = vmul.f32 %v14585_v4, %v6453_v1  ;;  %v6597_v31 = vmul.f32 %v6554_v63, %v14389_v41  ;;  %v10148_v4 = vld [vmem:[#allocation11 + $0x98] sm:$0xf0]  ;;  %vm14802_vm14 = vmor %vm6571_vm11, %vm6572_vm13  ;;  %v10873_v22 = vld [vmem:[#allocation11 + $0x6c] sm:$0xf] }
 0x6f1   :  { %7129 = vmatpush.bf16.msra.mxu2 %v10179_v32  ;;  %v10167_v38 = vor.u32 %v10881_v55, %v10164_v37  ;;  %v6479_v61 = vmul.f32 %v14696_v43, %v6468_v28  ;;  %11474 = vtanh.f32 %v14661_v44  ;;  %v6592_v29 = vand.u32 2147483648, %v14678_v15  ;;  %v10132_v30 = vld [vmem:[#allocation11 + $0x78] sm:$0xf0]  ;;  %v10114_v46 = vld [vmem:[#allocation11 + $0x48] sm:$0xf]  ;;  %v10906_v1 = vld [vmem:[#allocation13 + $0x30] sm:$0xff] }
 0x6f2   :  { %v6584_v0 = vmul.f32 %v14761_v5, %v6583_v9  ;;  %v6606_v2 = vpack.c.bf16 %v6478_v57, %v6478_v57  ;;  %v14793_v25 = vadd.f32 %v6599_v50, %v6597_v31  ;;  %v10139_v41 = vor.u32 %v10878_v62, %v10138_v6  ;;  %v10870_v50 = vld [vmem:[#allocation11 + $0x4c] sm:$0xf0]  ;;  %v10090_v28 = vld [vmem:[#allocation11 + $0x20] sm:$0xf]  ;;  %v10098_v31 = vld [vmem:[#allocation11 + $0x28] sm:$0xf] }
 0x6f3   :  { %7143 = vmatpush.bf16.msra.mxu3 %v10183_v17  ;;  %v6607_v21 = vpack.c.bf16 %v6479_v61, %v6479_v61  ;;  %v10987_v12 = vpack.c.bf16 %v6479_v61, %v6478_v57  ;;  %vm6587_vm5 = vweird.f32 %v14761_v5  ;;  %7119 = vmatpush.bf16.msrb.mxu1 %v10111_v51  ;;  %v10095_v43 = vor.u32 %v10864_v3, %v10092_v26  ;;  %v10106_v17 = vld [vmem:[#allocation11 + $0x40] sm:$0xf]  ;;  %v10866_v57 = vld [vmem:[#allocation11 + $0x2c] sm:$0xf0]  ;;  %v10865_v26 = vld [vmem:[#allocation11 + $0x2c] sm:$0xf] }
 0x6f4   :  { %7102 = vmatpush.bf16.msrb.mxu0 %v10155_v35  ;;  %v6585_v47 = vadd.f32 %v14761_v5, %v6584_v0  ;;  %v10147_v58 = vor.u32 %v10879_v52, %v10146_v14  ;;  %11476 = vtanh.f32 %v14793_v25  ;;  %v10151_v60 = vor.u32 %v10877_v59, %v10148_v4  ;;  %v10871_v35 = vld [vmem:[#allocation11 + $0x54] sm:$0xf0]  ;;  %v10100_v14 = vld [vmem:[#allocation11 + $0x38] sm:$0xf0]  ;;  %v10901_v39 = vld [vmem:[#allocation13 + $0x8] sm:$0xff] }
 0x6f5   :  { %7130 = vmatpush.bf16.msra.mxu2 %v10163_v11  ;;  %10988 = vst [vmem:[#allocation3 + $0x28] sm:$0xff] %v10987_v12   ;;  %v6674_v34 = vunpack.c.l.b16 %v6606_v2  ;;  %v6675_v48 = vunpack.c.l.b16 %v6607_v21  ;;  %vm6586_vm15 = vweird.f32 %v14678_v15  ;;  %v6590_v19 = vand.u32 2147483647, %v14678_v15  ;;  %v10074_v2 = vld [vmem:[#allocation11] sm:$0xf]  ;;  %v10894_v10 = vld [vmem:[#allocation3 + $0x18] sm:$0xff] }
 0x6f6   :  { %vm14810_vm0 = vcmp.eq.f32.partialorder %v6575_v53, 8.507059e+37  ;;  %vm14816_vm1 = vmor %vm6586_vm15, %vm6587_vm5  ;;  %v6574_v15 = vsel %vm14802_vm14, %v14591_v33, %v14756_v42  ;;  %v10079_v27 = vor.u32 %v10860_v16, %v10076_v49  ;;  %v10123_v32 = vor.u32 %v10874_v45, %v10122_v18  ;;  %v10907_v33 = vld [vmem:[#allocation13 + $0x38] sm:$0xff]  ;;  %v10869_v42 = vld [vmem:[#allocation11 + $0x4c] sm:$0xf] }
 0x6f7   :  { %7144 = vmatpush.bf16.msra.mxu3 %v10167_v38  ;;  %v6676_v40 = vpack.c.b16 %v6675_v48, %v6674_v34  ;;  %v11475_v36 = vpop.eup %11474  ;;  %v6589_v53 = vsel %vm14816_vm1, %v14761_v5, %v6585_v47  ;;  %7120 = vmatpush.bf16.msrb.mxu1 %v10095_v43  ;;  %v6578_v56 = vor.u32 1.1754944e-38, %v6577_v7  ;;  %v6593_v51 = vor.u32 1.1754944e-38, %v6592_v29  ;;  %v10116_v5 = vld [vmem:[#allocation11 + $0x58] sm:$0xf0]  ;;  %v10867_v38 = vld [vmem:[#allocation11 + $0x34] sm:$0xf0] }
 0x6f8   :  { %7103 = vmatpush.bf16.msrb.mxu0 %v10139_v41  ;;  %v10131_v55 = vor.u32 %v10875_v20, %v10130_v23  ;;  %v10135_v37 = vor.u32 %v10873_v22, %v10132_v30  ;;  %vm6591_vm2 = vcmp.eq.f32.partialorder %v6590_v19, 8.507059e+37  ;;  %v10107_v3 = vor.u32 %v10870_v50, %v10106_v17  ;;  %v10905_v29 = vld [vmem:[#allocation13 + $0x28] sm:$0xff]  ;;  %v10862_v41 = vld [vmem:[#allocation11 + $0xc] sm:$0xf0]  ;;  %v10863_v16 = vld [vmem:[#allocation11 + $0x14] sm:$0xf0] }
 0x6f9   :  { %7131 = vmatpush.bf16.msra.mxu2 %v10147_v58  ;;  %6846 = vmatmul.bf16.vlgmr.msra.gmra.mxu0 %v6676_v40  ;;  %v6579_v54 = vsel %vm14810_vm0, %v6578_v56, %v6574_v15  ;;  %v6594_v7 = vsel %vm6591_vm2, %v6593_v51, %v6589_v53  ;;  %v10115_v6 = vor.u32 %v10871_v35, %v10114_v46  ;;  %v10082_v21 = vld [vmem:[#allocation11 + $0x8] sm:$0xf]  ;;  %v10861_v47 = vld [vmem:[#allocation11 + $0xc] sm:$0xf]  ;;  %v10084_v43 = vld [vmem:[#allocation11 + $0x18] sm:$0xf0] }
 0x6fa   :  { %6860 = vmatmul.bf16.vlgmr.msra.gmra.mxu1 %v6676_v40  ;;  %v11477_v11 = vpop.eup %11476  ;;  %6874 = vmatmul.bf16.vlgmr.msrb.gmra.mxu2 %v6676_v40  ;;  %v6604_v63 = vmul.f32 %v11475_v36, %v6579_v54  ;;  %v10119_v62 = vor.u32 %v10869_v42, %v10116_v5  ;;  %v10091_v0 = vor.u32 %v10866_v57, %v10090_v28  ;;  %v10904_v34 = vld [vmem:[#allocation13 + $0x20] sm:$0xff]  ;;  %v10903_v23 = vld [vmem:[#allocation13 + $0x18] sm:$0xff]  ;;  %v10902_v20 = vld [vmem:[#allocation13 + $0x10] sm:$0xff] }
 0x6fb   :  { %7145 = vmatpush.bf16.msra.mxu3 %v10151_v60  ;;  %7121 = vmatpush.bf16.msrb.mxu1 %v10079_v27  ;;  %v6605_v9 = vmul.f32 %v11477_v11, %v6594_v7  ;;  %v10099_v59 = vor.u32 %v10867_v38, %v10098_v31  ;;  %v10103_v4 = vor.u32 %v10865_v26, %v10100_v14  ;;  %v10900_v19 = vld [vmem:[#allocation13] sm:$0xff]  ;;  %v10892_v22 = vld [vmem:[#allocation3 + $0x30] sm:$0xff]  ;;  %v15389_v15 = vld [vmem:[#allocation29_spill] sm:$0xff] }
 0x6fc   :  { %6888 = vmatmul.bf16.vlgmr.msrb.gmra.mxu3 %v6676_v40  ;;  %7104 = vmatpush.bf16.msrb.mxu0 %v10123_v32  ;;  %v6608_v12 = vpack.c.bf16 %v6604_v63, %v6604_v63  ;;  %v10075_v49 = vor.u32 %v10862_v41, %v10074_v2  ;;  %v10083_v18 = vor.u32 %v10863_v16, %v10082_v21  ;;  %v10893_v30 = vld [vmem:[#allocation3] sm:$0xff]  ;;  %v10895_v8 = vld [vmem:[#allocation3 + $0x10] sm:$0xff]  ;;  %v10896_v40 = vld [vmem:[#allocation3 + $0x8] sm:$0xff]  ;;  %v6620_v53 = vunpack.c.l.bf16 %v15389_v15 }
 0x6fd   :  { %7132 = vmatpush.bf16.msra.mxu2 %v10131_v55  ;;  %v10992_v52 = vpack.c.bf16 %v6605_v9, %v6604_v63  ;;  %v6609_v61 = vpack.c.bf16 %v6605_v9, %v6605_v9  ;;  %v10087_v45 = vor.u32 %v10861_v47, %v10084_v43  ;;  %v10897_v36 = vld [vmem:[#allocation3 + $0x20] sm:$0xff]  ;;  %v6621_v27 = vunpack.c.h.bf16 %v15389_v15  ;;  %v15390_v46 = vld [vmem:[#allocation60_spill] sm:$0xff]  ;;  %v15393_v38 = vld [vmem:[#allocation35_spill] sm:$0xff] }
 0x6fe   :  { %v6936_v60 = vunpack.c.l.b16 %v6608_v12  ;;  %v6623_v35 = vunpack.c.h.bf16 %v15390_v46  ;;  %v15391_v42 = vld [vmem:[#allocation32_spill] sm:$0xff]  ;;  %v15392_v31 = vld [vmem:[#allocation34_spill] sm:$0xff]  ;;  %v15396_v12 = vld [vmem:[#allocation33_spill] sm:$0xff] }
 0x6ff   :  { %7146 = vmatpush.bf16.msra.mxu3 %v10135_v37  ;;  %7730 = vmatpush.bf16.msra.mxu1 %v10907_v33  ;;  %10993 = vst [vmem:[#allocation4 + $0x8] sm:$0xff] %v10992_v52   ;;  %v6937_v58 = vunpack.c.l.b16 %v6609_v61  ;;  %v10898_v37 = vld [vmem:[#allocation3 + $0x28] sm:$0xff]  ;;  %v6624_v5 = vunpack.c.l.bf16 %v15391_v42  ;;  %v6625_v11 = vunpack.c.h.bf16 %v15391_v42  ;;  %v14838_v26 = vpack.c.bf16 %v15393_v38, %v15392_v31  ;;  %v15394_v61 = vld [vmem:[#allocation61_spill] sm:$0xff] }
 0x700   :  { %7105 = vmatpush.bf16.msrb.mxu0 %v10107_v3  ;;  %v6632_v16 = vunpack.c.l.bf16 %v15396_v12  ;;  %v6633_v47 = vunpack.c.h.bf16 %v15396_v12 }
 0x701   :  { %7133 = vmatpush.bf16.msra.mxu2 %v10115_v6  ;;  %v6938_v48 = vpack.c.b16 %v6937_v58, %v6936_v60  ;;  %v6636_v43 = vunpack.c.l.bf16 %v14838_v26  ;;  %v15397_v60 = vld [vmem:[#allocation63_spill] sm:$0xff] }
 0x703   :  { %7147 = vmatpush.bf16.msra.mxu3 %v10119_v62  ;;  %7731 = vmatpush.bf16.msra.mxu1 %v10906_v1 }
 0x704   :  { %7106 = vmatpush.bf16.msrb.mxu0 %v10091_v0  ;;  %v15395_v0 = vld [vmem:[#allocation62_spill] sm:$0xff] }
 0x705   :  { %7134 = vmatpush.bf16.msra.mxu2 %v10099_v59 }
 0x707   :  { %7148 = vmatpush.bf16.msra.mxu3 %v10103_v4  ;;  %7732 = vmatpush.bf16.msra.mxu1 %v10905_v29  ;;  %v868_v29 = vpack.c.bf16 %v15395_v0, %v15394_v61  ;;  %v6622_v4 = vunpack.c.l.bf16 %v15390_v46 }
 0x708   :  { %7107 = vmatpush.bf16.msrb.mxu0 %v10075_v49 }
 0x709   :  { %7135 = vmatpush.bf16.msra.mxu2 %v10083_v18  ;;  %v6627_v21 = vunpack.c.h.bf16 %v868_v29  ;;  %v6626_v18 = vunpack.c.l.bf16 %v868_v29 }
 0x70a   :  { %7122 = vmatmul.bf16.vlgmr.msrb.gmra.mxu1 %v6938_v48 }
 0x70b   :  { %7149 = vmatpush.bf16.msra.mxu3 %v10087_v45  ;;  %7733 = vmatpush.bf16.msra.mxu1 %v10904_v34  ;;  %v6634_v34 = vunpack.c.l.bf16 %v15397_v60 }
 0x70c   :  { %7108 = vmatmul.bf16.vlgmr.msrb.gmra.mxu0 %v6938_v48  ;;  %7136 = vmatmul.bf16.vlgmr.msra.gmra.mxu2 %v6938_v48 }
 0x70e   :  { %7150 = vmatmul.bf16.vlgmr.msra.gmra.mxu3 %v6938_v48  ;;  %v6635_v48 = vunpack.c.h.bf16 %v15397_v60 }
 0x70f   :  { %7734 = vmatpush.bf16.msra.mxu1 %v10903_v23 }
 0x713   :  { %7735 = vmatpush.bf16.msra.mxu1 %v10902_v20 }
 0x717   :  { %7736 = vmatpush.bf16.msra.mxu1 %v10901_v39 }
 0x71b   :  { %7737 = vmatpush.bf16.msra.mxu1 %v10900_v19 }
 0x71e   :  { %7738 = vmatmul.bf16.vlgmr.msra.gmra.mxu1 %v10892_v22 }
 0x72e   :  { %7743 = vmatmul.bf16.gmra.mxu1 %v10893_v30 }
 0x73e   :  { %7748 = vmatmul.bf16.gmra.mxu1 %v10894_v10 }
 0x74e   :  { %7753 = vmatmul.bf16.gmra.mxu1 %v10895_v8 }
 0x75e   :  { %7758 = vmatmul.bf16.gmra.mxu1 %v10896_v40 }
 0x76e   :  { %7763 = vmatmul.bf16.gmra.mxu1 %v10897_v36 }
 0x776   :  { %v6847_v32 = vpop.f32.mrf.mxu0 }
 0x777   :  { %v6861_v17 = vpop.f32.mrf.mxu1  ;;  %v6894_v50 = vadd.f32 %v6847_v32, %v6620_v53 }
 0x778   :  { %v6895_v56 = vadd.f32 %v6861_v17, %v6621_v27 }
 0x779   :  { %v10200_v51 = vmul.f32 -1.442695, %v6894_v50 }
 0x77a   :  { %v10202_v55 = vmul.f32 -1.442695, %v6895_v56 }
 0x77b   :  { %11478 = vpow2.f32 %v10200_v51 }
 0x77c   :  { %11480 = vpow2.f32 %v10202_v55 }
 0x77d   :  { %v6875_v1 = vpop.f32.mrf.mxu2 }
 0x77e   :  { %7768 = vmatmul.bf16.gmra.mxu1 %v10898_v37  ;;  %v6849_v7 = vpop.f32.mrf.mxu0  ;;  %v6896_v2 = vadd.f32 %v6875_v1, %v6622_v4  ;;  %v10923_v1 = vld [vmem:[#allocation14 + $0x38] sm:$0xff] }
 0x77f   :  { %v6889_v33 = vpop.f32.mrf.mxu3  ;;  %v6863_v3 = vpop.f32.mrf.mxu1  ;;  %v6898_v63 = vadd.f32 %v6849_v7, %v6624_v5  ;;  %7585 = vmatpush.bf16.msra.mxu0 %v10923_v1 }
 0x780   :  { %v6897_v54 = vadd.f32 %v6889_v33, %v6623_v35  ;;  %v6899_v9 = vadd.f32 %v6863_v3, %v6625_v11 }
 0x781   :  { %v11479_v62 = vpop.eup %11478  ;;  %v10201_v28 = vmul.f32 -1.442695, %v6898_v63 }
 0x782   :  { %v10204_v6 = vmul.f32 -1.442695, %v6897_v54  ;;  %v11481_v57 = vpop.eup %11480  ;;  %v14840_v14 = vadd.f32 1.0, %v11479_v62  ;;  %v10203_v52 = vmul.f32 -1.442695, %v6899_v9 }
 0x783   :  { %v14844_v59 = vadd.f32 1.0, %v11481_v57 }
 0x784   :  { %11482 = vpow2.f32 %v10204_v6  ;;  %v7181_v49 = vand.u32 2147483647, %v14840_v14  ;;  %vm7177_vm3 = vweird.f32 %v14840_v14  ;;  %v7183_v8 = vand.u32 2147483648, %v14840_v14 }
 0x785   :  { %11484 = vpow2.f32 %v10201_v28  ;;  %v6877_v39 = vpop.f32.mrf.mxu2  ;;  %vm7215_vm6 = vweird.f32 %v14844_v59  ;;  %v7221_v10 = vand.u32 2147483648, %v14844_v59  ;;  %v7219_v53 = vand.u32 2147483647, %v14844_v59 }
 0x786   :  { %11486 = vrcp.f32 %v14840_v14  ;;  %vm14867_vm7 = vcmp.eq.f32.partialorder %v7181_v49, 8.507059e+37  ;;  %v6900_v56 = vadd.f32 %v6877_v39, %v6626_v18  ;;  %v7184_v42 = vor.u32 1.1754944e-38, %v7183_v8 }
 0x787   :  { %11488 = vrcp.f32 %v14844_v59  ;;  %v6891_v41 = vpop.f32.mrf.mxu3  ;;  %v7123_v22 = vpop.f32.mrf.mxu1  ;;  %v7222_v33 = vor.u32 1.1754944e-38, %v7221_v10  ;;  %vm14876_vm10 = vcmp.eq.f32.partialorder %v7219_v53, 8.507059e+37 }
 0x788   :  { %11490 = vpow2.f32 %v10203_v52  ;;  %v6901_v19 = vadd.f32 %v6891_v41, %v6627_v21  ;;  %v7157_v51 = vadd.f32 %v7123_v22, %v6633_v47 }
 0x789   :  { %v7109_v45 = vpop.f32.mrf.mxu0  ;;  %11492 = vtanh.f32 %v6896_v2 }
 0x78a   :  { %v11483_v58 = vpop.eup %11482  ;;  %v7156_v27 = vadd.f32 %v7109_v45, %v6632_v16  ;;  %v10205_v46 = vmul.f32 -1.442695, %v6901_v19  ;;  %v10208_v28 = vmul.f32 -1.442695, %v7157_v51 }
 0x78b   :  { %v11485_v23 = vpop.eup %11484  ;;  %v14856_v20 = vadd.f32 1.0, %v11483_v58 }
 0x78c   :  { %v11487_v30 = vpop.eup %11486  ;;  %v14861_v40 = vadd.f32 1.0, %v11485_v23  ;;  %v10206_v7 = vmul.f32 -1.442695, %v7156_v27 }
 0x78d   :  { %v11489_v36 = vpop.eup %11488  ;;  %v7173_v15 = vmul.f32 %v11487_v30, %v14840_v14  ;;  %11494 = vrcp.f32 %v14856_v20  ;;  %v7261_v5 = vand.u32 2147483648, %v14856_v20  ;;  %vm7178_vm8 = vweird.f32 %v11487_v30 }
 0x78e   :  { %v11491_v32 = vpop.eup %11490  ;;  %v7211_v17 = vmul.f32 %v11489_v36, %v14844_v59  ;;  %11496 = vrcp.f32 %v14861_v40  ;;  %vm7216_vm9 = vweird.f32 %v11489_v36  ;;  %v7259_v62 = vand.u32 2147483647, %v14856_v20  ;;  %vm7179_vm11 = vmor %vm7177_vm3, %vm7178_vm8 }
 0x78f   :  { %v7174_v55 = vsub.f32 1.0, %v7173_v15  ;;  %v14872_v37 = vadd.f32 1.0, %v11491_v32  ;;  %v11493_v11 = vpop.eup %11492  ;;  %v14887_v38 = vor.u32 1.1754944e-38, %v7261_v5  ;;  %vm7192_vm12 = vweird.f32 %v14861_v40  ;;  %vm7217_vm4 = vmor %vm7215_vm6, %vm7216_vm9  ;;  %v7137_v27 = vpop.f32.mrf.mxu2 }
 0x790   :  { %v7212_v35 = vsub.f32 1.0, %v7211_v17  ;;  %v7196_v52 = vand.u32 2147483647, %v14861_v40  ;;  %vm7255_vm13 = vweird.f32 %v14856_v20  ;;  %v7198_v58 = vand.u32 2147483648, %v14861_v40 }
 0x791   :  { %v7175_v54 = vmul.f32 %v11487_v30, %v7174_v55  ;;  %11498 = vrcp.f32 %v14872_v37  ;;  %v7151_v63 = vpop.f32.mrf.mxu3  ;;  %v7236_v14 = vand.u32 2147483648, %v14872_v37  ;;  %vm7230_vm5 = vweird.f32 %v14872_v37  ;;  %v7111_v12 = vpop.f32.mrf.mxu0 }
 0x792   :  { %v7213_v3 = vmul.f32 %v11489_v36, %v7212_v35  ;;  %11500 = vtanh.f32 %v6900_v56  ;;  %v7159_v29 = vadd.f32 %v7151_v63, %v6635_v48  ;;  %v7234_v19 = vand.u32 2147483647, %v14872_v37 }
 0x793   :  { %v14880_v9 = vpop.eup %11494  ;;  %v7176_v6 = vadd.f32 %v11487_v30, %v7175_v54  ;;  %11502 = vpow2.f32 %v10205_v46  ;;  %v7237_v51 = vor.u32 1.1754944e-38, %v7236_v14  ;;  %vm7197_vm2 = vcmp.eq.f32.partialorder %v7196_v52, 8.507059e+37 }
 0x794   :  { %v7214_v57 = vadd.f32 %v11489_v36, %v7213_v3  ;;  %v7251_v31 = vmul.f32 %v14880_v9, %v14856_v20  ;;  %v11497_v61 = vpop.eup %11496  ;;  %11504 = vpow2.f32 %v10206_v7  ;;  %vm7256_vm14 = vweird.f32 %v14880_v9  ;;  %v7125_v3 = vpop.f32.mrf.mxu1 }
 0x795   :  { %v7180_v0 = vsel %vm7179_vm11, %v11487_v30, %v7176_v6  ;;  %v7188_v21 = vmul.f32 %v11497_v61, %v14861_v40  ;;  %11506 = vpow2.f32 %v10208_v28  ;;  %v10210_v22 = vmul.f32 -1.442695, %v7159_v29  ;;  %vm14920_vm3 = vmor %vm7255_vm13, %vm7256_vm14  ;;  %v15405_v6 = vld [vmem:[#allocation65_spill] sm:$0xff] }
 0x796   :  { %v7185_v4 = vsel %vm14867_vm7, %v7184_v42, %v7180_v0  ;;  %v7218_v2 = vsel %vm7217_vm4, %v11489_v36, %v7214_v57  ;;  %v7252_v41 = vsub.f32 1.0, %v7251_v31  ;;  %v7160_v30 = vadd.f32 %v7111_v12, %v6636_v43 }
 0x797   :  { %v11499_v16 = vpop.eup %11498  ;;  %v7223_v59 = vsel %vm14876_vm10, %v7222_v33, %v7218_v2  ;;  %v7282_v47 = vmul.f32 %v11493_v11, %v7185_v4  ;;  %v7189_v48 = vsub.f32 1.0, %v7188_v21  ;;  %vm7193_vm15 = vweird.f32 %v11497_v61  ;;  %v10922_v4 = vld [vmem:[#allocation14 + $0x30] sm:$0xff] }
 0x798   :  { %v11501_v49 = vpop.eup %11500  ;;  %v7280_v18 = vmul.f32 %v7223_v59, %v14493_v13  ;;  %v7253_v45 = vmul.f32 %v14880_v9, %v7252_v41  ;;  %v7226_v23 = vmul.f32 %v11499_v16, %v14872_v37  ;;  %11508 = vpow2.f32 %v10210_v22  ;;  %vm7194_vm1 = vmor %vm7192_vm12, %vm7193_vm15  ;;  %7586 = vmatpush.bf16.msra.mxu0 %v10922_v4 }
 0x799   :  { %v11503_v39 = vpop.eup %11502  ;;  %v7190_v36 = vmul.f32 %v11497_v61, %v7189_v48  ;;  %v10207_v32 = vmul.f32 -1.442695, %v7160_v30  ;;  %vm7231_vm0 = vweird.f32 %v11499_v16  ;;  %v7199_v43 = vor.u32 1.1754944e-38, %v7198_v58 }
 0x79a   :  { %v7284_v10 = vadd.f32 %v7282_v47, %v7280_v18  ;;  %v7227_v8 = vsub.f32 1.0, %v7226_v23  ;;  %v11505_v15 = vpop.eup %11504  ;;  %v7254_v13 = vadd.f32 %v14880_v9, %v7253_v45  ;;  %v14911_v53 = vadd.f32 1.0, %v11503_v39  ;;  %vm7232_vm6 = vmor %vm7230_vm5, %vm7231_vm0  ;;  %v10921_v45 = vld [vmem:[#allocation14 + $0x28] sm:$0xff] }
 0x79b   :  { %v7191_v50 = vadd.f32 %v11497_v61, %v7190_v36  ;;  %v11507_v56 = vpop.eup %11506  ;;  %v14924_v33 = vadd.f32 1.0, %v11505_v15  ;;  %v7158_v40 = vadd.f32 %v7137_v27, %v6634_v34  ;;  %vm7235_vm7 = vcmp.eq.f32.partialorder %v7234_v19, 8.507059e+37 }
 0x79c   :  { %11510 = vtanh.f32 %v7284_v10  ;;  %v7228_v17 = vmul.f32 %v11499_v16, %v7227_v8  ;;  %v7258_v42 = vsel %vm14920_vm3, %v14880_v9, %v7254_v13  ;;  %v14933_v11 = vadd.f32 1.0, %v11507_v56  ;;  %v15404_v9 = vld [vmem:[#allocation64_spill] sm:$0xff]  ;;  %7587 = vmatpush.bf16.msra.mxu0 %v10921_v45  ;;  %v7153_v13 = vpop.f32.mrf.mxu3  ;;  %v10920_v56 = vld [vmem:[#allocation14 + $0x20] sm:$0xff] }
 0x79d   :  { %11512 = vrcp.f32 %v14911_v53  ;;  %v7195_v46 = vsel %vm7194_vm1, %v11497_v61, %v7191_v50  ;;  %vm7260_vm8 = vcmp.eq.f32.partialorder %v7259_v62, 8.507059e+37  ;;  %v6637_v37 = vunpack.c.h.bf16 %v14838_v26 }
 0x79e   :  { %v7229_v35 = vadd.f32 %v11499_v16, %v7228_v17  ;;  %v7200_v5 = vsel %vm7197_vm2, %v7199_v43, %v7195_v46  ;;  %11514 = vpow2.f32 %v10207_v32  ;;  %v11509_v60 = vpop.eup %11508  ;;  %v14942_v28 = vpack.c.bf16 %v15405_v6, %v15404_v9 }
 0x79f   :  { %v7283_v7 = vmul.f32 %v11501_v49, %v7200_v5  ;;  %11516 = vrcp.f32 %v14924_v33  ;;  %v7263_v57 = vsel %vm7260_vm8, %v14887_v38, %v7258_v42  ;;  %v7274_v20 = vand.u32 2147483647, %v14911_v53 }
 0x7a0   :  { %v7233_v54 = vsel %vm7232_vm6, %v11499_v16, %v7229_v35  ;;  %11518 = vrcp.f32 %v14933_v11  ;;  %v14949_v62 = vadd.f32 1.0, %v11509_v60  ;;  %v7161_v0 = vadd.f32 %v7125_v3, %v6637_v37  ;;  %7588 = vmatpush.bf16.msra.mxu0 %v10920_v56 }
 0x7a1   :  { %v7238_v34 = vsel %vm7235_vm7, %v7237_v51, %v7233_v54  ;;  %v7276_v29 = vand.u32 2147483648, %v14911_v53  ;;  %11520 = vtanh.f32 %v7158_v40  ;;  %vm7270_vm9 = vweird.f32 %v14911_v53 }
 0x7a2   :  { %v11511_v63 = vpop.eup %11510  ;;  %v7281_v31 = vmul.f32 %v7238_v34, %v14593_v24  ;;  %11522 = vrcp.f32 %v14949_v62  ;;  %v6639_v41 = vunpack.c.h.bf16 %v14942_v28  ;;  %vm14956_vm10 = vcmp.eq.f32.partialorder %v7274_v20, 8.507059e+37  ;;  %v10919_v34 = vld [vmem:[#allocation14 + $0x18] sm:$0xff]  ;;  %v7139_v20 = vpop.f32.mrf.mxu2 }
 0x7a3   :  { %v11513_v52 = vpop.eup %11512  ;;  %v14946_v61 = vmul.f32 %v11511_v63, %v7263_v57  ;;  %v10209_v47 = vmul.f32 -1.442695, %v7161_v0  ;;  %v7277_v49 = vor.u32 1.1754944e-38, %v7276_v29  ;;  %vm7341_vm12 = vweird.f32 %v14933_v11 }
 0x7a4   :  { %v7285_v14 = vadd.f32 %v7283_v7, %v7281_v31  ;;  %v7266_v26 = vmul.f32 %v11513_v52, %v14911_v53  ;;  %v11515_v2 = vpop.eup %11514  ;;  %vm7271_vm11 = vweird.f32 %v11513_v52  ;;  %v7309_v23 = vand.u32 2147483648, %v14924_v33  ;;  %7589 = vmatpush.bf16.msra.mxu0 %v10919_v34  ;;  %v10910_v34 = vld [vmem:[#allocation4 + $0x30] sm:$0xff] }
 0x7a5   :  { %v11517_v24 = vpop.eup %11516  ;;  %v14961_v59 = vadd.f32 1.0, %v11515_v2  ;;  %v7347_v30 = vand.u32 2147483648, %v14933_v11  ;;  %vm7272_vm4 = vmor %vm7270_vm9, %vm7271_vm11  ;;  %v7307_v36 = vand.u32 2147483647, %v14924_v33  ;;  %v7345_v15 = vand.u32 2147483647, %v14933_v11 }
 0x7a6   :  { %11524 = vtanh.f32 %v7285_v14  ;;  %v7267_v38 = vsub.f32 1.0, %v7266_v26  ;;  %v11519_v21 = vpop.eup %11518  ;;  %v7299_v16 = vmul.f32 %v11517_v24, %v14924_v33  ;;  %vm7304_vm13 = vweird.f32 %v11517_v24 }
 0x7a7   :  { %v7337_v18 = vmul.f32 %v11519_v21, %v14933_v11  ;;  %11526 = vrcp.f32 %v14961_v59  ;;  %v11521_v39 = vpop.eup %11520  ;;  %vm7342_vm5 = vweird.f32 %v11519_v21  ;;  %vm7303_vm14 = vweird.f32 %v14924_v33 }
 0x7a8   :  { %v7268_v58 = vmul.f32 %v11513_v52, %v7267_v38  ;;  %v7300_v48 = vsub.f32 1.0, %v7299_v16  ;;  %11528 = vpow2.f32 %v10209_v47  ;;  %v14968_v10 = vpop.eup %11522  ;;  %v7310_v43 = vor.u32 1.1754944e-38, %v7309_v23  ;;  %vm7305_vm15 = vmor %vm7303_vm14, %vm7304_vm13 }
 0x7a9   :  { %v7338_v22 = vsub.f32 1.0, %v7337_v18  ;;  %v7377_v50 = vmul.f32 %v14968_v10, %v14949_v62  ;;  %v7163_v40 = vadd.f32 %v7153_v13, %v6639_v41  ;;  %vm7343_vm0 = vmor %vm7341_vm12, %vm7342_vm5  ;;  %v7348_v5 = vor.u32 1.1754944e-38, %v7347_v30 }
 0x7aa   :  { %v7269_v19 = vadd.f32 %v11513_v52, %v7268_v58  ;;  %v7301_v8 = vmul.f32 %v11517_v24, %v7300_v48  ;;  %vm7308_vm1 = vcmp.eq.f32.partialorder %v7307_v36, 8.507059e+37  ;;  %vm7346_vm2 = vcmp.eq.f32.partialorder %v7345_v15, 8.507059e+37 }
 0x7ab   :  { %v7339_v17 = vmul.f32 %v11519_v21, %v7338_v22  ;;  %v7378_v35 = vsub.f32 1.0, %v7377_v50  ;;  %v10211_v57 = vmul.f32 -1.442695, %v7163_v40  ;;  %vm7382_vm3 = vweird.f32 %v14968_v10 }
 0x7ac   :  { %v11525_v27 = vpop.eup %11524  ;;  %v7273_v32 = vsel %vm7272_vm4, %v11513_v52, %v7269_v19  ;;  %v7302_v53 = vadd.f32 %v11517_v24, %v7301_v8  ;;  %v10918_v52 = vld [vmem:[#allocation14 + $0x10] sm:$0xff]  ;;  %v6638_v14 = vunpack.c.l.bf16 %v14942_v28  ;;  %v7387_v29 = vand.u32 2147483648, %v14949_v62 }
 0x7ad   :  { %v7278_v51 = vsel %vm14956_vm10, %v7277_v49, %v7273_v32  ;;  %v7340_v46 = vadd.f32 %v11519_v21, %v7339_v17  ;;  %v14981_v42 = vpop.eup %11526  ;;  %v7379_v60 = vmul.f32 %v14968_v10, %v7378_v35  ;;  %7590 = vmatpush.bf16.msra.mxu0 %v10918_v52  ;;  %vm7381_vm6 = vweird.f32 %v14949_v62  ;;  %v10916_v49 = vld [vmem:[#allocation14] sm:$0xff] }
 0x7ae   :  { %v7289_v55 = vmul.f32 %v11525_v27, %v7278_v51  ;;  %v7306_v54 = vsel %vm7305_vm15, %v11517_v24, %v7302_v53  ;;  %v11529_v7 = vpop.eup %11528  ;;  %v7314_v9 = vmul.f32 %v14981_v42, %v14961_v59  ;;  %v7385_v4 = vand.u32 2147483647, %v14949_v62  ;;  %vm14997_vm7 = vmor %vm7381_vm6, %vm7382_vm3 }
 0x7af   :  { %v7311_v3 = vsel %vm7308_vm1, %v7310_v43, %v7306_v54  ;;  %v7344_v1 = vsel %vm7343_vm0, %v11519_v21, %v7340_v46  ;;  %v7335_v6 = vadd.f32 1.0, %v11529_v7  ;;  %v7380_v0 = vadd.f32 %v14968_v10, %v7379_v60  ;;  %v10909_v60 = vld [vmem:[#allocation4 + $0x8] sm:$0xff] }
 0x7b0   :  { %v10997_v33 = vpack.c.bf16 %v7289_v55, %v14946_v61  ;;  %v7349_v37 = vsel %vm7346_vm2, %v7348_v5, %v7344_v1  ;;  %v7408_v63 = vmul.f32 %v11521_v39, %v7311_v3  ;;  %v7315_v31 = vsub.f32 1.0, %v7314_v9  ;;  %v10913_v9 = vld [vmem:[#allocation4 + $0x28] sm:$0xff] }
 0x7b1   :  { %v7406_v11 = vmul.f32 %v7349_v37, %v14661_v44  ;;  %11530 = vrcp.f32 %v7335_v6  ;;  %v10917_v44 = vld [vmem:[#allocation14 + $0x8] sm:$0xff]  ;;  %v7162_v2 = vadd.f32 %v7139_v20, %v6638_v14  ;;  %vm7319_vm8 = vweird.f32 %v14981_v42  ;;  %v10911_v37 = vld [vmem:[#allocation4 + $0x10] sm:$0xff] }
 0x7b2   :  { %10998 = vst [vmem:[#allocation3 + $0x38] sm:$0xff] %v10997_v33   ;;  %11532 = vpow2.f32 %v10211_v57  ;;  %v7316_v26 = vmul.f32 %v14981_v42, %v7315_v31  ;;  %v7384_v41 = vsel %vm14997_vm7, %v14968_v10, %v7380_v0  ;;  %v7324_v21 = vand.u32 2147483648, %v14961_v59  ;;  %7591 = vmatpush.bf16.msra.mxu0 %v10917_v44  ;;  %v10915_v31 = vld [vmem:[#allocation4 + $0x38] sm:$0xff] }
 0x7b3   :  { %v7410_v61 = vadd.f32 %v7408_v63, %v7406_v11  ;;  %v7388_v47 = vor.u32 1.1754944e-38, %v7387_v29  ;;  %vm7318_vm9 = vweird.f32 %v14961_v59  ;;  %v7322_v58 = vand.u32 2147483647, %v14961_v59  ;;  %v10912_v63 = vld [vmem:[#allocation4 + $0x18] sm:$0xff]  ;;  %v7739_v11 = vpop.f32.mrf.mxu1 }
 0x7b4   :  { %v7317_v38 = vadd.f32 %v14981_v42, %v7316_v26  ;;  %vm7386_vm10 = vcmp.eq.f32.partialorder %v7385_v4, 8.507059e+37  ;;  %vm15009_vm11 = vmor %vm7318_vm9, %vm7319_vm8  ;;  %v7362_v30 = vand.u32 2147483648, %v7335_v6  ;;  %v7325_v59 = vor.u32 1.1754944e-38, %v7324_v21 }
 0x7b5   :  { %11534 = vtanh.f32 %v7410_v61  ;;  %v7389_v23 = vsel %vm7386_vm10, %v7388_v47, %v7384_v41  ;;  %vm7323_vm4 = vcmp.eq.f32.partialorder %v7322_v58, 8.507059e+37  ;;  %v7360_v8 = vand.u32 2147483647, %v7335_v6  ;;  %v15020_v61 = vld [vmem:[%s15047_s6] ss:$0 sm:$0xff]  ;;  %s11734_s6 = smov [#allocation16]  }
 0x7b6   :  { %11536 = vtanh.f32 %v7162_v2  ;;  %v7321_v19 = vsel %vm15009_vm11, %v14981_v42, %v7317_v38  ;;  %7592 = vmatpush.bf16.msra.mxu0 %v10916_v49  ;;  %vm7356_vm13 = vweird.f32 %v7335_v6  ;;  %v7363_v27 = vor.u32 1.1754944e-38, %v7362_v30  ;;  %s7819_s10 = sshll.u32 %s11734_s6, 4  ;;  %s7820_s10 = int_to_ptr.vmem [resolvable:$true] %s7819_s10 }
 0x7b7   :  { %v11531_v28 = vpop.eup %11530  ;;  %v7326_v36 = vsel %vm7323_vm4, %v7325_v59, %v7321_v19  ;;  %vm7361_vm14 = vcmp.eq.f32.partialorder %v7360_v8, 8.507059e+37 }
 0x7b8   :  { %v11533_v16 = vpop.eup %11532  ;;  %v7352_v62 = vmul.f32 %v11531_v28, %v7335_v6  ;;  %vm7357_vm12 = vweird.f32 %v11531_v28  ;;  %v10914_v6 = vld [vmem:[#allocation4 + $0x20] sm:$0xff] }
 0x7b9   :  { %v10899_v12 = vld [vmem:[#allocation3 + $0x38] sm:$0xff]  ;;  %v7375_v45 = vadd.f32 1.0, %v11533_v16  ;;  %vm7358_vm5 = vmor %vm7356_vm13, %vm7357_vm12 }
 0x7ba   :  { %7773 = vmatmul.bf16.gmra.mxu1 %v10899_v12  ;;  %v7353_v39 = vsub.f32 1.0, %v7352_v62 }
 0x7bb   :  { %v11535_v48 = vpop.eup %11534  ;;  %11538 = vrcp.f32 %v7375_v45  ;;  %v7402_v35 = vand.u32 2147483648, %v7375_v45  ;;  %v7400_v40 = vand.u32 2147483647, %v7375_v45  ;;  %vm7396_vm0 = vweird.f32 %v7375_v45  ;;  %v7741_v57 = vpop.f32.mrf.mxu1 }
 0x7bc   :  { %v7414_v22 = vmul.f32 %v11535_v48, %v7389_v23  ;;  %v7354_v10 = vmul.f32 %v11531_v28, %v7353_v39  ;;  %v11537_v13 = vpop.eup %11536 }
 0x7bd   :  { %v7409_v17 = vmul.f32 %v11537_v13, %v7326_v36  ;;  %v7403_v54 = vor.u32 1.1754944e-38, %v7402_v35  ;;  %vm7401_vm2 = vcmp.eq.f32.partialorder %v7400_v40, 8.507059e+37 }
 0x7be   :  { %v7355_v15 = vadd.f32 %v11531_v28, %v7354_v10 }
 0x7c0   :  { %v7359_v32 = vsel %vm7358_vm5, %v11531_v28, %v7355_v15 }
 0x7c1   :  { %v11539_v50 = vpop.eup %11538  ;;  %v7364_v56 = vsel %vm7361_vm14, %v7363_v27, %v7359_v32 }
 0x7c2   :  { %v7407_v51 = vmul.f32 %v7364_v56, %v14793_v25  ;;  %v7392_v53 = vmul.f32 %v11539_v50, %v7375_v45  ;;  %vm7397_vm15 = vweird.f32 %v11539_v50 }
 0x7c3   :  { %vm7398_vm1 = vmor %vm7396_vm0, %vm7397_vm15  ;;  %v7744_v52 = vpop.f32.mrf.mxu1 }
 0x7c4   :  { %v7411_v43 = vadd.f32 %v7409_v17, %v7407_v51  ;;  %v7393_v55 = vsub.f32 1.0, %v7392_v53 }
 0x7c6   :  { %11540 = vtanh.f32 %v7411_v43  ;;  %v7394_v46 = vmul.f32 %v11539_v50, %v7393_v55 }
 0x7c8   :  { %v7395_v42 = vadd.f32 %v11539_v50, %v7394_v46 }
 0x7ca   :  { %v7399_v5 = vsel %vm7398_vm1, %v11539_v50, %v7395_v42 }
 0x7cb   :  { %v7404_v33 = vsel %vm7401_vm2, %v7403_v54, %v7399_v5  ;;  %v7746_v14 = vpop.f32.mrf.mxu1 }
 0x7cc   :  { %v11541_v7 = vpop.eup %11540 }
 0x7cd   :  { %v7415_v3 = vmul.f32 %v11541_v7, %v7404_v33 }
 0x7cf   :  { %v11002_v1 = vpack.c.bf16 %v7415_v3, %v7414_v22 }
 0x7d1   :  { %11003 = vst [vmem:[#allocation4] sm:$0xff] %v11002_v1  }
 0x7d3   :  { %v7749_v2 = vpop.f32.mrf.mxu1 }
 0x7d8   :  { %v10908_v25 = vld [vmem:[#allocation4] sm:$0xff] }
 0x7d9   :  { %7593 = vmatmul.bf16.vlgmr.msra.gmra.mxu0 %v10908_v25 }
 0x7db   :  { %v7751_v41 = vpop.f32.mrf.mxu1 }
 0x7e3   :  { %v7754_v47 = vpop.f32.mrf.mxu1 }
 0x7e9   :  { %7598 = vmatmul.bf16.gmra.mxu0 %v10909_v60 }
 0x7eb   :  { %v7756_v48 = vpop.f32.mrf.mxu1 }
 0x7f3   :  { %v7759_v30 = vpop.f32.mrf.mxu1 }
 0x7f9   :  { %7603 = vmatmul.bf16.gmra.mxu0 %v10910_v34 }
 0x7fb   :  { %v7761_v36 = vpop.f32.mrf.mxu1 }
 0x803   :  { %v7764_v32 = vpop.f32.mrf.mxu1 }
 0x809   :  { %7608 = vmatmul.bf16.gmra.mxu0 %v10911_v37 }
 0x80b   :  { %v7766_v43 = vpop.f32.mrf.mxu1 }
 0x813   :  { %v7769_v42 = vpop.f32.mrf.mxu1 }
 0x819   :  { %7613 = vmatmul.bf16.gmra.mxu0 %v10912_v63 }
 0x81b   :  { %v7771_v33 = vpop.f32.mrf.mxu1 }
 0x829   :  { %7618 = vmatmul.bf16.gmra.mxu0 %v10913_v9 }
 0x837   :  { %v7774_v60 = vpop.f32.mrf.mxu1 }
 0x839   :  { %7623 = vmatmul.bf16.gmra.mxu0 %v10914_v6 }
 0x83f   :  { %v7776_v9 = vpop.f32.mrf.mxu1 }
 0x849   :  { %7628 = vmatmul.bf16.gmra.mxu0 %v10915_v31 }
 0x856   :  { %v7594_v20 = vpop.f32.mrf.mxu0 }
 0x857   :  { %v7740_v0 = vadd.f32 %v7739_v11, %v7594_v20 }
 0x859   :  { %v7783_v26 = vadd.f32 %v15020_v61, %v7740_v0 }
 0x85b   :  { %7799 = vst [vmem:[#allocation16] sm:$0xff] %v7783_v26 }
 0x85e   :  { %v7596_v29 = vpop.f32.mrf.mxu0 }
 0x85f   :  { %v7742_v44 = vadd.f32 %v7741_v57, %v7596_v29 }
 0x861   :  { %v7784_v4 = vadd.f32 %v15020_v61, %v7742_v44 }
 0x863   :  { %7800 = vst [vmem:[#allocation16 + $0x8] sm:$0xff] %v7784_v4 }
 0x866   :  { %v7599_v24 = vpop.f32.mrf.mxu0 }
 0x867   :  { %v7745_v38 = vadd.f32 %v7744_v52, %v7599_v24 }
 0x869   :  { %v7785_v28 = vadd.f32 %v15020_v61, %v7745_v38 }
 0x86b   :  { %7801 = vst [vmem:[#allocation16 + $0x10] sm:$0xff] %v7785_v28 }
 0x86e   :  { %v7601_v21 = vpop.f32.mrf.mxu0 }
 0x86f   :  { %v7747_v12 = vadd.f32 %v7746_v14, %v7601_v21 }
 0x871   :  { %v7786_v16 = vadd.f32 %v15020_v61, %v7747_v12 }
 0x873   :  { %7802 = vst [vmem:[#allocation16 + $0x18] sm:$0xff] %v7786_v16 }
 0x876   :  { %v7604_v62 = vpop.f32.mrf.mxu0 }
 0x877   :  { %v7750_v58 = vadd.f32 %v7749_v2, %v7604_v62 }
 0x879   :  { %v7787_v49 = vadd.f32 %v15020_v61, %v7750_v58 }
 0x87b   :  { %7803 = vst [vmem:[#allocation16 + $0x20] sm:$0xff] %v7787_v49 }
 0x87e   :  { %v7606_v18 = vpop.f32.mrf.mxu0 }
 0x87f   :  { %v7752_v45 = vadd.f32 %v7751_v41, %v7606_v18 }
 0x881   :  { %v7788_v23 = vadd.f32 %v15020_v61, %v7752_v45 }
 0x883   :  { %7804 = vst [vmem:[#allocation16 + $0x28] sm:$0xff] %v7788_v23 }
 0x886   :  { %v7609_v39 = vpop.f32.mrf.mxu0 }
 0x887   :  { %v7755_v19 = vadd.f32 %v7754_v47, %v7609_v39 }
 0x889   :  { %v7789_v22 = vadd.f32 %v15020_v61, %v7755_v19 }
 0x88b   :  { %7805 = vst [vmem:[#allocation16 + $0x30] sm:$0xff] %v7789_v22 }
 0x88e   :  { %v7611_v59 = vpop.f32.mrf.mxu0 }
 0x88f   :  { %v7757_v10 = vadd.f32 %v7756_v48, %v7611_v59 }
 0x891   :  { %v7790_v8 = vadd.f32 %v15020_v61, %v7757_v10 }
 0x893   :  { %7806 = vst [vmem:[#allocation16 + $0x38] sm:$0xff] %v7790_v8 }
 0x896   :  { %v7614_v15 = vpop.f32.mrf.mxu0 }
 0x897   :  { %v7760_v13 = vadd.f32 %v7759_v30, %v7614_v15 }
 0x899   :  { %v7791_v27 = vadd.f32 %v15020_v61, %v7760_v13 }
 0x89b   :  { %7807 = vst [vmem:[#allocation16 + $0x40] sm:$0xff] %v7791_v27 }
 0x89e   :  { %v7616_v17 = vpop.f32.mrf.mxu0 }
 0x89f   :  { %v7762_v50 = vadd.f32 %v7761_v36, %v7616_v17 }
 0x8a1   :  { %v7792_v56 = vadd.f32 %v15020_v61, %v7762_v50 }
 0x8a3   :  { %7808 = vst [vmem:[#allocation16 + $0x48] sm:$0xff] %v7792_v56 }
 0x8a6   :  { %v7619_v51 = vpop.f32.mrf.mxu0 }
 0x8a7   :  { %v7765_v53 = vadd.f32 %v7764_v32, %v7619_v51 }
 0x8a9   :  { %v7793_v55 = vadd.f32 %v15020_v61, %v7765_v53 }
 0x8ab   :  { %7809 = vst [vmem:[#allocation16 + $0x50] sm:$0xff] %v7793_v55 }
 0x8ae   :  { %v7621_v46 = vpop.f32.mrf.mxu0 }
 0x8af   :  { %v7767_v35 = vadd.f32 %v7766_v43, %v7621_v46 }
 0x8b1   :  { %v7794_v40 = vadd.f32 %v15020_v61, %v7767_v35 }
 0x8b3   :  { %7810 = vst [vmem:[#allocation16 + $0x58] sm:$0xff] %v7794_v40 }
 0x8b6   :  { %v7624_v5 = vpop.f32.mrf.mxu0 }
 0x8b7   :  { %v7770_v54 = vadd.f32 %v7769_v42, %v7624_v5 }
 0x8b9   :  { %v7795_v7 = vadd.f32 %v15020_v61, %v7770_v54 }
 0x8bb   :  { %7811 = vst [vmem:[#allocation16 + $0x60] sm:$0xff] %v7795_v7 }
 0x8be   :  { %v7626_v3 = vpop.f32.mrf.mxu0 }
 0x8bf   :  { %v7772_v1 = vadd.f32 %v7771_v33, %v7626_v3 }
 0x8c1   :  { %v7796_v25 = vadd.f32 %v15020_v61, %v7772_v1 }
 0x8c3   :  { %7812 = vst [vmem:[#allocation16 + $0x68] sm:$0xff] %v7796_v25 }
 0x8c6   :  { %v7629_v34 = vpop.f32.mrf.mxu0 }
 0x8c7   :  { %v7775_v37 = vadd.f32 %v7774_v60, %v7629_v34 }
 0x8c9   :  { %v7797_v63 = vadd.f32 %v15020_v61, %v7775_v37 }
 0x8cb   :  { %7813 = vst [vmem:[#allocation16 + $0x70] sm:$0xff] %v7797_v63 }
 0x8ce   :  { %v7631_v6 = vpop.f32.mrf.mxu0 }
 0x8cf   :  { %v7777_v11 = vadd.f32 %v7776_v9, %v7631_v6 }
 0x8d1   :  { %v7798_v57 = vadd.f32 %v15020_v61, %v7777_v11 }
 0x8d3   :  { %7814 = vst [vmem:[#allocation16 + $0x78] sm:$0xff] %v7798_v57 }
 0x8d4   :  { %7827 = dma.vmem_to_hbm [thread:$0]  %s7820_s10, 2048, %s7822_s13, [#allocation7], %s11735_s14, %s11735_s14, %s11736_s15  }
 0x8d5   :  { %11718 = dma.done.wait [#allocation7], 2048  }
 0x8d6   :  { %11719 = vsyncadd [#allocation7], 4294965248 }
 0x8d7   :  { %7832 = vsyncpa [#allocation6], 1 }
 0x8d8   :  { %7833 = vsyncpa [#allocation9], 1 }
 0x8d9   :  { %7834 = vsyncpa [#allocation12], 1 }
 0x8da   :  { %7835 = vsyncpa [#allocation15], 1 }
 0x8db   :  { %7836 = vsyncpa [#allocation7], 1 }

</bundles_post_ra>
